<compile_context>
chip_gen: v6e
topology: v6e:2x2x1
jax: 0.10.0
libtpu: 0.0.40
codegen_flags: <defaults>
</compile_context>

<pallas_src>
import jax
import jax.numpy as jnp
from jax.experimental import pallas as pl
from jax.experimental.pallas import tpu as pltpu

EPS = 1e-3      # norm_cfg eps=0.001
CPAD = 128      # lane-dense channel padding used for all stored activations

LAYER_SPECS = [
    ("conv1_1", 3, 16, 1, True), ("conv1_2", 16, 16, 1, True),
    ("down1", 16, 32, 2, False),
    ("conv2_1", 32, 32, 1, True), ("conv2_2", 32, 32, 1, True),
    ("down2", 32, 64, 2, False),
    ("conv3_1", 64, 64, 1, True), ("conv3_2", 64, 64, 1, True),
    ("down3", 64, 128, 2, False),
    ("conv4_1", 128, 128, 1, True), ("conv4_2", 128, 128, 1, True),
]
# Stride-1 SubM layers with 3*cin <= 128 -> single-fetch W-folded slab kernel.
SLAB_LAYERS = ("conv1_2", "conv2_1", "conv2_2")

_CPARAMS_1D = pltpu.CompilerParams(dimension_semantics=("parallel",),
                                   vmem_limit_bytes=32 * 1024 * 1024)
_CPARAMS_2D = pltpu.CompilerParams(dimension_semantics=("parallel", "parallel"),
                                   vmem_limit_bytes=32 * 1024 * 1024)


def _round_up(x, m):
    return ((x + m - 1) // m) * m


# ----------------------------------------------------------------------------
# Kernel A: stride-1 SubM conv as 9 shifted matmuls over a VMEM-resident volume
#   - input is W-folded (3*cin packed into <=128 channels), padded in D and H
#   - grid=(B,), whole (D+2, (H+2)*W, 128) volume fetched once per batch
#   - per depth slice, rows are processed in chunks of <=128 with pure value
#     accumulation (no VMEM accumulator RMW)
# ----------------------------------------------------------------------------
def _make_subm_slab_kernel(D, W, HW, RC):
    nchunks = HW // RC

    def kernel(x_ref, w_ref, b_ref, m_ref, o_ref):
        bias = b_ref[...]                                   # (1, 128) f32

        def body(d, carry):
            for c in range(nchunks):
                row0 = c * RC
                acc = None
                for kd in range(3):
                    for kh in range(3):
                        a = x_ref[d + kd, pl.ds(kh * W + row0, RC), :]   # (RC, 128) bf16
                        p = jnp.dot(a, w_ref[kd * 3 + kh],
                                    preferred_element_type=jnp.float32)
                        acc = p if acc is None else acc + p
                y = jnp.maximum(acc + bias, 0.0)             # folded BN + ReLU (f32)
                m = m_ref[d, pl.ds(row0, RC), :]             # (RC, 1) f32 active mask
                o_ref[d, pl.ds(row0, RC), :] = (y * m).astype(o_ref.dtype)
            return carry

        jax.lax.fori_loop(0, D, body, 0)

    return kernel


def _wfold_pad(x, cin):
    """x: (B,D,H,W,>=cin) bf16 -> (B, D+2, (H+2)*W, 128) bf16 with W-taps folded into channels."""
    B, D, H, W, _ = x.shape
    xc = x[..., :cin]
    xw = jnp.pad(xc, ((0, 0), (0, 0), (0, 0), (1, 1), (0, 0)))
    xkw = jnp.concatenate([xw[:, :, :, kw:kw + W, :] for kw in range(3)], axis=-1)  # 3*cin
    xs = jnp.pad(xkw, ((0, 0), (1, 1), (1, 1), (0, 0), (0, CPAD - 3 * cin)))
    return xs.reshape(B, D + 2, (H + 2) * W, CPAD)


def subm_conv_slab(x, mask, wpk, bias, cin):
    """x: (B,D,H,W,128) bf16, mask: (B,D,H,W,1) f32, wpk: (9, 128, 128) bf16."""
    B, D, H, W, _ = x.shape
    HW = H * W
    HpW = (H + 2) * W
    xs = _wfold_pad(x, cin)                                  # (B, D+2, HpW, 128)
    mflat = mask.reshape(B, D, HW, 1)
    RC = min(HW, 128)

    kernel = _make_subm_slab_kernel(D, W, HW, RC)
    flops = 2 * B * D * 9 * HW * CPAD * CPAD
    bytes_accessed = (xs.size * 2 + wpk.size * 2 + bias.size * 4
                      + mflat.size * 4 + B * D * HW * CPAD * 2)
    out = pl.pallas_call(
        kernel,
        out_shape=jax.ShapeDtypeStruct((B, D, HW, CPAD), jnp.bfloat16),
        grid=(B,),
        in_specs=[
            pl.BlockSpec((None, D + 2, HpW, CPAD), lambda b: (b, 0, 0, 0)),
            pl.BlockSpec((9, CPAD, CPAD), lambda b: (0, 0, 0)),
            pl.BlockSpec((1, CPAD), lambda b: (0, 0)),
            pl.BlockSpec((None, D, HW, 1), lambda b: (b, 0, 0, 0)),
        ],
        out_specs=pl.BlockSpec((None, D, HW, CPAD), lambda b: (b, 0, 0, 0)),
        compiler_params=_CPARAMS_1D,
        cost_estimate=pl.CostEstimate(flops=int(flops), transcendentals=0,
                                      bytes_accessed=int(bytes_accessed)),
    )(xs, wpk, bias, mflat)
    return out.reshape(B, D, H, W, CPAD), mask


# ----------------------------------------------------------------------------
# Kernel B: fused (patches @ W) + bias -> ReLU [-> mask], B-gridded row tiles
# ----------------------------------------------------------------------------
def _mm_bias_relu_mask_kernel(p_ref, w_ref, b_ref, m_ref, o_ref):
    acc = jnp.dot(p_ref[...], w_ref[...], preferred_element_type=jnp.float32)
    y = jnp.maximum(acc + b_ref[...], 0.0)
    o_ref[...] = (y * m_ref[...]).astype(o_ref.dtype)


def _mm_bias_relu_kernel(p_ref, w_ref, b_ref, o_ref):
    acc = jnp.dot(p_ref[...], w_ref[...], preferred_element_type=jnp.float32)
    o_ref[...] = jnp.maximum(acc + b_ref[...], 0.0).astype(o_ref.dtype)


def fused_matmul_b(patches, w, bias, mask=None, row_tile=512):
    """patches: (B,P,K) bf16, w: (K,N) bf16, bias: (1,N) f32, mask: (B,P,1) f32|None."""
    B, P, K = patches.shape
    N = w.shape[1]
    TP = min(row_tile, _round_up(P, 8))
    P_pad = _round_up(P, TP)
    if P_pad != P:
        patches = jnp.pad(patches, ((0, 0), (0, P_pad - P), (0, 0)))
        if mask is not None:
            mask = jnp.pad(mask, ((0, 0), (0, P_pad - P), (0, 0)))
    cost = pl.CostEstimate(flops=int(2 * B * P_pad * K * N), transcendentals=0,
                           bytes_accessed=int(B * P_pad * K * 2 + K * N * 2
                                              + N * 4 + B * P_pad * N * 2))
    common = dict(
        out_shape=jax.ShapeDtypeStruct((B, P_pad, N), jnp.bfloat16),
        grid=(B, P_pad // TP),
        out_specs=pl.BlockSpec((None, TP, N), lambda b, i: (b, i, 0)),
        compiler_params=_CPARAMS_2D,
        cost_estimate=cost,
    )
    if mask is None:
        out = pl.pallas_call(
            _mm_bias_relu_kernel,
            in_specs=[pl.BlockSpec((None, TP, K), lambda b, i: (b, i, 0)),
                      pl.BlockSpec((K, N), lambda b, i: (0, 0)),
                      pl.BlockSpec((1, N), lambda b, i: (0, 0))],
            **common)(patches, w, bias)
    else:
        out = pl.pallas_call(
            _mm_bias_relu_mask_kernel,
            in_specs=[pl.BlockSpec((None, TP, K), lambda b, i: (b, i, 0)),
                      pl.BlockSpec((K, N), lambda b, i: (0, 0)),
                      pl.BlockSpec((1, N), lambda b, i: (0, 0)),
                      pl.BlockSpec((None, TP, 1), lambda b, i: (b, i, 0))],
            **common)(patches, w, bias, mask)
    return out[:, :P, :]   # drop zero-padded rows (mask-free variant holds relu(bias) there)


def im2col_3d(x, cin, stride):
    """x: (B,D,H,W,>=cin) -> (B, Do*Ho*Wo, 27*cin) + output spatial shape."""
    B, D, H, W, _ = x.shape
    x = x[..., :cin]
    Do = (D - 1) // stride + 1
    Ho = (H - 1) // stride + 1
    Wo = (W - 1) // stride + 1
    xp = jnp.pad(x, ((0, 0), (1, 1), (1, 1), (1, 1), (0, 0)))
    cols = []
    for kd in range(3):
        for kh in range(3):
            for kw in range(3):
                cols.append(xp[:, kd:kd + (Do - 1) * stride + 1:stride,
                                  kh:kh + (Ho - 1) * stride + 1:stride,
                                  kw:kw + (Wo - 1) * stride + 1:stride, :])
    patches = jnp.stack(cols, axis=-2)                       # (B,Do,Ho,Wo,27,cin)
    return patches.reshape(B, Do * Ho * Wo, 27 * cin), (B, Do, Ho, Wo)


def conv_block_im2col(x, mask, w2, bias, cin, stride, subm):
    """SubMConv3d / SparseConv3d + folded BN + ReLU for conv1_1 and the small deep layers."""
    patches, (B, Do, Ho, Wo) = im2col_3d(x, cin, stride)
    K = patches.shape[-1]
    if K < w2.shape[0]:                                      # only conv1_1 (81 -> 128)
        patches = jnp.pad(patches, ((0, 0), (0, 0), (0, w2.shape[0] - K)))
    if subm:
        out_mask = mask
    else:
        # Active-set dilation as a windowed max (no 27x mask im2col).
        out_mask = jax.lax.reduce_window(
            mask, 0.0, jax.lax.max,
            window_dimensions=(1, 3, 3, 3, 1),
            window_strides=(1, stride, stride, stride, 1),
            padding=((0, 0), (1, 1), (1, 1), (1, 1), (0, 0)))
    P = Do * Ho * Wo
    out = fused_matmul_b(patches, w2, bias, out_mask.reshape(B, P, 1))
    return out.reshape(B, Do, Ho, Wo, CPAD), out_mask


# ----------------------------------------------------------------------------
# Voxelization + DynamicSimpleVFE (mean of points per voxel)
# ----------------------------------------------------------------------------
def voxelize_and_encode(points_list, pc_range, voxel_size, grid_size):
    D, H, W = grid_size                        # (nz, ny, nx)
    B = len(points_list)
    x_min, y_min, z_min = pc_range[0], pc_range[1], pc_range[2]
    vx, vy, vz = voxel_size
    sums = jnp.zeros((B * D * H * W, 3), jnp.float32)
    counts = jnp.zeros((B * D * H * W, 1), jnp.float32)
    for b, pts in enumerate(points_list):
        ix = jnp.floor((pts[:, 0] - x_min) / vx).astype(jnp.int32)
        iy = jnp.floor((pts[:, 1] - y_min) / vy).astype(jnp.int32)
        iz = jnp.floor((pts[:, 2] - z_min) / vz).astype(jnp.int32)
        valid = ((ix >= 0) & (ix < W) & (iy >= 0) & (iy < H) &
                 (iz >= 0) & (iz < D)).astype(jnp.float32)
        flat = ((b * D + jnp.clip(iz, 0, D - 1)) * H +
                jnp.clip(iy, 0, H - 1)) * W + jnp.clip(ix, 0, W - 1)
        sums = sums.at[flat].add(pts * valid[:, None])
        counts = counts.at[flat].add(valid[:, None])
    mean = sums / jnp.maximum(counts, 1.0)
    mask = (counts > 0).astype(jnp.float32)
    x = (mean * mask).reshape(B, D, H, W, 3)
    m = mask.reshape(B, D, H, W, 1)
    return x, m


# ----------------------------------------------------------------------------
# Parameters (synthetic init; conv bias=False, frozen SyncBN folded into weights)
# ----------------------------------------------------------------------------
def _bn_fold(key, cout):
    k1, k2, k3, k4 = jax.random.split(key, 4)
    gamma = 1.0 + 0.1 * jax.random.normal(k1, (cout,), jnp.float32)
    beta = 0.1 * jax.random.normal(k2, (cout,), jnp.float32)
    rmean = 0.1 * jax.random.normal(k3, (cout,), jnp.float32)
    rvar = 1.0 + 0.1 * jax.random.uniform(k4, (cout,), jnp.float32)
    scale = gamma / jnp.sqrt(rvar + EPS)
    bias = beta - rmean * scale
    return scale, bias


def make_params(key):
    params = {}
    for name, cin, cout, _, _ in LAYER_SPECS:
        key, kw, kb = jax.random.split(key, 3)
        w = jax.random.normal(kw, (3, 3, 3, cin, cout), jnp.float32) / jnp.sqrt(27.0 * cin)
        scale, bias = _bn_fold(kb, cout)
        w = w * scale                                   # fold eval-mode BN scale
        bias_p = jnp.zeros((1, CPAD), jnp.float32).at[0, :cout].set(bias)
        if name in SLAB_LAYERS:
            # (kd,kh) -> 9 taps ; (kw, cin) -> 3*cin contraction, tight-packed then padded to 128
            wt = w.reshape(9, 3 * cin, cout)
            wp = jnp.zeros((9, CPAD, CPAD), jnp.float32)
            wp = wp.at[:, :3 * cin, :cout].set(wt)
            params[name] = {"w": wp.astype(jnp.bfloat16), "b": bias_p}
        else:
            K_im = 27 * cin
            K_pad = K_im if K_im >= CPAD else CPAD      # conv1_1: 81 -> 128
            wp = jnp.zeros((K_pad, CPAD), jnp.float32)
            wp = wp.at[:K_im, :cout].set(w.reshape(K_im, cout))
            params[name] = {"w": wp.astype(jnp.bfloat16), "b": bias_p}
    # final ConvModule: Conv2d(128*3, 128, 1, bias=False) + BN + ReLU
    key, kw, kb = jax.random.split(key, 3)
    w = jax.random.normal(kw, (128 * 3, 128), jnp.float32) / jnp.sqrt(128.0 * 3.0)
    scale, bias = _bn_fold(kb, 128)
    params["out"] = {"w": (w * scale).astype(jnp.bfloat16),
                     "b": bias.reshape(1, 128)}
    return params


# ----------------------------------------------------------------------------
# Full SparseEncoder forward (dense-with-mask voxel grid)
# ----------------------------------------------------------------------------
@jax.jit
def voxelnet_encoder_forward(x, mask, params):
    # x: (B, D, H, W, 3) bf16 voxel means ; mask: (B, D, H, W, 1) f32 active voxels
    for name, cin, cout, stride, subm in LAYER_SPECS:
        p = params[name]
        if name in SLAB_LAYERS:
            x, mask = subm_conv_slab(x, mask, p["w"], p["b"], cin)
        else:
            x, mask = conv_block_im2col(x, mask, p["w"], p["b"], cin, stride, subm)
    # x: (B, D=3, H, W, 128) ; emulate .dense() -> view(N, C*D, H, W)  (index c*D + d)
    B, D, H, W, C = x.shape
    feat2d = jnp.transpose(x, (0, 2, 3, 4, 1)).reshape(B, H * W, C * D)
    out = fused_matmul_b(feat2d, params["out"]["w"], params["out"]["b"], mask=None)
    out = out.reshape(B, H, W, 128).astype(jnp.float32)
    return jnp.transpose(out, (0, 3, 1, 2))              # NCHW output


# ----------------------------------------------------------------------------
if __name__ == "__main__":
    # Small config: voxel grid (D=17, H=16, W=16) so three stride-2 downsamples
    # give D=3, matching the 128*3 input channels of the final 1x1 ConvModule.
    point_cloud_range = (0.0, 0.0, 0.0, 6.4, 6.4, 6.8)
    voxel_size = (0.4, 0.4, 0.4)
    grid_size = (17, 16, 16)   # (nz, ny, nx) = sparse_shape

    key = jax.random.PRNGKey(0)
    key, kp0, kp1, kparam = jax.random.split(key, 4)

    def sample_points(k, n):
        u = jax.random.uniform(k, (n, 3), jnp.float32)
        lo = jnp.array(point_cloud_range[:3], jnp.float32)
        hi = jnp.array(point_cloud_range[3:], jnp.float32)
        # slightly overshoot the range so a few points get filtered by voxelization
        return lo + u * (hi - lo) * 1.05

    points = [sample_points(kp0, 256), sample_points(kp1, 256)]
    params = make_params(kparam)

    # DynamicSimpleVFE: mean of point xyz per voxel + active mask
    x_dense, mask = voxelize_and_encode(points, point_cloud_range, voxel_size, grid_size)
    x0 = x_dense.astype(jnp.bfloat16)

    out = voxelnet_encoder_forward(x0, mask, params)
    out = jax.block_until_ready(out)

    assert out.shape == (2, 128, 2, 2), out.shape
    assert bool(jnp.all(jnp.isfinite(out)))
    print("KERNEL_OK")
</pallas_src>

<mosaic_0001>
module attributes {stable_mosaic.version = 11 : i64} {
  func.func @_mm_bias_relu_mask_kernel(%arg0: i32, %arg1: i32, %arg2: memref<1x512x128xbf16, #tpu.memory_space<vmem>>, %arg3: memref<128x128xbf16, #tpu.memory_space<vmem>>, %arg4: memref<1x128xf32, #tpu.memory_space<vmem>>, %arg5: memref<1x512x1xf32, #tpu.memory_space<vmem>>, %arg6: memref<1x512x128xbf16, #tpu.memory_space<vmem>>) attributes {dimension_semantics = [#tpu.dimension_semantics<parallel>, #tpu.dimension_semantics<parallel>], iteration_bounds = array<i64: 2, 9>, scalar_prefetch = 0 : i64, scratch_operands = 0 : i64, tpu.core_type = #tpu.core_type<tc>, window_params = [{transform_indices = @transform_0, window_bounds = array<i64: 1, 512, 128>}, {pipeline_mode = #tpu.pipeline_mode<synchronous>, transform_indices = @transform_1, window_bounds = array<i64: 128, 128>}, {pipeline_mode = #tpu.pipeline_mode<synchronous>, transform_indices = @transform_2, window_bounds = array<i64: 1, 128>}, {transform_indices = @transform_3, window_bounds = array<i64: 1, 512, 1>}, {transform_indices = @transform_4, window_bounds = array<i64: 1, 512, 128>}]} {
    %c0 = arith.constant 0 : index
    %c0_0 = arith.constant 0 : index
    %c0_1 = arith.constant 0 : index
    %0 = vector.load %arg2[%c0, %c0_0, %c0_1] : memref<1x512x128xbf16, #tpu.memory_space<vmem>>, vector<1x512x128xbf16>
    %1 = vector.shape_cast %0 : vector<1x512x128xbf16> to vector<512x128xbf16>
    %c0_2 = arith.constant 0 : index
    %c0_3 = arith.constant 0 : index
    %2 = vector.load %arg3[%c0_2, %c0_3] : memref<128x128xbf16, #tpu.memory_space<vmem>>, vector<128x128xbf16>
    %cst = arith.constant dense<0.000000e+00> : vector<512x128xf32>
    %3 = tpu.matmul %1, %2, %cst {dimension_numbers = #tpu.dot_dimension_numbers<[1], [0], [0], [1], [0, 0, 1, 1], [], []>} : vector<512x128xbf16>, vector<128x128xbf16>, vector<512x128xf32> -> vector<512x128xf32>
    %c0_4 = arith.constant 0 : index
    %c0_5 = arith.constant 0 : index
    %4 = vector.load %arg4[%c0_4, %c0_5] : memref<1x128xf32, #tpu.memory_space<vmem>>, vector<1x128xf32>
    %5 = vector.broadcast %4 : vector<1x128xf32> to vector<512x128xf32>
    %6 = arith.addf %3, %5 : vector<512x128xf32>
    %cst_6 = arith.constant 0.000000e+00 : f32
    %7 = vector.broadcast %cst_6 : f32 to vector<512x128xf32>
    %8 = arith.maximumf %6, %7 : vector<512x128xf32>
    %c0_7 = arith.constant 0 : index
    %c0_8 = arith.constant 0 : index
    %c0_9 = arith.constant 0 : index
    %9 = vector.load %arg5[%c0_7, %c0_8, %c0_9] : memref<1x512x1xf32, #tpu.memory_space<vmem>>, vector<1x512x1xf32>
    %10 = vector.shape_cast %9 : vector<1x512x1xf32> to vector<512x1xf32>
    %11 = vector.broadcast %10 : vector<512x1xf32> to vector<512x128xf32>
    %12 = arith.mulf %8, %11 : vector<512x128xf32>
    %13 = arith.truncf %12 : vector<512x128xf32> to vector<512x128xbf16>
    %c0_10 = arith.constant 0 : index
    %c0_11 = arith.constant 0 : index
    %c0_12 = arith.constant 0 : index
    %14 = vector.load %arg6[%c0_10, %c0_11, %c0_12] : memref<1x512x128xbf16, #tpu.memory_space<vmem>>, vector<1x512x128xbf16>
    %15 = vector.shape_cast %14 : vector<1x512x128xbf16> to vector<512x128xbf16>
    %16 = vector.shape_cast %13 : vector<512x128xbf16> to vector<1x512x128xbf16>
    tpu.vector_store %arg6[%c0_10, %c0_11, %c0_12], %16 {strides = array<i32>} : memref<1x512x128xbf16, #tpu.memory_space<vmem>>, vector<1x512x128xbf16>,
    return
  }
  func.func @transform_0(%arg0: i32, %arg1: i32) -> (i32, i32, i32) {
    %c0_i32 = arith.constant 0 : i32
    %c0_i32_0 = arith.constant 0 : i32
    return %arg0, %arg1, %c0_i32 : i32, i32, i32
  }
  func.func @transform_1(%arg0: i32, %arg1: i32) -> (i32, i32) {
    %c0_i32 = arith.constant 0 : i32
    %c0_i32_0 = arith.constant 0 : i32
    %c0_i32_1 = arith.constant 0 : i32
    return %c0_i32, %c0_i32_0 : i32, i32
  }
  func.func @transform_2(%arg0: i32, %arg1: i32) -> (i32, i32) {
    %c0_i32 = arith.constant 0 : i32
    %c0_i32_0 = arith.constant 0 : i32
    %c0_i32_1 = arith.constant 0 : i32
    return %c0_i32, %c0_i32_0 : i32, i32
  }
  func.func @transform_3(%arg0: i32, %arg1: i32) -> (i32, i32, i32) {
    %c0_i32 = arith.constant 0 : i32
    %c0_i32_0 = arith.constant 0 : i32
    return %arg0, %arg1, %c0_i32 : i32, i32, i32
  }
  func.func @transform_4(%arg0: i32, %arg1: i32) -> (i32, i32, i32) {
    %c0_i32 = arith.constant 0 : i32
    %c0_i32_0 = arith.constant 0 : i32
    return %arg0, %arg1, %c0_i32 : i32, i32, i32
  }
}

module attributes {stable_mosaic.version = 11 : i64} {
  func.func @kernel(%arg0: i32, %arg1: memref<1x19x288x128xbf16, #tpu.memory_space<vmem>>, %arg2: memref<9x128x128xbf16, #tpu.memory_space<vmem>>, %arg3: memref<1x128xf32, #tpu.memory_space<vmem>>, %arg4: memref<1x17x256x1xf32, #tpu.memory_space<vmem>>, %arg5: memref<1x17x256x128xbf16, #tpu.memory_space<vmem>>) attributes {dimension_semantics = [#tpu.dimension_semantics<parallel>], iteration_bounds = array<i64: 2>, scalar_prefetch = 0 : i64, scratch_operands = 0 : i64, tpu.core_type = #tpu.core_type<tc>, window_params = [{transform_indices = @transform_0, window_bounds = array<i64: 1, 19, 288, 128>}, {pipeline_mode = #tpu.pipeline_mode<synchronous>, transform_indices = @transform_1, window_bounds = array<i64: 9, 128, 128>}, {pipeline_mode = #tpu.pipeline_mode<synchronous>, transform_indices = @transform_2, window_bounds = array<i64: 1, 128>}, {transform_indices = @transform_3, window_bounds = array<i64: 1, 17, 256, 1>}, {transform_indices = @transform_4, window_bounds = array<i64: 1, 17, 256, 128>}]} {
    %c0 = arith.constant 0 : index
    %c0_0 = arith.constant 0 : index
    %0 = vector.load %arg3[%c0, %c0_0] : memref<1x128xf32, #tpu.memory_space<vmem>>, vector<1x128xf32>
    %c0_i32 = arith.constant 0 : i32
    %c17_i32 = arith.constant 17 : i32
    %1 = arith.addi %c0_i32, %c17_i32 : i32
    %c1_i32 = arith.constant 1 : i32
    scf.for %arg6 = %c0_i32 to %1 step %c1_i32  : i32 {
      %c0_i32_2 = arith.constant 0 : i32
      %2 = arith.addi %arg6, %c0_i32_2 : i32
      %c0_3 = arith.constant 0 : index
      %3 = arith.index_cast %2 : i32 to index
      %c0_4 = arith.constant 0 : index
      %c0_5 = arith.constant 0 : index
      %4 = vector.load %arg1[%c0_3, %3, %c0_4, %c0_5] : memref<1x19x288x128xbf16, #tpu.memory_space<vmem>>, vector<1x1x128x128xbf16>
      %5 = vector.shape_cast %4 : vector<1x1x128x128xbf16> to vector<128x128xbf16>
      %c0_6 = arith.constant 0 : index
      %c0_7 = arith.constant 0 : index
      %c0_8 = arith.constant 0 : index
      %6 = vector.load %arg2[%c0_6, %c0_7, %c0_8] : memref<9x128x128xbf16, #tpu.memory_space<vmem>>, vector<1x128x128xbf16>
      %7 = vector.shape_cast %6 : vector<1x128x128xbf16> to vector<128x128xbf16>
      %cst = arith.constant dense<0.000000e+00> : vector<128x128xf32>
      %8 = tpu.matmul %5, %7, %cst {dimension_numbers = #tpu.dot_dimension_numbers<[1], [0], [0], [1], [0, 0, 1, 1], [], []>} : vector<128x128xbf16>, vector<128x128xbf16>, vector<128x128xf32> -> vector<128x128xf32>
      %c0_i32_9 = arith.constant 0 : i32
      %9 = arith.addi %arg6, %c0_i32_9 : i32
      %c0_10 = arith.constant 0 : index
      %10 = arith.index_cast %9 : i32 to index
      %c16 = arith.constant 16 : index
      %c0_11 = arith.constant 0 : index
      %11 = vector.load %arg1[%c0_10, %10, %c16, %c0_11] : memref<1x19x288x128xbf16, #tpu.memory_space<vmem>>, vector<1x1x128x128xbf16>
      %12 = vector.shape_cast %11 : vector<1x1x128x128xbf16> to vector<128x128xbf16>
      %c1 = arith.constant 1 : index
      %c0_12 = arith.constant 0 : index
      %c0_13 = arith.constant 0 : index
      %13 = vector.load %arg2[%c1, %c0_12, %c0_13] : memref<9x128x128xbf16, #tpu.memory_space<vmem>>, vector<1x128x128xbf16>
      %14 = vector.shape_cast %13 : vector<1x128x128xbf16> to vector<128x128xbf16>
      %cst_14 = arith.constant dense<0.000000e+00> : vector<128x128xf32>
      %15 = tpu.matmul %12, %14, %cst_14 {dimension_numbers = #tpu.dot_dimension_numbers<[1], [0], [0], [1], [0, 0, 1, 1], [], []>} : vector<128x128xbf16>, vector<128x128xbf16>, vector<128x128xf32> -> vector<128x128xf32>
      %16 = arith.addf %8, %15 : vector<128x128xf32>
      %c0_i32_15 = arith.constant 0 : i32
      %17 = arith.addi %arg6, %c0_i32_15 : i32
      %c0_16 = arith.constant 0 : index
      %18 = arith.index_cast %17 : i32 to index
      %c32 = arith.constant 32 : index
      %c0_17 = arith.constant 0 : index
      %19 = vector.load %arg1[%c0_16, %18, %c32, %c0_17] : memref<1x19x288x128xbf16, #tpu.memory_space<vmem>>, vector<1x1x128x128xbf16>
      %20 = vector.shape_cast %19 : vector<1x1x128x128xbf16> to vector<128x128xbf16>
      %c2 = arith.constant 2 : index
      %c0_18 = arith.constant 0 : index
      %c0_19 = arith.constant 0 : index
      %21 = vector.load %arg2[%c2, %c0_18, %c0_19] : memref<9x128x128xbf16, #tpu.memory_space<vmem>>, vector<1x128x128xbf16>
      %22 = vector.shape_cast %21 : vector<1x128x128xbf16> to vector<128x128xbf16>
      %cst_20 = arith.constant dense<0.000000e+00> : vector<128x128xf32>
      %23 = tpu.matmul %20, %22, %cst_20 {dimension_numbers = #tpu.dot_dimension_numbers<[1], [0], [0], [1], [0, 0, 1, 1], [], []>} : vector<128x128xbf16>, vector<128x128xbf16>, vector<128x128xf32> -> vector<128x128xf32>
      %24 = arith.addf %16, %23 : vector<128x128xf32>
      %c1_i32_21 = arith.constant 1 : i32
      %25 = arith.addi %arg6, %c1_i32_21 : i32
      %c0_22 = arith.constant 0 : index
      %26 = arith.index_cast %25 : i32 to index
      %c0_23 = arith.constant 0 : index
      %c0_24 = arith.constant 0 : index
      %27 = vector.load %arg1[%c0_22, %26, %c0_23, %c0_24] : memref<1x19x288x128xbf16, #tpu.memory_space<vmem>>, vector<1x1x128x128xbf16>
      %28 = vector.shape_cast %27 : vector<1x1x128x128xbf16> to vector<128x128xbf16>
      %c3 = arith.constant 3 : index
      %c0_25 = arith.constant 0 : index
      %c0_26 = arith.constant 0 : index
      %29 = vector.load %arg2[%c3, %c0_25, %c0_26] : memref<9x128x128xbf16, #tpu.memory_space<vmem>>, vector<1x128x128xbf16>
      %30 = vector.shape_cast %29 : vector<1x128x128xbf16> to vector<128x128xbf16>
      %cst_27 = arith.constant dense<0.000000e+00> : vector<128x128xf32>
      %31 = tpu.matmul %28, %30, %cst_27 {dimension_numbers = #tpu.dot_dimension_numbers<[1], [0], [0], [1], [0, 0, 1, 1], [], []>} : vector<128x128xbf16>, vector<128x128xbf16>, vector<128x128xf32> -> vector<128x128xf32>
      %32 = arith.addf %24, %31 : vector<128x128xf32>
      %c1_i32_28 = arith.constant 1 : i32
      %33 = arith.addi %arg6, %c1_i32_28 : i32
      %c0_29 = arith.constant 0 : index
      %34 = arith.index_cast %33 : i32 to index
      %c16_30 = arith.constant 16 : index
      %c0_31 = arith.constant 0 : index
      %35 = vector.load %arg1[%c0_29, %34, %c16_30, %c0_31] : memref<1x19x288x128xbf16, #tpu.memory_space<vmem>>, vector<1x1x128x128xbf16>
      %36 = vector.shape_cast %35 : vector<1x1x128x128xbf16> to vector<128x128xbf16>
      %c4 = arith.constant 4 : index
      %c0_32 = arith.constant 0 : index
      %c0_33 = arith.constant 0 : index
      %37 = vector.load %arg2[%c4, %c0_32, %c0_33] : memref<9x128x128xbf16, #tpu.memory_space<vmem>>, vector<1x128x128xbf16>
      %38 = vector.shape_cast %37 : vector<1x128x128xbf16> to vector<128x128xbf16>
      %cst_34 = arith.constant dense<0.000000e+00> : vector<128x128xf32>
      %39 = tpu.matmul %36, %38, %cst_34 {dimension_numbers = #tpu.dot_dimension_numbers<[1], [0], [0], [1], [0, 0, 1, 1], [], []>} : vector<128x128xbf16>, vector<128x128xbf16>, vector<128x128xf32> -> vector<128x128xf32>
      %40 = arith.addf %32, %39 : vector<128x128xf32>
      %c1_i32_35 = arith.constant 1 : i32
      %41 = arith.addi %arg6, %c1_i32_35 : i32
      %c0_36 = arith.constant 0 : index
      %42 = arith.index_cast %41 : i32 to index
      %c32_37 = arith.constant 32 : index
      %c0_38 = arith.constant 0 : index
      %43 = vector.load %arg1[%c0_36, %42, %c32_37, %c0_38] : memref<1x19x288x128xbf16, #tpu.memory_space<vmem>>, vector<1x1x128x128xbf16>
      %44 = vector.shape_cast %43 : vector<1x1x128x128xbf16> to vector<128x128xbf16>
      %c5 = arith.constant 5 : index
      %c0_39 = arith.constant 0 : index
      %c0_40 = arith.constant 0 : index
      %45 = vector.load %arg2[%c5, %c0_39, %c0_40] : memref<9x128x128xbf16, #tpu.memory_space<vmem>>, vector<1x128x128xbf16>
      %46 = vector.shape_cast %45 : vector<1x128x128xbf16> to vector<128x128xbf16>
      %cst_41 = arith.constant dense<0.000000e+00> : vector<128x128xf32>
      %47 = tpu.matmul %44, %46, %cst_41 {dimension_numbers = #tpu.dot_dimension_numbers<[1], [0], [0], [1], [0, 0, 1, 1], [], []>} : vector<128x128xbf16>, vector<128x128xbf16>, vector<128x128xf32> -> vector<128x128xf32>
      %48 = arith.addf %40, %47 : vector<128x128xf32>
      %c2_i32 = arith.constant 2 : i32
      %49 = arith.addi %arg6, %c2_i32 : i32
      %c0_42 = arith.constant 0 : index
      %50 = arith.index_cast %49 : i32 to index
      %c0_43 = arith.constant 0 : index
      %c0_44 = arith.constant 0 : index
      %51 = vector.load %arg1[%c0_42, %50, %c0_43, %c0_44] : memref<1x19x288x128xbf16, #tpu.memory_space<vmem>>, vector<1x1x128x128xbf16>
      %52 = vector.shape_cast %51 : vector<1x1x128x128xbf16> to vector<128x128xbf16>
      %c6 = arith.constant 6 : index
      %c0_45 = arith.constant 0 : index
      %c0_46 = arith.constant 0 : index
      %53 = vector.load %arg2[%c6, %c0_45, %c0_46] : memref<9x128x128xbf16, #tpu.memory_space<vmem>>, vector<1x128x128xbf16>
      %54 = vector.shape_cast %53 : vector<1x128x128xbf16> to vector<128x128xbf16>
      %cst_47 = arith.constant dense<0.000000e+00> : vector<128x128xf32>
      %55 = tpu.matmul %52, %54, %cst_47 {dimension_numbers = #tpu.dot_dimension_numbers<[1], [0], [0], [1], [0, 0, 1, 1], [], []>} : vector<128x128xbf16>, vector<128x128xbf16>, vector<128x128xf32> -> vector<128x128xf32>
      %56 = arith.addf %48, %55 : vector<128x128xf32>
      %c2_i32_48 = arith.constant 2 : i32
      %57 = arith.addi %arg6, %c2_i32_48 : i32
      %c0_49 = arith.constant 0 : index
      %58 = arith.index_cast %57 : i32 to index
      %c16_50 = arith.constant 16 : index
      %c0_51 = arith.constant 0 : index
      %59 = vector.load %arg1[%c0_49, %58, %c16_50, %c0_51] : memref<1x19x288x128xbf16, #tpu.memory_space<vmem>>, vector<1x1x128x128xbf16>
      %60 = vector.shape_cast %59 : vector<1x1x128x128xbf16> to vector<128x128xbf16>
      %c7 = arith.constant 7 : index
      %c0_52 = arith.constant 0 : index
      %c0_53 = arith.constant 0 : index
      %61 = vector.load %arg2[%c7, %c0_52, %c0_53] : memref<9x128x128xbf16, #tpu.memory_space<vmem>>, vector<1x128x128xbf16>
      %62 = vector.shape_cast %61 : vector<1x128x128xbf16> to vector<128x128xbf16>
      %cst_54 = arith.constant dense<0.000000e+00> : vector<128x128xf32>
      %63 = tpu.matmul %60, %62, %cst_54 {dimension_numbers = #tpu.dot_dimension_numbers<[1], [0], [0], [1], [0, 0, 1, 1], [], []>} : vector<128x128xbf16>, vector<128x128xbf16>, vector<128x128xf32> -> vector<128x128xf32>
      %64 = arith.addf %56, %63 : vector<128x128xf32>
      %c2_i32_55 = arith.constant 2 : i32
      %65 = arith.addi %arg6, %c2_i32_55 : i32
      %c0_56 = arith.constant 0 : index
      %66 = arith.index_cast %65 : i32 to index
      %c32_57 = arith.constant 32 : index
      %c0_58 = arith.constant 0 : index
      %67 = vector.load %arg1[%c0_56, %66, %c32_57, %c0_58] : memref<1x19x288x128xbf16, #tpu.memory_space<vmem>>, vector<1x1x128x128xbf16>
      %68 = vector.shape_cast %67 : vector<1x1x128x128xbf16> to vector<128x128xbf16>
      %c8 = arith.constant 8 : index
      %c0_59 = arith.constant 0 : index
      %c0_60 = arith.constant 0 : index
      %69 = vector.load %arg2[%c8, %c0_59, %c0_60] : memref<9x128x128xbf16, #tpu.memory_space<vmem>>, vector<1x128x128xbf16>
      %70 = vector.shape_cast %69 : vector<1x128x128xbf16> to vector<128x128xbf16>
      %cst_61 = arith.constant dense<0.000000e+00> : vector<128x128xf32>
      %71 = tpu.matmul %68, %70, %cst_61 {dimension_numbers = #tpu.dot_dimension_numbers<[1], [0], [0], [1], [0, 0, 1, 1], [], []>} : vector<128x128xbf16>, vector<128x128xbf16>, vector<128x128xf32> -> vector<128x128xf32>
      %72 = arith.addf %64, %71 : vector<128x128xf32>
      %73 = vector.broadcast %0 : vector<1x128xf32> to vector<128x128xf32>
      %74 = arith.addf %72, %73 : vector<128x128xf32>
      %cst_62 = arith.constant 0.000000e+00 : f32
      %75 = vector.broadcast %cst_62 : f32 to vector<128x128xf32>
      %76 = arith.maximumf %74, %75 : vector<128x128xf32>
      %c0_63 = arith.constant 0 : index
      %77 = arith.index_cast %arg6 : i32 to index
      %c0_64 = arith.constant 0 : index
      %c0_65 = arith.constant 0 : index
      %78 = vector.load %arg4[%c0_63, %77, %c0_64, %c0_65] : memref<1x17x256x1xf32, #tpu.memory_space<vmem>>, vector<1x1x128x1xf32>
      %79 = vector.shape_cast %78 : vector<1x1x128x1xf32> to vector<128x1xf32>
      %80 = vector.broadcast %79 : vector<128x1xf32> to vector<128x128xf32>
      %81 = arith.mulf %76, %80 : vector<128x128xf32>
      %82 = arith.truncf %81 : vector<128x128xf32> to vector<128x128xbf16>
      %c0_66 = arith.constant 0 : index
      %83 = arith.index_cast %arg6 : i32 to index
      %c0_67 = arith.constant 0 : index
      %c0_68 = arith.constant 0 : index
      %84 = vector.load %arg5[%c0_66, %83, %c0_67, %c0_68] : memref<1x17x256x128xbf16, #tpu.memory_space<vmem>>, vector<1x1x128x128xbf16>
      %85 = vector.shape_cast %84 : vector<1x1x128x128xbf16> to vector<128x128xbf16>
      %86 = vector.shape_cast %82 : vector<128x128xbf16> to vector<1x1x128x128xbf16>
      tpu.vector_store %arg5[%c0_66, %83, %c0_67, %c0_68], %86 {strides = array<i32>} : memref<1x17x256x128xbf16, #tpu.memory_space<vmem>>, vector<1x1x128x128xbf16>,
      %c0_i32_69 = arith.constant 0 : i32
      %87 = arith.addi %arg6, %c0_i32_69 : i32
      %c0_70 = arith.constant 0 : index
      %88 = arith.index_cast %87 : i32 to index
      %c128 = arith.constant 128 : index
      %c0_71 = arith.constant 0 : index
      %89 = vector.load %arg1[%c0_70, %88, %c128, %c0_71] : memref<1x19x288x128xbf16, #tpu.memory_space<vmem>>, vector<1x1x128x128xbf16>
      %90 = vector.shape_cast %89 : vector<1x1x128x128xbf16> to vector<128x128xbf16>
      %c0_72 = arith.constant 0 : index
      %c0_73 = arith.constant 0 : index
      %c0_74 = arith.constant 0 : index
      %91 = vector.load %arg2[%c0_72, %c0_73, %c0_74] : memref<9x128x128xbf16, #tpu.memory_space<vmem>>, vector<1x128x128xbf16>
      %92 = vector.shape_cast %91 : vector<1x128x128xbf16> to vector<128x128xbf16>
      %cst_75 = arith.constant dense<0.000000e+00> : vector<128x128xf32>
      %93 = tpu.matmul %90, %92, %cst_75 {dimension_numbers = #tpu.dot_dimension_numbers<[1], [0], [0], [1], [0, 0, 1, 1], [], []>} : vector<128x128xbf16>, vector<128x128xbf16>, vector<128x128xf32> -> vector<128x128xf32>
      %c0_i32_76 = arith.constant 0 : i32
      %94 = arith.addi %arg6, %c0_i32_76 : i32
      %c0_77 = arith.constant 0 : index
      %95 = arith.index_cast %94 : i32 to index
      %c144 = arith.constant 144 : index
      %c0_78 = arith.constant 0 : index
      %96 = vector.load %arg1[%c0_77, %95, %c144, %c0_78] : memref<1x19x288x128xbf16, #tpu.memory_space<vmem>>, vector<1x1x128x128xbf16>
      %97 = vector.shape_cast %96 : vector<1x1x128x128xbf16> to vector<128x128xbf16>
      %c1_79 = arith.constant 1 : index
      %c0_80 = arith.constant 0 : index
      %c0_81 = arith.constant 0 : index
      %98 = vector.load %arg2[%c1_79, %c0_80, %c0_81] : memref<9x128x128xbf16, #tpu.memory_space<vmem>>, vector<1x128x128xbf16>
      %99 = vector.shape_cast %98 : vector<1x128x128xbf16> to vector<128x128xbf16>
      %cst_82 = arith.constant dense<0.000000e+00> : vector<128x128xf32>
      %100 = tpu.matmul %97, %99, %cst_82 {dimension_numbers = #tpu.dot_dimension_numbers<[1], [0], [0], [1], [0, 0, 1, 1], [], []>} : vector<128x128xbf16>, vector<128x128xbf16>, vector<128x128xf32> -> vector<128x128xf32>
      %101 = arith.addf %93, %100 : vector<128x128xf32>
      %c0_i32_83 = arith.constant 0 : i32
      %102 = arith.addi %arg6, %c0_i32_83 : i32
      %c0_84 = arith.constant 0 : index
      %103 = arith.index_cast %102 : i32 to index
      %c160 = arith.constant 160 : index
      %c0_85 = arith.constant 0 : index
      %104 = vector.load %arg1[%c0_84, %103, %c160, %c0_85] : memref<1x19x288x128xbf16, #tpu.memory_space<vmem>>, vector<1x1x128x128xbf16>
      %105 = vector.shape_cast %104 : vector<1x1x128x128xbf16> to vector<128x128xbf16>
      %c2_86 = arith.constant 2 : index
      %c0_87 = arith.constant 0 : index
      %c0_88 = arith.constant 0 : index
      %106 = vector.load %arg2[%c2_86, %c0_87, %c0_88] : memref<9x128x128xbf16, #tpu.memory_space<vmem>>, vector<1x128x128xbf16>
      %107 = vector.shape_cast %106 : vector<1x128x128xbf16> to vector<128x128xbf16>
      %cst_89 = arith.constant dense<0.000000e+00> : vector<128x128xf32>
      %108 = tpu.matmul %105, %107, %cst_89 {dimension_numbers = #tpu.dot_dimension_numbers<[1], [0], [0], [1], [0, 0, 1, 1], [], []>} : vector<128x128xbf16>, vector<128x128xbf16>, vector<128x128xf32> -> vector<128x128xf32>
      %109 = arith.addf %101, %108 : vector<128x128xf32>
      %c1_i32_90 = arith.constant 1 : i32
      %110 = arith.addi %arg6, %c1_i32_90 : i32
      %c0_91 = arith.constant 0 : index
      %111 = arith.index_cast %110 : i32 to index
      %c128_92 = arith.constant 128 : index
      %c0_93 = arith.constant 0 : index
      %112 = vector.load %arg1[%c0_91, %111, %c128_92, %c0_93] : memref<1x19x288x128xbf16, #tpu.memory_space<vmem>>, vector<1x1x128x128xbf16>
      %113 = vector.shape_cast %112 : vector<1x1x128x128xbf16> to vector<128x128xbf16>
      %c3_94 = arith.constant 3 : index
      %c0_95 = arith.constant 0 : index
      %c0_96 = arith.constant 0 : index
      %114 = vector.load %arg2[%c3_94, %c0_95, %c0_96] : memref<9x128x128xbf16, #tpu.memory_space<vmem>>, vector<1x128x128xbf16>
      %115 = vector.shape_cast %114 : vector<1x128x128xbf16> to vector<128x128xbf16>
      %cst_97 = arith.constant dense<0.000000e+00> : vector<128x128xf32>
      %116 = tpu.matmul %113, %115, %cst_97 {dimension_numbers = #tpu.dot_dimension_numbers<[1], [0], [0], [1], [0, 0, 1, 1], [], []>} : vector<128x128xbf16>, vector<128x128xbf16>, vector<128x128xf32> -> vector<128x128xf32>
      %117 = arith.addf %109, %116 : vector<128x128xf32>
      %c1_i32_98 = arith.constant 1 : i32
      %118 = arith.addi %arg6, %c1_i32_98 : i32
      %c0_99 = arith.constant 0 : index
      %119 = arith.index_cast %118 : i32 to index
      %c144_100 = arith.constant 144 : index
      %c0_101 = arith.constant 0 : index
      %120 = vector.load %arg1[%c0_99, %119, %c144_100, %c0_101] : memref<1x19x288x128xbf16, #tpu.memory_space<vmem>>, vector<1x1x128x128xbf16>
      %121 = vector.shape_cast %120 : vector<1x1x128x128xbf16> to vector<128x128xbf16>
      %c4_102 = arith.constant 4 : index
      %c0_103 = arith.constant 0 : index
      %c0_104 = arith.constant 0 : index
      %122 = vector.load %arg2[%c4_102, %c0_103, %c0_104] : memref<9x128x128xbf16, #tpu.memory_space<vmem>>, vector<1x128x128xbf16>
      %123 = vector.shape_cast %122 : vector<1x128x128xbf16> to vector<128x128xbf16>
      %cst_105 = arith.constant dense<0.000000e+00> : vector<128x128xf32>
      %124 = tpu.matmul %121, %123, %cst_105 {dimension_numbers = #tpu.dot_dimension_numbers<[1], [0], [0], [1], [0, 0, 1, 1], [], []>} : vector<128x128xbf16>, vector<128x128xbf16>, vector<128x128xf32> -> vector<128x128xf32>
      %125 = arith.addf %117, %124 : vector<128x128xf32>
      %c1_i32_106 = arith.constant 1 : i32
      %126 = arith.addi %arg6, %c1_i32_106 : i32
      %c0_107 = arith.constant 0 : index
      %127 = arith.index_cast %126 : i32 to index
      %c160_108 = arith.constant 160 : index
      %c0_109 = arith.constant 0 : index
      %128 = vector.load %arg1[%c0_107, %127, %c160_108, %c0_109] : memref<1x19x288x128xbf16, #tpu.memory_space<vmem>>, vector<1x1x128x128xbf16>
      %129 = vector.shape_cast %128 : vector<1x1x128x128xbf16> to vector<128x128xbf16>
      %c5_110 = arith.constant 5 : index
      %c0_111 = arith.constant 0 : index
      %c0_112 = arith.constant 0 : index
      %130 = vector.load %arg2[%c5_110, %c0_111, %c0_112] : memref<9x128x128xbf16, #tpu.memory_space<vmem>>, vector<1x128x128xbf16>
      %131 = vector.shape_cast %130 : vector<1x128x128xbf16> to vector<128x128xbf16>
      %cst_113 = arith.constant dense<0.000000e+00> : vector<128x128xf32>
      %132 = tpu.matmul %129, %131, %cst_113 {dimension_numbers = #tpu.dot_dimension_numbers<[1], [0], [0], [1], [0, 0, 1, 1], [], []>} : vector<128x128xbf16>, vector<128x128xbf16>, vector<128x128xf32> -> vector<128x128xf32>
      %133 = arith.addf %125, %132 : vector<128x128xf32>
      %c2_i32_114 = arith.constant 2 : i32
      %134 = arith.addi %arg6, %c2_i32_114 : i32
      %c0_115 = arith.constant 0 : index
      %135 = arith.index_cast %134 : i32 to index
      %c128_116 = arith.constant 128 : index
      %c0_117 = arith.constant 0 : index
      %136 = vector.load %arg1[%c0_115, %135, %c128_116, %c0_117] : memref<1x19x288x128xbf16, #tpu.memory_space<vmem>>, vector<1x1x128x128xbf16>
      %137 = vector.shape_cast %136 : vector<1x1x128x128xbf16> to vector<128x128xbf16>
      %c6_118 = arith.constant 6 : index
      %c0_119 = arith.constant 0 : index
      %c0_120 = arith.constant 0 : index
      %138 = vector.load %arg2[%c6_118, %c0_119, %c0_120] : memref<9x128x128xbf16, #tpu.memory_space<vmem>>, vector<1x128x128xbf16>
      %139 = vector.shape_cast %138 : vector<1x128x128xbf16> to vector<128x128xbf16>
      %cst_121 = arith.constant dense<0.000000e+00> : vector<128x128xf32>
      %140 = tpu.matmul %137, %139, %cst_121 {dimension_numbers = #tpu.dot_dimension_numbers<[1], [0], [0], [1], [0, 0, 1, 1], [], []>} : vector<128x128xbf16>, vector<128x128xbf16>, vector<128x128xf32> -> vector<128x128xf32>
      %141 = arith.addf %133, %140 : vector<128x128xf32>
      %c2_i32_122 = arith.constant 2 : i32
      %142 = arith.addi %arg6, %c2_i32_122 : i32
      %c0_123 = arith.constant 0 : index
      %143 = arith.index_cast %142 : i32 to index
      %c144_124 = arith.constant 144 : index
      %c0_125 = arith.constant 0 : index
      %144 = vector.load %arg1[%c0_123, %143, %c144_124, %c0_125] : memref<1x19x288x128xbf16, #tpu.memory_space<vmem>>, vector<1x1x128x128xbf16>
      %145 = vector.shape_cast %144 : vector<1x1x128x128xbf16> to vector<128x128xbf16>
      %c7_126 = arith.constant 7 : index
      %c0_127 = arith.constant 0 : index
      %c0_128 = arith.constant 0 : index
      %146 = vector.load %arg2[%c7_126, %c0_127, %c0_128] : memref<9x128x128xbf16, #tpu.memory_space<vmem>>, vector<1x128x128xbf16>
      %147 = vector.shape_cast %146 : vector<1x128x128xbf16> to vector<128x128xbf16>
      %cst_129 = arith.constant dense<0.000000e+00> : vector<128x128xf32>
      %148 = tpu.matmul %145, %147, %cst_129 {dimension_numbers = #tpu.dot_dimension_numbers<[1], [0], [0], [1], [0, 0, 1, 1], [], []>} : vector<128x128xbf16>, vector<128x128xbf16>, vector<128x128xf32> -> vector<128x128xf32>
      %149 = arith.addf %141, %148 : vector<128x128xf32>
      %c2_i32_130 = arith.constant 2 : i32
      %150 = arith.addi %arg6, %c2_i32_130 : i32
      %c0_131 = arith.constant 0 : index
      %151 = arith.index_cast %150 : i32 to index
      %c160_132 = arith.constant 160 : index
      %c0_133 = arith.constant 0 : index
      %152 = vector.load %arg1[%c0_131, %151, %c160_132, %c0_133] : memref<1x19x288x128xbf16, #tpu.memory_space<vmem>>, vector<1x1x128x128xbf16>
      %153 = vector.shape_cast %152 : vector<1x1x128x128xbf16> to vector<128x128xbf16>
      %c8_134 = arith.constant 8 : index
      %c0_135 = arith.constant 0 : index
      %c0_136 = arith.constant 0 : index
      %154 = vector.load %arg2[%c8_134, %c0_135, %c0_136] : memref<9x128x128xbf16, #tpu.memory_space<vmem>>, vector<1x128x128xbf16>
      %155 = vector.shape_cast %154 : vector<1x128x128xbf16> to vector<128x128xbf16>
      %cst_137 = arith.constant dense<0.000000e+00> : vector<128x128xf32>
      %156 = tpu.matmul %153, %155, %cst_137 {dimension_numbers = #tpu.dot_dimension_numbers<[1], [0], [0], [1], [0, 0, 1, 1], [], []>} : vector<128x128xbf16>, vector<128x128xbf16>, vector<128x128xf32> -> vector<128x128xf32>
      %157 = arith.addf %149, %156 : vector<128x128xf32>
      %158 = vector.broadcast %0 : vector<1x128xf32> to vector<128x128xf32>
      %159 = arith.addf %157, %158 : vector<128x128xf32>
      %cst_138 = arith.constant 0.000000e+00 : f32
      %160 = vector.broadcast %cst_138 : f32 to vector<128x128xf32>
      %161 = arith.maximumf %159, %160 : vector<128x128xf32>
      %c0_139 = arith.constant 0 : index
      %162 = arith.index_cast %arg6 : i32 to index
      %c128_140 = arith.constant 128 : index
      %c0_141 = arith.constant 0 : index
      %163 = vector.load %arg4[%c0_139, %162, %c128_140, %c0_141] : memref<1x17x256x1xf32, #tpu.memory_space<vmem>>, vector<1x1x128x1xf32>
      %164 = vector.shape_cast %163 : vector<1x1x128x1xf32> to vector<128x1xf32>
      %165 = vector.broadcast %164 : vector<128x1xf32> to vector<128x128xf32>
      %166 = arith.mulf %161, %165 : vector<128x128xf32>
      %167 = arith.truncf %166 : vector<128x128xf32> to vector<128x128xbf16>
      %c0_142 = arith.constant 0 : index
      %168 = arith.index_cast %arg6 : i32 to index
      %c128_143 = arith.constant 128 : index
      %c0_144 = arith.constant 0 : index
      %169 = vector.load %arg5[%c0_142, %168, %c128_143, %c0_144] : memref<1x17x256x128xbf16, #tpu.memory_space<vmem>>, vector<1x1x128x128xbf16>
      %170 = vector.shape_cast %169 : vector<1x1x128x128xbf16> to vector<128x128xbf16>
      %171 = vector.shape_cast %167 : vector<128x128xbf16> to vector<1x1x128x128xbf16>
      tpu.vector_store %arg5[%c0_142, %168, %c128_143, %c0_144], %171 {strides = array<i32>} : memref<1x17x256x128xbf16, #tpu.memory_space<vmem>>, vector<1x1x128x128xbf16>,
    }
    %c17_i32_1 = arith.constant 17 : i32
    return
  }
  func.func @transform_0(%arg0: i32) -> (i32, i32, i32, i32) {
    %c0_i32 = arith.constant 0 : i32
    %c0_i32_0 = arith.constant 0 : i32
    %c0_i32_1 = arith.constant 0 : i32
    %c0_i32_2 = arith.constant 0 : i32
    return %arg0, %c0_i32, %c0_i32_0, %c0_i32_1 : i32, i32, i32, i32
  }
  func.func @transform_1(%arg0: i32) -> (i32, i32, i32) {
    %c0_i32 = arith.constant 0 : i32
    %c0_i32_0 = arith.constant 0 : i32
    %c0_i32_1 = arith.constant 0 : i32
    %c0_i32_2 = arith.constant 0 : i32
    return %c0_i32, %c0_i32_0, %c0_i32_1 : i32, i32, i32
  }
  func.func @transform_2(%arg0: i32) -> (i32, i32) {
    %c0_i32 = arith.constant 0 : i32
    %c0_i32_0 = arith.constant 0 : i32
    %c0_i32_1 = arith.constant 0 : i32
    return %c0_i32, %c0_i32_0 : i32, i32
  }
  func.func @transform_3(%arg0: i32) -> (i32, i32, i32, i32) {
    %c0_i32 = arith.constant 0 : i32
    %c0_i32_0 = arith.constant 0 : i32
    %c0_i32_1 = arith.constant 0 : i32
    %c0_i32_2 = arith.constant 0 : i32
    return %arg0, %c0_i32, %c0_i32_0, %c0_i32_1 : i32, i32, i32, i32
  }
  func.func @transform_4(%arg0: i32) -> (i32, i32, i32, i32) {
    %c0_i32 = arith.constant 0 : i32
    %c0_i32_0 = arith.constant 0 : i32
    %c0_i32_1 = arith.constant 0 : i32
    %c0_i32_2 = arith.constant 0 : i32
    return %arg0, %c0_i32, %c0_i32_0, %c0_i32_1 : i32, i32, i32, i32
  }
}

module attributes {stable_mosaic.version = 11 : i64} {
  func.func @_mm_bias_relu_mask_kernel(%arg0: i32, %arg1: i32, %arg2: memref<1x512x432xbf16, #tpu.memory_space<vmem>>, %arg3: memref<432x128xbf16, #tpu.memory_space<vmem>>, %arg4: memref<1x128xf32, #tpu.memory_space<vmem>>, %arg5: memref<1x512x1xf32, #tpu.memory_space<vmem>>, %arg6: memref<1x512x128xbf16, #tpu.memory_space<vmem>>) attributes {dimension_semantics = [#tpu.dimension_semantics<parallel>, #tpu.dimension_semantics<parallel>], iteration_bounds = array<i64: 2, 2>, scalar_prefetch = 0 : i64, scratch_operands = 0 : i64, tpu.core_type = #tpu.core_type<tc>, window_params = [{transform_indices = @transform_0, window_bounds = array<i64: 1, 512, 432>}, {pipeline_mode = #tpu.pipeline_mode<synchronous>, transform_indices = @transform_1, window_bounds = array<i64: 432, 128>}, {pipeline_mode = #tpu.pipeline_mode<synchronous>, transform_indices = @transform_2, window_bounds = array<i64: 1, 128>}, {transform_indices = @transform_3, window_bounds = array<i64: 1, 512, 1>}, {transform_indices = @transform_4, window_bounds = array<i64: 1, 512, 128>}]} {
    %c0 = arith.constant 0 : index
    %c0_0 = arith.constant 0 : index
    %c0_1 = arith.constant 0 : index
    %0 = vector.load %arg2[%c0, %c0_0, %c0_1] : memref<1x512x432xbf16, #tpu.memory_space<vmem>>, vector<1x512x432xbf16>
    %1 = vector.shape_cast %0 : vector<1x512x432xbf16> to vector<512x432xbf16>
    %c0_2 = arith.constant 0 : index
    %c0_3 = arith.constant 0 : index
    %2 = vector.load %arg3[%c0_2, %c0_3] : memref<432x128xbf16, #tpu.memory_space<vmem>>, vector<432x128xbf16>
    %cst = arith.constant dense<0.000000e+00> : vector<512x128xf32>
    %3 = tpu.matmul %1, %2, %cst {dimension_numbers = #tpu.dot_dimension_numbers<[1], [0], [0], [1], [0, 0, 1, 1], [], []>} : vector<512x432xbf16>, vector<432x128xbf16>, vector<512x128xf32> -> vector<512x128xf32>
    %c0_4 = arith.constant 0 : index
    %c0_5 = arith.constant 0 : index
    %4 = vector.load %arg4[%c0_4, %c0_5] : memref<1x128xf32, #tpu.memory_space<vmem>>, vector<1x128xf32>
    %5 = vector.broadcast %4 : vector<1x128xf32> to vector<512x128xf32>
    %6 = arith.addf %3, %5 : vector<512x128xf32>
    %cst_6 = arith.constant 0.000000e+00 : f32
    %7 = vector.broadcast %cst_6 : f32 to vector<512x128xf32>
    %8 = arith.maximumf %6, %7 : vector<512x128xf32>
    %c0_7 = arith.constant 0 : index
    %c0_8 = arith.constant 0 : index
    %c0_9 = arith.constant 0 : index
    %9 = vector.load %arg5[%c0_7, %c0_8, %c0_9] : memref<1x512x1xf32, #tpu.memory_space<vmem>>, vector<1x512x1xf32>
    %10 = vector.shape_cast %9 : vector<1x512x1xf32> to vector<512x1xf32>
    %11 = vector.broadcast %10 : vector<512x1xf32> to vector<512x128xf32>
    %12 = arith.mulf %8, %11 : vector<512x128xf32>
    %13 = arith.truncf %12 : vector<512x128xf32> to vector<512x128xbf16>
    %c0_10 = arith.constant 0 : index
    %c0_11 = arith.constant 0 : index
    %c0_12 = arith.constant 0 : index
    %14 = vector.load %arg6[%c0_10, %c0_11, %c0_12] : memref<1x512x128xbf16, #tpu.memory_space<vmem>>, vector<1x512x128xbf16>
    %15 = vector.shape_cast %14 : vector<1x512x128xbf16> to vector<512x128xbf16>
    %16 = vector.shape_cast %13 : vector<512x128xbf16> to vector<1x512x128xbf16>
    tpu.vector_store %arg6[%c0_10, %c0_11, %c0_12], %16 {strides = array<i32>} : memref<1x512x128xbf16, #tpu.memory_space<vmem>>, vector<1x512x128xbf16>,
    return
  }
  func.func @transform_0(%arg0: i32, %arg1: i32) -> (i32, i32, i32) {
    %c0_i32 = arith.constant 0 : i32
    %c0_i32_0 = arith.constant 0 : i32
    return %arg0, %arg1, %c0_i32 : i32, i32, i32
  }
  func.func @transform_1(%arg0: i32, %arg1: i32) -> (i32, i32) {
    %c0_i32 = arith.constant 0 : i32
    %c0_i32_0 = arith.constant 0 : i32
    %c0_i32_1 = arith.constant 0 : i32
    return %c0_i32, %c0_i32_0 : i32, i32
  }
  func.func @transform_2(%arg0: i32, %arg1: i32) -> (i32, i32) {
    %c0_i32 = arith.constant 0 : i32
    %c0_i32_0 = arith.constant 0 : i32
    %c0_i32_1 = arith.constant 0 : i32
    return %c0_i32, %c0_i32_0 : i32, i32
  }
  func.func @transform_3(%arg0: i32, %arg1: i32) -> (i32, i32, i32) {
    %c0_i32 = arith.constant 0 : i32
    %c0_i32_0 = arith.constant 0 : i32
    return %arg0, %arg1, %c0_i32 : i32, i32, i32
  }
  func.func @transform_4(%arg0: i32, %arg1: i32) -> (i32, i32, i32) {
    %c0_i32 = arith.constant 0 : i32
    %c0_i32_0 = arith.constant 0 : i32
    return %arg0, %arg1, %c0_i32 : i32, i32, i32
  }
}

module attributes {stable_mosaic.version = 11 : i64} {
  func.func @kernel(%arg0: i32, %arg1: memref<1x11x80x128xbf16, #tpu.memory_space<vmem>>, %arg2: memref<9x128x128xbf16, #tpu.memory_space<vmem>>, %arg3: memref<1x128xf32, #tpu.memory_space<vmem>>, %arg4: memref<1x9x64x1xf32, #tpu.memory_space<vmem>>, %arg5: memref<1x9x64x128xbf16, #tpu.memory_space<vmem>>) attributes {dimension_semantics = [#tpu.dimension_semantics<parallel>], iteration_bounds = array<i64: 2>, scalar_prefetch = 0 : i64, scratch_operands = 0 : i64, tpu.core_type = #tpu.core_type<tc>, window_params = [{transform_indices = @transform_0, window_bounds = array<i64: 1, 11, 80, 128>}, {pipeline_mode = #tpu.pipeline_mode<synchronous>, transform_indices = @transform_1, window_bounds = array<i64: 9, 128, 128>}, {pipeline_mode = #tpu.pipeline_mode<synchronous>, transform_indices = @transform_2, window_bounds = array<i64: 1, 128>}, {transform_indices = @transform_3, window_bounds = array<i64: 1, 9, 64, 1>}, {transform_indices = @transform_4, window_bounds = array<i64: 1, 9, 64, 128>}]} {
    %c0 = arith.constant 0 : index
    %c0_0 = arith.constant 0 : index
    %0 = vector.load %arg3[%c0, %c0_0] : memref<1x128xf32, #tpu.memory_space<vmem>>, vector<1x128xf32>
    %c0_i32 = arith.constant 0 : i32
    %c9_i32 = arith.constant 9 : i32
    %1 = arith.addi %c0_i32, %c9_i32 : i32
    %c1_i32 = arith.constant 1 : i32
    scf.for %arg6 = %c0_i32 to %1 step %c1_i32  : i32 {
      %c0_i32_2 = arith.constant 0 : i32
      %2 = arith.addi %arg6, %c0_i32_2 : i32
      %c0_3 = arith.constant 0 : index
      %3 = arith.index_cast %2 : i32 to index
      %c0_4 = arith.constant 0 : index
      %c0_5 = arith.constant 0 : index
      %4 = vector.load %arg1[%c0_3, %3, %c0_4, %c0_5] : memref<1x11x80x128xbf16, #tpu.memory_space<vmem>>, vector<1x1x64x128xbf16>
      %5 = vector.shape_cast %4 : vector<1x1x64x128xbf16> to vector<64x128xbf16>
      %c0_6 = arith.constant 0 : index
      %c0_7 = arith.constant 0 : index
      %c0_8 = arith.constant 0 : index
      %6 = vector.load %arg2[%c0_6, %c0_7, %c0_8] : memref<9x128x128xbf16, #tpu.memory_space<vmem>>, vector<1x128x128xbf16>
      %7 = vector.shape_cast %6 : vector<1x128x128xbf16> to vector<128x128xbf16>
      %cst = arith.constant dense<0.000000e+00> : vector<64x128xf32>
      %8 = tpu.matmul %5, %7, %cst {dimension_numbers = #tpu.dot_dimension_numbers<[1], [0], [0], [1], [0, 0, 1, 1], [], []>} : vector<64x128xbf16>, vector<128x128xbf16>, vector<64x128xf32> -> vector<64x128xf32>
      %c0_i32_9 = arith.constant 0 : i32
      %9 = arith.addi %arg6, %c0_i32_9 : i32
      %c0_10 = arith.constant 0 : index
      %10 = arith.index_cast %9 : i32 to index
      %c8 = arith.constant 8 : index
      %c0_11 = arith.constant 0 : index
      %11 = vector.load %arg1[%c0_10, %10, %c8, %c0_11] : memref<1x11x80x128xbf16, #tpu.memory_space<vmem>>, vector<1x1x64x128xbf16>
      %12 = vector.shape_cast %11 : vector<1x1x64x128xbf16> to vector<64x128xbf16>
      %c1 = arith.constant 1 : index
      %c0_12 = arith.constant 0 : index
      %c0_13 = arith.constant 0 : index
      %13 = vector.load %arg2[%c1, %c0_12, %c0_13] : memref<9x128x128xbf16, #tpu.memory_space<vmem>>, vector<1x128x128xbf16>
      %14 = vector.shape_cast %13 : vector<1x128x128xbf16> to vector<128x128xbf16>
      %cst_14 = arith.constant dense<0.000000e+00> : vector<64x128xf32>
      %15 = tpu.matmul %12, %14, %cst_14 {dimension_numbers = #tpu.dot_dimension_numbers<[1], [0], [0], [1], [0, 0, 1, 1], [], []>} : vector<64x128xbf16>, vector<128x128xbf16>, vector<64x128xf32> -> vector<64x128xf32>
      %16 = arith.addf %8, %15 : vector<64x128xf32>
      %c0_i32_15 = arith.constant 0 : i32
      %17 = arith.addi %arg6, %c0_i32_15 : i32
      %c0_16 = arith.constant 0 : index
      %18 = arith.index_cast %17 : i32 to index
      %c16 = arith.constant 16 : index
      %c0_17 = arith.constant 0 : index
      %19 = vector.load %arg1[%c0_16, %18, %c16, %c0_17] : memref<1x11x80x128xbf16, #tpu.memory_space<vmem>>, vector<1x1x64x128xbf16>
      %20 = vector.shape_cast %19 : vector<1x1x64x128xbf16> to vector<64x128xbf16>
      %c2 = arith.constant 2 : index
      %c0_18 = arith.constant 0 : index
      %c0_19 = arith.constant 0 : index
      %21 = vector.load %arg2[%c2, %c0_18, %c0_19] : memref<9x128x128xbf16, #tpu.memory_space<vmem>>, vector<1x128x128xbf16>
      %22 = vector.shape_cast %21 : vector<1x128x128xbf16> to vector<128x128xbf16>
      %cst_20 = arith.constant dense<0.000000e+00> : vector<64x128xf32>
      %23 = tpu.matmul %20, %22, %cst_20 {dimension_numbers = #tpu.dot_dimension_numbers<[1], [0], [0], [1], [0, 0, 1, 1], [], []>} : vector<64x128xbf16>, vector<128x128xbf16>, vector<64x128xf32> -> vector<64x128xf32>
      %24 = arith.addf %16, %23 : vector<64x128xf32>
      %c1_i32_21 = arith.constant 1 : i32
      %25 = arith.addi %arg6, %c1_i32_21 : i32
      %c0_22 = arith.constant 0 : index
      %26 = arith.index_cast %25 : i32 to index
      %c0_23 = arith.constant 0 : index
      %c0_24 = arith.constant 0 : index
      %27 = vector.load %arg1[%c0_22, %26, %c0_23, %c0_24] : memref<1x11x80x128xbf16, #tpu.memory_space<vmem>>, vector<1x1x64x128xbf16>
      %28 = vector.shape_cast %27 : vector<1x1x64x128xbf16> to vector<64x128xbf16>
      %c3 = arith.constant 3 : index
      %c0_25 = arith.constant 0 : index
      %c0_26 = arith.constant 0 : index
      %29 = vector.load %arg2[%c3, %c0_25, %c0_26] : memref<9x128x128xbf16, #tpu.memory_space<vmem>>, vector<1x128x128xbf16>
      %30 = vector.shape_cast %29 : vector<1x128x128xbf16> to vector<128x128xbf16>
      %cst_27 = arith.constant dense<0.000000e+00> : vector<64x128xf32>
      %31 = tpu.matmul %28, %30, %cst_27 {dimension_numbers = #tpu.dot_dimension_numbers<[1], [0], [0], [1], [0, 0, 1, 1], [], []>} : vector<64x128xbf16>, vector<128x128xbf16>, vector<64x128xf32> -> vector<64x128xf32>
      %32 = arith.addf %24, %31 : vector<64x128xf32>
      %c1_i32_28 = arith.constant 1 : i32
      %33 = arith.addi %arg6, %c1_i32_28 : i32
      %c0_29 = arith.constant 0 : index
      %34 = arith.index_cast %33 : i32 to index
      %c8_30 = arith.constant 8 : index
      %c0_31 = arith.constant 0 : index
      %35 = vector.load %arg1[%c0_29, %34, %c8_30, %c0_31] : memref<1x11x80x128xbf16, #tpu.memory_space<vmem>>, vector<1x1x64x128xbf16>
      %36 = vector.shape_cast %35 : vector<1x1x64x128xbf16> to vector<64x128xbf16>
      %c4 = arith.constant 4 : index
      %c0_32 = arith.constant 0 : index
      %c0_33 = arith.constant 0 : index
      %37 = vector.load %arg2[%c4, %c0_32, %c0_33] : memref<9x128x128xbf16, #tpu.memory_space<vmem>>, vector<1x128x128xbf16>
      %38 = vector.shape_cast %37 : vector<1x128x128xbf16> to vector<128x128xbf16>
      %cst_34 = arith.constant dense<0.000000e+00> : vector<64x128xf32>
      %39 = tpu.matmul %36, %38, %cst_34 {dimension_numbers = #tpu.dot_dimension_numbers<[1], [0], [0], [1], [0, 0, 1, 1], [], []>} : vector<64x128xbf16>, vector<128x128xbf16>, vector<64x128xf32> -> vector<64x128xf32>
      %40 = arith.addf %32, %39 : vector<64x128xf32>
      %c1_i32_35 = arith.constant 1 : i32
      %41 = arith.addi %arg6, %c1_i32_35 : i32
      %c0_36 = arith.constant 0 : index
      %42 = arith.index_cast %41 : i32 to index
      %c16_37 = arith.constant 16 : index
      %c0_38 = arith.constant 0 : index
      %43 = vector.load %arg1[%c0_36, %42, %c16_37, %c0_38] : memref<1x11x80x128xbf16, #tpu.memory_space<vmem>>, vector<1x1x64x128xbf16>
      %44 = vector.shape_cast %43 : vector<1x1x64x128xbf16> to vector<64x128xbf16>
      %c5 = arith.constant 5 : index
      %c0_39 = arith.constant 0 : index
      %c0_40 = arith.constant 0 : index
      %45 = vector.load %arg2[%c5, %c0_39, %c0_40] : memref<9x128x128xbf16, #tpu.memory_space<vmem>>, vector<1x128x128xbf16>
      %46 = vector.shape_cast %45 : vector<1x128x128xbf16> to vector<128x128xbf16>
      %cst_41 = arith.constant dense<0.000000e+00> : vector<64x128xf32>
      %47 = tpu.matmul %44, %46, %cst_41 {dimension_numbers = #tpu.dot_dimension_numbers<[1], [0], [0], [1], [0, 0, 1, 1], [], []>} : vector<64x128xbf16>, vector<128x128xbf16>, vector<64x128xf32> -> vector<64x128xf32>
      %48 = arith.addf %40, %47 : vector<64x128xf32>
      %c2_i32 = arith.constant 2 : i32
      %49 = arith.addi %arg6, %c2_i32 : i32
      %c0_42 = arith.constant 0 : index
      %50 = arith.index_cast %49 : i32 to index
      %c0_43 = arith.constant 0 : index
      %c0_44 = arith.constant 0 : index
      %51 = vector.load %arg1[%c0_42, %50, %c0_43, %c0_44] : memref<1x11x80x128xbf16, #tpu.memory_space<vmem>>, vector<1x1x64x128xbf16>
      %52 = vector.shape_cast %51 : vector<1x1x64x128xbf16> to vector<64x128xbf16>
      %c6 = arith.constant 6 : index
      %c0_45 = arith.constant 0 : index
      %c0_46 = arith.constant 0 : index
      %53 = vector.load %arg2[%c6, %c0_45, %c0_46] : memref<9x128x128xbf16, #tpu.memory_space<vmem>>, vector<1x128x128xbf16>
      %54 = vector.shape_cast %53 : vector<1x128x128xbf16> to vector<128x128xbf16>
      %cst_47 = arith.constant dense<0.000000e+00> : vector<64x128xf32>
      %55 = tpu.matmul %52, %54, %cst_47 {dimension_numbers = #tpu.dot_dimension_numbers<[1], [0], [0], [1], [0, 0, 1, 1], [], []>} : vector<64x128xbf16>, vector<128x128xbf16>, vector<64x128xf32> -> vector<64x128xf32>
      %56 = arith.addf %48, %55 : vector<64x128xf32>
      %c2_i32_48 = arith.constant 2 : i32
      %57 = arith.addi %arg6, %c2_i32_48 : i32
      %c0_49 = arith.constant 0 : index
      %58 = arith.index_cast %57 : i32 to index
      %c8_50 = arith.constant 8 : index
      %c0_51 = arith.constant 0 : index
      %59 = vector.load %arg1[%c0_49, %58, %c8_50, %c0_51] : memref<1x11x80x128xbf16, #tpu.memory_space<vmem>>, vector<1x1x64x128xbf16>
      %60 = vector.shape_cast %59 : vector<1x1x64x128xbf16> to vector<64x128xbf16>
      %c7 = arith.constant 7 : index
      %c0_52 = arith.constant 0 : index
      %c0_53 = arith.constant 0 : index
      %61 = vector.load %arg2[%c7, %c0_52, %c0_53] : memref<9x128x128xbf16, #tpu.memory_space<vmem>>, vector<1x128x128xbf16>
      %62 = vector.shape_cast %61 : vector<1x128x128xbf16> to vector<128x128xbf16>
      %cst_54 = arith.constant dense<0.000000e+00> : vector<64x128xf32>
      %63 = tpu.matmul %60, %62, %cst_54 {dimension_numbers = #tpu.dot_dimension_numbers<[1], [0], [0], [1], [0, 0, 1, 1], [], []>} : vector<64x128xbf16>, vector<128x128xbf16>, vector<64x128xf32> -> vector<64x128xf32>
      %64 = arith.addf %56, %63 : vector<64x128xf32>
      %c2_i32_55 = arith.constant 2 : i32
      %65 = arith.addi %arg6, %c2_i32_55 : i32
      %c0_56 = arith.constant 0 : index
      %66 = arith.index_cast %65 : i32 to index
      %c16_57 = arith.constant 16 : index
      %c0_58 = arith.constant 0 : index
      %67 = vector.load %arg1[%c0_56, %66, %c16_57, %c0_58] : memref<1x11x80x128xbf16, #tpu.memory_space<vmem>>, vector<1x1x64x128xbf16>
      %68 = vector.shape_cast %67 : vector<1x1x64x128xbf16> to vector<64x128xbf16>
      %c8_59 = arith.constant 8 : index
      %c0_60 = arith.constant 0 : index
      %c0_61 = arith.constant 0 : index
      %69 = vector.load %arg2[%c8_59, %c0_60, %c0_61] : memref<9x128x128xbf16, #tpu.memory_space<vmem>>, vector<1x128x128xbf16>
      %70 = vector.shape_cast %69 : vector<1x128x128xbf16> to vector<128x128xbf16>
      %cst_62 = arith.constant dense<0.000000e+00> : vector<64x128xf32>
      %71 = tpu.matmul %68, %70, %cst_62 {dimension_numbers = #tpu.dot_dimension_numbers<[1], [0], [0], [1], [0, 0, 1, 1], [], []>} : vector<64x128xbf16>, vector<128x128xbf16>, vector<64x128xf32> -> vector<64x128xf32>
      %72 = arith.addf %64, %71 : vector<64x128xf32>
      %73 = vector.broadcast %0 : vector<1x128xf32> to vector<64x128xf32>
      %74 = arith.addf %72, %73 : vector<64x128xf32>
      %cst_63 = arith.constant 0.000000e+00 : f32
      %75 = vector.broadcast %cst_63 : f32 to vector<64x128xf32>
      %76 = arith.maximumf %74, %75 : vector<64x128xf32>
      %c0_64 = arith.constant 0 : index
      %77 = arith.index_cast %arg6 : i32 to index
      %c0_65 = arith.constant 0 : index
      %c0_66 = arith.constant 0 : index
      %78 = vector.load %arg4[%c0_64, %77, %c0_65, %c0_66] : memref<1x9x64x1xf32, #tpu.memory_space<vmem>>, vector<1x1x64x1xf32>
      %79 = vector.shape_cast %78 : vector<1x1x64x1xf32> to vector<64x1xf32>
      %80 = vector.broadcast %79 : vector<64x1xf32> to vector<64x128xf32>
      %81 = arith.mulf %76, %80 : vector<64x128xf32>
      %82 = arith.truncf %81 : vector<64x128xf32> to vector<64x128xbf16>
      %c0_67 = arith.constant 0 : index
      %83 = arith.index_cast %arg6 : i32 to index
      %c0_68 = arith.constant 0 : index
      %c0_69 = arith.constant 0 : index
      %84 = vector.load %arg5[%c0_67, %83, %c0_68, %c0_69] : memref<1x9x64x128xbf16, #tpu.memory_space<vmem>>, vector<1x1x64x128xbf16>
      %85 = vector.shape_cast %84 : vector<1x1x64x128xbf16> to vector<64x128xbf16>
      %86 = vector.shape_cast %82 : vector<64x128xbf16> to vector<1x1x64x128xbf16>
      tpu.vector_store %arg5[%c0_67, %83, %c0_68, %c0_69], %86 {strides = array<i32>} : memref<1x9x64x128xbf16, #tpu.memory_space<vmem>>, vector<1x1x64x128xbf16>,
    }
    %c9_i32_1 = arith.constant 9 : i32
    return
  }
  func.func @transform_0(%arg0: i32) -> (i32, i32, i32, i32) {
    %c0_i32 = arith.constant 0 : i32
    %c0_i32_0 = arith.constant 0 : i32
    %c0_i32_1 = arith.constant 0 : i32
    %c0_i32_2 = arith.constant 0 : i32
    return %arg0, %c0_i32, %c0_i32_0, %c0_i32_1 : i32, i32, i32, i32
  }
  func.func @transform_1(%arg0: i32) -> (i32, i32, i32) {
    %c0_i32 = arith.constant 0 : i32
    %c0_i32_0 = arith.constant 0 : i32
    %c0_i32_1 = arith.constant 0 : i32
    %c0_i32_2 = arith.constant 0 : i32
    return %c0_i32, %c0_i32_0, %c0_i32_1 : i32, i32, i32
  }
  func.func @transform_2(%arg0: i32) -> (i32, i32) {
    %c0_i32 = arith.constant 0 : i32
    %c0_i32_0 = arith.constant 0 : i32
    %c0_i32_1 = arith.constant 0 : i32
    return %c0_i32, %c0_i32_0 : i32, i32
  }
  func.func @transform_3(%arg0: i32) -> (i32, i32, i32, i32) {
    %c0_i32 = arith.constant 0 : i32
    %c0_i32_0 = arith.constant 0 : i32
    %c0_i32_1 = arith.constant 0 : i32
    %c0_i32_2 = arith.constant 0 : i32
    return %arg0, %c0_i32, %c0_i32_0, %c0_i32_1 : i32, i32, i32, i32
  }
  func.func @transform_4(%arg0: i32) -> (i32, i32, i32, i32) {
    %c0_i32 = arith.constant 0 : i32
    %c0_i32_0 = arith.constant 0 : i32
    %c0_i32_1 = arith.constant 0 : i32
    %c0_i32_2 = arith.constant 0 : i32
    return %arg0, %c0_i32, %c0_i32_0, %c0_i32_1 : i32, i32, i32, i32
  }
}

module attributes {stable_mosaic.version = 11 : i64} {
  func.func @_mm_bias_relu_mask_kernel(%arg0: i32, %arg1: i32, %arg2: memref<1x80x864xbf16, #tpu.memory_space<vmem>>, %arg3: memref<864x128xbf16, #tpu.memory_space<vmem>>, %arg4: memref<1x128xf32, #tpu.memory_space<vmem>>, %arg5: memref<1x80x1xf32, #tpu.memory_space<vmem>>, %arg6: memref<1x80x128xbf16, #tpu.memory_space<vmem>>) attributes {dimension_semantics = [#tpu.dimension_semantics<parallel>, #tpu.dimension_semantics<parallel>], iteration_bounds = array<i64: 2, 1>, scalar_prefetch = 0 : i64, scratch_operands = 0 : i64, tpu.core_type = #tpu.core_type<tc>, window_params = [{transform_indices = @transform_0, window_bounds = array<i64: 1, 80, 864>}, {pipeline_mode = #tpu.pipeline_mode<synchronous>, transform_indices = @transform_1, window_bounds = array<i64: 864, 128>}, {pipeline_mode = #tpu.pipeline_mode<synchronous>, transform_indices = @transform_2, window_bounds = array<i64: 1, 128>}, {transform_indices = @transform_3, window_bounds = array<i64: 1, 80, 1>}, {transform_indices = @transform_4, window_bounds = array<i64: 1, 80, 128>}]} {
    %c0 = arith.constant 0 : index
    %c0_0 = arith.constant 0 : index
    %c0_1 = arith.constant 0 : index
    %0 = vector.load %arg2[%c0, %c0_0, %c0_1] : memref<1x80x864xbf16, #tpu.memory_space<vmem>>, vector<1x80x864xbf16>
    %1 = vector.shape_cast %0 : vector<1x80x864xbf16> to vector<80x864xbf16>
    %c0_2 = arith.constant 0 : index
    %c0_3 = arith.constant 0 : index
    %2 = vector.load %arg3[%c0_2, %c0_3] : memref<864x128xbf16, #tpu.memory_space<vmem>>, vector<864x128xbf16>
    %cst = arith.constant dense<0.000000e+00> : vector<80x128xf32>
    %3 = tpu.matmul %1, %2, %cst {dimension_numbers = #tpu.dot_dimension_numbers<[1], [0], [0], [1], [0, 0, 1, 1], [], []>} : vector<80x864xbf16>, vector<864x128xbf16>, vector<80x128xf32> -> vector<80x128xf32>
    %c0_4 = arith.constant 0 : index
    %c0_5 = arith.constant 0 : index
    %4 = vector.load %arg4[%c0_4, %c0_5] : memref<1x128xf32, #tpu.memory_space<vmem>>, vector<1x128xf32>
    %5 = vector.broadcast %4 : vector<1x128xf32> to vector<80x128xf32>
    %6 = arith.addf %3, %5 : vector<80x128xf32>
    %cst_6 = arith.constant 0.000000e+00 : f32
    %7 = vector.broadcast %cst_6 : f32 to vector<80x128xf32>
    %8 = arith.maximumf %6, %7 : vector<80x128xf32>
    %c0_7 = arith.constant 0 : index
    %c0_8 = arith.constant 0 : index
    %c0_9 = arith.constant 0 : index
    %9 = vector.load %arg5[%c0_7, %c0_8, %c0_9] : memref<1x80x1xf32, #tpu.memory_space<vmem>>, vector<1x80x1xf32>
    %10 = vector.shape_cast %9 : vector<1x80x1xf32> to vector<80x1xf32>
    %11 = vector.broadcast %10 : vector<80x1xf32> to vector<80x128xf32>
    %12 = arith.mulf %8, %11 : vector<80x128xf32>
    %13 = arith.truncf %12 : vector<80x128xf32> to vector<80x128xbf16>
    %c0_10 = arith.constant 0 : index
    %c0_11 = arith.constant 0 : index
    %c0_12 = arith.constant 0 : index
    %14 = vector.load %arg6[%c0_10, %c0_11, %c0_12] : memref<1x80x128xbf16, #tpu.memory_space<vmem>>, vector<1x80x128xbf16>
    %15 = vector.shape_cast %14 : vector<1x80x128xbf16> to vector<80x128xbf16>
    %16 = vector.shape_cast %13 : vector<80x128xbf16> to vector<1x80x128xbf16>
    tpu.vector_store %arg6[%c0_10, %c0_11, %c0_12], %16 {strides = array<i32>} : memref<1x80x128xbf16, #tpu.memory_space<vmem>>, vector<1x80x128xbf16>,
    return
  }
  func.func @transform_0(%arg0: i32, %arg1: i32) -> (i32, i32, i32) {
    %c0_i32 = arith.constant 0 : i32
    %c0_i32_0 = arith.constant 0 : i32
    return %arg0, %arg1, %c0_i32 : i32, i32, i32
  }
  func.func @transform_1(%arg0: i32, %arg1: i32) -> (i32, i32) {
    %c0_i32 = arith.constant 0 : i32
    %c0_i32_0 = arith.constant 0 : i32
    %c0_i32_1 = arith.constant 0 : i32
    return %c0_i32, %c0_i32_0 : i32, i32
  }
  func.func @transform_2(%arg0: i32, %arg1: i32) -> (i32, i32) {
    %c0_i32 = arith.constant 0 : i32
    %c0_i32_0 = arith.constant 0 : i32
    %c0_i32_1 = arith.constant 0 : i32
    return %c0_i32, %c0_i32_0 : i32, i32
  }
  func.func @transform_3(%arg0: i32, %arg1: i32) -> (i32, i32, i32) {
    %c0_i32 = arith.constant 0 : i32
    %c0_i32_0 = arith.constant 0 : i32
    return %arg0, %arg1, %c0_i32 : i32, i32, i32
  }
  func.func @transform_4(%arg0: i32, %arg1: i32) -> (i32, i32, i32) {
    %c0_i32 = arith.constant 0 : i32
    %c0_i32_0 = arith.constant 0 : i32
    return %arg0, %arg1, %c0_i32 : i32, i32, i32
  }
}

module attributes {stable_mosaic.version = 11 : i64} {
  func.func @_mm_bias_relu_mask_kernel(%arg0: i32, %arg1: i32, %arg2: memref<1x80x1728xbf16, #tpu.memory_space<vmem>>, %arg3: memref<1728x128xbf16, #tpu.memory_space<vmem>>, %arg4: memref<1x128xf32, #tpu.memory_space<vmem>>, %arg5: memref<1x80x1xf32, #tpu.memory_space<vmem>>, %arg6: memref<1x80x128xbf16, #tpu.memory_space<vmem>>) attributes {dimension_semantics = [#tpu.dimension_semantics<parallel>, #tpu.dimension_semantics<parallel>], iteration_bounds = array<i64: 2, 1>, scalar_prefetch = 0 : i64, scratch_operands = 0 : i64, tpu.core_type = #tpu.core_type<tc>, window_params = [{transform_indices = @transform_0, window_bounds = array<i64: 1, 80, 1728>}, {pipeline_mode = #tpu.pipeline_mode<synchronous>, transform_indices = @transform_1, window_bounds = array<i64: 1728, 128>}, {pipeline_mode = #tpu.pipeline_mode<synchronous>, transform_indices = @transform_2, window_bounds = array<i64: 1, 128>}, {transform_indices = @transform_3, window_bounds = array<i64: 1, 80, 1>}, {transform_indices = @transform_4, window_bounds = array<i64: 1, 80, 128>}]} {
    %c0 = arith.constant 0 : index
    %c0_0 = arith.constant 0 : index
    %c0_1 = arith.constant 0 : index
    %0 = vector.load %arg2[%c0, %c0_0, %c0_1] : memref<1x80x1728xbf16, #tpu.memory_space<vmem>>, vector<1x80x1728xbf16>
    %1 = vector.shape_cast %0 : vector<1x80x1728xbf16> to vector<80x1728xbf16>
    %c0_2 = arith.constant 0 : index
    %c0_3 = arith.constant 0 : index
    %2 = vector.load %arg3[%c0_2, %c0_3] : memref<1728x128xbf16, #tpu.memory_space<vmem>>, vector<1728x128xbf16>
    %cst = arith.constant dense<0.000000e+00> : vector<80x128xf32>
    %3 = tpu.matmul %1, %2, %cst {dimension_numbers = #tpu.dot_dimension_numbers<[1], [0], [0], [1], [0, 0, 1, 1], [], []>} : vector<80x1728xbf16>, vector<1728x128xbf16>, vector<80x128xf32> -> vector<80x128xf32>
    %c0_4 = arith.constant 0 : index
    %c0_5 = arith.constant 0 : index
    %4 = vector.load %arg4[%c0_4, %c0_5] : memref<1x128xf32, #tpu.memory_space<vmem>>, vector<1x128xf32>
    %5 = vector.broadcast %4 : vector<1x128xf32> to vector<80x128xf32>
    %6 = arith.addf %3, %5 : vector<80x128xf32>
    %cst_6 = arith.constant 0.000000e+00 : f32
    %7 = vector.broadcast %cst_6 : f32 to vector<80x128xf32>
    %8 = arith.maximumf %6, %7 : vector<80x128xf32>
    %c0_7 = arith.constant 0 : index
    %c0_8 = arith.constant 0 : index
    %c0_9 = arith.constant 0 : index
    %9 = vector.load %arg5[%c0_7, %c0_8, %c0_9] : memref<1x80x1xf32, #tpu.memory_space<vmem>>, vector<1x80x1xf32>
    %10 = vector.shape_cast %9 : vector<1x80x1xf32> to vector<80x1xf32>
    %11 = vector.broadcast %10 : vector<80x1xf32> to vector<80x128xf32>
    %12 = arith.mulf %8, %11 : vector<80x128xf32>
    %13 = arith.truncf %12 : vector<80x128xf32> to vector<80x128xbf16>
    %c0_10 = arith.constant 0 : index
    %c0_11 = arith.constant 0 : index
    %c0_12 = arith.constant 0 : index
    %14 = vector.load %arg6[%c0_10, %c0_11, %c0_12] : memref<1x80x128xbf16, #tpu.memory_space<vmem>>, vector<1x80x128xbf16>
    %15 = vector.shape_cast %14 : vector<1x80x128xbf16> to vector<80x128xbf16>
    %16 = vector.shape_cast %13 : vector<80x128xbf16> to vector<1x80x128xbf16>
    tpu.vector_store %arg6[%c0_10, %c0_11, %c0_12], %16 {strides = array<i32>} : memref<1x80x128xbf16, #tpu.memory_space<vmem>>, vector<1x80x128xbf16>,
    return
  }
  func.func @transform_0(%arg0: i32, %arg1: i32) -> (i32, i32, i32) {
    %c0_i32 = arith.constant 0 : i32
    %c0_i32_0 = arith.constant 0 : i32
    return %arg0, %arg1, %c0_i32 : i32, i32, i32
  }
  func.func @transform_1(%arg0: i32, %arg1: i32) -> (i32, i32) {
    %c0_i32 = arith.constant 0 : i32
    %c0_i32_0 = arith.constant 0 : i32
    %c0_i32_1 = arith.constant 0 : i32
    return %c0_i32, %c0_i32_0 : i32, i32
  }
  func.func @transform_2(%arg0: i32, %arg1: i32) -> (i32, i32) {
    %c0_i32 = arith.constant 0 : i32
    %c0_i32_0 = arith.constant 0 : i32
    %c0_i32_1 = arith.constant 0 : i32
    return %c0_i32, %c0_i32_0 : i32, i32
  }
  func.func @transform_3(%arg0: i32, %arg1: i32) -> (i32, i32, i32) {
    %c0_i32 = arith.constant 0 : i32
    %c0_i32_0 = arith.constant 0 : i32
    return %arg0, %arg1, %c0_i32 : i32, i32, i32
  }
  func.func @transform_4(%arg0: i32, %arg1: i32) -> (i32, i32, i32) {
    %c0_i32 = arith.constant 0 : i32
    %c0_i32_0 = arith.constant 0 : i32
    return %arg0, %arg1, %c0_i32 : i32, i32, i32
  }
}

module attributes {stable_mosaic.version = 11 : i64} {
  func.func @_mm_bias_relu_mask_kernel(%arg0: i32, %arg1: i32, %arg2: memref<1x16x1728xbf16, #tpu.memory_space<vmem>>, %arg3: memref<1728x128xbf16, #tpu.memory_space<vmem>>, %arg4: memref<1x128xf32, #tpu.memory_space<vmem>>, %arg5: memref<1x16x1xf32, #tpu.memory_space<vmem>>, %arg6: memref<1x16x128xbf16, #tpu.memory_space<vmem>>) attributes {dimension_semantics = [#tpu.dimension_semantics<parallel>, #tpu.dimension_semantics<parallel>], iteration_bounds = array<i64: 2, 1>, scalar_prefetch = 0 : i64, scratch_operands = 0 : i64, tpu.core_type = #tpu.core_type<tc>, window_params = [{transform_indices = @transform_0, window_bounds = array<i64: 1, 16, 1728>}, {pipeline_mode = #tpu.pipeline_mode<synchronous>, transform_indices = @transform_1, window_bounds = array<i64: 1728, 128>}, {pipeline_mode = #tpu.pipeline_mode<synchronous>, transform_indices = @transform_2, window_bounds = array<i64: 1, 128>}, {transform_indices = @transform_3, window_bounds = array<i64: 1, 16, 1>}, {transform_indices = @transform_4, window_bounds = array<i64: 1, 16, 128>}]} {
    %c0 = arith.constant 0 : index
    %c0_0 = arith.constant 0 : index
    %c0_1 = arith.constant 0 : index
    %0 = vector.load %arg2[%c0, %c0_0, %c0_1] : memref<1x16x1728xbf16, #tpu.memory_space<vmem>>, vector<1x16x1728xbf16>
    %1 = vector.shape_cast %0 : vector<1x16x1728xbf16> to vector<16x1728xbf16>
    %c0_2 = arith.constant 0 : index
    %c0_3 = arith.constant 0 : index
    %2 = vector.load %arg3[%c0_2, %c0_3] : memref<1728x128xbf16, #tpu.memory_space<vmem>>, vector<1728x128xbf16>
    %cst = arith.constant dense<0.000000e+00> : vector<16x128xf32>
    %3 = tpu.matmul %1, %2, %cst {dimension_numbers = #tpu.dot_dimension_numbers<[1], [0], [0], [1], [0, 0, 1, 1], [], []>} : vector<16x1728xbf16>, vector<1728x128xbf16>, vector<16x128xf32> -> vector<16x128xf32>
    %c0_4 = arith.constant 0 : index
    %c0_5 = arith.constant 0 : index
    %4 = vector.load %arg4[%c0_4, %c0_5] : memref<1x128xf32, #tpu.memory_space<vmem>>, vector<1x128xf32>
    %5 = vector.broadcast %4 : vector<1x128xf32> to vector<16x128xf32>
    %6 = arith.addf %3, %5 : vector<16x128xf32>
    %cst_6 = arith.constant 0.000000e+00 : f32
    %7 = vector.broadcast %cst_6 : f32 to vector<16x128xf32>
    %8 = arith.maximumf %6, %7 : vector<16x128xf32>
    %c0_7 = arith.constant 0 : index
    %c0_8 = arith.constant 0 : index
    %c0_9 = arith.constant 0 : index
    %9 = vector.load %arg5[%c0_7, %c0_8, %c0_9] : memref<1x16x1xf32, #tpu.memory_space<vmem>>, vector<1x16x1xf32>
    %10 = vector.shape_cast %9 : vector<1x16x1xf32> to vector<16x1xf32>
    %11 = vector.broadcast %10 : vector<16x1xf32> to vector<16x128xf32>
    %12 = arith.mulf %8, %11 : vector<16x128xf32>
    %13 = arith.truncf %12 : vector<16x128xf32> to vector<16x128xbf16>
    %c0_10 = arith.constant 0 : index
    %c0_11 = arith.constant 0 : index
    %c0_12 = arith.constant 0 : index
    %14 = vector.load %arg6[%c0_10, %c0_11, %c0_12] : memref<1x16x128xbf16, #tpu.memory_space<vmem>>, vector<1x16x128xbf16>
    %15 = vector.shape_cast %14 : vector<1x16x128xbf16> to vector<16x128xbf16>
    %16 = vector.shape_cast %13 : vector<16x128xbf16> to vector<1x16x128xbf16>
    tpu.vector_store %arg6[%c0_10, %c0_11, %c0_12], %16 {strides = array<i32>} : memref<1x16x128xbf16, #tpu.memory_space<vmem>>, vector<1x16x128xbf16>,
    return
  }
  func.func @transform_0(%arg0: i32, %arg1: i32) -> (i32, i32, i32) {
    %c0_i32 = arith.constant 0 : i32
    %c0_i32_0 = arith.constant 0 : i32
    return %arg0, %arg1, %c0_i32 : i32, i32, i32
  }
  func.func @transform_1(%arg0: i32, %arg1: i32) -> (i32, i32) {
    %c0_i32 = arith.constant 0 : i32
    %c0_i32_0 = arith.constant 0 : i32
    %c0_i32_1 = arith.constant 0 : i32
    return %c0_i32, %c0_i32_0 : i32, i32
  }
  func.func @transform_2(%arg0: i32, %arg1: i32) -> (i32, i32) {
    %c0_i32 = arith.constant 0 : i32
    %c0_i32_0 = arith.constant 0 : i32
    %c0_i32_1 = arith.constant 0 : i32
    return %c0_i32, %c0_i32_0 : i32, i32
  }
  func.func @transform_3(%arg0: i32, %arg1: i32) -> (i32, i32, i32) {
    %c0_i32 = arith.constant 0 : i32
    %c0_i32_0 = arith.constant 0 : i32
    return %arg0, %arg1, %c0_i32 : i32, i32, i32
  }
  func.func @transform_4(%arg0: i32, %arg1: i32) -> (i32, i32, i32) {
    %c0_i32 = arith.constant 0 : i32
    %c0_i32_0 = arith.constant 0 : i32
    return %arg0, %arg1, %c0_i32 : i32, i32, i32
  }
}

module attributes {stable_mosaic.version = 11 : i64} {
  func.func @_mm_bias_relu_mask_kernel(%arg0: i32, %arg1: i32, %arg2: memref<1x16x3456xbf16, #tpu.memory_space<vmem>>, %arg3: memref<3456x128xbf16, #tpu.memory_space<vmem>>, %arg4: memref<1x128xf32, #tpu.memory_space<vmem>>, %arg5: memref<1x16x1xf32, #tpu.memory_space<vmem>>, %arg6: memref<1x16x128xbf16, #tpu.memory_space<vmem>>) attributes {dimension_semantics = [#tpu.dimension_semantics<parallel>, #tpu.dimension_semantics<parallel>], iteration_bounds = array<i64: 2, 1>, scalar_prefetch = 0 : i64, scratch_operands = 0 : i64, tpu.core_type = #tpu.core_type<tc>, window_params = [{transform_indices = @transform_0, window_bounds = array<i64: 1, 16, 3456>}, {pipeline_mode = #tpu.pipeline_mode<synchronous>, transform_indices = @transform_1, window_bounds = array<i64: 3456, 128>}, {pipeline_mode = #tpu.pipeline_mode<synchronous>, transform_indices = @transform_2, window_bounds = array<i64: 1, 128>}, {transform_indices = @transform_3, window_bounds = array<i64: 1, 16, 1>}, {transform_indices = @transform_4, window_bounds = array<i64: 1, 16, 128>}]} {
    %c0 = arith.constant 0 : index
    %c0_0 = arith.constant 0 : index
    %c0_1 = arith.constant 0 : index
    %0 = vector.load %arg2[%c0, %c0_0, %c0_1] : memref<1x16x3456xbf16, #tpu.memory_space<vmem>>, vector<1x16x3456xbf16>
    %1 = vector.shape_cast %0 : vector<1x16x3456xbf16> to vector<16x3456xbf16>
    %c0_2 = arith.constant 0 : index
    %c0_3 = arith.constant 0 : index
    %2 = vector.load %arg3[%c0_2, %c0_3] : memref<3456x128xbf16, #tpu.memory_space<vmem>>, vector<3456x128xbf16>
    %cst = arith.constant dense<0.000000e+00> : vector<16x128xf32>
    %3 = tpu.matmul %1, %2, %cst {dimension_numbers = #tpu.dot_dimension_numbers<[1], [0], [0], [1], [0, 0, 1, 1], [], []>} : vector<16x3456xbf16>, vector<3456x128xbf16>, vector<16x128xf32> -> vector<16x128xf32>
    %c0_4 = arith.constant 0 : index
    %c0_5 = arith.constant 0 : index
    %4 = vector.load %arg4[%c0_4, %c0_5] : memref<1x128xf32, #tpu.memory_space<vmem>>, vector<1x128xf32>
    %5 = vector.broadcast %4 : vector<1x128xf32> to vector<16x128xf32>
    %6 = arith.addf %3, %5 : vector<16x128xf32>
    %cst_6 = arith.constant 0.000000e+00 : f32
    %7 = vector.broadcast %cst_6 : f32 to vector<16x128xf32>
    %8 = arith.maximumf %6, %7 : vector<16x128xf32>
    %c0_7 = arith.constant 0 : index
    %c0_8 = arith.constant 0 : index
    %c0_9 = arith.constant 0 : index
    %9 = vector.load %arg5[%c0_7, %c0_8, %c0_9] : memref<1x16x1xf32, #tpu.memory_space<vmem>>, vector<1x16x1xf32>
    %10 = vector.shape_cast %9 : vector<1x16x1xf32> to vector<16x1xf32>
    %11 = vector.broadcast %10 : vector<16x1xf32> to vector<16x128xf32>
    %12 = arith.mulf %8, %11 : vector<16x128xf32>
    %13 = arith.truncf %12 : vector<16x128xf32> to vector<16x128xbf16>
    %c0_10 = arith.constant 0 : index
    %c0_11 = arith.constant 0 : index
    %c0_12 = arith.constant 0 : index
    %14 = vector.load %arg6[%c0_10, %c0_11, %c0_12] : memref<1x16x128xbf16, #tpu.memory_space<vmem>>, vector<1x16x128xbf16>
    %15 = vector.shape_cast %14 : vector<1x16x128xbf16> to vector<16x128xbf16>
    %16 = vector.shape_cast %13 : vector<16x128xbf16> to vector<1x16x128xbf16>
    tpu.vector_store %arg6[%c0_10, %c0_11, %c0_12], %16 {strides = array<i32>} : memref<1x16x128xbf16, #tpu.memory_space<vmem>>, vector<1x16x128xbf16>,
    return
  }
  func.func @transform_0(%arg0: i32, %arg1: i32) -> (i32, i32, i32) {
    %c0_i32 = arith.constant 0 : i32
    %c0_i32_0 = arith.constant 0 : i32
    return %arg0, %arg1, %c0_i32 : i32, i32, i32
  }
  func.func @transform_1(%arg0: i32, %arg1: i32) -> (i32, i32) {
    %c0_i32 = arith.constant 0 : i32
    %c0_i32_0 = arith.constant 0 : i32
    %c0_i32_1 = arith.constant 0 : i32
    return %c0_i32, %c0_i32_0 : i32, i32
  }
  func.func @transform_2(%arg0: i32, %arg1: i32) -> (i32, i32) {
    %c0_i32 = arith.constant 0 : i32
    %c0_i32_0 = arith.constant 0 : i32
    %c0_i32_1 = arith.constant 0 : i32
    return %c0_i32, %c0_i32_0 : i32, i32
  }
  func.func @transform_3(%arg0: i32, %arg1: i32) -> (i32, i32, i32) {
    %c0_i32 = arith.constant 0 : i32
    %c0_i32_0 = arith.constant 0 : i32
    return %arg0, %arg1, %c0_i32 : i32, i32, i32
  }
  func.func @transform_4(%arg0: i32, %arg1: i32) -> (i32, i32, i32) {
    %c0_i32 = arith.constant 0 : i32
    %c0_i32_0 = arith.constant 0 : i32
    return %arg0, %arg1, %c0_i32 : i32, i32, i32
  }
}

module attributes {stable_mosaic.version = 11 : i64} {
  func.func @_mm_bias_relu_kernel(%arg0: i32, %arg1: i32, %arg2: memref<1x8x384xbf16, #tpu.memory_space<vmem>>, %arg3: memref<384x128xbf16, #tpu.memory_space<vmem>>, %arg4: memref<1x128xf32, #tpu.memory_space<vmem>>, %arg5: memref<1x8x128xbf16, #tpu.memory_space<vmem>>) attributes {dimension_semantics = [#tpu.dimension_semantics<parallel>, #tpu.dimension_semantics<parallel>], iteration_bounds = array<i64: 2, 1>, scalar_prefetch = 0 : i64, scratch_operands = 0 : i64, tpu.core_type = #tpu.core_type<tc>, window_params = [{transform_indices = @transform_0, window_bounds = array<i64: 1, 8, 384>}, {pipeline_mode = #tpu.pipeline_mode<synchronous>, transform_indices = @transform_1, window_bounds = array<i64: 384, 128>}, {pipeline_mode = #tpu.pipeline_mode<synchronous>, transform_indices = @transform_2, window_bounds = array<i64: 1, 128>}, {transform_indices = @transform_3, window_bounds = array<i64: 1, 8, 128>}]} {
    %c0 = arith.constant 0 : index
    %c0_0 = arith.constant 0 : index
    %c0_1 = arith.constant 0 : index
    %0 = vector.load %arg2[%c0, %c0_0, %c0_1] : memref<1x8x384xbf16, #tpu.memory_space<vmem>>, vector<1x8x384xbf16>
    %1 = vector.shape_cast %0 : vector<1x8x384xbf16> to vector<8x384xbf16>
    %c0_2 = arith.constant 0 : index
    %c0_3 = arith.constant 0 : index
    %2 = vector.load %arg3[%c0_2, %c0_3] : memref<384x128xbf16, #tpu.memory_space<vmem>>, vector<384x128xbf16>
    %cst = arith.constant dense<0.000000e+00> : vector<8x128xf32>
    %3 = tpu.matmul %1, %2, %cst {dimension_numbers = #tpu.dot_dimension_numbers<[1], [0], [0], [1], [0, 0, 1, 1], [], []>} : vector<8x384xbf16>, vector<384x128xbf16>, vector<8x128xf32> -> vector<8x128xf32>
    %c0_4 = arith.constant 0 : index
    %c0_5 = arith.constant 0 : index
    %4 = vector.load %arg4[%c0_4, %c0_5] : memref<1x128xf32, #tpu.memory_space<vmem>>, vector<1x128xf32>
    %5 = vector.broadcast %4 : vector<1x128xf32> to vector<8x128xf32>
    %6 = arith.addf %3, %5 : vector<8x128xf32>
    %cst_6 = arith.constant 0.000000e+00 : f32
    %7 = vector.broadcast %cst_6 : f32 to vector<8x128xf32>
    %8 = arith.maximumf %6, %7 : vector<8x128xf32>
    %9 = arith.truncf %8 : vector<8x128xf32> to vector<8x128xbf16>
    %c0_7 = arith.constant 0 : index
    %c0_8 = arith.constant 0 : index
    %c0_9 = arith.constant 0 : index
    %10 = vector.load %arg5[%c0_7, %c0_8, %c0_9] : memref<1x8x128xbf16, #tpu.memory_space<vmem>>, vector<1x8x128xbf16>
    %11 = vector.shape_cast %10 : vector<1x8x128xbf16> to vector<8x128xbf16>
    %12 = vector.shape_cast %9 : vector<8x128xbf16> to vector<1x8x128xbf16>
    tpu.vector_store %arg5[%c0_7, %c0_8, %c0_9], %12 {strides = array<i32>} : memref<1x8x128xbf16, #tpu.memory_space<vmem>>, vector<1x8x128xbf16>,
    return
  }
  func.func @transform_0(%arg0: i32, %arg1: i32) -> (i32, i32, i32) {
    %c0_i32 = arith.constant 0 : i32
    %c0_i32_0 = arith.constant 0 : i32
    return %arg0, %arg1, %c0_i32 : i32, i32, i32
  }
  func.func @transform_1(%arg0: i32, %arg1: i32) -> (i32, i32) {
    %c0_i32 = arith.constant 0 : i32
    %c0_i32_0 = arith.constant 0 : i32
    %c0_i32_1 = arith.constant 0 : i32
    return %c0_i32, %c0_i32_0 : i32, i32
  }
  func.func @transform_2(%arg0: i32, %arg1: i32) -> (i32, i32) {
    %c0_i32 = arith.constant 0 : i32
    %c0_i32_0 = arith.constant 0 : i32
    %c0_i32_1 = arith.constant 0 : i32
    return %c0_i32, %c0_i32_0 : i32, i32
  }
  func.func @transform_3(%arg0: i32, %arg1: i32) -> (i32, i32, i32) {
    %c0_i32 = arith.constant 0 : i32
    %c0_i32_0 = arith.constant 0 : i32
    return %arg0, %arg1, %c0_i32 : i32, i32, i32
  }
}

</mosaic_0001>

<bundles_post_ra>
// kernel: voxelnet_encoder_forward.12
= control target key start
LH: loop header
LB: loop body
LE: loop exit
PB: predicated region body
PF: predicated region fallthrough
CT: control target
= control target key end

     0   :  { %s2489_s15 = smov 0   ;;  %s2491_s16 = smov 0   ;;  %s2937_s0 = inlined_call_operand.vmem [shape: bf16[2,4608,128], index: 0, kind: input, shape index: {}]   ;;  %s2938_s1 = inlined_call_operand.vmem [shape: bf16[128,128], index: 1, kind: input, shape index: {}]   ;;  %s2939_s2 = inlined_call_operand.vmem [shape: f32[1,128], index: 2, kind: input, shape index: {}]   ;;  %s2940_s3 = inlined_call_operand.vmem [shape: f32[2,4608,1], index: 3, kind: input, shape index: {}]   ;;  %s2941_s4 = inlined_call_operand.vmem [shape: bf16[2,4608,128], index: 4, kind: output, shape index: {}]  }
   0x1   :  { %s2493_s17 = smov 0   ;;  %s2495_s18 = smov 0  }
   0x2   :  { %s2497_s19 = smov 0  }
   0x3 LB: > { %s23_s20 = sadd.s32 1, %s2453_s17  ;;  %s26_s21 = sadd.s32 1, %s2457_s18  ;;  %s2461_s19 = sphi %s2497_s19, %s14_s19   ;;  %s2457_s18 = sphi %s2495_s18, %s2955_s18   ;;  %s2453_s17 = sphi %s2493_s17, %s2954_s17   ;;  %s2449_s16 = sphi %s2491_s16, %s2953_s16   ;;  %s2445_s15 = sphi %s2489_s15, %s2952_s15  }
   0x4   : > { %p24_p0 = scmp.ge.s32.totalorder %s23_s20, 9  ;;  %p1834_p1 = scmp.ge.s32.totalorder %s2461_s19, 1 }
   0x5   : > { %p200_p2 = scmp.lt.s32.totalorder %s2461_s19, 19 }
   0x6   : > { %s2957_s20 = smov (%p24_p0, %s23_s20), 0  ;;  %s2959_s21 = smov (!%p24_p0, %s26_s21), %s2457_s18 }
   0x7   : > { %p201_p3 = pnand %p1834_p1, %p200_p2  ;;  %p28_p4 = scmp.ge.s32.totalorder %s2959_s21, 2 }
   0x9   : > { %s2961_s21 = smov (%p28_p4, %s2959_s21), 0  ;;  %204 = sbr.rel (%p201_p3) target bundleno = 312 (0x138), region = 36 }
   0xe   : > { %v2383_v0 = vld [vmem:[%s2938_s1 + $0x38] sm:$0xff]   ;;  %v2384_v1 = vld [vmem:[%s2938_s1 + $0x30] sm:$0xff]   ;;  %v2463_v2 = vmov 0   ;;  %s1835_s26 = sshll.u32 %s2445_s15, 6  ;;  %p244_p5 = scmp.lt.s32.totalorder %s2449_s16, 1  ;;  %v2385_v3 = vld [vmem:[%s2938_s1 + $0x28] sm:$0xff]  }
   0xf   : > { %2382 = vset.pattern.permute.xlu1 %v2463_v2  ;;  %2381 = vset.pattern.permute.xlu0 %v2463_v2  ;;  %p246_p6 = scmp.lt.s32.totalorder %s1835_s26, 575  ;;  %v2386_v4 = vld [vmem:[%s2938_s1 + $0x20] sm:$0xff]   ;;  %v2387_v9 = vld [vmem:[%s2938_s1 + $0x18] sm:$0xff]   ;;  %v2388_v11 = vld [vmem:[%s2938_s1 + $0x10] sm:$0xff]  }
  0x10   : > { %2243 = vmatprep.subr.bf16.mxu0 %v2383_v0  ;;  %2323 = vmatprep.subr.bf16.mxu1 %v2383_v0  ;;  %s2963_s16 = smov (!%p244_p5, %s2449_s16), 1  ;;  %v2389_v16 = vld [vmem:[%s2938_s1 + $0x8] sm:$0xff]   ;;  %v2390_v20 = vld [vmem:[%s2938_s1] sm:$0xff]  }
  0x11   : > { %2244 = vmatpush3.bf16.msra.mxu0 %v2383_v0  ;;  %2331 = vmatpush3.bf16.msra.mxu1 %v2383_v0  ;;  %s2965_s26 = smov (!%p246_p6, %s1835_s26), 575  ;;  %s2339_s29 = smul.u32 576, %s2963_s16 }
  0x12   : > { %2245 = vmatprep.subr.bf16.mxu0 %v2384_v1  ;;  %2324 = vmatprep.subr.bf16.mxu1 %v2384_v1 }
  0x13   : > { %s2531_s30 = sadd.s32 %s2339_s29, %s2965_s26 }
  0x14   : > { %s1838_s5 = sshll.u32 %s2531_s30, 3  ;;  %s1836_s11 = sshll.u32 %s2531_s30, 2 }
  0x15   : > { %2246 = vmatpush3.bf16.msra.mxu0 %v2384_v1  ;;  %2332 = vmatpush3.bf16.msra.mxu1 %v2384_v1  ;;  %s2540_s10 = scalar_lea.vmem %s2940_s3, %s1838_s5  ;;  %s2555_s16 = scalar_lea.vmem %s2937_s0, %s1836_s11 }
  0x16   : > { %2247 = vmatprep.subr.bf16.mxu0 %v2385_v3  ;;  %2325 = vmatprep.subr.bf16.mxu1 %v2385_v3  ;;  %v956_v5 = vld [vmem:[%s2540_s10 + $0x10] sm:$0xff]  ;;  %v954_v6 = vld [vmem:[%s2540_s10] sm:$0xff]  ;;  %v957_v7 = vld [vmem:[%s2540_s10 + $0x18] sm:$0xff]  ;;  %s2765_s7 = scalar_lea.vmem %s2941_s4, %s1836_s11 }
  0x17   : > { %1030 = vperm.xlu1 %2382, %v956_v5   ;;  %1020 = vperm.xlu0 %2381, %v954_v6   ;;  %v955_v8 = vld [vmem:[%s2540_s10 + $0x8] sm:$0xff]  ;;  %v2391_v12 = vld [vmem:[%s2555_s16] sm:$0xff]   ;;  %v961_v15 = vld [vmem:[%s2540_s10 + $0x38] sm:$0xff] }
  0x18   : > { %v959_v10 = vld [vmem:[%s2540_s10 + $0x28] sm:$0xff]  ;;  %v958_v13 = vld [vmem:[%s2540_s10 + $0x20] sm:$0xff]  ;;  %2259 = vmatprep.mubr.bf16.mxu0 %v2391_v12  ;;  %v960_v17 = vld [vmem:[%s2540_s10 + $0x30] sm:$0xff] }
  0x19   : > { %2248 = vmatpush3.bf16.msra.mxu0 %v2385_v3  ;;  %2333 = vmatpush3.bf16.msra.mxu1 %v2385_v3  ;;  %v2392_v14 = vld [vmem:[%s2555_s16 + $0x80] sm:$0xff]   ;;  %v963_v18 = vld [vmem:[%s2540_s10 + $0x48] sm:$0xff]  ;;  %v965_v21 = vld [vmem:[%s2540_s10 + $0x58] sm:$0xff] }
  0x1a   : > { %2249 = vmatprep.subr.bf16.mxu0 %v2386_v4  ;;  %2326 = vmatprep.subr.bf16.mxu1 %v2386_v4  ;;  %v962_v19 = vld [vmem:[%s2540_s10 + $0x40] sm:$0xff]  ;;  %v964_v22 = vld [vmem:[%s2540_s10 + $0x50] sm:$0xff]  ;;  %v2393_v23 = vld [vmem:[%s2555_s16 + $0x8] sm:$0xff]  }
  0x1b   : > { %1035 = vperm.xlu1 %2382, %v957_v7   ;;  %1025 = vperm.xlu0 %2381, %v955_v8   ;;  %v2394_v24 = vld [vmem:[%s2555_s16 + $0x88] sm:$0xff]   ;;  %v2395_v25 = vld [vmem:[%s2555_s16 + $0x10] sm:$0xff]   ;;  %v966_v28 = vld [vmem:[%s2540_s10 + $0x60] sm:$0xff] }
  0x1c   : > { %2291 = vmatprep.mubr.bf16.mxu1 %v2392_v14  ;;  %v2396_v26 = vld [vmem:[%s2555_s16 + $0x90] sm:$0xff]   ;;  %v967_v27 = vld [vmem:[%s2540_s10 + $0x68] sm:$0xff]  ;;  %v969_v29 = vld [vmem:[%s2540_s10 + $0x78] sm:$0xff] }
  0x1d   : > { %2250 = vmatpush3.bf16.msra.mxu0 %v2386_v4  ;;  %2334 = vmatpush3.bf16.msra.mxu1 %v2386_v4  ;;  %v968_v30 = vld [vmem:[%s2540_s10 + $0x70] sm:$0xff]  ;;  %v2397_v31 = vld [vmem:[%s2555_s16 + $0x18] sm:$0xff]   ;;  %v2399_v33 = vld [vmem:[%s2555_s16 + $0x20] sm:$0xff]  }
  0x1e   : > { %2251 = vmatprep.subr.bf16.mxu0 %v2387_v9  ;;  %2327 = vmatprep.subr.bf16.mxu1 %v2387_v9  ;;  %v2398_v32 = vld [vmem:[%s2555_s16 + $0x98] sm:$0xff]   ;;  %v2400_v34 = vld [vmem:[%s2555_s16 + $0xa0] sm:$0xff]   ;;  %v971_v35 = vld [vmem:[%s2540_s10 + $0x88] sm:$0xff] }
  0x1f   : > { %1045 = vperm.xlu1 %2382, %v959_v10   ;;  %1040 = vperm.xlu0 %2381, %v958_v13   ;;  %v970_v36 = vld [vmem:[%s2540_s10 + $0x80] sm:$0xff]  ;;  %v973_v37 = vld [vmem:[%s2540_s10 + $0x98] sm:$0xff]  ;;  %v972_v38 = vld [vmem:[%s2540_s10 + $0x90] sm:$0xff] }
  0x20   : > { %v2401_v39 = vld [vmem:[%s2555_s16 + $0x28] sm:$0xff]   ;;  %v2403_v41 = vld [vmem:[%s2555_s16 + $0x30] sm:$0xff]   ;;  %v974_v44 = vld [vmem:[%s2540_s10 + $0xa0] sm:$0xff] }
  0x21   : > { %2252 = vmatpush3.bf16.msra.mxu0 %v2387_v9  ;;  %2335 = vmatpush3.bf16.msra.mxu1 %v2387_v9  ;;  %v2402_v40 = vld [vmem:[%s2555_s16 + $0xa8] sm:$0xff]   ;;  %v2404_v42 = vld [vmem:[%s2555_s16 + $0xb0] sm:$0xff]   ;;  %v977_v45 = vld [vmem:[%s2540_s10 + $0xb8] sm:$0xff] }
  0x22   : > { %2253 = vmatprep.subr.bf16.mxu0 %v2388_v11  ;;  %2328 = vmatprep.subr.bf16.mxu1 %v2388_v11  ;;  %v975_v43 = vld [vmem:[%s2540_s10 + $0xa8] sm:$0xff]  ;;  %v976_v46 = vld [vmem:[%s2540_s10 + $0xb0] sm:$0xff]  ;;  %v2405_v47 = vld [vmem:[%s2555_s16 + $0x38] sm:$0xff]  }
  0x23   : > { %1055 = vperm.xlu1 %2382, %v961_v15   ;;  %1050 = vperm.xlu0 %2381, %v960_v17   ;;  %v2406_v48 = vld [vmem:[%s2555_s16 + $0xb8] sm:$0xff]   ;;  %v2407_v49 = vld [vmem:[%s2555_s16 + $0x40] sm:$0xff]   ;;  %v979_v51 = vld [vmem:[%s2540_s10 + $0xc8] sm:$0xff] }
  0x24   : > { %v2408_v50 = vld [vmem:[%s2555_s16 + $0xc0] sm:$0xff]   ;;  %v981_v53 = vld [vmem:[%s2540_s10 + $0xd8] sm:$0xff]  ;;  %v980_v54 = vld [vmem:[%s2540_s10 + $0xd0] sm:$0xff] }
  0x25   : > { %2254 = vmatpush3.bf16.msra.mxu0 %v2388_v11  ;;  %2336 = vmatpush3.bf16.msra.mxu1 %v2388_v11  ;;  %v978_v52 = vld [vmem:[%s2540_s10 + $0xc0] sm:$0xff]  ;;  %v2409_v55 = vld [vmem:[%s2555_s16 + $0x48] sm:$0xff]   ;;  %v2411_v57 = vld [vmem:[%s2555_s16 + $0x50] sm:$0xff]  }
  0x26   : > { %2255 = vmatprep.subr.bf16.mxu0 %v2389_v16  ;;  %2329 = vmatprep.subr.bf16.mxu1 %v2389_v16  ;;  %v2410_v56 = vld [vmem:[%s2555_s16 + $0xc8] sm:$0xff]   ;;  %v2412_v58 = vld [vmem:[%s2555_s16 + $0xd0] sm:$0xff]   ;;  %v982_v60 = vld [vmem:[%s2540_s10 + $0xe0] sm:$0xff] }
  0x27   : > { %1065 = vperm.xlu1 %2382, %v963_v18   ;;  %1060 = vperm.xlu0 %2381, %v962_v19   ;;  %v983_v59 = vld [vmem:[%s2540_s10 + $0xe8] sm:$0xff]  ;;  %v985_v61 = vld [vmem:[%s2540_s10 + $0xf8] sm:$0xff]  ;;  %v984_v62 = vld [vmem:[%s2540_s10 + $0xf0] sm:$0xff] }
  0x28   : > { %v2413_v63 = vld [vmem:[%s2555_s16 + $0x58] sm:$0xff]   ;;  %v2415_v1 = vld [vmem:[%s2555_s16 + $0x60] sm:$0xff]   ;;  %v987_v3 = vld [vmem:[%s2540_s10 + $0x108] sm:$0xff] }
  0x29   : > { %2256 = vmatpush3.bf16.msra.mxu0 %v2389_v16  ;;  %2337 = vmatpush3.bf16.msra.mxu1 %v2389_v16  ;;  %v2414_v0 = vld [vmem:[%s2555_s16 + $0xd8] sm:$0xff]   ;;  %v2416_v2 = vld [vmem:[%s2555_s16 + $0xe0] sm:$0xff]   ;;  %v988_v6 = vld [vmem:[%s2540_s10 + $0x110] sm:$0xff] }
  0x2a   : > { %2257 = vmatprep.subr.bf16.mxu0 %v2390_v20  ;;  %2330 = vmatprep.subr.bf16.mxu1 %v2390_v20  ;;  %v986_v4 = vld [vmem:[%s2540_s10 + $0x100] sm:$0xff]  ;;  %v989_v5 = vld [vmem:[%s2540_s10 + $0x118] sm:$0xff]  ;;  %v2417_v7 = vld [vmem:[%s2555_s16 + $0x68] sm:$0xff]  }
  0x2b   : > { %1075 = vperm.xlu1 %2382, %v965_v21   ;;  %1070 = vperm.xlu0 %2381, %v964_v22   ;;  %v2418_v8 = vld [vmem:[%s2555_s16 + $0xe8] sm:$0xff]   ;;  %v2419_v9 = vld [vmem:[%s2555_s16 + $0x70] sm:$0xff]   ;;  %v990_v12 = vld [vmem:[%s2540_s10 + $0x120] sm:$0xff] }
  0x2c   : > { %v2420_v10 = vld [vmem:[%s2555_s16 + $0xf0] sm:$0xff]   ;;  %v991_v11 = vld [vmem:[%s2540_s10 + $0x128] sm:$0xff]  ;;  %v993_v13 = vld [vmem:[%s2540_s10 + $0x138] sm:$0xff] }
  0x2d   : > { %2258 = vmatpush3.bf16.msra.mxu0 %v2390_v20  ;;  %2338 = vmatpush3.bf16.msra.mxu1 %v2390_v20  ;;  %v992_v14 = vld [vmem:[%s2540_s10 + $0x130] sm:$0xff]  ;;  %v2421_v15 = vld [vmem:[%s2555_s16 + $0x78] sm:$0xff]   ;;  %v995_v17 = vld [vmem:[%s2540_s10 + $0x148] sm:$0xff] }
  0x2e   : > { %v2422_v16 = vld [vmem:[%s2555_s16 + $0xf8] sm:$0xff]   ;;  %v994_v18 = vld [vmem:[%s2540_s10 + $0x140] sm:$0xff]  ;;  %v996_v20 = vld [vmem:[%s2540_s10 + $0x150] sm:$0xff] }
  0x2f   : > { %1085 = vperm.xlu1 %2382, %v967_v27   ;;  %1080 = vperm.xlu0 %2381, %v966_v28   ;;  %v997_v19 = vld [vmem:[%s2540_s10 + $0x158] sm:$0xff]  ;;  %v999_v21 = vld [vmem:[%s2540_s10 + $0x168] sm:$0xff]  ;;  %v998_v22 = vld [vmem:[%s2540_s10 + $0x160] sm:$0xff] }
  0x30   : > { %2260 = vmatmul.mubr.bf16.vlgmr.msra.gmra.mxu0 %v2393_v23  ;;  %2292 = vmatmul.mubr.bf16.vlgmr.msra.gmra.mxu1 %v2394_v24  ;;  %v1001_v23 = vld [vmem:[%s2540_s10 + $0x178] sm:$0xff]  ;;  %v1000_v24 = vld [vmem:[%s2540_s10 + $0x170] sm:$0xff] }
  0x31   : > { %2263 = vmatprep.mubr.bf16.mxu0 %v2395_v25  ;;  %2295 = vmatprep.mubr.bf16.mxu1 %v2396_v26  ;;  %v1003_v25 = vld [vmem:[%s2540_s10 + $0x188] sm:$0xff]  ;;  %v1002_v26 = vld [vmem:[%s2540_s10 + $0x180] sm:$0xff]  ;;  %v1005_v27 = vld [vmem:[%s2540_s10 + $0x198] sm:$0xff] }
  0x32   : > { %v1004_v28 = vld [vmem:[%s2540_s10 + $0x190] sm:$0xff] }
  0x33   : > { %1095 = vperm.xlu1 %2382, %v969_v29   ;;  %1090 = vperm.xlu0 %2381, %v968_v30   ;;  %v1007_v29 = vld [vmem:[%s2540_s10 + $0x1a8] sm:$0xff]  ;;  %v1006_v30 = vld [vmem:[%s2540_s10 + $0x1a0] sm:$0xff] }
  0x37   : > { %1105 = vperm.xlu1 %2382, %v971_v35   ;;  %1100 = vperm.xlu0 %2381, %v970_v36   ;;  %v1013_v35 = vld [vmem:[%s2540_s10 + $0x1d8] sm:$0xff]  ;;  %v1012_v36 = vld [vmem:[%s2540_s10 + $0x1d0] sm:$0xff] }
  0x38   : > { %2264 = vmatmul.mubr.bf16.gmra.mxu0 %v2397_v31  ;;  %2296 = vmatmul.mubr.bf16.gmra.mxu1 %v2398_v32  ;;  %v1009_v31 = vld [vmem:[%s2540_s10 + $0x1b8] sm:$0xff]  ;;  %v1008_v32 = vld [vmem:[%s2540_s10 + $0x1b0] sm:$0xff] }
  0x39   : > { %2267 = vmatprep.mubr.bf16.mxu0 %v2399_v33  ;;  %2299 = vmatprep.mubr.bf16.mxu1 %v2400_v34  ;;  %v1011_v33 = vld [vmem:[%s2540_s10 + $0x1c8] sm:$0xff]  ;;  %v1010_v34 = vld [vmem:[%s2540_s10 + $0x1c0] sm:$0xff] }
  0x3b   : > { %1115 = vperm.xlu1 %2382, %v973_v37   ;;  %1110 = vperm.xlu0 %2381, %v972_v38   ;;  %v1015_v37 = vld [vmem:[%s2540_s10 + $0x1e8] sm:$0xff]  ;;  %v1014_v38 = vld [vmem:[%s2540_s10 + $0x1e0] sm:$0xff] }
  0x3f   : > { %1125 = vperm.xlu1 %2382, %v975_v43   ;;  %1120 = vperm.xlu0 %2381, %v974_v44  }
  0x40   : > { %2268 = vmatmul.mubr.bf16.gmra.mxu0 %v2401_v39  ;;  %2300 = vmatmul.mubr.bf16.gmra.mxu1 %v2402_v40  ;;  %v1017_v39 = vld [vmem:[%s2540_s10 + $0x1f8] sm:$0xff]  ;;  %v1016_v40 = vld [vmem:[%s2540_s10 + $0x1f0] sm:$0xff] }
  0x41   : > { %2271 = vmatprep.mubr.bf16.mxu0 %v2403_v41  ;;  %2303 = vmatprep.mubr.bf16.mxu1 %v2404_v42 }
  0x43   : > { %1135 = vperm.xlu1 %2382, %v977_v45   ;;  %1130 = vperm.xlu0 %2381, %v976_v46  }
  0x47   : > { %1145 = vperm.xlu1 %2382, %v979_v51   ;;  %1140 = vperm.xlu0 %2381, %v978_v52  }
  0x48   : > { %2272 = vmatmul.mubr.bf16.gmra.mxu0 %v2405_v47  ;;  %2304 = vmatmul.mubr.bf16.gmra.mxu1 %v2406_v48 }
  0x49   : > { %2275 = vmatprep.mubr.bf16.mxu0 %v2407_v49  ;;  %2307 = vmatprep.mubr.bf16.mxu1 %v2408_v50 }
  0x4b   : > { %1155 = vperm.xlu1 %2382, %v981_v53   ;;  %1150 = vperm.xlu0 %2381, %v980_v54  }
  0x4f   : > { %1165 = vperm.xlu1 %2382, %v983_v59   ;;  %1160 = vperm.xlu0 %2381, %v982_v60  }
  0x50   : > { %2276 = vmatmul.mubr.bf16.gmra.mxu0 %v2409_v55  ;;  %2308 = vmatmul.mubr.bf16.gmra.mxu1 %v2410_v56 }
  0x51   : > { %2279 = vmatprep.mubr.bf16.mxu0 %v2411_v57  ;;  %2311 = vmatprep.mubr.bf16.mxu1 %v2412_v58 }
  0x53   : > { %1175 = vperm.xlu1 %2382, %v985_v61   ;;  %1170 = vperm.xlu0 %2381, %v984_v62  }
  0x57   : > { %1185 = vperm.xlu1 %2382, %v987_v3   ;;  %1180 = vperm.xlu0 %2381, %v986_v4  }
  0x58   : > { %2280 = vmatmul.mubr.bf16.gmra.mxu0 %v2413_v63  ;;  %2312 = vmatmul.mubr.bf16.gmra.mxu1 %v2414_v0 }
  0x59   : > { %2283 = vmatprep.mubr.bf16.mxu0 %v2415_v1  ;;  %2315 = vmatprep.mubr.bf16.mxu1 %v2416_v2 }
  0x5b   : > { %1195 = vperm.xlu1 %2382, %v989_v5   ;;  %1190 = vperm.xlu0 %2381, %v988_v6  }
  0x5f   : > { %1205 = vperm.xlu1 %2382, %v991_v11   ;;  %1200 = vperm.xlu0 %2381, %v990_v12  }
  0x60   : > { %2284 = vmatmul.mubr.bf16.gmra.mxu0 %v2417_v7  ;;  %2316 = vmatmul.mubr.bf16.gmra.mxu1 %v2418_v8 }
  0x61   : > { %2287 = vmatprep.mubr.bf16.mxu0 %v2419_v9  ;;  %2319 = vmatprep.mubr.bf16.mxu1 %v2420_v10 }
  0x63   : > { %1215 = vperm.xlu1 %2382, %v993_v13   ;;  %1210 = vperm.xlu0 %2381, %v992_v14  }
  0x67   : > { %1225 = vperm.xlu1 %2382, %v995_v17   ;;  %1220 = vperm.xlu0 %2381, %v994_v18   ;;  %v2733_v17 = vld [vmem:[%s2939_s2] ss:$0 sm:$0xff] }
  0x68   : > { %2288 = vmatmul.mubr.bf16.gmra.mxu0 %v2421_v15  ;;  %2320 = vmatmul.mubr.bf16.gmra.mxu1 %v2422_v16 }
  0x6b   : > { %1235 = vperm.xlu1 %2382, %v997_v19   ;;  %1230 = vperm.xlu0 %2381, %v996_v20  }
  0x6f   : > { %1245 = vperm.xlu1 %2382, %v999_v21   ;;  %1240 = vperm.xlu0 %2381, %v998_v22  }
  0x73   : > { %1255 = vperm.xlu1 %2382, %v1001_v23   ;;  %1250 = vperm.xlu0 %2381, %v1000_v24  }
  0x77   : > { %1265 = vperm.xlu1 %2382, %v1003_v25   ;;  %1260 = vperm.xlu0 %2381, %v1002_v26  }
  0x7b   : > { %1275 = vperm.xlu1 %2382, %v1005_v27   ;;  %1270 = vperm.xlu0 %2381, %v1004_v28  }
  0x7f   : > { %1285 = vperm.xlu1 %2382, %v1007_v29   ;;  %1280 = vperm.xlu0 %2381, %v1006_v30  }
  0x83   : > { %1295 = vperm.xlu1 %2382, %v1009_v31   ;;  %1290 = vperm.xlu0 %2381, %v1008_v32  }
  0x87   : > { %1305 = vperm.xlu1 %2382, %v1011_v33   ;;  %1300 = vperm.xlu0 %2381, %v1010_v34  }
  0x8b   : > { %1315 = vperm.xlu1 %2382, %v1013_v35   ;;  %1310 = vperm.xlu0 %2381, %v1012_v36  }
  0x8f   : > { %1325 = vperm.xlu1 %2382, %v1015_v37   ;;  %1320 = vperm.xlu0 %2381, %v1014_v38  }
  0x92   : > { %v2658_v41 = vpop.permute.xlu1 %1030  ;;  %v2660_v42 = vpop.permute.xlu0 %1020 }
  0x93   : > { %1335 = vperm.xlu1 %2382, %v1017_v39   ;;  %1330 = vperm.xlu0 %2381, %v1016_v40  }
  0x96   : > { %v2662_v43 = vpop.permute.xlu1 %1035  ;;  %v2664_v44 = vpop.permute.xlu0 %1025 }
  0x9a   : > { %v2666_v45 = vpop.permute.xlu1 %1045  ;;  %v2668_v46 = vpop.permute.xlu0 %1040 }
  0x9e   : > { %v2670_v47 = vpop.permute.xlu1 %1055  ;;  %v2672_v48 = vpop.permute.xlu0 %1050 }
  0xa2   : > { %v2674_v49 = vpop.permute.xlu1 %1065  ;;  %v2676_v50 = vpop.permute.xlu0 %1060 }
  0xa6   : > { %v2678_v51 = vpop.permute.xlu1 %1075  ;;  %v2680_v52 = vpop.permute.xlu0 %1070 }
  0xaa   : > { %v2682_v53 = vpop.permute.xlu1 %1085  ;;  %v2684_v54 = vpop.permute.xlu0 %1080 }
  0xae   : > { %v2686_v55 = vpop.permute.xlu1 %1095  ;;  %v2688_v56 = vpop.permute.xlu0 %1090 }
  0xb2   : > { %v2690_v57 = vpop.permute.xlu1 %1105  ;;  %v2692_v58 = vpop.permute.xlu0 %1100 }
  0xb6   : > { %v2694_v59 = vpop.permute.xlu1 %1115  ;;  %v2696_v60 = vpop.permute.xlu0 %1110 }
  0xba   : > { %v2698_v61 = vpop.permute.xlu1 %1125  ;;  %v2700_v62 = vpop.permute.xlu0 %1120 }
  0xbe   : > { %v2702_v63 = vpop.permute.xlu1 %1135  ;;  %v2704_v0 = vpop.permute.xlu0 %1130 }
  0xc2   : > { %v2706_v1 = vpop.permute.xlu1 %1145  ;;  %v2708_v2 = vpop.permute.xlu0 %1140 }
  0xc3   : > { %2942 = vst [vmem:[#allocation2_spill] sm:$0xff] %v2706_v1 }
  0xc6   : > { %v2710_v3 = vpop.permute.xlu1 %1155  ;;  %v2712_v4 = vpop.permute.xlu0 %1150 }
  0xca   : > { %v2714_v5 = vpop.permute.xlu1 %1165  ;;  %v2716_v6 = vpop.permute.xlu0 %1160 }
  0xcb   : > { %2943 = vst [vmem:[#allocation3_spill] sm:$0xff] %v2714_v5  ;;  %2944 = vst [vmem:[#allocation4_spill] sm:$0xff] %v2716_v6 }
  0xce   : > { %v2718_v7 = vpop.permute.xlu1 %1175  ;;  %v2720_v8 = vpop.permute.xlu0 %1170 }
  0xcf   : > { %2945 = vst [vmem:[#allocation5_spill] sm:$0xff] %v2718_v7  ;;  %2946 = vst [vmem:[#allocation6_spill] sm:$0xff] %v2720_v8 }
  0xd2   : > { %v1186_v9 = vpop.permute.xlu1 %1185  ;;  %v1181_v10 = vpop.permute.xlu0 %1180 }
  0xd6   : > { %v1196_v11 = vpop.permute.xlu1 %1195  ;;  %v1191_v12 = vpop.permute.xlu0 %1190 }
  0xda   : > { %v2722_v13 = vpop.permute.xlu1 %1205  ;;  %v2724_v14 = vpop.permute.xlu0 %1200 }
  0xde   : > { %v2726_v15 = vpop.permute.xlu1 %1215  ;;  %v2728_v16 = vpop.permute.xlu0 %1210 }
  0xe2   : > { %v2735_v18 = vpop.permute.xlu1 %1225  ;;  %v2737_v19 = vpop.permute.xlu0 %1220 }
  0xe6   : > { %v2743_v30 = vpop.permute.xlu1 %1235  ;;  %v2745_v31 = vpop.permute.xlu0 %1230 }
  0xf0   : > { %v2261_v20 = vpop.f32.mrf.mxu0  ;;  %v2293_v21 = vpop.f32.mrf.mxu1 }
  0xf1   : > { %v644_v22 = vadd.f32 %v2261_v20, %v2733_v17  ;;  %v772_v23 = vadd.f32 %v2293_v21, %v2733_v17 }
  0xf2   : > { %v635_v24 = vpop.f32.mrf.mxu0  ;;  %v763_v25 = vpop.f32.mrf.mxu1 }
  0xf3   : > { %v636_v26 = vadd.f32 %v2733_v17, %v635_v24  ;;  %v764_v27 = vadd.f32 %v2733_v17, %v763_v25  ;;  %v892_v32 = vmax.f32 %v644_v22, 0.0  ;;  %v924_v33 = vmax.f32 %v772_v23, 0.0 }
  0xf4   : > { %v2262_v28 = vpop.f32.mrf.mxu0  ;;  %v2294_v29 = vpop.f32.mrf.mxu1 }
  0xf5   : > { %v647_v34 = vadd.f32 %v2262_v28, %v2733_v17  ;;  %v775_v35 = vadd.f32 %v2294_v29, %v2733_v17  ;;  %v890_v38 = vmax.f32 %v636_v26, 0.0  ;;  %v922_v39 = vmax.f32 %v764_v27, 0.0 }
  0xf6   : > { %v638_v36 = vpop.f32.mrf.mxu0  ;;  %v766_v37 = vpop.f32.mrf.mxu1  ;;  %v1340_v22 = vmul.f32 %v2658_v41, %v892_v32  ;;  %v1372_v23 = vmul.f32 %v1191_v12, %v924_v33 }
  0xf7   : > { %v639_v40 = vadd.f32 %v2733_v17, %v638_v36  ;;  %v767_v20 = vadd.f32 %v2733_v17, %v766_v37  ;;  %v893_v21 = vmax.f32 %v647_v34, 0.0  ;;  %v925_v24 = vmax.f32 %v775_v35, 0.0  ;;  %v2755_v37 = vpop.permute.xlu1 %1245  ;;  %v2757_v34 = vpop.permute.xlu0 %1240 }
  0xf8   : > { %v2265_v25 = vpop.f32.mrf.mxu0  ;;  %v2297_v5 = vpop.f32.mrf.mxu1  ;;  %v1338_v35 = vmul.f32 %v2660_v42, %v890_v38  ;;  %v1370_v1 = vmul.f32 %v1181_v10, %v922_v39 }
  0xf9   : > { %v891_v6 = vmax.f32 %v639_v40, 0.0  ;;  %v923_v28 = vmax.f32 %v767_v20, 0.0  ;;  %v1341_v29 = vmul.f32 %v2662_v43, %v893_v21  ;;  %v1373_v7 = vmul.f32 %v1196_v11, %v925_v24 }
  0xfa   : > { %v660_v26 = vadd.f32 %v2265_v25, %v2733_v17  ;;  %v788_v27 = vadd.f32 %v2297_v5, %v2733_v17  ;;  %v651_v36 = vpop.f32.mrf.mxu0  ;;  %v779_v8 = vpop.f32.mrf.mxu1 }
  0xfb   : > { %v1339_v41 = vmul.f32 %v2664_v44, %v891_v6  ;;  %v1371_v43 = vmul.f32 %v1186_v9, %v923_v28  ;;  %v2020_v5 = vpack.c.bf16 %v1341_v29, %v1340_v22  ;;  %v2100_v11 = vpack.c.bf16 %v1373_v7, %v1372_v23  ;;  %v2778_v28 = vpop.permute.xlu1 %1255  ;;  %v2780_v29 = vpop.permute.xlu0 %1250 }
  0xfc   : > { %v652_v12 = vadd.f32 %v2733_v17, %v651_v36  ;;  %v780_v42 = vadd.f32 %v2733_v17, %v779_v8  ;;  %v2266_v10 = vpop.f32.mrf.mxu0  ;;  %v2298_v32 = vpop.f32.mrf.mxu1  ;;  %v896_v39 = vmax.f32 %v660_v26, 0.0  ;;  %v928_v40 = vmax.f32 %v788_v27, 0.0 }
  0xfd   : > { %v2015_v33 = vpack.c.bf16 %v1339_v41, %v1338_v35  ;;  %v2095_v38 = vpack.c.bf16 %v1371_v43, %v1370_v1  ;;  %2172 = vst [vmem:[%s2765_s7 + $0x8] sm:$0xff] %v2020_v5   ;;  %2188 = vst [vmem:[%s2765_s7 + $0x88] sm:$0xff] %v2100_v11   ;;  %v663_v20 = vadd.f32 %v2266_v10, %v2733_v17 }
  0xfe   : > { %v791_v44 = vadd.f32 %v2298_v32, %v2733_v17  ;;  %v654_v6 = vpop.f32.mrf.mxu0  ;;  %v782_v9 = vpop.f32.mrf.mxu1  ;;  %v894_v7 = vmax.f32 %v652_v12, 0.0  ;;  %v926_v21 = vmax.f32 %v780_v42, 0.0  ;;  %v1344_v41 = vmul.f32 %v2672_v48, %v896_v39 }
  0xff   : > { %2016 = vst [vmem:[%s2765_s7] sm:$0xff] %v2015_v33   ;;  %2187 = vst [vmem:[%s2765_s7 + $0x80] sm:$0xff] %v2095_v38   ;;  %v655_v8 = vadd.f32 %v2733_v17, %v654_v6  ;;  %v783_v24 = vadd.f32 %v2733_v17, %v782_v9  ;;  %v897_v25 = vmax.f32 %v663_v20, 0.0  ;;  %v1376_v43 = vmul.f32 %v2728_v16, %v928_v40 }
 0x100   : > { %v929_v1 = vmax.f32 %v791_v44, 0.0  ;;  %v2269_v22 = vpop.f32.mrf.mxu0  ;;  %v2301_v23 = vpop.f32.mrf.mxu1  ;;  %v1342_v10 = vmul.f32 %v2668_v46, %v894_v7  ;;  %v1374_v32 = vmul.f32 %v2724_v14, %v926_v21 }
 0x101   : > { %v895_v26 = vmax.f32 %v655_v8, 0.0  ;;  %v927_v27 = vmax.f32 %v783_v24, 0.0  ;;  %v676_v36 = vadd.f32 %v2269_v22, %v2733_v17  ;;  %v804_v35 = vadd.f32 %v2301_v23, %v2733_v17  ;;  %v2798_v7 = vpop.permute.xlu1 %1265  ;;  %v2800_v21 = vpop.permute.xlu0 %1260 }
 0x102   : > { %v1345_v5 = vmul.f32 %v2670_v47, %v897_v25  ;;  %v1377_v11 = vmul.f32 %v2726_v15, %v929_v1  ;;  %v667_v12 = vpop.f32.mrf.mxu0  ;;  %v795_v42 = vpop.f32.mrf.mxu1 }
 0x103   : > { %v1343_v33 = vmul.f32 %v2666_v45, %v895_v26  ;;  %v1375_v38 = vmul.f32 %v2722_v13, %v927_v27  ;;  %v668_v16 = vadd.f32 %v2733_v17, %v667_v12  ;;  %v796_v47 = vadd.f32 %v2733_v17, %v795_v42 }
 0x104   : > { %v2030_v20 = vpack.c.bf16 %v1345_v5, %v1344_v41  ;;  %v2110_v48 = vpack.c.bf16 %v1377_v11, %v1376_v43  ;;  %v2270_v15 = vpop.f32.mrf.mxu0  ;;  %v2302_v39 = vpop.f32.mrf.mxu1  ;;  %v900_v6 = vmax.f32 %v676_v36, 0.0  ;;  %v932_v46 = vmax.f32 %v804_v35, 0.0 }
 0x105   : > { %v2025_v40 = vpack.c.bf16 %v1343_v33, %v1342_v10  ;;  %v2105_v44 = vpack.c.bf16 %v1375_v38, %v1374_v32  ;;  %v679_v45 = vadd.f32 %v2270_v15, %v2733_v17  ;;  %v807_v13 = vadd.f32 %v2302_v39, %v2733_v17  ;;  %v2818_v15 = vpop.permute.xlu1 %1275  ;;  %v2820_v39 = vpop.permute.xlu0 %1270 }
 0x106   : > { %2174 = vst [vmem:[%s2765_s7 + $0x18] sm:$0xff] %v2030_v20   ;;  %2190 = vst [vmem:[%s2765_s7 + $0x98] sm:$0xff] %v2110_v48   ;;  %v670_v14 = vpop.f32.mrf.mxu0  ;;  %v798_v9 = vpop.f32.mrf.mxu1  ;;  %v898_v8 = vmax.f32 %v668_v16, 0.0  ;;  %v930_v24 = vmax.f32 %v796_v47, 0.0  ;;  %v1348_v36 = vmul.f32 %v2680_v52, %v900_v6  ;;  %v1380_v35 = vmul.f32 %v2745_v31, %v932_v46 }
 0x107   : > { %2173 = vst [vmem:[%s2765_s7 + $0x10] sm:$0xff] %v2025_v40   ;;  %2189 = vst [vmem:[%s2765_s7 + $0x90] sm:$0xff] %v2105_v44   ;;  %v671_v25 = vadd.f32 %v2733_v17, %v670_v14  ;;  %v799_v1 = vadd.f32 %v2733_v17, %v798_v9  ;;  %v901_v22 = vmax.f32 %v679_v45, 0.0  ;;  %v933_v23 = vmax.f32 %v807_v13, 0.0 }
 0x108   : > { %v2273_v26 = vpop.f32.mrf.mxu0  ;;  %v2305_v27 = vpop.f32.mrf.mxu1  ;;  %v1346_v33 = vmul.f32 %v2676_v50, %v898_v8  ;;  %v1378_v52 = vmul.f32 %v2737_v19, %v930_v24 }
 0x109   : > { %v899_v41 = vmax.f32 %v671_v25, 0.0  ;;  %v931_v43 = vmax.f32 %v799_v1, 0.0  ;;  %v1349_v5 = vmul.f32 %v2678_v51, %v901_v22  ;;  %v1381_v11 = vmul.f32 %v2743_v30, %v933_v23 }
 0x10a   : > { %v692_v12 = vadd.f32 %v2273_v26, %v2733_v17  ;;  %v820_v42 = vadd.f32 %v2305_v27, %v2733_v17  ;;  %v683_v10 = vpop.f32.mrf.mxu0  ;;  %v811_v32 = vpop.f32.mrf.mxu1 }
 0x10b   : > { %v1347_v31 = vmul.f32 %v2674_v49, %v899_v41  ;;  %v1379_v38 = vmul.f32 %v2735_v18, %v931_v43  ;;  %v2040_v20 = vpack.c.bf16 %v1349_v5, %v1348_v36  ;;  %v2120_v51 = vpack.c.bf16 %v1381_v11, %v1380_v35 }
 0x10c   : > { %v684_v30 = vadd.f32 %v2733_v17, %v683_v10  ;;  %v812_v48 = vadd.f32 %v2733_v17, %v811_v32  ;;  %v2274_v16 = vpop.f32.mrf.mxu0  ;;  %v2306_v47 = vpop.f32.mrf.mxu1  ;;  %v904_v49 = vmax.f32 %v692_v12, 0.0  ;;  %v936_v18 = vmax.f32 %v820_v42, 0.0 }
 0x10d   : > { %v2035_v50 = vpack.c.bf16 %v1347_v31, %v1346_v33  ;;  %v2115_v19 = vpack.c.bf16 %v1379_v38, %v1378_v52  ;;  %2176 = vst [vmem:[%s2765_s7 + $0x28] sm:$0xff] %v2040_v20   ;;  %2192 = vst [vmem:[%s2765_s7 + $0xa8] sm:$0xff] %v2120_v51   ;;  %v695_v40 = vadd.f32 %v2274_v16, %v2733_v17  ;;  %v2836_v12 = vpop.permute.xlu1 %1285  ;;  %v2838_v42 = vpop.permute.xlu0 %1280 }
 0x10e   : > { %v823_v44 = vadd.f32 %v2306_v47, %v2733_v17  ;;  %v686_v6 = vpop.f32.mrf.mxu0  ;;  %v814_v46 = vpop.f32.mrf.mxu1  ;;  %v902_v45 = vmax.f32 %v684_v30, 0.0  ;;  %v934_v13 = vmax.f32 %v812_v48, 0.0  ;;  %v1352_v36 = vmul.f32 %v2688_v56, %v904_v49 }
 0x10f   : > { %2175 = vst [vmem:[%s2765_s7 + $0x20] sm:$0xff] %v2035_v50   ;;  %2191 = vst [vmem:[%s2765_s7 + $0xa0] sm:$0xff] %v2115_v19   ;;  %v687_v14 = vadd.f32 %v2733_v17, %v686_v6  ;;  %v815_v9 = vadd.f32 %v2733_v17, %v814_v46  ;;  %v905_v8 = vmax.f32 %v695_v40, 0.0  ;;  %v1384_v35 = vmul.f32 %v2780_v29, %v936_v18 }
 0x110   : > { %v937_v24 = vmax.f32 %v823_v44, 0.0  ;;  %v2277_v25 = vpop.f32.mrf.mxu0  ;;  %v2309_v1 = vpop.f32.mrf.mxu1  ;;  %v1350_v10 = vmul.f32 %v2684_v54, %v902_v45  ;;  %v1382_v32 = vmul.f32 %v2757_v34, %v934_v13 }
 0x111   : > { %v903_v22 = vmax.f32 %v687_v14, 0.0  ;;  %v935_v23 = vmax.f32 %v815_v9, 0.0  ;;  %v708_v26 = vadd.f32 %v2277_v25, %v2733_v17  ;;  %v836_v27 = vadd.f32 %v2309_v1, %v2733_v17  ;;  %v1296_v6 = vpop.permute.xlu1 %1295  ;;  %v1291_v46 = vpop.permute.xlu0 %1290 }
 0x112   : > { %v1353_v41 = vmul.f32 %v2686_v55, %v905_v8  ;;  %v1385_v43 = vmul.f32 %v2778_v28, %v937_v24  ;;  %v699_v5 = vpop.f32.mrf.mxu0  ;;  %v827_v11 = vpop.f32.mrf.mxu1 }
 0x113   : > { %v1351_v56 = vmul.f32 %v2682_v53, %v903_v22  ;;  %v1383_v29 = vmul.f32 %v2755_v37, %v935_v23  ;;  %v700_v28 = vadd.f32 %v2733_v17, %v699_v5  ;;  %v828_v52 = vadd.f32 %v2733_v17, %v827_v11 }
 0x114   : > { %v2050_v33 = vpack.c.bf16 %v1353_v41, %v1352_v36  ;;  %v2130_v55 = vpack.c.bf16 %v1385_v43, %v1384_v35  ;;  %v2278_v31 = vpop.f32.mrf.mxu0  ;;  %v2310_v38 = vpop.f32.mrf.mxu1  ;;  %v908_v30 = vmax.f32 %v708_v26, 0.0  ;;  %v940_v54 = vmax.f32 %v836_v27, 0.0 }
 0x115   : > { %v2045_v20 = vpack.c.bf16 %v1351_v56, %v1350_v10  ;;  %v2125_v51 = vpack.c.bf16 %v1383_v29, %v1382_v32  ;;  %v711_v53 = vadd.f32 %v2278_v31, %v2733_v17  ;;  %v839_v37 = vadd.f32 %v2310_v38, %v2733_v17  ;;  %v2870_v56 = vpop.permute.xlu1 %1305  ;;  %v2872_v29 = vpop.permute.xlu0 %1300 }
 0x116   : > { %2178 = vst [vmem:[%s2765_s7 + $0x38] sm:$0xff] %v2050_v33   ;;  %2194 = vst [vmem:[%s2765_s7 + $0xb8] sm:$0xff] %v2130_v55   ;;  %v702_v34 = vpop.f32.mrf.mxu0  ;;  %v830_v48 = vpop.f32.mrf.mxu1  ;;  %v906_v16 = vmax.f32 %v700_v28, 0.0  ;;  %v938_v47 = vmax.f32 %v828_v52, 0.0  ;;  %v1356_v45 = vmul.f32 %v2696_v60, %v908_v30  ;;  %v1388_v13 = vmul.f32 %v2820_v39, %v940_v54 }
 0x117   : > { %2177 = vst [vmem:[%s2765_s7 + $0x30] sm:$0xff] %v2045_v20   ;;  %2193 = vst [vmem:[%s2765_s7 + $0xb0] sm:$0xff] %v2125_v51   ;;  %v703_v50 = vadd.f32 %v2733_v17, %v702_v34  ;;  %v831_v19 = vadd.f32 %v2733_v17, %v830_v48  ;;  %v909_v49 = vmax.f32 %v711_v53, 0.0  ;;  %v941_v18 = vmax.f32 %v839_v37, 0.0 }
 0x118   : > { %v2281_v40 = vpop.f32.mrf.mxu0  ;;  %v2313_v44 = vpop.f32.mrf.mxu1  ;;  %v1354_v26 = vmul.f32 %v2692_v58, %v906_v16  ;;  %v1386_v60 = vmul.f32 %v2800_v21, %v938_v47 }
 0x119   : > { %v907_v14 = vmax.f32 %v703_v50, 0.0  ;;  %v939_v9 = vmax.f32 %v831_v19, 0.0  ;;  %v1357_v8 = vmul.f32 %v2694_v59, %v909_v49  ;;  %v1389_v24 = vmul.f32 %v2818_v15, %v941_v18 }
 0x11a   : > { %v724_v25 = vadd.f32 %v2281_v40, %v2733_v17  ;;  %v852_v1 = vadd.f32 %v2313_v44, %v2733_v17  ;;  %v715_v22 = vpop.f32.mrf.mxu0  ;;  %v843_v23 = vpop.f32.mrf.mxu1 }
 0x11b   : > { %v1355_v39 = vmul.f32 %v2690_v57, %v907_v14  ;;  %v1387_v27 = vmul.f32 %v2798_v7, %v939_v9  ;;  %v2060_v36 = vpack.c.bf16 %v1357_v8, %v1356_v45  ;;  %v2140_v59 = vpack.c.bf16 %v1389_v24, %v1388_v13  ;;  %v1316_v14 = vpop.permute.xlu1 %1315 }
 0x11c   : > { %v716_v15 = vadd.f32 %v2733_v17, %v715_v22  ;;  %v844_v35 = vadd.f32 %v2733_v17, %v843_v23  ;;  %v2282_v41 = vpop.f32.mrf.mxu0  ;;  %v2314_v43 = vpop.f32.mrf.mxu1  ;;  %v912_v58 = vmax.f32 %v724_v25, 0.0  ;;  %v944_v21 = vmax.f32 %v852_v1, 0.0 }
 0x11d   : > { %v2055_v5 = vpack.c.bf16 %v1355_v39, %v1354_v26  ;;  %v2135_v11 = vpack.c.bf16 %v1387_v27, %v1386_v60  ;;  %2180 = vst [vmem:[%s2765_s7 + $0x48] sm:$0xff] %v2060_v36   ;;  %2196 = vst [vmem:[%s2765_s7 + $0xc8] sm:$0xff] %v2140_v59   ;;  %v727_v57 = vadd.f32 %v2282_v41, %v2733_v17 }
 0x11e   : > { %v855_v7 = vadd.f32 %v2314_v43, %v2733_v17  ;;  %v718_v10 = vpop.f32.mrf.mxu0  ;;  %v846_v32 = vpop.f32.mrf.mxu1  ;;  %v910_v33 = vmax.f32 %v716_v15, 0.0  ;;  %v942_v55 = vmax.f32 %v844_v35, 0.0  ;;  %v1360_v34 = vmul.f32 %v2704_v0, %v912_v58 }
 0x11f   : > { %2179 = vst [vmem:[%s2765_s7 + $0x40] sm:$0xff] %v2055_v5   ;;  %2195 = vst [vmem:[%s2765_s7 + $0xc0] sm:$0xff] %v2135_v11   ;;  %v719_v28 = vadd.f32 %v2733_v17, %v718_v10  ;;  %v847_v52 = vadd.f32 %v2733_v17, %v846_v32  ;;  %v913_v31 = vmax.f32 %v727_v57, 0.0  ;;  %v1392_v48 = vmul.f32 %v1291_v46, %v944_v21  ;;  %v1326_v10 = vpop.permute.xlu1 %1325 }
 0x120   : > { %v945_v38 = vmax.f32 %v855_v7, 0.0  ;;  %v2285_v20 = vpop.f32.mrf.mxu0  ;;  %v2317_v51 = vpop.f32.mrf.mxu1  ;;  %v1358_v49 = vmul.f32 %v2700_v62, %v910_v33  ;;  %v1390_v18 = vmul.f32 %v2838_v42, %v942_v55  ;;  %v2947_v55 = vld [vmem:[#allocation2_spill] sm:$0xff] }
 0x121   : > { %v911_v30 = vmax.f32 %v719_v28, 0.0  ;;  %v943_v54 = vmax.f32 %v847_v52, 0.0  ;;  %v740_v53 = vadd.f32 %v2285_v20, %v2733_v17  ;;  %v868_v37 = vadd.f32 %v2317_v51, %v2733_v17  ;;  %v1311_v62 = vpop.permute.xlu0 %1310 }
 0x122   : > { %v1361_v16 = vmul.f32 %v2702_v63, %v913_v31  ;;  %v1393_v47 = vmul.f32 %v1296_v6, %v945_v38  ;;  %v731_v50 = vpop.f32.mrf.mxu0  ;;  %v859_v19 = vpop.f32.mrf.mxu1 }
 0x123   : > { %v1359_v40 = vmul.f32 %v2698_v61, %v911_v30  ;;  %v1391_v44 = vmul.f32 %v2836_v12, %v943_v54  ;;  %v732_v0 = vadd.f32 %v2733_v17, %v731_v50  ;;  %v860_v63 = vadd.f32 %v2733_v17, %v859_v19 }
 0x124   : > { %v2070_v45 = vpack.c.bf16 %v1361_v16, %v1360_v34  ;;  %v2150_v13 = vpack.c.bf16 %v1393_v47, %v1392_v48  ;;  %v2286_v6 = vpop.f32.mrf.mxu0  ;;  %v2318_v46 = vpop.f32.mrf.mxu1  ;;  %v916_v42 = vmax.f32 %v740_v53, 0.0  ;;  %v948_v24 = vmax.f32 %v868_v37, 0.0 }
 0x125   : > { %v2065_v9 = vpack.c.bf16 %v1359_v40, %v1358_v49  ;;  %v2145_v8 = vpack.c.bf16 %v1391_v44, %v1390_v18  ;;  %v743_v61 = vadd.f32 %v2286_v6, %v2733_v17  ;;  %v871_v12 = vadd.f32 %v2318_v46, %v2733_v17  ;;  %v1321_v32 = vpop.permute.xlu0 %1320  ;;  %v1336_v40 = vpop.permute.xlu1 %1335  ;;  %v2949_v46 = vld [vmem:[#allocation5_spill] sm:$0xff] }
 0x126   : > { %2182 = vst [vmem:[%s2765_s7 + $0x58] sm:$0xff] %v2070_v45   ;;  %2198 = vst [vmem:[%s2765_s7 + $0xd8] sm:$0xff] %v2150_v13   ;;  %v734_v25 = vpop.f32.mrf.mxu0  ;;  %v862_v1 = vpop.f32.mrf.mxu1  ;;  %v914_v22 = vmax.f32 %v732_v0, 0.0  ;;  %v946_v23 = vmax.f32 %v860_v63, 0.0  ;;  %v1364_v15 = vmul.f32 %v2712_v4, %v916_v42  ;;  %v1396_v35 = vmul.f32 %v1311_v62, %v948_v24  ;;  %v2948_v0 = vld [vmem:[#allocation6_spill] sm:$0xff] }
 0x127   : > { %2181 = vst [vmem:[%s2765_s7 + $0x50] sm:$0xff] %v2065_v9   ;;  %2197 = vst [vmem:[%s2765_s7 + $0xd0] sm:$0xff] %v2145_v8   ;;  %v735_v26 = vadd.f32 %v2733_v17, %v734_v25  ;;  %v863_v60 = vadd.f32 %v2733_v17, %v862_v1  ;;  %v917_v39 = vmax.f32 %v743_v61, 0.0  ;;  %v949_v27 = vmax.f32 %v871_v12, 0.0  ;;  %v2950_v9 = vld [vmem:[#allocation4_spill] sm:$0xff] }
 0x128   : > { %v2289_v36 = vpop.f32.mrf.mxu0  ;;  %v2321_v59 = vpop.f32.mrf.mxu1  ;;  %v1362_v33 = vmul.f32 %v2708_v2, %v914_v22  ;;  %v1394_v4 = vmul.f32 %v2872_v29, %v946_v23 }
 0x129   : > { %v915_v41 = vmax.f32 %v735_v26, 0.0  ;;  %v947_v43 = vmax.f32 %v863_v60, 0.0  ;;  %v1365_v5 = vmul.f32 %v2710_v3, %v917_v39  ;;  %v1397_v11 = vmul.f32 %v1316_v14, %v949_v27  ;;  %v1331_v44 = vpop.permute.xlu0 %1330 }
 0x12a   : > { %v756_v58 = vadd.f32 %v2289_v36, %v2733_v17  ;;  %v884_v21 = vadd.f32 %v2321_v59, %v2733_v17  ;;  %v747_v57 = vpop.f32.mrf.mxu0  ;;  %v875_v7 = vpop.f32.mrf.mxu1 }
 0x12b   : > { %v1363_v28 = vmul.f32 %v2947_v55, %v915_v41  ;;  %v1395_v52 = vmul.f32 %v2870_v56, %v947_v43  ;;  %v2080_v3 = vpack.c.bf16 %v1365_v5, %v1364_v15  ;;  %v2160_v31 = vpack.c.bf16 %v1397_v11, %v1396_v35 }
 0x12c   : > { %v748_v38 = vadd.f32 %v2733_v17, %v747_v57  ;;  %v876_v20 = vadd.f32 %v2733_v17, %v875_v7  ;;  %v2290_v51 = vpop.f32.mrf.mxu0  ;;  %v2322_v30 = vpop.f32.mrf.mxu1  ;;  %v920_v2 = vmax.f32 %v756_v58, 0.0  ;;  %v952_v29 = vmax.f32 %v884_v21, 0.0 }
 0x12d   : > { %v2075_v54 = vpack.c.bf16 %v1363_v28, %v1362_v33  ;;  %v2155_v53 = vpack.c.bf16 %v1395_v52, %v1394_v4  ;;  %2184 = vst [vmem:[%s2765_s7 + $0x68] sm:$0xff] %v2080_v3   ;;  %2200 = vst [vmem:[%s2765_s7 + $0xe8] sm:$0xff] %v2160_v31   ;;  %v759_v37 = vadd.f32 %v2290_v51, %v2733_v17 }
 0x12e   : > { %v887_v56 = vadd.f32 %v2322_v30, %v2733_v17  ;;  %v750_v34 = vpop.f32.mrf.mxu0  ;;  %v878_v48 = vpop.f32.mrf.mxu1  ;;  %v918_v16 = vmax.f32 %v748_v38, 0.0  ;;  %v950_v47 = vmax.f32 %v876_v20, 0.0  ;;  %v1368_v63 = vmul.f32 %v2948_v0, %v920_v2 }
 0x12f   : > { %2183 = vst [vmem:[%s2765_s7 + $0x60] sm:$0xff] %v2075_v54   ;;  %2199 = vst [vmem:[%s2765_s7 + $0xe0] sm:$0xff] %v2155_v53   ;;  %v751_v50 = vadd.f32 %v2733_v17, %v750_v34  ;;  %v879_v19 = vadd.f32 %v2733_v17, %v878_v48  ;;  %v921_v49 = vmax.f32 %v759_v37, 0.0  ;;  %v1400_v6 = vmul.f32 %v1331_v44, %v952_v29  ;;  %v2951_v17 = vld [vmem:[#allocation3_spill] sm:$0xff] }
 0x130   : > { %v953_v18 = vmax.f32 %v887_v56, 0.0  ;;  %v1366_v8 = vmul.f32 %v2950_v9, %v918_v16  ;;  %v1398_v42 = vmul.f32 %v1321_v32, %v950_v47 }
 0x131   : > { %v919_v45 = vmax.f32 %v751_v50, 0.0  ;;  %v951_v13 = vmax.f32 %v879_v19, 0.0  ;;  %v1369_v14 = vmul.f32 %v2949_v46, %v921_v49 }
 0x132   : > { %v1401_v62 = vmul.f32 %v1336_v40, %v953_v18 }
 0x133   : > { %v1367_v24 = vmul.f32 %v2951_v17, %v919_v45  ;;  %v1399_v61 = vmul.f32 %v1326_v10, %v951_v13  ;;  %v2090_v12 = vpack.c.bf16 %v1369_v14, %v1368_v63 }
 0x134   : > { %v2170_v25 = vpack.c.bf16 %v1401_v62, %v1400_v6 }
 0x135   : > { %v2085_v1 = vpack.c.bf16 %v1367_v24, %v1366_v8  ;;  %v2165_v22 = vpack.c.bf16 %v1399_v61, %v1398_v42  ;;  %2186 = vst [vmem:[%s2765_s7 + $0x78] sm:$0xff] %v2090_v12  }
 0x136   : > { %2202 = vst [vmem:[%s2765_s7 + $0xf8] sm:$0xff] %v2170_v25  }
 0x137   : > { %2185 = vst [vmem:[%s2765_s7 + $0x70] sm:$0xff] %v2085_v1   ;;  %2201 = vst [vmem:[%s2765_s7 + $0xf0] sm:$0xff] %v2165_v22  }
 0x138 PF: > { %s14_s19 = sadd.s32 1, %s2461_s19   ;;  %s2952_s15 = smov %s2453_s17 }
 0x139   : > { %p11_p7 = scmp.ge.s32.totalorder %s14_s19, 20   ;;  %s2953_s16 = smov %s2457_s18 }
 0x13a   : > { %s2954_s17 = smov %s2957_s20  ;;  %s2955_s18 = smov %s2961_s21 }
 0x13b   :  { %13 = sbr.rel (!%p11_p7) target bundleno = 3 (0x3), region = 69 }

// kernel: voxelnet_encoder_forward.13
= control target key start
LH: loop header
LB: loop body
LE: loop exit
PB: predicated region body
PF: predicated region fallthrough
CT: control target
= control target key end

     0   :  { %s7050_s15 = smov 0   ;;  %s8335_s0 = inlined_call_operand.vmem [shape: bf16[2,19,288,128], index: 0, kind: input, shape index: {}]   ;;  %s8336_s1 = inlined_call_operand.vmem [shape: bf16[9,128,128], index: 1, kind: input, shape index: {}]   ;;  %s8337_s2 = inlined_call_operand.vmem [shape: f32[1,128], index: 2, kind: input, shape index: {}]   ;;  %s8338_s3 = inlined_call_operand.vmem [shape: f32[2,17,256,1], index: 3, kind: input, shape index: {}]   ;;  %s8339_s4 = inlined_call_operand.vmem [shape: bf16[2,17,256,128], index: 4, kind: output, shape index: {}]  }
   0x1 LB: > { %s4950_s16 = sadd.s32 4294967295, %s7018_s15   ;;  %p4954_p0 = scmp.ge.s32.totalorder %s7018_s15, 1  ;;  %s7018_s15 = sphi %s7050_s15, %s14_s15  }
   0x2   : > { %p172_p1 = scmp.lt.s32.totalorder %s7018_s15, 3 }
   0x4   : > { %p173_p2 = pnand %p4954_p0, %p172_p1 }
   0x5   : > { %p203_p3 = scmp.lt.s32.totalorder (!%p173_p2), %s4950_s16, 1  ;;  %s7078_s5 = smov (!%p173_p2), 0  }
   0x6   : > { %176 = sbr.rel (%p173_p2) target bundleno = 542 (0x21e), region = 36 }
   0xb   : > { %v7061_v0 = vld [vmem:[%s8337_s2] ss:$0 sm:$0xff]  ;;  %s8425_s16 = smov (!%p203_p3, %s4950_s16), 1 }
   0xc   : > { %s6712_s19 = smul.u32 2736, %s8425_s16 }
   0xd   : > { %s6713_s20 = smul.u32 4352, %s8425_s16 }
   0xe   : > { %s7066_s23 = scalar_lea.vmem %s8335_s0, %s6712_s19  ;;  %s6714_s24 = smul.u32 2176, %s8425_s16 }
   0xf   : > { %s7071_s27 = scalar_lea.vmem %s8338_s3, %s6713_s20 }
  0x10   : > { %s7076_s30 = scalar_lea.vmem %s8339_s4, %s6714_s24 }
  0x11 LB: >> { %v6734_v1 = vld [vmem:[%s8336_s1 + $0x78] sm:$0xff]   ;;  %v6736_v3 = vld [vmem:[%s8336_s1 + $0x70] sm:$0xff]   ;;  %v6738_v5 = vld [vmem:[%s8336_s1 + $0x68] sm:$0xff]   ;;  %s5719_s24 = smul.u32 144, %s7022_s5  ;;  %s5321_s11 = sshll.u32 %s7022_s5, 8  ;;  %s7022_s5 = sphi %s7078_s5, %s225_s5  }
  0x12   : >> { %v6735_v2 = vld [vmem:[%s8336_s1 + $0x38] sm:$0xff]   ;;  %6136 = vmatprep.subr.bf16.mxu0 %v6734_v1  ;;  %v6737_v4 = vld [vmem:[%s8336_s1 + $0x30] sm:$0xff]   ;;  %v6739_v6 = vld [vmem:[%s8336_s1 + $0x28] sm:$0xff]   ;;  %s7499_s14 = scalar_lea.vmem %s7071_s27, %s5321_s11 }
  0x13   : >> { %6168 = vmatprep.subr.bf16.mxu1 %v6735_v2  ;;  %6137 = vmatpush3.bf16.msra.mxu0 %v6734_v1  ;;  %v6740_v7 = vld [vmem:[%s8336_s1 + $0x60] sm:$0xff]   ;;  %v6742_v9 = vld [vmem:[%s8336_s1 + $0x58] sm:$0xff]   ;;  %s7115_s6 = scalar_lea.vmem %s7066_s23, %s5719_s24  ;;  %v6744_v11 = vld [vmem:[%s8336_s1 + $0x50] sm:$0xff]  }
  0x14   : >> { %6169 = vmatpush3.bf16.msra.mxu1 %v6735_v2  ;;  %6138 = vmatprep.subr.bf16.mxu0 %v6736_v3  ;;  %v6741_v8 = vld [vmem:[%s8336_s1 + $0x20] sm:$0xff]   ;;  %v6743_v10 = vld [vmem:[%s8336_s1 + $0x18] sm:$0xff]   ;;  %v6745_v12 = vld [vmem:[%s8336_s1 + $0x10] sm:$0xff]  }
  0x15   : >> { %6170 = vmatprep.subr.bf16.mxu1 %v6737_v4  ;;  %v6750_v13 = vld [vmem:[%s7115_s6 + $0x8] sm:$0xff]   ;;  %v6751_v14 = vld [vmem:[%s7115_s6] sm:$0xff]   ;;  %v6753_v19 = vld [vmem:[%s8336_s1 + $0xb8] sm:$0xff]  }
  0x16   : >> { %6152 = vmatprep.mubr.bf16.mxu0 %v6750_v13  ;;  %6184 = vmatprep.mubr.bf16.mxu1 %v6751_v14  ;;  %v6746_v15 = vld [vmem:[%s8336_s1 + $0x48] sm:$0xff]   ;;  %v6748_v17 = vld [vmem:[%s8336_s1 + $0x40] sm:$0xff]   ;;  %v6754_v20 = vld [vmem:[%s8336_s1 + $0xf8] sm:$0xff]  }
  0x17   : >> { %6139 = vmatpush3.bf16.msra.mxu0 %v6736_v3  ;;  %v6747_v16 = vld [vmem:[%s8336_s1 + $0x8] sm:$0xff]   ;;  %v6749_v18 = vld [vmem:[%s8336_s1] sm:$0xff]   ;;  %v6752_v21 = vld [vmem:[%s7115_s6 + $0x10] sm:$0xff]  }
  0x18   : >> { %6171 = vmatpush3.bf16.msra.mxu1 %v6737_v4  ;;  %6140 = vmatprep.subr.bf16.mxu0 %v6738_v5  ;;  %v6755_v22 = vld [vmem:[%s8336_s1 + $0xb0] sm:$0xff]   ;;  %v6757_v24 = vld [vmem:[%s7115_s6 + $0x18] sm:$0xff]   ;;  %v6759_v25 = vld [vmem:[%s8336_s1 + $0xa8] sm:$0xff]  }
  0x19   : >> { %6172 = vmatprep.subr.bf16.mxu1 %v6739_v6  ;;  %v6756_v23 = vld [vmem:[%s8336_s1 + $0xf0] sm:$0xff]   ;;  %v6760_v26 = vld [vmem:[%s8336_s1 + $0xe8] sm:$0xff]   ;;  %v6758_v27 = vld [vmem:[%s7115_s6 + $0x20] sm:$0xff]  }
  0x1a   : >> { %v6761_v28 = vld [vmem:[%s8336_s1 + $0xa0] sm:$0xff]   ;;  %v6763_v30 = vld [vmem:[%s7115_s6 + $0x28] sm:$0xff]   ;;  %v6765_v31 = vld [vmem:[%s8336_s1 + $0x98] sm:$0xff]  }
  0x1b   : >> { %6141 = vmatpush3.bf16.msra.mxu0 %v6738_v5  ;;  %v6762_v29 = vld [vmem:[%s8336_s1 + $0xe0] sm:$0xff]   ;;  %v6766_v32 = vld [vmem:[%s8336_s1 + $0xd8] sm:$0xff]   ;;  %v6764_v33 = vld [vmem:[%s7115_s6 + $0x30] sm:$0xff]  }
  0x1c   : >> { %6173 = vmatpush3.bf16.msra.mxu1 %v6739_v6  ;;  %6142 = vmatprep.subr.bf16.mxu0 %v6740_v7  ;;  %v6767_v34 = vld [vmem:[%s8336_s1 + $0x90] sm:$0xff]   ;;  %v6769_v36 = vld [vmem:[%s7115_s6 + $0x38] sm:$0xff]   ;;  %v6771_v37 = vld [vmem:[%s8336_s1 + $0x88] sm:$0xff]  }
  0x1d   : >> { %6174 = vmatprep.subr.bf16.mxu1 %v6741_v8  ;;  %v6768_v35 = vld [vmem:[%s8336_s1 + $0xd0] sm:$0xff]   ;;  %v6772_v38 = vld [vmem:[%s8336_s1 + $0xc8] sm:$0xff]   ;;  %v6770_v39 = vld [vmem:[%s7115_s6 + $0x40] sm:$0xff]  }
  0x1e   : >> { %v6773_v40 = vld [vmem:[%s8336_s1 + $0x80] sm:$0xff]   ;;  %v6775_v42 = vld [vmem:[%s7115_s6 + $0x10] sm:$0xff]   ;;  %v6777_v44 = vld [vmem:[%s7115_s6 + $0x18] sm:$0xff]  }
  0x1f   : >> { %6143 = vmatpush3.bf16.msra.mxu0 %v6740_v7  ;;  %v6774_v41 = vld [vmem:[%s8336_s1 + $0xc0] sm:$0xff]   ;;  %v6776_v43 = vld [vmem:[%s7115_s6 + $0x90] sm:$0xff]   ;;  %v6779_v45 = vld [vmem:[%s8336_s1 + $0x138] sm:$0xff]  }
  0x20   : >> { %6175 = vmatpush3.bf16.msra.mxu1 %v6741_v8  ;;  %6144 = vmatprep.subr.bf16.mxu0 %v6742_v9  ;;  %v6780_v46 = vld [vmem:[%s8336_s1 + $0x178] sm:$0xff]   ;;  %v6781_v48 = vld [vmem:[%s8336_s1 + $0x130] sm:$0xff]   ;;  %v6783_v50 = vld [vmem:[%s7115_s6 + $0x20] sm:$0xff]  }
  0x21   : >> { %6176 = vmatprep.subr.bf16.mxu1 %v6743_v10  ;;  %v6778_v47 = vld [vmem:[%s7115_s6 + $0x98] sm:$0xff]   ;;  %v6782_v49 = vld [vmem:[%s8336_s1 + $0x170] sm:$0xff]   ;;  %v6784_v51 = vld [vmem:[%s7115_s6 + $0xa0] sm:$0xff]  }
  0x22   : >> { %v6785_v52 = vld [vmem:[%s7115_s6 + $0x28] sm:$0xff]   ;;  %v6789_v56 = vld [vmem:[%s8336_s1 + $0x120] sm:$0xff]   ;;  %v6791_v58 = vld [vmem:[%s7115_s6 + $0x30] sm:$0xff]  }
  0x23   : >> { %6145 = vmatpush3.bf16.msra.mxu0 %v6742_v9  ;;  %v6787_v53 = vld [vmem:[%s8336_s1 + $0x128] sm:$0xff]   ;;  %v6790_v57 = vld [vmem:[%s8336_s1 + $0x160] sm:$0xff]   ;;  %v6792_v59 = vld [vmem:[%s7115_s6 + $0xb0] sm:$0xff]  }
  0x24   : >> { %6177 = vmatpush3.bf16.msra.mxu1 %v6743_v10  ;;  %6146 = vmatprep.subr.bf16.mxu0 %v6744_v11  ;;  %v6788_v54 = vld [vmem:[%s8336_s1 + $0x168] sm:$0xff]   ;;  %v6793_v60 = vld [vmem:[%s7115_s6 + $0x38] sm:$0xff]   ;;  %v6797_v1 = vld [vmem:[%s8336_s1 + $0x110] sm:$0xff]  }
  0x25   : >> { %6178 = vmatprep.subr.bf16.mxu1 %v6745_v12  ;;  %v6786_v55 = vld [vmem:[%s7115_s6 + $0xa8] sm:$0xff]   ;;  %v6795_v61 = vld [vmem:[%s8336_s1 + $0x118] sm:$0xff]   ;;  %v6798_v2 = vld [vmem:[%s8336_s1 + $0x150] sm:$0xff]  }
  0x26   : >> { %v6796_v62 = vld [vmem:[%s8336_s1 + $0x158] sm:$0xff]   ;;  %v6799_v3 = vld [vmem:[%s7115_s6 + $0x40] sm:$0xff]   ;;  %v6801_v5 = vld [vmem:[%s7115_s6 + $0x48] sm:$0xff]  }
  0x27   : >> { %6147 = vmatpush3.bf16.msra.mxu0 %v6744_v11  ;;  %v6794_v63 = vld [vmem:[%s7115_s6 + $0xb8] sm:$0xff]   ;;  %v6800_v4 = vld [vmem:[%s7115_s6 + $0xc0] sm:$0xff]   ;;  %v6803_v6 = vld [vmem:[%s8336_s1 + $0x108] sm:$0xff]  }
  0x28   : >> { %6179 = vmatpush3.bf16.msra.mxu1 %v6745_v12  ;;  %6148 = vmatprep.subr.bf16.mxu0 %v6746_v15  ;;  %v6804_v7 = vld [vmem:[%s8336_s1 + $0x148] sm:$0xff]   ;;  %v6805_v9 = vld [vmem:[%s8336_s1 + $0x100] sm:$0xff]   ;;  %v6807_v11 = vld [vmem:[%s7115_s6 + $0x98] sm:$0xff]  }
  0x29   : >> { %6180 = vmatprep.subr.bf16.mxu1 %v6747_v16  ;;  %v6802_v8 = vld [vmem:[%s7115_s6 + $0xc8] sm:$0xff]   ;;  %v6806_v10 = vld [vmem:[%s8336_s1 + $0x140] sm:$0xff]   ;;  %v6811_v14 = vld [vmem:[%s8336_s1 + $0x1b8] sm:$0xff]  }
  0x2a   : >> { %v6808_v12 = vld [vmem:[%s7115_s6 + $0xa0] sm:$0xff]  }
  0x2b   : >> { %6149 = vmatpush3.bf16.msra.mxu0 %v6746_v15  ;;  %v6812_v15 = vld [vmem:[%s8336_s1 + $0x1f8] sm:$0xff]  }
  0x2c   : >> { %6181 = vmatpush3.bf16.msra.mxu1 %v6747_v16  ;;  %6150 = vmatprep.subr.bf16.mxu0 %v6748_v17  ;;  %v6810_v16 = vld [vmem:[%s7115_s6 + $0xa8] sm:$0xff]  }
  0x2d   : >> { %6182 = vmatprep.subr.bf16.mxu1 %v6749_v18 }
  0x2f   : >> { %6151 = vmatpush3.bf16.msra.mxu0 %v6748_v17  ;;  %v6813_v17 = vld [vmem:[%s8336_s1 + $0x1b0] sm:$0xff]  }
  0x30   : >> { %6183 = vmatpush3.bf16.msra.mxu1 %v6749_v18  ;;  %6200 = vmatprep.subr.bf16.mxu0 %v6753_v19  ;;  %v6814_v18 = vld [vmem:[%s8336_s1 + $0x1f0] sm:$0xff]  }
  0x31   : >> { %6232 = vmatprep.subr.bf16.mxu1 %v6754_v20 }
  0x32   : >> { %6153 = vmatmul.mubr.bf16.vlgmr.msra.gmra.mxu0 %v6752_v21 }
  0x33   : >> { %6185 = vmatmul.mubr.bf16.vlgmr.msra.gmra.mxu1 %v6750_v13  ;;  %6201 = vmatpush3.bf16.msra.mxu0 %v6753_v19  ;;  %v6809_v13 = vld [vmem:[%s7115_s6 + $0xa0] sm:$0xff]   ;;  %v6815_v19 = vld [vmem:[%s7115_s6 + $0xa8] sm:$0xff]  }
  0x34   : >> { %6233 = vmatpush3.bf16.msra.mxu1 %v6754_v20  ;;  %6202 = vmatprep.subr.bf16.mxu0 %v6755_v22  ;;  %v6816_v20 = vld [vmem:[%s7115_s6 + $0xb0] sm:$0xff]  }
  0x35   : >> { %6234 = vmatprep.subr.bf16.mxu1 %v6756_v23  ;;  %6156 = vmatprep.mubr.bf16.mxu0 %v6757_v24 }
  0x36   : >> { %6188 = vmatprep.mubr.bf16.mxu1 %v6752_v21  ;;  %v6817_v21 = vld [vmem:[%s7115_s6 + $0xb0] sm:$0xff]  }
  0x37   : >> { %6203 = vmatpush3.bf16.msra.mxu0 %v6755_v22  ;;  %v6819_v22 = vld [vmem:[%s8336_s1 + $0x1a8] sm:$0xff]  }
  0x38   : >> { %6235 = vmatpush3.bf16.msra.mxu1 %v6756_v23  ;;  %6204 = vmatprep.subr.bf16.mxu0 %v6759_v25  ;;  %v6820_v23 = vld [vmem:[%s8336_s1 + $0x1e8] sm:$0xff]  }
  0x39   : >> { %6236 = vmatprep.subr.bf16.mxu1 %v6760_v26 }
  0x3a   : >> { %6157 = vmatmul.mubr.bf16.gmra.mxu0 %v6758_v27 }
  0x3b   : >> { %6189 = vmatmul.mubr.bf16.gmra.mxu1 %v6757_v24  ;;  %6205 = vmatpush3.bf16.msra.mxu0 %v6759_v25  ;;  %v6818_v24 = vld [vmem:[%s7115_s6 + $0xb8] sm:$0xff]   ;;  %v6821_v25 = vld [vmem:[%s8336_s1 + $0x1a0] sm:$0xff]  }
  0x3c   : >> { %6237 = vmatpush3.bf16.msra.mxu1 %v6760_v26  ;;  %6206 = vmatprep.subr.bf16.mxu0 %v6761_v28  ;;  %v6822_v26 = vld [vmem:[%s8336_s1 + $0x1e0] sm:$0xff]  }
  0x3d   : >> { %6238 = vmatprep.subr.bf16.mxu1 %v6762_v29  ;;  %6160 = vmatprep.mubr.bf16.mxu0 %v6763_v30 }
  0x3e   : >> { %6192 = vmatprep.mubr.bf16.mxu1 %v6758_v27  ;;  %v6823_v27 = vld [vmem:[%s7115_s6 + $0xb8] sm:$0xff]  }
  0x3f   : >> { %6207 = vmatpush3.bf16.msra.mxu0 %v6761_v28  ;;  %v7024_v28 = vmov 0  }
  0x40   : >> { %6239 = vmatpush3.bf16.msra.mxu1 %v6762_v29  ;;  %6208 = vmatprep.subr.bf16.mxu0 %v6765_v31  ;;  %v6824_v29 = vld [vmem:[%s7115_s6 + $0xc0] sm:$0xff]  }
  0x41   : >> { %6240 = vmatprep.subr.bf16.mxu1 %v6766_v32  ;;  %6732 = vset.pattern.permute.xlu0 %v7024_v28 }
  0x42   : >> { %6161 = vmatmul.mubr.bf16.gmra.mxu0 %v6764_v33  ;;  %6733 = vset.pattern.permute.xlu1 %v7024_v28  ;;  %v6886_v28 = vld [vmem:[%s8336_s1 + $0xa0] sm:$0xff]  }
  0x43   : >> { %6193 = vmatmul.mubr.bf16.gmra.mxu1 %v6763_v30  ;;  %6209 = vmatpush3.bf16.msra.mxu0 %v6765_v31  ;;  %v6825_v30 = vld [vmem:[%s7115_s6 + $0xc0] sm:$0xff]   ;;  %v6827_v31 = vld [vmem:[%s8336_s1 + $0x198] sm:$0xff]  }
  0x44   : >> { %6241 = vmatpush3.bf16.msra.mxu1 %v6766_v32  ;;  %6210 = vmatprep.subr.bf16.mxu0 %v6767_v34  ;;  %v6828_v32 = vld [vmem:[%s8336_s1 + $0x1d8] sm:$0xff]  }
  0x45   : >> { %6242 = vmatprep.subr.bf16.mxu1 %v6768_v35  ;;  %6164 = vmatprep.mubr.bf16.mxu0 %v6769_v36 }
  0x46   : >> { %6196 = vmatprep.mubr.bf16.mxu1 %v6764_v33  ;;  %v6826_v33 = vld [vmem:[%s7115_s6 + $0xc8] sm:$0xff]  }
  0x47   : >> { %6211 = vmatpush3.bf16.msra.mxu0 %v6767_v34  ;;  %v6829_v34 = vld [vmem:[%s8336_s1 + $0x190] sm:$0xff]  }
  0x48   : >> { %6243 = vmatpush3.bf16.msra.mxu1 %v6768_v35  ;;  %6212 = vmatprep.subr.bf16.mxu0 %v6771_v37  ;;  %v6830_v35 = vld [vmem:[%s8336_s1 + $0x1d0] sm:$0xff]  }
  0x49   : >> { %6244 = vmatprep.subr.bf16.mxu1 %v6772_v38 }
  0x4a   : >> { %6165 = vmatmul.mubr.bf16.gmra.mxu0 %v6770_v39  ;;  %v6835_v39 = vld [vmem:[%s8336_s1 + $0x188] sm:$0xff]  }
  0x4b   : >> { %6197 = vmatmul.mubr.bf16.gmra.mxu1 %v6769_v36  ;;  %6213 = vmatpush3.bf16.msra.mxu0 %v6771_v37  ;;  %v6831_v36 = vld [vmem:[%s7115_s6 + $0xc8] sm:$0xff]   ;;  %v6832_v37 = vld [vmem:[%s7115_s6 + $0xd0] sm:$0xff]  }
  0x4c   : >> { %6245 = vmatpush3.bf16.msra.mxu1 %v6772_v38  ;;  %6214 = vmatprep.subr.bf16.mxu0 %v6773_v40  ;;  %v6833_v38 = vld [vmem:[%s7115_s6 + $0xd0] sm:$0xff]  }
  0x4d   : >> { %6246 = vmatprep.subr.bf16.mxu1 %v6774_v41  ;;  %6216 = vmatprep.mubr.bf16.mxu0 %v6775_v42  ;;  %v6837_v42 = vld [vmem:[%s8336_s1 + $0x180] sm:$0xff]  }
  0x4e   : >> { %6248 = vmatprep.mubr.bf16.mxu1 %v6776_v43  ;;  %v6838_v43 = vld [vmem:[%s8336_s1 + $0x1c0] sm:$0xff]  }
  0x4f   : >> { %6215 = vmatpush3.bf16.msra.mxu0 %v6773_v40  ;;  %v6836_v40 = vld [vmem:[%s8336_s1 + $0x1c8] sm:$0xff]  }
  0x50   : >> { %6247 = vmatpush3.bf16.msra.mxu1 %v6774_v41  ;;  %6264 = vmatprep.subr.bf16.mxu0 %v6779_v45  ;;  %v6834_v41 = vld [vmem:[%s7115_s6 + $0xd8] sm:$0xff]  }
  0x51   : >> { %6296 = vmatprep.subr.bf16.mxu1 %v6780_v46 }
  0x52   : >> { %6217 = vmatmul.mubr.bf16.vlgmr.msra.gmra.mxu0 %v6777_v44  ;;  %v6839_v44 = vld [vmem:[%s7115_s6 + $0x120] sm:$0xff]  }
  0x53   : >> { %6249 = vmatmul.mubr.bf16.vlgmr.msra.gmra.mxu1 %v6778_v47  ;;  %6265 = vmatpush3.bf16.msra.mxu0 %v6779_v45  ;;  %v6840_v45 = vld [vmem:[%s7115_s6 + $0x128] sm:$0xff]   ;;  %v6843_v47 = vld [vmem:[%s8336_s1 + $0x238] sm:$0xff]  }
  0x54   : >> { %6297 = vmatpush3.bf16.msra.mxu1 %v6780_v46  ;;  %6266 = vmatprep.subr.bf16.mxu0 %v6781_v48  ;;  %v6841_v46 = vld [vmem:[%s7115_s6 + $0x128] sm:$0xff]  }
  0x55   : >> { %6298 = vmatprep.subr.bf16.mxu1 %v6782_v49  ;;  %6220 = vmatprep.mubr.bf16.mxu0 %v6783_v50  ;;  %v6845_v50 = vld [vmem:[%s8336_s1 + $0x230] sm:$0xff]  }
  0x56   : >> { %6252 = vmatprep.mubr.bf16.mxu1 %v6784_v51  ;;  %v6846_v51 = vld [vmem:[%s8336_s1 + $0x70] sm:$0xff]  }
  0x57   : >> { %6267 = vmatpush3.bf16.msra.mxu0 %v6781_v48  ;;  %v6844_v48 = vld [vmem:[%s8336_s1 + $0x78] sm:$0xff]  }
  0x58   : >> { %6299 = vmatpush3.bf16.msra.mxu1 %v6782_v49  ;;  %6268 = vmatprep.subr.bf16.mxu0 %v6787_v53  ;;  %v6842_v49 = vld [vmem:[%s7115_s6 + $0x130] sm:$0xff]  }
  0x59   : >> { %6300 = vmatprep.subr.bf16.mxu1 %v6788_v54 }
  0x5a   : >> { %6221 = vmatmul.mubr.bf16.gmra.mxu0 %v6785_v52  ;;  %v6847_v52 = vld [vmem:[%s7115_s6 + $0x130] sm:$0xff]  }
  0x5b   : >> { %6253 = vmatmul.mubr.bf16.gmra.mxu1 %v6786_v55  ;;  %6269 = vmatpush3.bf16.msra.mxu0 %v6787_v53  ;;  %v6848_v53 = vld [vmem:[%s7115_s6 + $0x138] sm:$0xff]   ;;  %v6851_v55 = vld [vmem:[%s8336_s1 + $0x228] sm:$0xff]  }
  0x5c   : >> { %6301 = vmatpush3.bf16.msra.mxu1 %v6788_v54  ;;  %6270 = vmatprep.subr.bf16.mxu0 %v6789_v56  ;;  %v6849_v54 = vld [vmem:[%s7115_s6 + $0x138] sm:$0xff]  }
  0x5d   : >> { %6302 = vmatprep.subr.bf16.mxu1 %v6790_v57  ;;  %6224 = vmatprep.mubr.bf16.mxu0 %v6791_v58  ;;  %v6853_v58 = vld [vmem:[%s8336_s1 + $0x220] sm:$0xff]  }
  0x5e   : >> { %6256 = vmatprep.mubr.bf16.mxu1 %v6792_v59  ;;  %v6854_v59 = vld [vmem:[%s8336_s1 + $0x60] sm:$0xff]  }
  0x5f   : >> { %6271 = vmatpush3.bf16.msra.mxu0 %v6789_v56  ;;  %v6852_v56 = vld [vmem:[%s8336_s1 + $0x68] sm:$0xff]  }
  0x60   : >> { %6303 = vmatpush3.bf16.msra.mxu1 %v6790_v57  ;;  %6272 = vmatprep.subr.bf16.mxu0 %v6795_v61  ;;  %v6850_v57 = vld [vmem:[%s7115_s6 + $0x140] sm:$0xff]  }
  0x61   : >> { %6304 = vmatprep.subr.bf16.mxu1 %v6796_v62 }
  0x62   : >> { %6225 = vmatmul.mubr.bf16.gmra.mxu0 %v6793_v60  ;;  %v6855_v60 = vld [vmem:[%s7115_s6 + $0x140] sm:$0xff]  }
  0x63   : >> { %6257 = vmatmul.mubr.bf16.gmra.mxu1 %v6794_v63  ;;  %6273 = vmatpush3.bf16.msra.mxu0 %v6795_v61  ;;  %v6856_v61 = vld [vmem:[%s7115_s6 + $0x148] sm:$0xff]   ;;  %v6859_v63 = vld [vmem:[%s8336_s1 + $0x218] sm:$0xff]  }
  0x64   : >> { %6305 = vmatpush3.bf16.msra.mxu1 %v6796_v62  ;;  %6274 = vmatprep.subr.bf16.mxu0 %v6797_v1  ;;  %v6857_v62 = vld [vmem:[%s7115_s6 + $0x148] sm:$0xff]  }
  0x65   : >> { %6306 = vmatprep.subr.bf16.mxu1 %v6798_v2  ;;  %6228 = vmatprep.mubr.bf16.mxu0 %v6799_v3  ;;  %v6861_v3 = vld [vmem:[%s8336_s1 + $0x210] sm:$0xff]  }
  0x66   : >> { %6260 = vmatprep.mubr.bf16.mxu1 %v6800_v4  ;;  %v6862_v4 = vld [vmem:[%s8336_s1 + $0x50] sm:$0xff]  }
  0x67   : >> { %6275 = vmatpush3.bf16.msra.mxu0 %v6797_v1  ;;  %v6860_v1 = vld [vmem:[%s8336_s1 + $0x58] sm:$0xff]  }
  0x68   : >> { %6307 = vmatpush3.bf16.msra.mxu1 %v6798_v2  ;;  %6276 = vmatprep.subr.bf16.mxu0 %v6803_v6  ;;  %v6858_v2 = vld [vmem:[%s7115_s6 + $0x150] sm:$0xff]  }
  0x69   : >> { %6308 = vmatprep.subr.bf16.mxu1 %v6804_v7 }
  0x6a   : >> { %6229 = vmatmul.mubr.bf16.gmra.mxu0 %v6801_v5  ;;  %v6863_v5 = vld [vmem:[%s7115_s6 + $0x150] sm:$0xff]  }
  0x6b   : >> { %6261 = vmatmul.mubr.bf16.gmra.mxu1 %v6802_v8  ;;  %6277 = vmatpush3.bf16.msra.mxu0 %v6803_v6  ;;  %v6864_v6 = vld [vmem:[%s7115_s6 + $0x158] sm:$0xff]   ;;  %v6867_v8 = vld [vmem:[%s8336_s1 + $0x208] sm:$0xff]  }
  0x6c   : >> { %6309 = vmatpush3.bf16.msra.mxu1 %v6804_v7  ;;  %6278 = vmatprep.subr.bf16.mxu0 %v6805_v9  ;;  %v6865_v7 = vld [vmem:[%s7115_s6 + $0x158] sm:$0xff]  }
  0x6d   : >> { %6310 = vmatprep.subr.bf16.mxu1 %v6806_v10  ;;  %6280 = vmatprep.mubr.bf16.mxu0 %v6807_v11  ;;  %v6869_v11 = vld [vmem:[%s8336_s1 + $0x200] sm:$0xff]  }
  0x6e   : >> { %6312 = vmatprep.mubr.bf16.mxu1 %v6808_v12  ;;  %v6870_v12 = vld [vmem:[%s8336_s1 + $0x40] sm:$0xff]  }
  0x6f   : >> { %6279 = vmatpush3.bf16.msra.mxu0 %v6805_v9  ;;  %v6868_v9 = vld [vmem:[%s8336_s1 + $0x48] sm:$0xff]  }
  0x70   : >> { %6311 = vmatpush3.bf16.msra.mxu1 %v6806_v10  ;;  %6328 = vmatprep.subr.bf16.mxu0 %v6811_v14  ;;  %v6866_v10 = vld [vmem:[%s7115_s6 + $0x160] sm:$0xff]  }
  0x71   : >> { %6360 = vmatprep.subr.bf16.mxu1 %v6812_v15 }
  0x72   : >> { %6281 = vmatmul.mubr.bf16.vlgmr.msra.gmra.mxu0 %v6809_v13  ;;  %v6871_v13 = vld [vmem:[%s7115_s6 + $0x130] sm:$0xff]  }
  0x73   : >> { %6313 = vmatmul.mubr.bf16.vlgmr.msra.gmra.mxu1 %v6810_v16  ;;  %6329 = vmatpush3.bf16.msra.mxu0 %v6811_v14  ;;  %v7386_v14 = vld [vmem:[%s7115_s6 + $0x48] sm:$0xff]   ;;  %v6875_v16 = vld [vmem:[%s8336_s1 + $0x38] sm:$0xff]  }
  0x74   : >> { %6361 = vmatpush3.bf16.msra.mxu1 %v6812_v15  ;;  %6330 = vmatprep.subr.bf16.mxu0 %v6813_v17  ;;  %v6873_v15 = vld [vmem:[%s7115_s6 + $0x138] sm:$0xff]  }
  0x75   : >> { %6362 = vmatprep.subr.bf16.mxu1 %v6814_v18  ;;  %6284 = vmatprep.mubr.bf16.mxu0 %v6815_v19  ;;  %v6877_v19 = vld [vmem:[%s8336_s1 + $0x30] sm:$0xff]  }
  0x76   : >> { %6316 = vmatprep.mubr.bf16.mxu1 %v6816_v20  ;;  %v6878_v20 = vld [vmem:[%s8336_s1 + $0xb0] sm:$0xff]  }
  0x77   : >> { %6331 = vmatpush3.bf16.msra.mxu0 %v6813_v17  ;;  %v6876_v17 = vld [vmem:[%s8336_s1 + $0xb8] sm:$0xff]  }
  0x78   : >> { %6363 = vmatpush3.bf16.msra.mxu1 %v6814_v18  ;;  %6332 = vmatprep.subr.bf16.mxu0 %v6819_v22  ;;  %v7397_v18 = vld [vmem:[%s7115_s6 + $0x50] sm:$0xff]  }
  0x79   : >> { %6364 = vmatprep.subr.bf16.mxu1 %v6820_v23 }
  0x7a   : >> { %6285 = vmatmul.mubr.bf16.gmra.mxu0 %v6817_v21  ;;  %v6879_v21 = vld [vmem:[%s7115_s6 + $0x140] sm:$0xff]  }
  0x7b   : >> { %6317 = vmatmul.mubr.bf16.gmra.mxu1 %v6818_v24  ;;  %6333 = vmatpush3.bf16.msra.mxu0 %v6819_v22  ;;  %v7407_v22 = vld [vmem:[%s7115_s6 + $0x58] sm:$0xff]   ;;  %v6883_v24 = vld [vmem:[%s8336_s1 + $0x28] sm:$0xff]  }
  0x7c   : >> { %6365 = vmatpush3.bf16.msra.mxu1 %v6820_v23  ;;  %6334 = vmatprep.subr.bf16.mxu0 %v6821_v25  ;;  %v6881_v23 = vld [vmem:[%s7115_s6 + $0x148] sm:$0xff]  }
  0x7d   : >> { %6366 = vmatprep.subr.bf16.mxu1 %v6822_v26  ;;  %6288 = vmatprep.mubr.bf16.mxu0 %v6823_v27  ;;  %v6885_v27 = vld [vmem:[%s8336_s1 + $0x20] sm:$0xff]  }
  0x7e   : >> { %6320 = vmatprep.mubr.bf16.mxu1 %v6824_v29  ;;  %v6887_v29 = vld [vmem:[%s7115_s6 + $0x150] sm:$0xff]  }
  0x7f   : >> { %6335 = vmatpush3.bf16.msra.mxu0 %v6821_v25  ;;  %v6884_v25 = vld [vmem:[%s8336_s1 + $0xa8] sm:$0xff]  }
  0x80   : >> { %6367 = vmatpush3.bf16.msra.mxu1 %v6822_v26  ;;  %6336 = vmatprep.subr.bf16.mxu0 %v6827_v31  ;;  %v7419_v26 = vld [vmem:[%s7115_s6 + $0x60] sm:$0xff]  }
  0x81   : >> { %6368 = vmatprep.subr.bf16.mxu1 %v6828_v32 }
  0x82   : >> { %6289 = vmatmul.mubr.bf16.gmra.mxu0 %v6825_v30  ;;  %v7429_v30 = vld [vmem:[%s7115_s6 + $0x68] sm:$0xff]  }
  0x83   : >> { %6321 = vmatmul.mubr.bf16.gmra.mxu1 %v6826_v33  ;;  %6337 = vmatpush3.bf16.msra.mxu0 %v6827_v31  ;;  %v6889_v31 = vld [vmem:[%s7115_s6 + $0x158] sm:$0xff]  }
  0x84   : >> { %6369 = vmatpush3.bf16.msra.mxu1 %v6828_v32  ;;  %6338 = vmatprep.subr.bf16.mxu0 %v6829_v34  ;;  %v6891_v32 = vld [vmem:[%s8336_s1 + $0x18] sm:$0xff]  }
  0x85   : >> { %6370 = vmatprep.subr.bf16.mxu1 %v6830_v35  ;;  %6292 = vmatprep.mubr.bf16.mxu0 %v6831_v36  ;;  %v6892_v33 = vld [vmem:[%s8336_s1 + $0x98] sm:$0xff]   ;;  %v6894_v36 = vld [vmem:[%s8336_s1 + $0x90] sm:$0xff]  }
  0x86   : >> { %6324 = vmatprep.mubr.bf16.mxu1 %v6832_v37  ;;  %v6895_v37 = vld [vmem:[%s7115_s6 + $0x160] sm:$0xff]  }
  0x87   : >> { %6339 = vmatpush3.bf16.msra.mxu0 %v6829_v34  ;;  %v7441_v34 = vld [vmem:[%s7115_s6 + $0x70] sm:$0xff]  }
  0x88   : >> { %6371 = vmatpush3.bf16.msra.mxu1 %v6830_v35  ;;  %6340 = vmatprep.subr.bf16.mxu0 %v6835_v39  ;;  %v6893_v35 = vld [vmem:[%s8336_s1 + $0x10] sm:$0xff]  }
  0x89   : >> { %6372 = vmatprep.subr.bf16.mxu1 %v6836_v40 }
  0x8a   : >> { %6293 = vmatmul.mubr.bf16.gmra.mxu0 %v6833_v38  ;;  %v7451_v38 = vld [vmem:[%s7115_s6 + $0x78] sm:$0xff]  }
  0x8b   : >> { %6325 = vmatmul.mubr.bf16.gmra.mxu1 %v6834_v41  ;;  %6341 = vmatpush3.bf16.msra.mxu0 %v6835_v39  ;;  %v6897_v39 = vld [vmem:[%s7115_s6 + $0x168] sm:$0xff]  }
  0x8c   : >> { %6373 = vmatpush3.bf16.msra.mxu1 %v6836_v40  ;;  %6342 = vmatprep.subr.bf16.mxu0 %v6837_v42  ;;  %v6899_v40 = vld [vmem:[%s8336_s1 + $0x8] sm:$0xff]  }
  0x8d   : >> { %6374 = vmatprep.subr.bf16.mxu1 %v6838_v43  ;;  %6344 = vmatprep.mubr.bf16.mxu0 %v6839_v44  ;;  %v6900_v41 = vld [vmem:[%s8336_s1 + $0x88] sm:$0xff]   ;;  %v6902_v44 = vld [vmem:[%s8336_s1 + $0x80] sm:$0xff]  }
  0x8e   : >> { %6376 = vmatprep.mubr.bf16.mxu1 %v6840_v45  ;;  %v6903_v45 = vld [vmem:[%s7115_s6 + $0x40] sm:$0xff]  }
  0x8f   : >> { %6343 = vmatpush3.bf16.msra.mxu0 %v6837_v42  ;;  %v6898_v42 = vld [vmem:[%s7115_s6 + $0x80] sm:$0xff]  }
  0x90   : >> { %6375 = vmatpush3.bf16.msra.mxu1 %v6838_v43  ;;  %6392 = vmatprep.subr.bf16.mxu0 %v6843_v47  ;;  %v6901_v43 = vld [vmem:[%s8336_s1] sm:$0xff]  }
  0x91   : >> { %6424 = vmatprep.subr.bf16.mxu1 %v6844_v48 }
  0x92   : >> { %6345 = vmatmul.mubr.bf16.vlgmr.msra.gmra.mxu0 %v6841_v46  ;;  %v6904_v46 = vld [vmem:[%s7115_s6 + $0x50] sm:$0xff]  }
  0x93   : >> { %6377 = vmatmul.mubr.bf16.vlgmr.msra.gmra.mxu1 %v6842_v49  ;;  %6393 = vmatpush3.bf16.msra.mxu0 %v6843_v47  ;;  %v6906_v47 = vld [vmem:[%s8336_s1 + $0xf8] sm:$0xff]  }
  0x94   : >> { %6425 = vmatpush3.bf16.msra.mxu1 %v6844_v48  ;;  %6394 = vmatprep.subr.bf16.mxu0 %v6845_v50  ;;  %v6907_v48 = vld [vmem:[%s8336_s1 + $0x138] sm:$0xff]  }
  0x95   : >> { %6426 = vmatprep.subr.bf16.mxu1 %v6846_v51  ;;  %6348 = vmatprep.mubr.bf16.mxu0 %v6847_v52  ;;  %v6905_v49 = vld [vmem:[%s7115_s6 + $0x58] sm:$0xff]   ;;  %v6910_v52 = vld [vmem:[%s7115_s6 + $0x60] sm:$0xff]  }
  0x96   : >> { %6380 = vmatprep.mubr.bf16.mxu1 %v6848_v53  ;;  %v6912_v53 = vld [vmem:[%s8336_s1 + $0xe8] sm:$0xff]  }
  0x97   : >> { %6395 = vmatpush3.bf16.msra.mxu0 %v6845_v50  ;;  %v6908_v50 = vld [vmem:[%s8336_s1 + $0xf0] sm:$0xff]  }
  0x98   : >> { %6427 = vmatpush3.bf16.msra.mxu1 %v6846_v51  ;;  %6396 = vmatprep.subr.bf16.mxu0 %v6851_v55  ;;  %v6909_v51 = vld [vmem:[%s8336_s1 + $0x130] sm:$0xff]  }
  0x99   : >> { %6428 = vmatprep.subr.bf16.mxu1 %v6852_v56 }
  0x9a   : >> { %6349 = vmatmul.mubr.bf16.gmra.mxu0 %v6849_v54  ;;  %v6913_v54 = vld [vmem:[%s8336_s1 + $0x128] sm:$0xff]  }
  0x9b   : >> { %6381 = vmatmul.mubr.bf16.gmra.mxu1 %v6850_v57  ;;  %6397 = vmatpush3.bf16.msra.mxu0 %v6851_v55  ;;  %v6911_v55 = vld [vmem:[%s7115_s6 + $0x68] sm:$0xff]   ;;  %v6915_v57 = vld [vmem:[%s8336_s1 + $0x120] sm:$0xff]  }
  0x9c   : >> { %6429 = vmatpush3.bf16.msra.mxu1 %v6852_v56  ;;  %6398 = vmatprep.subr.bf16.mxu0 %v6853_v58  ;;  %v6914_v56 = vld [vmem:[%s8336_s1 + $0xe0] sm:$0xff]  }
  0x9d   : >> { %6430 = vmatprep.subr.bf16.mxu1 %v6854_v59  ;;  %6352 = vmatprep.mubr.bf16.mxu0 %v6855_v60  ;;  %v6918_v60 = vld [vmem:[%s8336_s1 + $0xd8] sm:$0xff]  }
  0x9e   : >> { %6384 = vmatprep.mubr.bf16.mxu1 %v6856_v61  ;;  %v6919_v61 = vld [vmem:[%s8336_s1 + $0x118] sm:$0xff]  }
  0x9f   : >> { %6399 = vmatpush3.bf16.msra.mxu0 %v6853_v58  ;;  %v6916_v58 = vld [vmem:[%s7115_s6 + $0x70] sm:$0xff]  }
  0xa0   : >> { %6431 = vmatpush3.bf16.msra.mxu1 %v6854_v59  ;;  %6400 = vmatprep.subr.bf16.mxu0 %v6859_v63  ;;  %v2366_v59 = vld [vmem:[%s7499_s14] sm:$0xff] }
  0xa1   : >> { %6432 = vmatprep.subr.bf16.mxu1 %v6860_v1  ;;  %2384 = vperm.xlu0 %6732, %v2366_v59   ;;  %v6949_v59 = vld [vmem:[%s8336_s1 + $0x198] sm:$0xff]  }
  0xa2   : >> { %6353 = vmatmul.mubr.bf16.gmra.mxu0 %v6857_v62  ;;  %v6917_v62 = vld [vmem:[%s7115_s6 + $0x78] sm:$0xff]  }
  0xa3   : >> { %6385 = vmatmul.mubr.bf16.gmra.mxu1 %v6858_v2  ;;  %6401 = vmatpush3.bf16.msra.mxu0 %v6859_v63  ;;  %v6920_v63 = vld [vmem:[%s8336_s1 + $0xd0] sm:$0xff]   ;;  %v2367_v2 = vld [vmem:[%s7499_s14 + $0x8] sm:$0xff] }
  0xa4   : >> { %6433 = vmatpush3.bf16.msra.mxu1 %v6860_v1  ;;  %6402 = vmatprep.subr.bf16.mxu0 %v6861_v3  ;;  %v2368_v1 = vld [vmem:[%s7499_s14 + $0x10] sm:$0xff] }
  0xa5   : >> { %6434 = vmatprep.subr.bf16.mxu1 %v6862_v4  ;;  %6356 = vmatprep.mubr.bf16.mxu0 %v6863_v5  ;;  %v6924_v5 = vld [vmem:[%s8336_s1 + $0xc8] sm:$0xff]  }
  0xa6   : >> { %6388 = vmatprep.mubr.bf16.mxu1 %v6864_v6  ;;  %2394 = vperm.xlu1 %6733, %v2368_v1   ;;  %v2369_v6 = vld [vmem:[%s7499_s14 + $0x18] sm:$0xff]  ;;  %v2380_v1 = vld [vmem:[%s7499_s14 + $0x70] sm:$0xff] }
  0xa7   : >> { %6403 = vmatpush3.bf16.msra.mxu0 %v6861_v3  ;;  %v6921_v3 = vld [vmem:[%s8336_s1 + $0x110] sm:$0xff]   ;;  %2389 = vperm.xlu0 %6732, %v2367_v2  }
  0xa8   : >> { %6435 = vmatpush3.bf16.msra.mxu1 %v6862_v4  ;;  %6404 = vmatprep.subr.bf16.mxu0 %v6867_v8  ;;  %v6922_v4 = vld [vmem:[%s7115_s6 + $0x80] sm:$0xff]  }
  0xa9   : >> { %6436 = vmatprep.subr.bf16.mxu1 %v6868_v9 }
  0xaa   : >> { %6357 = vmatmul.mubr.bf16.gmra.mxu0 %v6865_v7  ;;  %v2370_v7 = vld [vmem:[%s7499_s14 + $0x20] sm:$0xff]  ;;  %2399 = vperm.xlu1 %6733, %v2369_v6  }
  0xab   : >> { %6389 = vmatmul.mubr.bf16.gmra.mxu1 %v6866_v10  ;;  %6405 = vmatpush3.bf16.msra.mxu0 %v6867_v8  ;;  %v6925_v8 = vld [vmem:[%s8336_s1 + $0x108] sm:$0xff]   ;;  %v6926_v10 = vld [vmem:[%s8336_s1 + $0xc0] sm:$0xff]  }
  0xac   : >> { %6437 = vmatpush3.bf16.msra.mxu1 %v6868_v9  ;;  %6406 = vmatprep.subr.bf16.mxu0 %v6869_v11  ;;  %v6923_v9 = vld [vmem:[%s7115_s6 + $0x88] sm:$0xff]   ;;  %v6952_v6 = vld [vmem:[%s7115_s6 + $0x100] sm:$0xff]  }
  0xad   : >> { %6438 = vmatprep.subr.bf16.mxu1 %v6870_v12  ;;  %6408 = vmatprep.mubr.bf16.mxu0 %v6871_v13  ;;  %v2371_v13 = vld [vmem:[%s7499_s14 + $0x28] sm:$0xff] }
  0xae   : >> { %6440 = vmatprep.mubr.bf16.mxu1 %v7386_v14  ;;  %2404 = vperm.xlu0 %6732, %v2370_v7  }
  0xaf   : >> { %6407 = vmatpush3.bf16.msra.mxu0 %v6869_v11  ;;  %v6927_v11 = vld [vmem:[%s8336_s1 + $0x100] sm:$0xff]   ;;  %2409 = vperm.xlu1 %6733, %v2371_v13  }
  0xb0   : >> { %6439 = vmatpush3.bf16.msra.mxu1 %v6870_v12  ;;  %6456 = vmatprep.subr.bf16.mxu0 %v6875_v16  ;;  %v6928_v12 = vld [vmem:[%s7115_s6 + $0xd0] sm:$0xff]  }
  0xb1   : >> { %6488 = vmatprep.subr.bf16.mxu1 %v6876_v17 }
  0xb2   : >> { %6409 = vmatmul.mubr.bf16.vlgmr.msra.gmra.mxu0 %v6873_v15  ;;  %v2372_v15 = vld [vmem:[%s7499_s14 + $0x30] sm:$0xff] }
  0xb3   : >> { %6441 = vmatmul.mubr.bf16.vlgmr.msra.gmra.mxu1 %v7397_v18  ;;  %6457 = vmatpush3.bf16.msra.mxu0 %v6875_v16  ;;  %v6930_v16 = vld [vmem:[%s7115_s6 + $0xd8] sm:$0xff]  }
  0xb4   : >> { %6489 = vmatpush3.bf16.msra.mxu1 %v6876_v17  ;;  %6458 = vmatprep.subr.bf16.mxu0 %v6877_v19  ;;  %v6932_v17 = vld [vmem:[%s8336_s1 + $0x178] sm:$0xff]  }
  0xb5   : >> { %6490 = vmatprep.subr.bf16.mxu1 %v6878_v20  ;;  %6412 = vmatprep.mubr.bf16.mxu0 %v6879_v21  ;;  %v6934_v21 = vld [vmem:[%s8336_s1 + $0x170] sm:$0xff]  }
  0xb6   : >> { %6444 = vmatprep.mubr.bf16.mxu1 %v7407_v22  ;;  %2414 = vperm.xlu0 %6732, %v2372_v15   ;;  %v6956_v15 = vld [vmem:[%s8336_s1 + $0x148] sm:$0xff]  }
  0xb7   : >> { %6459 = vmatpush3.bf16.msra.mxu0 %v6877_v19  ;;  %v6931_v19 = vld [vmem:[%s7115_s6 + $0xe0] sm:$0xff]  }
  0xb8   : >> { %6491 = vmatpush3.bf16.msra.mxu1 %v6878_v20  ;;  %6460 = vmatprep.subr.bf16.mxu0 %v6883_v24  ;;  %v6933_v20 = vld [vmem:[%s8336_s1 + $0x1b8] sm:$0xff]  }
  0xb9   : >> { %6492 = vmatprep.subr.bf16.mxu1 %v6884_v25 }
  0xba   : >> { %6413 = vmatmul.mubr.bf16.gmra.mxu0 %v6881_v23  ;;  %v6935_v23 = vld [vmem:[%s8336_s1 + $0x1b0] sm:$0xff]  }
  0xbb   : >> { %6445 = vmatmul.mubr.bf16.gmra.mxu1 %v7419_v26  ;;  %6461 = vmatpush3.bf16.msra.mxu0 %v6883_v24  ;;  %v6936_v24 = vld [vmem:[%s7115_s6 + $0xe0] sm:$0xff]  }
  0xbc   : >> { %6493 = vmatpush3.bf16.msra.mxu1 %v6884_v25  ;;  %6462 = vmatprep.subr.bf16.mxu0 %v6885_v27 }
  0xbd   : >> { %6494 = vmatprep.subr.bf16.mxu1 %v6886_v28  ;;  %6416 = vmatprep.mubr.bf16.mxu0 %v6887_v29  ;;  %v2375_v29 = vld [vmem:[%s7499_s14 + $0x48] sm:$0xff] }
  0xbe   : >> { %6448 = vmatprep.mubr.bf16.mxu1 %v7429_v30 }
  0xbf   : >> { %6463 = vmatpush3.bf16.msra.mxu0 %v6885_v27 }
  0xc0   : >> { %6495 = vmatpush3.bf16.msra.mxu1 %v6886_v28  ;;  %6464 = vmatprep.subr.bf16.mxu0 %v6891_v32  ;;  %v6940_v28 = vld [vmem:[%s8336_s1 + $0x168] sm:$0xff]  }
  0xc1   : >> { %6496 = vmatprep.subr.bf16.mxu1 %v6892_v33 }
  0xc2   : >> { %6417 = vmatmul.mubr.bf16.gmra.mxu0 %v6889_v31 }
  0xc3   : >> { %6449 = vmatmul.mubr.bf16.gmra.mxu1 %v7441_v34  ;;  %6465 = vmatpush3.bf16.msra.mxu0 %v6891_v32  ;;  %v6938_v32 = vld [vmem:[%s7115_s6 + $0xe8] sm:$0xff]  }
  0xc4   : >> { %6497 = vmatpush3.bf16.msra.mxu1 %v6892_v33  ;;  %6466 = vmatprep.subr.bf16.mxu0 %v6893_v35  ;;  %v2376_v33 = vld [vmem:[%s7499_s14 + $0x50] sm:$0xff] }
  0xc5   : >> { %6498 = vmatprep.subr.bf16.mxu1 %v6894_v36  ;;  %6420 = vmatprep.mubr.bf16.mxu0 %v6895_v37 }
  0xc6   : >> { %6452 = vmatprep.mubr.bf16.mxu1 %v7451_v38 }
  0xc7   : >> { %6467 = vmatpush3.bf16.msra.mxu0 %v6893_v35  ;;  %v6939_v35 = vld [vmem:[%s7115_s6 + $0xf0] sm:$0xff]  }
  0xc8   : >> { %6499 = vmatpush3.bf16.msra.mxu1 %v6894_v36  ;;  %6468 = vmatprep.subr.bf16.mxu0 %v6899_v40  ;;  %v6941_v36 = vld [vmem:[%s8336_s1 + $0x1a8] sm:$0xff]  }
  0xc9   : >> { %6500 = vmatprep.subr.bf16.mxu1 %v6900_v41 }
  0xca   : >> { %6421 = vmatmul.mubr.bf16.gmra.mxu0 %v6897_v39  ;;  %v6942_v39 = vld [vmem:[%s8336_s1 + $0x160] sm:$0xff]  }
  0xcb   : >> { %6453 = vmatmul.mubr.bf16.gmra.mxu1 %v6898_v42  ;;  %6469 = vmatpush3.bf16.msra.mxu0 %v6899_v40 }
  0xcc   : >> { %6501 = vmatpush3.bf16.msra.mxu1 %v6900_v41  ;;  %6470 = vmatprep.subr.bf16.mxu0 %v6901_v43  ;;  %v2377_v41 = vld [vmem:[%s7499_s14 + $0x58] sm:$0xff] }
  0xcd   : >> { %6502 = vmatprep.subr.bf16.mxu1 %v6902_v44  ;;  %6472 = vmatprep.mubr.bf16.mxu0 %v6903_v45 }
  0xce   : >> { %6504 = vmatprep.mubr.bf16.mxu1 %v6904_v46  ;;  %v6944_v46 = vld [vmem:[%s7115_s6 + $0xf0] sm:$0xff]  }
  0xcf   : >> { %6471 = vmatpush3.bf16.msra.mxu0 %v6901_v43 }
  0xd0   : >> { %6503 = vmatpush3.bf16.msra.mxu1 %v6902_v44  ;;  %6520 = vmatprep.subr.bf16.mxu0 %v6906_v47  ;;  %v6943_v44 = vld [vmem:[%s8336_s1 + $0x1a0] sm:$0xff]  }
  0xd1   : >> { %6552 = vmatprep.subr.bf16.mxu1 %v6907_v48 }
  0xd2   : >> { %6473 = vmatmul.mubr.bf16.vlgmr.msra.gmra.mxu0 %v7386_v14  ;;  %v6929_v14 = vld [vmem:[%s7115_s6 + $0xd8] sm:$0xff]  }
  0xd3   : >> { %6505 = vmatmul.mubr.bf16.vlgmr.msra.gmra.mxu1 %v6905_v49  ;;  %6521 = vmatpush3.bf16.msra.mxu0 %v6906_v47  ;;  %v6945_v49 = vld [vmem:[%s7115_s6 + $0xf8] sm:$0xff]  }
  0xd4   : >> { %6553 = vmatpush3.bf16.msra.mxu1 %v6907_v48  ;;  %6522 = vmatprep.subr.bf16.mxu0 %v6908_v50 }
  0xd5   : >> { %6554 = vmatprep.subr.bf16.mxu1 %v6909_v51  ;;  %6476 = vmatprep.mubr.bf16.mxu0 %v7397_v18  ;;  %v2373_v18 = vld [vmem:[%s7499_s14 + $0x38] sm:$0xff] }
  0xd6   : >> { %6508 = vmatprep.mubr.bf16.mxu1 %v6910_v52  ;;  %2419 = vperm.xlu1 %6733, %v2373_v18  }
  0xd7   : >> { %6523 = vmatpush3.bf16.msra.mxu0 %v6908_v50 }
  0xd8   : >> { %6555 = vmatpush3.bf16.msra.mxu1 %v6909_v51  ;;  %6524 = vmatprep.subr.bf16.mxu0 %v6912_v53  ;;  %v2378_v51 = vld [vmem:[%s7499_s14 + $0x60] sm:$0xff] }
  0xd9   : >> { %6556 = vmatprep.subr.bf16.mxu1 %v6913_v54 }
  0xda   : >> { %6477 = vmatmul.mubr.bf16.gmra.mxu0 %v7407_v22  ;;  %v2374_v22 = vld [vmem:[%s7499_s14 + $0x40] sm:$0xff]  ;;  %2429 = vperm.xlu1 %6733, %v2375_v29  }
  0xdb   : >> { %6509 = vmatmul.mubr.bf16.gmra.mxu1 %v6911_v55  ;;  %6525 = vmatpush3.bf16.msra.mxu0 %v6912_v53  ;;  %v6948_v55 = vld [vmem:[%s8336_s1 + $0x158] sm:$0xff]  }
  0xdc   : >> { %6557 = vmatpush3.bf16.msra.mxu1 %v6913_v54  ;;  %6526 = vmatprep.subr.bf16.mxu0 %v6914_v56  ;;  %v6946_v54 = vld [vmem:[%s7115_s6 + $0xf8] sm:$0xff]  }
  0xdd   : >> { %6558 = vmatprep.subr.bf16.mxu1 %v6915_v57  ;;  %6480 = vmatprep.mubr.bf16.mxu0 %v7419_v26  ;;  %v6937_v26 = vld [vmem:[%s7115_s6 + $0xe8] sm:$0xff]  }
  0xde   : >> { %6512 = vmatprep.mubr.bf16.mxu1 %v6916_v58  ;;  %2424 = vperm.xlu0 %6732, %v2374_v22   ;;  %v6947_v58 = vld [vmem:[%s7115_s6 + $0x100] sm:$0xff]  }
  0xdf   : >> { %6527 = vmatpush3.bf16.msra.mxu0 %v6914_v56  ;;  %2439 = vperm.xlu1 %6733, %v2377_v41   ;;  %v2379_v56 = vld [vmem:[%s7499_s14 + $0x68] sm:$0xff]  ;;  %v6958_v22 = vld [vmem:[%s8336_s1 + $0x140] sm:$0xff]  }
  0xe0   : >> { %6559 = vmatpush3.bf16.msra.mxu1 %v6915_v57  ;;  %6528 = vmatprep.subr.bf16.mxu0 %v6918_v60 }
  0xe1   : >> { %6560 = vmatprep.subr.bf16.mxu1 %v6919_v61 }
  0xe2   : >> { %6481 = vmatmul.mubr.bf16.gmra.mxu0 %v7429_v30  ;;  %2434 = vperm.xlu0 %6732, %v2376_v33  }
  0xe3   : >> { %6513 = vmatmul.mubr.bf16.gmra.mxu1 %v6917_v62  ;;  %6529 = vmatpush3.bf16.msra.mxu0 %v6918_v60  ;;  %v6950_v62 = vld [vmem:[%s8336_s1 + $0x150] sm:$0xff]  }
  0xe4   : >> { %6561 = vmatpush3.bf16.msra.mxu1 %v6919_v61  ;;  %6530 = vmatprep.subr.bf16.mxu0 %v6920_v63 }
  0xe5   : >> { %6562 = vmatprep.subr.bf16.mxu1 %v6921_v3  ;;  %6484 = vmatprep.mubr.bf16.mxu0 %v7441_v34 }
  0xe6   : >> { %6516 = vmatprep.mubr.bf16.mxu1 %v6922_v4  ;;  %2444 = vperm.xlu0 %6732, %v2378_v51   ;;  %v6951_v4 = vld [vmem:[%s8336_s1 + $0x190] sm:$0xff]  }
  0xe7   : >> { %6531 = vmatpush3.bf16.msra.mxu0 %v6920_v63  ;;  %2449 = vperm.xlu1 %6733, %v2379_v56   ;;  %v6968_v51 = vld [vmem:[%s7115_s6 + $0xf0] sm:$0xff]  }
  0xe8   : >> { %6563 = vmatpush3.bf16.msra.mxu1 %v6921_v3  ;;  %6532 = vmatprep.subr.bf16.mxu0 %v6924_v5 }
  0xe9   : >> { %6564 = vmatprep.subr.bf16.mxu1 %v6925_v8 }
  0xea   : >> { %6485 = vmatmul.mubr.bf16.gmra.mxu0 %v7451_v38  ;;  %2454 = vperm.xlu0 %6732, %v2380_v1  }
  0xeb   : >> { %6517 = vmatmul.mubr.bf16.gmra.mxu1 %v6923_v9  ;;  %6533 = vmatpush3.bf16.msra.mxu0 %v6924_v5  ;;  %v6953_v9 = vld [vmem:[%s7115_s6 + $0x108] sm:$0xff]  }
  0xec   : >> { %6565 = vmatpush3.bf16.msra.mxu1 %v6925_v8  ;;  %6534 = vmatprep.subr.bf16.mxu0 %v6926_v10 }
  0xed   : >> { %6566 = vmatprep.subr.bf16.mxu1 %v6927_v11  ;;  %6536 = vmatprep.mubr.bf16.mxu0 %v6928_v12 }
  0xee   : >> { %6568 = vmatprep.mubr.bf16.mxu1 %v6929_v14  ;;  %v6954_v14 = vld [vmem:[%s7115_s6 + $0x108] sm:$0xff]  }
  0xef   : >> { %6535 = vmatpush3.bf16.msra.mxu0 %v6926_v10 }
  0xf0   : >> { %6567 = vmatpush3.bf16.msra.mxu1 %v6927_v11  ;;  %6584 = vmatprep.subr.bf16.mxu0 %v6932_v17  ;;  %v2381_v11 = vld [vmem:[%s7499_s14 + $0x78] sm:$0xff] }
  0xf1   : >> { %6616 = vmatprep.subr.bf16.mxu1 %v6933_v20  ;;  %2459 = vperm.xlu1 %6733, %v2381_v11  }
  0xf2   : >> { %v6154_v25 = vpop.f32.mrf.mxu0  ;;  %6537 = vmatmul.mubr.bf16.vlgmr.msra.gmra.mxu0 %v6930_v16 }
  0xf3   : >> { %v6186_v27 = vpop.f32.mrf.mxu1  ;;  %6569 = vmatmul.mubr.bf16.vlgmr.msra.gmra.mxu1 %v6931_v19  ;;  %6585 = vmatpush3.bf16.msra.mxu0 %v6932_v17  ;;  %v6957_v17 = vld [vmem:[%s8336_s1 + $0x188] sm:$0xff]  }
  0xf4   : >> { %v7568_v30 = vadd.f32 %v6186_v27, %v6154_v25  ;;  %6617 = vmatpush3.bf16.msra.mxu1 %v6933_v20  ;;  %v410_v31 = vpop.f32.mrf.mxu0  ;;  %6586 = vmatprep.subr.bf16.mxu0 %v6934_v21  ;;  %v6955_v20 = vld [vmem:[%s7115_s6 + $0x110] sm:$0xff]   ;;  %v6959_v25 = vld [vmem:[%s8336_s1 + $0x180] sm:$0xff]  }
  0xf5   : >> { %v561_v34 = vpop.f32.mrf.mxu1  ;;  %6618 = vmatprep.subr.bf16.mxu1 %v6935_v23  ;;  %6540 = vmatprep.mubr.bf16.mxu0 %v6936_v24  ;;  %v6960_v27 = vld [vmem:[%s7115_s6 + $0xe0] sm:$0xff]  }
  0xf6   : >> { %v7576_v37 = vadd.f32 %v561_v34, %v410_v31  ;;  %v6155_v38 = vpop.f32.mrf.mxu0  ;;  %6572 = vmatprep.mubr.bf16.mxu1 %v6937_v26  ;;  %v6961_v31 = vld [vmem:[%s7115_s6 + $0x160] sm:$0xff]  }
  0xf7   : >> { %v6187_v40 = vpop.f32.mrf.mxu1  ;;  %6587 = vmatpush3.bf16.msra.mxu0 %v6934_v21 }
  0xf8   : >> { %v7582_v42 = vadd.f32 %v6187_v40, %v6155_v38  ;;  %6619 = vmatpush3.bf16.msra.mxu1 %v6935_v23  ;;  %v413_v43 = vpop.f32.mrf.mxu0  ;;  %6588 = vmatprep.subr.bf16.mxu0 %v6940_v28 }
  0xf9   : >> { %v564_v45 = vpop.f32.mrf.mxu1  ;;  %6620 = vmatprep.subr.bf16.mxu1 %v6941_v36 }
  0xfa   : >> { %v7588_v47 = vadd.f32 %v564_v45, %v413_v43  ;;  %v6158_v48 = vpop.f32.mrf.mxu0  ;;  %6541 = vmatmul.mubr.bf16.gmra.mxu0 %v6938_v32  ;;  %v6963_v43 = vld [vmem:[%s7115_s6 + $0x168] sm:$0xff]   ;;  %v6966_v45 = vld [vmem:[%s8336_s1 + $0x1f0] sm:$0xff]  }
  0xfb   : >> { %v6190_v50 = vpop.f32.mrf.mxu1  ;;  %6573 = vmatmul.mubr.bf16.gmra.mxu1 %v6939_v35  ;;  %6589 = vmatpush3.bf16.msra.mxu0 %v6940_v28  ;;  %v6962_v35 = vld [vmem:[%s7115_s6 + $0xe8] sm:$0xff]  }
  0xfc   : >> { %v7592_v52 = vadd.f32 %v6190_v50, %v6158_v48  ;;  %6621 = vmatpush3.bf16.msra.mxu1 %v6941_v36  ;;  %v426_v53 = vpop.f32.mrf.mxu0  ;;  %6590 = vmatprep.subr.bf16.mxu0 %v6942_v39  ;;  %v6964_v36 = vld [vmem:[%s8336_s1 + $0x1f8] sm:$0xff]  }
  0xfd   : >> { %v577_v57 = vpop.f32.mrf.mxu1  ;;  %6622 = vmatprep.subr.bf16.mxu1 %v6943_v44  ;;  %6544 = vmatprep.mubr.bf16.mxu0 %v6944_v46 }
  0xfe   : >> { %v7603_v60 = vadd.f32 %v577_v57, %v426_v53  ;;  %v6159_v61 = vpop.f32.mrf.mxu0  ;;  %6576 = vmatprep.mubr.bf16.mxu1 %v6945_v49  ;;  %v6967_v49 = vld [vmem:[%s8336_s1 + $0x230] sm:$0xff]  }
  0xff   : >> { %v6191_v63 = vpop.f32.mrf.mxu1  ;;  %6591 = vmatpush3.bf16.msra.mxu0 %v6942_v39  ;;  %v6965_v39 = vld [vmem:[%s8336_s1 + $0x238] sm:$0xff]  }
 0x100   : >> { %v7609_v2 = vadd.f32 %v6191_v63, %v6159_v61  ;;  %6623 = vmatpush3.bf16.msra.mxu1 %v6943_v44  ;;  %v429_v3 = vpop.f32.mrf.mxu0  ;;  %6592 = vmatprep.subr.bf16.mxu0 %v6948_v55  ;;  %v6972_v61 = vld [vmem:[%s8336_s1 + $0x1e8] sm:$0xff]  }
 0x101   : >> { %v580_v5 = vpop.f32.mrf.mxu1  ;;  %6624 = vmatprep.subr.bf16.mxu1 %v6949_v59 }
 0x102   : >> { %v7615_v7 = vadd.f32 %v580_v5, %v429_v3  ;;  %v6162_v8 = vpop.f32.mrf.mxu0  ;;  %6545 = vmatmul.mubr.bf16.gmra.mxu0 %v6946_v54 }
 0x103   : >> { %v6194_v10 = vpop.f32.mrf.mxu1  ;;  %6577 = vmatmul.mubr.bf16.gmra.mxu1 %v6947_v58  ;;  %6593 = vmatpush3.bf16.msra.mxu0 %v6948_v55  ;;  %v6969_v55 = vld [vmem:[%s7115_s6 + $0x170] sm:$0xff]  }
 0x104   : >> { %v7619_v12 = vadd.f32 %v6194_v10, %v6162_v8  ;;  %6625 = vmatpush3.bf16.msra.mxu1 %v6949_v59  ;;  %v442_v13 = vpop.f32.mrf.mxu0  ;;  %6594 = vmatprep.subr.bf16.mxu0 %v6950_v62  ;;  %v6970_v59 = vld [vmem:[%s7115_s6 + $0xf8] sm:$0xff]   ;;  %v6975_v10 = vld [vmem:[%s8336_s1 + $0x220] sm:$0xff]  }
 0x105   : >> { %v593_v16 = vpop.f32.mrf.mxu1  ;;  %6626 = vmatprep.subr.bf16.mxu1 %v6951_v4  ;;  %6548 = vmatprep.mubr.bf16.mxu0 %v6952_v6 }
 0x106   : >> { %v7628_v18 = vadd.f32 %v593_v16, %v442_v13  ;;  %v6163_v19 = vpop.f32.mrf.mxu0  ;;  %6580 = vmatprep.mubr.bf16.mxu1 %v6953_v9  ;;  %v6977_v16 = vld [vmem:[%s7115_s6 + $0x180] sm:$0xff]  }
 0x107   : >> { %v6195_v21 = vpop.f32.mrf.mxu1  ;;  %6595 = vmatpush3.bf16.msra.mxu0 %v6950_v62 }
 0x108   : >> { %v7634_v23 = vadd.f32 %v6195_v21, %v6163_v19  ;;  %6627 = vmatpush3.bf16.msra.mxu1 %v6951_v4  ;;  %v445_v24 = vpop.f32.mrf.mxu0  ;;  %6596 = vmatprep.subr.bf16.mxu0 %v6956_v15  ;;  %v6971_v4 = vld [vmem:[%s7115_s6 + $0x178] sm:$0xff]  }
 0x109   : >> { %v596_v26 = vpop.f32.mrf.mxu1  ;;  %6628 = vmatprep.subr.bf16.mxu1 %v6957_v17 }
 0x10a   : >> { %v7640_v28 = vadd.f32 %v596_v26, %v445_v24  ;;  %v6166_v29 = vpop.f32.mrf.mxu0  ;;  %6549 = vmatmul.mubr.bf16.gmra.mxu0 %v6954_v14 }
 0x10b   : >> { %v6198_v32 = vpop.f32.mrf.mxu1  ;;  %6581 = vmatmul.mubr.bf16.gmra.mxu1 %v6955_v20  ;;  %6597 = vmatpush3.bf16.msra.mxu0 %v6956_v15 }
 0x10c   : >> { %v7643_v33 = vadd.f32 %v6198_v32, %v6166_v29  ;;  %6629 = vmatpush3.bf16.msra.mxu1 %v6957_v17  ;;  %v458_v34 = vpop.f32.mrf.mxu0  ;;  %6598 = vmatprep.subr.bf16.mxu0 %v6958_v22  ;;  %v6979_v29 = vld [vmem:[%s7115_s6 + $0x188] sm:$0xff]  }
 0x10d   : >> { %v609_v38 = vpop.f32.mrf.mxu1  ;;  %6630 = vmatprep.subr.bf16.mxu1 %v6959_v25  ;;  %6600 = vmatprep.mubr.bf16.mxu0 %v6960_v27 }
 0x10e   : >> { %v7652_v40 = vadd.f32 %v609_v38, %v458_v34  ;;  %v6167_v41 = vpop.f32.mrf.mxu0  ;;  %6632 = vmatprep.mubr.bf16.mxu1 %v6961_v31 }
 0x10f   : >> { %v6199_v44 = vpop.f32.mrf.mxu1  ;;  %6599 = vmatpush3.bf16.msra.mxu0 %v6958_v22  ;;  %v6978_v22 = vld [vmem:[%s7115_s6 + $0x108] sm:$0xff]  }
 0x110   : >> { %v7658_v46 = vadd.f32 %v6199_v44, %v6167_v41  ;;  %6631 = vmatpush3.bf16.msra.mxu1 %v6959_v25  ;;  %v461_v48 = vpop.f32.mrf.mxu0  ;;  %6648 = vmatprep.subr.bf16.mxu0 %v6964_v36  ;;  %v6985_v44 = vld [vmem:[%s7115_s6 + $0x190] sm:$0xff]  }
 0x111   : >> { %v612_v50 = vpop.f32.mrf.mxu1  ;;  %6680 = vmatprep.subr.bf16.mxu1 %v6965_v39 }
 0x112   : >> { %v7664_v53 = vadd.f32 %v612_v50, %v461_v48  ;;  %v6218_v54 = vpop.f32.mrf.mxu0  ;;  %6601 = vmatmul.mubr.bf16.vlgmr.msra.gmra.mxu0 %v6962_v35  ;;  %v4675_v50 = vld [vmem:[%s7499_s14 + $0x88] sm:$0xff] }
 0x113   : >> { %v852_v56 = vadd.f32 %v6218_v54, %v7568_v30  ;;  %v6250_v57 = vpop.f32.mrf.mxu1  ;;  %6633 = vmatmul.mubr.bf16.vlgmr.msra.gmra.mxu1 %v6963_v43  ;;  %6649 = vmatpush3.bf16.msra.mxu0 %v6964_v36  ;;  %v6973_v30 = vld [vmem:[%s8336_s1 + $0x228] sm:$0xff]   ;;  %v6983_v36 = vld [vmem:[%s8336_s1 + $0x210] sm:$0xff]   ;;  %v4674_v54 = vld [vmem:[%s7499_s14 + $0x80] sm:$0xff] }
 0x114   : >> { %6681 = vmatpush3.bf16.msra.mxu1 %v6965_v39  ;;  %v787_v58 = vpop.f32.mrf.mxu0  ;;  %6650 = vmatprep.subr.bf16.mxu0 %v6966_v45 }
 0x115   : >> { %v7672_v62 = vadd.f32 %v6250_v57, %v852_v56  ;;  %v850_v63 = vadd.f32 %v787_v58, %v7576_v37  ;;  %v1033_v1 = vpop.f32.mrf.mxu1  ;;  %6682 = vmatprep.subr.bf16.mxu1 %v6967_v49  ;;  %6604 = vmatprep.mubr.bf16.mxu0 %v6968_v51  ;;  %v6974_v37 = vld [vmem:[%s8336_s1 + $0x1e0] sm:$0xff]   ;;  %v6989_v57 = vld [vmem:[%s8336_s1 + $0x208] sm:$0xff]  }
 0x116   : >> { %v6219_v3 = vpop.f32.mrf.mxu0  ;;  %6636 = vmatprep.mubr.bf16.mxu1 %v6969_v55  ;;  %4697 = vperm.xlu1 %6733, %v4675_v50  }
 0x117   : >> { %v7679_v5 = vadd.f32 %v1033_v1, %v850_v63  ;;  %v853_v6 = vadd.f32 %v6219_v3, %v7582_v42  ;;  %v6251_v8 = vpop.f32.mrf.mxu1  ;;  %6651 = vmatpush3.bf16.msra.mxu0 %v6966_v45  ;;  %v6976_v42 = vld [vmem:[%s7115_s6 + $0x100] sm:$0xff]   ;;  %4692 = vperm.xlu0 %6732, %v4674_v54   ;;  %v7000_v54 = vld [vmem:[%s7115_s6 + $0x188] sm:$0xff]  }
 0x118   : >> { %6683 = vmatpush3.bf16.msra.mxu1 %v6967_v49  ;;  %v790_v9 = vpop.f32.mrf.mxu0  ;;  %6652 = vmatprep.subr.bf16.mxu0 %v6972_v61 }
 0x119   : >> { %v7688_v11 = vadd.f32 %v6251_v8, %v853_v6  ;;  %v851_v13 = vadd.f32 %v790_v9, %v7588_v47  ;;  %v1036_v14 = vpop.f32.mrf.mxu1  ;;  %6684 = vmatprep.subr.bf16.mxu1 %v6973_v30  ;;  %v6980_v47 = vld [vmem:[%s8336_s1 + $0x1d8] sm:$0xff]   ;;  %v6992_v9 = vld [vmem:[%s7115_s6 + $0x168] sm:$0xff]  }
 0x11a   : >> { %v6222_v15 = vpop.f32.mrf.mxu0  ;;  %6605 = vmatmul.mubr.bf16.gmra.mxu0 %v6970_v59  ;;  %v6986_v59 = vld [vmem:[%s7115_s6 + $0x118] sm:$0xff]  }
 0x11b   : >> { %v7693_v17 = vadd.f32 %v1036_v14, %v851_v13  ;;  %v856_v19 = vadd.f32 %v6222_v15, %v7592_v52  ;;  %v6254_v20 = vpop.f32.mrf.mxu1  ;;  %6637 = vmatmul.mubr.bf16.gmra.mxu1 %v6971_v4  ;;  %6653 = vmatpush3.bf16.msra.mxu0 %v6972_v61  ;;  %v6981_v52 = vld [vmem:[%s8336_s1 + $0x218] sm:$0xff]   ;;  %v6990_v4 = vld [vmem:[%s8336_s1 + $0x1c0] sm:$0xff]   ;;  %v6993_v13 = vld [vmem:[%s7115_s6 + $0x170] sm:$0xff]  }
 0x11c   : >> { %6685 = vmatpush3.bf16.msra.mxu1 %v6973_v30  ;;  %v803_v21 = vpop.f32.mrf.mxu0  ;;  %6654 = vmatprep.subr.bf16.mxu0 %v6974_v37  ;;  %v6987_v61 = vld [vmem:[%s7115_s6 + $0x198] sm:$0xff]  }
 0x11d   : >> { %v7700_v24 = vadd.f32 %v6254_v20, %v856_v19  ;;  %v854_v25 = vadd.f32 %v803_v21, %v7603_v60  ;;  %v1049_v26 = vpop.f32.mrf.mxu1  ;;  %6686 = vmatprep.subr.bf16.mxu1 %v6975_v10  ;;  %6608 = vmatprep.mubr.bf16.mxu0 %v6976_v42  ;;  %v6982_v60 = vld [vmem:[%s8336_s1 + $0x1d0] sm:$0xff]   ;;  %v4679_v19 = vld [vmem:[%s7499_s14 + $0xa8] sm:$0xff] }
 0x11e   : >> { %v6223_v27 = vpop.f32.mrf.mxu0  ;;  %6640 = vmatprep.mubr.bf16.mxu1 %v6977_v16 }
 0x11f   : >> { %v7707_v31 = vadd.f32 %v1049_v26, %v854_v25  ;;  %v857_v32 = vadd.f32 %v6223_v27, %v7609_v2  ;;  %v6255_v34 = vpop.f32.mrf.mxu1  ;;  %6655 = vmatpush3.bf16.msra.mxu0 %v6974_v37  ;;  %v6984_v2 = vld [vmem:[%s7115_s6 + $0x110] sm:$0xff]   ;;  %v6995_v27 = vld [vmem:[%s7115_s6 + $0x178] sm:$0xff]  }
 0x120   : >> { %6687 = vmatpush3.bf16.msra.mxu1 %v6975_v10  ;;  %v806_v35 = vpop.f32.mrf.mxu0  ;;  %6656 = vmatprep.subr.bf16.mxu0 %v6980_v47 }
 0x121   : >> { %v7716_v38 = vadd.f32 %v6255_v34, %v857_v32  ;;  %v855_v39 = vadd.f32 %v806_v35, %v7615_v7  ;;  %v1052_v41 = vpop.f32.mrf.mxu1  ;;  %6688 = vmatprep.subr.bf16.mxu1 %v6981_v52  ;;  %v6988_v7 = vld [vmem:[%s8336_s1 + $0x1c8] sm:$0xff]   ;;  %v6997_v34 = vld [vmem:[%s7115_s6 + $0x180] sm:$0xff]  }
 0x122   : >> { %v6226_v43 = vpop.f32.mrf.mxu0  ;;  %6609 = vmatmul.mubr.bf16.gmra.mxu0 %v6978_v22 }
 0x123   : >> { %v7721_v45 = vadd.f32 %v1052_v41, %v855_v39  ;;  %v860_v48 = vadd.f32 %v6226_v43, %v7619_v12  ;;  %v6258_v49 = vpop.f32.mrf.mxu1  ;;  %6641 = vmatmul.mubr.bf16.gmra.mxu1 %v6979_v29  ;;  %6657 = vmatpush3.bf16.msra.mxu0 %v6980_v47  ;;  %v6994_v47 = vld [vmem:[%s7115_s6 + $0x170] sm:$0xff]   ;;  %v6996_v29 = vld [vmem:[%s7115_s6 + $0x178] sm:$0xff]  }
 0x124   : >> { %6689 = vmatpush3.bf16.msra.mxu1 %v6981_v52  ;;  %v819_v51 = vpop.f32.mrf.mxu0  ;;  %6658 = vmatprep.subr.bf16.mxu0 %v6982_v60  ;;  %v4681_v39 = vld [vmem:[%s7499_s14 + $0xb8] sm:$0xff]  ;;  %v4680_v43 = vld [vmem:[%s7499_s14 + $0xb0] sm:$0xff] }
 0x125   : >> { %v7729_v55 = vadd.f32 %v6258_v49, %v860_v48  ;;  %v858_v56 = vadd.f32 %v819_v51, %v7628_v18  ;;  %v1065_v12 = vpop.f32.mrf.mxu1  ;;  %6690 = vmatprep.subr.bf16.mxu1 %v6983_v36  ;;  %6612 = vmatprep.mubr.bf16.mxu0 %v6984_v2  ;;  %v4677_v18 = vld [vmem:[%s7499_s14 + $0x98] sm:$0xff]  ;;  %v4683_v48 = vld [vmem:[%s7499_s14 + $0xc8] sm:$0xff] }
 0x126   : >> { %v6227_v58 = vpop.f32.mrf.mxu0  ;;  %6644 = vmatprep.mubr.bf16.mxu1 %v6985_v44  ;;  %4707 = vperm.xlu1 %6733, %v4677_v18   ;;  %v6999_v51 = vld [vmem:[%s7115_s6 + $0x188] sm:$0xff]  }
 0x127   : >> { %v7737_v63 = vadd.f32 %v1065_v12, %v858_v56  ;;  %v861_v1 = vadd.f32 %v6227_v58, %v7634_v23  ;;  %v6259_v30 = vpop.f32.mrf.mxu1  ;;  %6659 = vmatpush3.bf16.msra.mxu0 %v6982_v60  ;;  %v6991_v23 = vld [vmem:[%s8336_s1 + $0x200] sm:$0xff]  }
 0x128   : >> { %6691 = vmatpush3.bf16.msra.mxu1 %v6983_v36  ;;  %v822_v3 = vpop.f32.mrf.mxu0  ;;  %6660 = vmatprep.subr.bf16.mxu0 %v6988_v7  ;;  %v4682_v56 = vld [vmem:[%s7499_s14 + $0xc0] sm:$0xff] }
 0x129   : >> { %v7744_v6 = vadd.f32 %v6259_v30, %v861_v1  ;;  %v859_v8 = vadd.f32 %v822_v3, %v7640_v28  ;;  %v1068_v37 = vpop.f32.mrf.mxu1  ;;  %6692 = vmatprep.subr.bf16.mxu1 %v6989_v57  ;;  %v4676_v28 = vld [vmem:[%s7499_s14 + $0x90] sm:$0xff] }
 0x12a   : >> { %v6230_v10 = vpop.f32.mrf.mxu0  ;;  %6613 = vmatmul.mubr.bf16.gmra.mxu0 %v6986_v59  ;;  %4702 = vperm.xlu0 %6732, %v4676_v28   ;;  %v4685_v59 = vld [vmem:[%s7499_s14 + $0xd8] sm:$0xff]  ;;  %v4684_v30 = vld [vmem:[%s7499_s14 + $0xd0] sm:$0xff] }
 0x12b   : >> { %v7752_v14 = vadd.f32 %v1068_v37, %v859_v8  ;;  %v864_v42 = vadd.f32 %v6230_v10, %v7643_v33  ;;  %v6262_v15 = vpop.f32.mrf.mxu1  ;;  %6645 = vmatmul.mubr.bf16.gmra.mxu1 %v6987_v61  ;;  %6661 = vmatpush3.bf16.msra.mxu0 %v6988_v7  ;;  %v6998_v7 = vld [vmem:[%s7115_s6 + $0x180] sm:$0xff]   ;;  %v7002_v37 = vld [vmem:[%s7115_s6 + $0x190] sm:$0xff]   ;;  %v7004_v10 = vld [vmem:[%s7115_s6 + $0x198] sm:$0xff]  }
 0x12c   : >> { %6693 = vmatpush3.bf16.msra.mxu1 %v6989_v57  ;;  %v835_v16 = vpop.f32.mrf.mxu0  ;;  %6662 = vmatprep.subr.bf16.mxu0 %v6990_v4  ;;  %v7001_v57 = vld [vmem:[%s7115_s6 + $0x190] sm:$0xff]  }
 0x12d   : >> { %v7757_v20 = vadd.f32 %v6262_v15, %v864_v42  ;;  %v862_v21 = vadd.f32 %v835_v16, %v7652_v40  ;;  %v1081_v22 = vpop.f32.mrf.mxu1  ;;  %6694 = vmatprep.subr.bf16.mxu1 %v6991_v23  ;;  %6664 = vmatprep.mubr.bf16.mxu0 %v6992_v9  ;;  %v4678_v40 = vld [vmem:[%s7499_s14 + $0xa0] sm:$0xff]  ;;  %v7003_v9 = vld [vmem:[%s7115_s6 + $0x198] sm:$0xff]  }
 0x12e   : >> { %v6231_v33 = vpop.f32.mrf.mxu0  ;;  %6696 = vmatprep.mubr.bf16.mxu1 %v6993_v13  ;;  %4717 = vperm.xlu1 %6733, %v4679_v19   ;;  %v4686_v13 = vld [vmem:[%s7499_s14 + $0xe0] sm:$0xff]  ;;  %v4689_v16 = vld [vmem:[%s7499_s14 + $0xf8] sm:$0xff] }
 0x12f   : >> { %v7761_v25 = vadd.f32 %v1081_v22, %v862_v21  ;;  %v865_v26 = vadd.f32 %v6231_v33, %v7658_v46  ;;  %v6263_v52 = vpop.f32.mrf.mxu1  ;;  %6663 = vmatpush3.bf16.msra.mxu0 %v6990_v4  ;;  %4712 = vperm.xlu0 %6732, %v4678_v40   ;;  %v4687_v4 = vld [vmem:[%s7499_s14 + $0xe8] sm:$0xff]  ;;  %v7005_v15 = vld [vmem:[%s7115_s6 + $0x1a0] sm:$0xff]   ;;  %v4688_v22 = vld [vmem:[%s7499_s14 + $0xf0] sm:$0xff] }
 0x130   : >> { %6695 = vmatpush3.bf16.msra.mxu1 %v6991_v23  ;;  %v838_v32 = vpop.f32.mrf.mxu0 }
 0x131   : >> { %8340 = vst [vmem:[#allocation2_spill] sm:$0xff] %v7761_v25  ;;  %v7768_v60 = vadd.f32 %v6263_v52, %v865_v26  ;;  %v863_v35 = vadd.f32 %v838_v32, %v7664_v53  ;;  %v1084_v36 = vpop.f32.mrf.mxu1  ;;  %v7006_v52 = vld [vmem:[%s7115_s6 + $0x1a0] sm:$0xff]  }
 0x132   : >> { %v7772_v41 = vpop.f32.mrf.mxu0  ;;  %6665 = vmatmul.mubr.bf16.vlgmr.msra.gmra.mxu0 %v6994_v47  ;;  %4727 = vperm.xlu1 %6733, %v4681_v39  }
 0x133   : >> { %8341 = vst [vmem:[#allocation3_spill] sm:$0xff] %v7768_v60  ;;  %v7774_v46 = vadd.f32 %v1084_v36, %v863_v35  ;;  %v7776_v2 = vpop.f32.mrf.mxu1  ;;  %6697 = vmatmul.mubr.bf16.vlgmr.msra.gmra.mxu1 %v6995_v27  ;;  %6668 = vmatprep.mubr.bf16.mxu0 %v6996_v29  ;;  %v7007_v29 = vld [vmem:[%s7115_s6 + $0x1a8] sm:$0xff]   ;;  %v1340_v60 = vadd.f32 %v7772_v41, %v7672_v62  ;;  %s5736_s6 = sshll.u32 %s7022_s5, 7  ;;  %s225_s5 = sadd.s32 1, %s7022_s5  }
 0x134   : >> { %v7779_v44 = vpop.f32.mrf.mxu0  ;;  %6700 = vmatprep.mubr.bf16.mxu1 %v6997_v34  ;;  %4722 = vperm.xlu0 %6732, %v4680_v43   ;;  %s7985_s14 = scalar_lea.vmem %s7076_s30, %s5736_s6  ;;  %p222_p4 = scmp.ge.s32.totalorder %s225_s5, 17  }
 0x135   : >> { %8342 = vst [vmem:[#allocation4_spill] sm:$0xff] %v7774_v46  ;;  %v7781_v53 = vpop.f32.mrf.mxu1 }
 0x136   : >> { %v7784_v49 = vpop.f32.mrf.mxu0  ;;  %4737 = vperm.xlu1 %6733, %v4683_v48  }
 0x137   : >> { %v7787_v50 = vpop.f32.mrf.mxu1  ;;  %v1341_v62 = vadd.f32 %v7784_v49, %v7688_v11 }
 0x138   : >> { %v7792_v12 = vpop.f32.mrf.mxu0  ;;  %4732 = vperm.xlu0 %6732, %v4682_v56  }
 0x139   : >> { %v7795_v58 = vpop.f32.mrf.mxu1  ;;  %v1583_v11 = vadd.f32 %v7787_v50, %v1341_v62 }
 0x13a   : >> { %v7798_v61 = vpop.f32.mrf.mxu0  ;;  %6669 = vmatmul.mubr.bf16.gmra.mxu0 %v6998_v7  ;;  %4747 = vperm.xlu1 %6733, %v4685_v59  }
 0x13b   : >> { %v7800_v1 = vpop.f32.mrf.mxu1  ;;  %6701 = vmatmul.mubr.bf16.gmra.mxu1 %v6999_v51  ;;  %6672 = vmatprep.mubr.bf16.mxu0 %v7000_v54 }
 0x13c   : >> { %v7803_v18 = vpop.f32.mrf.mxu0  ;;  %6704 = vmatprep.mubr.bf16.mxu1 %v7001_v57  ;;  %4742 = vperm.xlu0 %6732, %v4684_v30  }
 0x13d   : >> { %v7805_v3 = vpop.f32.mrf.mxu1 }
 0x13e   : >> { %v7808_v8 = vpop.f32.mrf.mxu0  ;;  %4757 = vperm.xlu1 %6733, %v4687_v4  }
 0x13f   : >> { %v7811_v23 = vpop.f32.mrf.mxu1 }
 0x140   : >> { %v7816_v42 = vpop.f32.mrf.mxu0  ;;  %4752 = vperm.xlu0 %6732, %v4686_v13  }
 0x141   : >> { %v7819_v28 = vpop.f32.mrf.mxu1 }
 0x142   : >> { %v7822_v19 = vpop.f32.mrf.mxu0  ;;  %6673 = vmatmul.mubr.bf16.gmra.mxu0 %v7002_v37  ;;  %4767 = vperm.xlu1 %6733, %v4689_v16  }
 0x143   : >> { %v7824_v21 = vpop.f32.mrf.mxu1  ;;  %6705 = vmatmul.mubr.bf16.gmra.mxu1 %v7003_v9  ;;  %6676 = vmatprep.mubr.bf16.mxu0 %v7004_v10 }
 0x144   : >> { %v7827_v33 = vpop.f32.mrf.mxu0  ;;  %6708 = vmatprep.mubr.bf16.mxu1 %v7005_v15  ;;  %4762 = vperm.xlu0 %6732, %v4688_v22  }
 0x145   : >> { %v7829_v47 = vpop.f32.mrf.mxu1 }
 0x146   : >> { %v7831_v26 = vpop.f32.mrf.mxu0 }
 0x147   : >> { %v7834_v27 = vpop.f32.mrf.mxu1 }
 0x148   : >> { %v7837_v40 = vpop.f32.mrf.mxu0 }
 0x149   : >> { %v7839_v32 = vpop.f32.mrf.mxu1 }
 0x14a   : >> { %8343 = vst [vmem:[#allocation5_spill] sm:$0xff] %v7839_v32  ;;  %v7841_v34 = vpop.f32.mrf.mxu0  ;;  %6677 = vmatmul.mubr.bf16.gmra.mxu0 %v7006_v52  ;;  %v7889_v32 = vpop.permute.xlu1 %2394 }
 0x14b   : >> { %v7843_v35 = vpop.f32.mrf.mxu1  ;;  %6709 = vmatmul.mubr.bf16.gmra.mxu1 %v7007_v29 }
 0x14c   : >> { %8344 = vst [vmem:[#allocation6_spill] sm:$0xff] %v7843_v35  ;;  %v7845_v36 = vpop.f32.mrf.mxu0 }
 0x14d   : >> { %8345 = vst [vmem:[#allocation7_spill] sm:$0xff] %v7845_v36  ;;  %v7847_v39 = vpop.f32.mrf.mxu1  ;;  %v7885_v36 = vpop.permute.xlu0 %2384 }
 0x14e   : >> { %8346 = vst [vmem:[#allocation8_spill] sm:$0xff] %v7847_v39  ;;  %v7849_v43 = vpop.f32.mrf.mxu0  ;;  %8357 = vst [vmem:[#allocation19_spill] sm:$0xff] %v7885_v36 }
 0x14f   : >> { %8347 = vst [vmem:[#allocation9_spill] sm:$0xff] %v7849_v43  ;;  %v7851_v48 = vpop.f32.mrf.mxu1 }
 0x150   : >> { %8348 = vst [vmem:[#allocation10_spill] sm:$0xff] %v7851_v48  ;;  %v7853_v7 = vpop.f32.mrf.mxu0 }
 0x151   : >> { %8349 = vst [vmem:[#allocation11_spill] sm:$0xff] %v7853_v7  ;;  %v7855_v51 = vpop.f32.mrf.mxu1 }
 0x152   : >> { %8350 = vst [vmem:[#allocation12_spill] sm:$0xff] %v7855_v51  ;;  %v6346_v54 = vpop.f32.mrf.mxu0 }
 0x153   : >> { %v6378_v56 = vpop.f32.mrf.mxu1 }
 0x154   : >> { %v1763_v57 = vpop.f32.mrf.mxu0 }
 0x155   : >> { %v2005_v59 = vpop.f32.mrf.mxu1 }
 0x156   : >> { %v6347_v30 = vpop.f32.mrf.mxu0 }
 0x157   : >> { %v6379_v4 = vpop.f32.mrf.mxu1 }
 0x158   : >> { %v1766_v37 = vpop.f32.mrf.mxu0 }
 0x159   : >> { %v7857_v9 = vpop.f32.mrf.mxu1 }
 0x15a   : >> { %v6350_v10 = vpop.f32.mrf.mxu0 }
 0x15b   : >> { %v7859_v13 = vpop.f32.mrf.mxu1 }
 0x15c   : >> { %v1779_v15 = vpop.f32.mrf.mxu0 }
 0x15d   : >> { %v7861_v16 = vpop.f32.mrf.mxu1 }
 0x15e   : >> { %v7863_v22 = vpop.f32.mrf.mxu0 }
 0x15f   : >> { %v7865_v52 = vpop.f32.mrf.mxu1 }
 0x160   : >> { %v7867_v29 = vpop.f32.mrf.mxu0 }
 0x161   : >> { %v7869_v51 = vpop.f32.mrf.mxu1 }
 0x162   : >> { %8351 = vst [vmem:[#allocation13_spill] sm:$0xff] %v7869_v51  ;;  %v7871_v48 = vpop.f32.mrf.mxu0 }
 0x163   : >> { %v7873_v39 = vpop.f32.mrf.mxu1 }
 0x164   : >> { %8352 = vst [vmem:[#allocation14_spill] sm:$0xff] %v7873_v39  ;;  %v7875_v7 = vpop.f32.mrf.mxu0  ;;  %v1338_v39 = vadd.f32 %v7779_v44, %v7679_v5  ;;  %v7909_v44 = vpop.permute.xlu0 %2389 }
 0x165   : >> { %8353 = vst [vmem:[#allocation15_spill] sm:$0xff] %v7875_v7  ;;  %v7877_v46 = vpop.f32.mrf.mxu1 }
 0x166   : >> { %8354 = vst [vmem:[#allocation16_spill] sm:$0xff] %v7877_v46  ;;  %v7879_v43 = vpop.f32.mrf.mxu0  ;;  %v1582_v46 = vadd.f32 %v7776_v2, %v1340_v60  ;;  %v7913_v60 = vpop.permute.xlu1 %2399  ;;  %v1344_v2 = vadd.f32 %v7798_v61, %v7700_v24 }
 0x167   : >> { %8355 = vst [vmem:[#allocation17_spill] sm:$0xff] %v7879_v43  ;;  %v7883_v35 = vpop.f32.mrf.mxu1  ;;  %v1339_v43 = vadd.f32 %v7792_v12, %v7693_v17  ;;  %v1342_v17 = vadd.f32 %v7803_v18, %v7707_v31  ;;  %v1345_v18 = vadd.f32 %v7808_v8, %v7716_v38 }
 0x168   : >> { %8356 = vst [vmem:[#allocation18_spill] sm:$0xff] %v7883_v35  ;;  %v7887_v25 = vpop.f32.mrf.mxu0  ;;  %v1828_v36 = vadd.f32 %v6346_v54, %v1582_v46  ;;  %v1586_v50 = vadd.f32 %v7800_v1, %v1344_v2  ;;  %v7930_v61 = vpop.permute.xlu0 %2404 }
 0x169   : >> { %8358 = vst [vmem:[#allocation20_spill] sm:$0xff] %v7887_v25  ;;  %v7893_v51 = vpop.f32.mrf.mxu1  ;;  %v1580_v25 = vadd.f32 %v7781_v53, %v1338_v39  ;;  %v1581_v53 = vadd.f32 %v7795_v58, %v1339_v43  ;;  %v1829_v39 = vadd.f32 %v6347_v30, %v1583_v11  ;;  %v1584_v31 = vadd.f32 %v7805_v3, %v1342_v17 }
 0x16a   : >> { %8359 = vst [vmem:[#allocation21_spill] sm:$0xff] %v7893_v51  ;;  %v7895_v7 = vpop.f32.mrf.mxu0  ;;  %v2070_v12 = vadd.f32 %v6378_v56, %v1828_v36  ;;  %v1343_v58 = vadd.f32 %v7816_v42, %v7721_v45  ;;  %v1348_v36 = vadd.f32 %v7822_v19, %v7729_v55  ;;  %v7939_v1 = vpop.permute.xlu1 %2409  ;;  %v1346_v3 = vadd.f32 %v7827_v33, %v7737_v63 }
 0x16b   : >> { %v7900_v41 = vpop.f32.mrf.mxu1  ;;  %v1826_v49 = vadd.f32 %v1763_v57, %v1580_v25  ;;  %v2071_v56 = vadd.f32 %v6379_v4, %v1829_v39  ;;  %v1832_v57 = vadd.f32 %v6350_v10, %v1586_v50  ;;  %v1830_v38 = vadd.f32 %v1779_v15, %v1584_v31 }
 0x16c   : >> { %8360 = vst [vmem:[#allocation22_spill] sm:$0xff] %v7900_v41  ;;  %v7902_v35 = vpop.f32.mrf.mxu0  ;;  %v1587_v4 = vadd.f32 %v7811_v23, %v1345_v18  ;;  %v1585_v10 = vadd.f32 %v7819_v28, %v1343_v58  ;;  %v1349_v11 = vadd.f32 %v7831_v26, %v7744_v6  ;;  %v1588_v23 = vadd.f32 %v7829_v47, %v1346_v3  ;;  %v8366_v3 = vld [vmem:[#allocation5_spill] sm:$0xff] }
 0x16d   : >> { %v7907_v5 = vpop.f32.mrf.mxu1  ;;  %v2068_v62 = vadd.f32 %v2005_v59, %v1826_v49  ;;  %v2074_v63 = vadd.f32 %v7859_v13, %v1832_v57  ;;  %v7959_v49 = vpop.permute.xlu0 %2414  ;;  %v2072_v28 = vadd.f32 %v7861_v16, %v1830_v38  ;;  %v1347_v16 = vadd.f32 %v7837_v40, %v7752_v14  ;;  %v8364_v57 = vld [vmem:[#allocation15_spill] sm:$0xff] }
 0x16e   : >> { %8361 = vst [vmem:[#allocation23_spill] sm:$0xff] %v7907_v5  ;;  %v7911_v51 = vpop.f32.mrf.mxu0  ;;  %v1831_v6 = vadd.f32 %v7867_v29, %v1585_v10  ;;  %v7965_v17 = vpop.permute.xlu1 %2419  ;;  %v1591_v47 = vadd.f32 %v7834_v27, %v1349_v11  ;;  %v8363_v27 = vld [vmem:[#allocation13_spill] sm:$0xff]  ;;  %v1834_v14 = vadd.f32 %v8364_v57, %v1588_v23 }
 0x16f   : >> { %8362 = vst [vmem:[#allocation24_spill] sm:$0xff] %v7911_v51  ;;  %v7918_v41 = vpop.f32.mrf.mxu1  ;;  %v1827_v51 = vadd.f32 %v1766_v37, %v1581_v53  ;;  %v1589_v38 = vadd.f32 %v8366_v3, %v1347_v16  ;;  %v8376_v16 = vld [vmem:[#allocation16_spill] sm:$0xff]  ;;  %v8380_v3 = vld [vmem:[#allocation10_spill] sm:$0xff] }
 0x170   : >> { %v7922_v46 = vpop.f32.mrf.mxu0 }
 0x171   : >> { %v7925_v54 = vpop.f32.mrf.mxu1  ;;  %v2069_v45 = vadd.f32 %v7857_v9, %v1827_v51 }
 0x172   : >> { %v6410_v5 = vpop.f32.mrf.mxu0  ;;  %v7999_v11 = vpop.permute.xlu1 %2429 }
 0x173   : >> { %v2312_v24 = vadd.f32 %v6410_v5, %v2070_v12  ;;  %v7928_v25 = vpop.f32.mrf.mxu1  ;;  %v1590_v5 = vadd.f32 %v7824_v21, %v1348_v36  ;;  %v1833_v21 = vadd.f32 %v7863_v22, %v1587_v4  ;;  %v1352_v22 = vadd.f32 %v7841_v34, %v7757_v20  ;;  %v8365_v34 = vld [vmem:[#allocation19_spill] sm:$0xff] }
 0x174   : >> { %v2247_v43 = vpop.f32.mrf.mxu0 }
 0x175   : >> { %v2334_v59 = vadd.f32 %v7061_v0, %v2312_v24  ;;  %v2310_v30 = vadd.f32 %v2247_v43, %v2068_v62  ;;  %v7942_v37 = vpop.f32.mrf.mxu1  ;;  %v1836_v29 = vadd.f32 %v7871_v48, %v1590_v5  ;;  %v2075_v43 = vadd.f32 %v7865_v52, %v1833_v21  ;;  %v7993_v52 = vpop.permute.xlu0 %2424  ;;  %v8373_v21 = vld [vmem:[#allocation9_spill] sm:$0xff] }
 0x176   : >> { %v6411_v8 = vpop.f32.mrf.mxu0 }
 0x177   : >> { %v2332_v42 = vadd.f32 %v7061_v0, %v2310_v30  ;;  %v2313_v55 = vadd.f32 %v6411_v8, %v2071_v56  ;;  %v7948_v19 = vpop.f32.mrf.mxu1  ;;  %v2350_v33 = vmax.f32 %v2334_v59, 0.0  ;;  %v2073_v56 = vadd.f32 %v8363_v27, %v1831_v6  ;;  %v8367_v8 = vld [vmem:[#allocation2_spill] sm:$0xff] }
 0x178   : >> { %v2250_v2 = vpop.f32.mrf.mxu0 }
 0x179   : >> { %v2335_v51 = vadd.f32 %v7061_v0, %v2313_v55  ;;  %v2311_v9 = vadd.f32 %v2250_v2, %v2069_v45  ;;  %v7957_v15 = vpop.f32.mrf.mxu1  ;;  %v2348_v13 = vmax.f32 %v2332_v42, 0.0  ;;  %v2464_v24 = vmul.f32 %v7889_v32, %v2350_v33  ;;  %v8368_v45 = vld [vmem:[#allocation7_spill] sm:$0xff]  ;;  %v8369_v55 = vld [vmem:[#allocation17_spill] sm:$0xff] }
 0x17a   : >> { %v6414_v26 = vpop.f32.mrf.mxu0  ;;  %v1350_v42 = vadd.f32 %v8368_v45, %v8367_v8  ;;  %v1837_v4 = vadd.f32 %v8369_v55, %v1591_v47  ;;  %v8381_v45 = vld [vmem:[#allocation12_spill] sm:$0xff] }
 0x17b   : >> { %v2351_v53 = vmax.f32 %v2335_v51, 0.0  ;;  %v2333_v12 = vadd.f32 %v7061_v0, %v2311_v9  ;;  %v2316_v39 = vadd.f32 %v6414_v26, %v2074_v63  ;;  %v7969_v50 = vpop.f32.mrf.mxu1  ;;  %v2462_v32 = vmul.f32 %v8365_v34, %v2348_v13  ;;  %v8371_v63 = vld [vmem:[#allocation14_spill] sm:$0xff]  ;;  %v8374_v26 = vld [vmem:[#allocation4_spill] sm:$0xff]  ;;  %v8375_v13 = vld [vmem:[#allocation11_spill] sm:$0xff] }
 0x17c   : >> { %v2263_v62 = vpop.f32.mrf.mxu0  ;;  %v2078_v33 = vadd.f32 %v8371_v63, %v1836_v29 }
 0x17d   : >> { %v2349_v31 = vmax.f32 %v2333_v12, 0.0  ;;  %v2465_v18 = vmul.f32 %v7913_v60, %v2351_v53  ;;  %v2314_v58 = vadd.f32 %v2263_v62, %v2072_v28  ;;  %v7979_v36 = vpop.f32.mrf.mxu1  ;;  %v2338_v20 = vadd.f32 %v7061_v0, %v2316_v39  ;;  %v8372_v28 = vld [vmem:[#allocation3_spill] sm:$0xff] }
 0x17e   : >> { %v6415_v40 = vpop.f32.mrf.mxu0  ;;  %v1353_v6 = vadd.f32 %v8373_v21, %v8372_v28  ;;  %v1351_v53 = vadd.f32 %v8375_v13, %v8374_v26  ;;  %v2076_v62 = vadd.f32 %v8376_v16, %v1834_v14 }
 0x17f   : >> { %v2463_v48 = vmul.f32 %v7909_v44, %v2349_v31  ;;  %v5761_v60 = vpack.c.bf16 %v2465_v18, %v2464_v24  ;;  %v2336_v59 = vadd.f32 %v7061_v0, %v2314_v58  ;;  %v7991_v30 = vpop.f32.mrf.mxu1  ;;  %v2317_v10 = vadd.f32 %v6415_v40, %v2075_v43  ;;  %v8370_v44 = vld [vmem:[#allocation6_spill] sm:$0xff]  ;;  %v8377_v18 = vld [vmem:[#allocation8_spill] sm:$0xff] }
 0x180   : >> { %v2266_v5 = vpop.f32.mrf.mxu0  ;;  %v1594_v2 = vadd.f32 %v8370_v44, %v1352_v22  ;;  %v2354_v12 = vmax.f32 %v2338_v20, 0.0  ;;  %v1592_v58 = vadd.f32 %v8377_v18, %v1350_v42  ;;  %v8378_v43 = vld [vmem:[#allocation18_spill] sm:$0xff]  ;;  %v1595_v8 = vadd.f32 %v8380_v3, %v1353_v6 }
 0x181   : >> { %v5756_v51 = vpack.c.bf16 %v2463_v48, %v2462_v32  ;;  %5833 = vst [vmem:[%s7985_s14 + $0x8] sm:$0xff] %v5761_v60   ;;  %v2315_v9 = vadd.f32 %v2266_v5, %v2073_v56  ;;  %v8004_v23 = vpop.f32.mrf.mxu1  ;;  %v2339_v39 = vadd.f32 %v7061_v0, %v2317_v10  ;;  %v2352_v22 = vmax.f32 %v2336_v59, 0.0  ;;  %v8379_v56 = vld [vmem:[#allocation20_spill] sm:$0xff]  ;;  %v2435_v59 = vpop.permute.xlu0 %2434  ;;  %v8384_v6 = vld [vmem:[#allocation22_spill] sm:$0xff] }
 0x182   : >> { %v6418_v47 = vpop.f32.mrf.mxu0  ;;  %v2079_v27 = vadd.f32 %v8378_v43, %v1837_v4  ;;  %v1835_v57 = vadd.f32 %v8379_v56, %v1589_v38  ;;  %v1840_v34 = vadd.f32 %v7895_v7, %v1594_v2  ;;  %v1593_v55 = vadd.f32 %v8381_v45, %v1351_v53  ;;  %v2440_v10 = vpop.permute.xlu1 %2439 }
 0x183   : >> { %5757 = vst [vmem:[%s7985_s14] sm:$0xff] %v5756_v51   ;;  %v2337_v29 = vadd.f32 %v7061_v0, %v2315_v9  ;;  %v2320_v24 = vadd.f32 %v6418_v47, %v2078_v33  ;;  %v8014_v31 = vpop.f32.mrf.mxu1  ;;  %v2355_v40 = vmax.f32 %v2339_v39, 0.0  ;;  %v2468_v42 = vmul.f32 %v7959_v49, %v2354_v12  ;;  %v8382_v33 = vld [vmem:[#allocation21_spill] sm:$0xff]  ;;  %v8383_v9 = vld [vmem:[#allocation24_spill] sm:$0xff]  ;;  %v8385_v39 = vld [vmem:[#allocation23_spill] sm:$0xff] }
 0x184   : >> { %v2279_v20 = vpop.f32.mrf.mxu0  ;;  %v1838_v7 = vadd.f32 %v7902_v35, %v1592_v58  ;;  %v2466_v5 = vmul.f32 %v7930_v61, %v2352_v22  ;;  %v2077_v51 = vadd.f32 %v8382_v33, %v1835_v57  ;;  %v1841_v28 = vadd.f32 %v8383_v9, %v1595_v8 }
 0x185   : >> { %v2353_v32 = vmax.f32 %v2337_v29, 0.0  ;;  %v2342_v14 = vadd.f32 %v7061_v0, %v2320_v24  ;;  %v2318_v48 = vadd.f32 %v2279_v20, %v2076_v62  ;;  %v8021_v60 = vpop.f32.mrf.mxu1  ;;  %v2469_v4 = vmul.f32 %v7965_v17, %v2355_v40  ;;  %v2445_v24 = vpop.permute.xlu0 %2444 }
 0x186   : >> { %v6419_v38 = vpop.f32.mrf.mxu0  ;;  %v2082_v26 = vadd.f32 %v8384_v6, %v1840_v34  ;;  %v2080_v47 = vadd.f32 %v8385_v39, %v1838_v7  ;;  %v1839_v16 = vadd.f32 %v7922_v46, %v1593_v55  ;;  %v2083_v18 = vadd.f32 %v7918_v41, %v1841_v28  ;;  %v2450_v56 = vpop.permute.xlu1 %2449 }
 0x187   : >> { %v2467_v44 = vmul.f32 %v7939_v1, %v2353_v32  ;;  %v2321_v2 = vadd.f32 %v6419_v38, %v2079_v27  ;;  %v8030_v63 = vpop.f32.mrf.mxu1  ;;  %v5771_v49 = vpack.c.bf16 %v2469_v4, %v2468_v42  ;;  %v2340_v17 = vadd.f32 %v7061_v0, %v2318_v48 }
 0x188   : >> { %v2282_v21 = vpop.f32.mrf.mxu0  ;;  %v2358_v35 = vmax.f32 %v2342_v14, 0.0  ;;  %v2081_v48 = vadd.f32 %v7925_v54, %v1839_v16 }
 0x189   : >> { %v5766_v13 = vpack.c.bf16 %v2467_v44, %v2466_v5  ;;  %v2343_v61 = vadd.f32 %v7061_v0, %v2321_v2  ;;  %v8037_v53 = vpop.f32.mrf.mxu1  ;;  %5835 = vst [vmem:[%s7985_s14 + $0x18] sm:$0xff] %v5771_v49   ;;  %v2319_v1 = vadd.f32 %v2282_v21, %v2077_v51  ;;  %v2356_v58 = vmax.f32 %v2340_v17, 0.0 }
 0x18a   : >> { %v6422_v12 = vpop.f32.mrf.mxu0  ;;  %v2472_v57 = vmul.f32 %v2435_v59, %v2358_v35  ;;  %v2460_v33 = vpop.permute.xlu1 %2459 }
 0x18b   : >> { %5834 = vst [vmem:[%s7985_s14 + $0x10] sm:$0xff] %v5766_v13   ;;  %v2359_v62 = vmax.f32 %v2343_v61, 0.0  ;;  %v2324_v22 = vadd.f32 %v6422_v12, %v2082_v26  ;;  %v8043_v29 = vpop.f32.mrf.mxu1  ;;  %v2341_v43 = vadd.f32 %v7061_v0, %v2319_v1  ;;  %v2470_v55 = vmul.f32 %v7993_v52, %v2356_v58 }
 0x18c   : >> { %v2295_v27 = vpop.f32.mrf.mxu0 }
 0x18d   : >> { %v2346_v40 = vadd.f32 %v7061_v0, %v2324_v22  ;;  %v2473_v20 = vmul.f32 %v2440_v10, %v2359_v62  ;;  %v2322_v34 = vadd.f32 %v2295_v27, %v2080_v47  ;;  %v8048_v46 = vpop.f32.mrf.mxu1  ;;  %v2357_v32 = vmax.f32 %v2341_v43, 0.0  ;;  %v2455_v10 = vpop.permute.xlu0 %2454 }
 0x18e   : >> { %v6423_v14 = vpop.f32.mrf.mxu0 }
 0x18f   : >> { %v5781_v3 = vpack.c.bf16 %v2473_v20, %v2472_v57  ;;  %v2344_v41 = vadd.f32 %v7061_v0, %v2322_v34  ;;  %v2325_v8 = vadd.f32 %v6423_v14, %v2083_v18  ;;  %v8052_v45 = vpop.f32.mrf.mxu1  ;;  %v2471_v59 = vmul.f32 %v7999_v11, %v2357_v32 }
 0x190   : >> { %v2362_v42 = vmax.f32 %v2346_v40, 0.0  ;;  %v2298_v4 = vpop.f32.mrf.mxu0 }
 0x191   : >> { %5837 = vst [vmem:[%s7985_s14 + $0x28] sm:$0xff] %v5781_v3   ;;  %v2347_v38 = vadd.f32 %v7061_v0, %v2325_v8  ;;  %v2323_v7 = vadd.f32 %v2298_v4, %v2081_v48  ;;  %v8058_v5 = vpop.f32.mrf.mxu1  ;;  %v5776_v54 = vpack.c.bf16 %v2471_v59, %v2470_v55  ;;  %v2360_v44 = vmax.f32 %v2344_v41, 0.0 }
 0x192   : >> { %v6474_v2 = vpop.f32.mrf.mxu0  ;;  %v2476_v28 = vmul.f32 %v2455_v10, %v2362_v42 }
 0x193   : >> { %v2363_v51 = vmax.f32 %v2347_v38, 0.0  ;;  %v2345_v9 = vadd.f32 %v7061_v0, %v2323_v7  ;;  %v2901_v52 = vadd.f32 %v6474_v2, %v7928_v25  ;;  %v6506_v11 = vpop.f32.mrf.mxu1  ;;  %5836 = vst [vmem:[%s7985_s14 + $0x20] sm:$0xff] %v5776_v54   ;;  %v2474_v35 = vmul.f32 %v2445_v24, %v2360_v44 }
 0x194   : >> { %v2892_v49 = vpop.f32.mrf.mxu0 }
 0x195   : >> { %v2361_v17 = vmax.f32 %v2345_v9, 0.0  ;;  %v8063_v21 = vadd.f32 %v6506_v11, %v2901_v52  ;;  %v2477_v6 = vmul.f32 %v2460_v33, %v2363_v51  ;;  %v2893_v26 = vadd.f32 %v2892_v49, %v7942_v37  ;;  %v3117_v13 = vpop.f32.mrf.mxu1 }
 0x196   : >> { %v6475_v61 = vpop.f32.mrf.mxu0 }
 0x197   : >> { %v2475_v1 = vmul.f32 %v2450_v56, %v2361_v17  ;;  %v5791_v12 = vpack.c.bf16 %v2477_v6, %v2476_v28  ;;  %v8066_v39 = vadd.f32 %v3117_v13, %v2893_v26  ;;  %v2904_v25 = vadd.f32 %v6475_v61, %v7948_v19  ;;  %v6507_v47 = vpop.f32.mrf.mxu1 }
 0x198   : >> { %v2895_v16 = vpop.f32.mrf.mxu0 }
 0x199   : >> { %v5786_v62 = vpack.c.bf16 %v2475_v1, %v2474_v35  ;;  %5839 = vst [vmem:[%s7985_s14 + $0x38] sm:$0xff] %v5791_v12   ;;  %v8070_v22 = vadd.f32 %v6507_v47, %v2904_v25  ;;  %v2896_v18 = vadd.f32 %v2895_v16, %v7957_v15  ;;  %v3120_v58 = vpop.f32.mrf.mxu1 }
 0x19a   : >> { %v6478_v37 = vpop.f32.mrf.mxu0 }
 0x19b   : >> { %5838 = vst [vmem:[%s7985_s14 + $0x30] sm:$0xff] %v5786_v62   ;;  %v8074_v43 = vadd.f32 %v3120_v58, %v2896_v18  ;;  %v2917_v24 = vadd.f32 %v6478_v37, %v7969_v50  ;;  %v6510_v27 = vpop.f32.mrf.mxu1 }
 0x19c   : >> { %v2908_v56 = vpop.f32.mrf.mxu0 }
 0x19d   : >> { %v8077_v57 = vadd.f32 %v6510_v27, %v2917_v24  ;;  %v2909_v19 = vadd.f32 %v2908_v56, %v7979_v36  ;;  %v3133_v40 = vpop.f32.mrf.mxu1 }
 0x19e   : >> { %v6479_v20 = vpop.f32.mrf.mxu0 }
 0x19f   : >> { %v8080_v34 = vadd.f32 %v3133_v40, %v2909_v19  ;;  %v2920_v32 = vadd.f32 %v6479_v20, %v7991_v30  ;;  %v6511_v15 = vpop.f32.mrf.mxu1 }
 0x1a0   : >> { %v2911_v14 = vpop.f32.mrf.mxu0 }
 0x1a1   : >> { %v8083_v48 = vadd.f32 %v6511_v15, %v2920_v32  ;;  %v2912_v3 = vadd.f32 %v2911_v14, %v8004_v23  ;;  %v3136_v41 = vpop.f32.mrf.mxu1 }
 0x1a2   : >> { %v6482_v50 = vpop.f32.mrf.mxu0 }
 0x1a3   : >> { %v8086_v8 = vadd.f32 %v3136_v41, %v2912_v3  ;;  %v2933_v55 = vadd.f32 %v6482_v50, %v8014_v31  ;;  %v6514_v59 = vpop.f32.mrf.mxu1 }
 0x1a4   : >> { %v2924_v36 = vpop.f32.mrf.mxu0 }
 0x1a5   : >> { %v8089_v42 = vadd.f32 %v6514_v59, %v2933_v55  ;;  %v2925_v4 = vadd.f32 %v2924_v36, %v8021_v60  ;;  %v3149_v38 = vpop.f32.mrf.mxu1 }
 0x1a6   : >> { %v6483_v30 = vpop.f32.mrf.mxu0 }
 0x1a7   : >> { %v8092_v10 = vadd.f32 %v3149_v38, %v2925_v4  ;;  %v2936_v7 = vadd.f32 %v6483_v30, %v8030_v63  ;;  %v6515_v54 = vpop.f32.mrf.mxu1 }
 0x1a8   : >> { %v2927_v23 = vpop.f32.mrf.mxu0 }
 0x1a9   : >> { %v8095_v44 = vadd.f32 %v6515_v54, %v2936_v7  ;;  %v2928_v2 = vadd.f32 %v2927_v23, %v8037_v53  ;;  %v3152_v33 = vpop.f32.mrf.mxu1 }
 0x1aa   : >> { %v6486_v31 = vpop.f32.mrf.mxu0 }
 0x1ab   : >> { %v8098_v51 = vadd.f32 %v3152_v33, %v2928_v2  ;;  %v2949_v9 = vadd.f32 %v6486_v31, %v8043_v29  ;;  %v6518_v52 = vpop.f32.mrf.mxu1 }
 0x1ac   : >> { %v2940_v60 = vpop.f32.mrf.mxu0 }
 0x1ad   : >> { %v8101_v11 = vadd.f32 %v6518_v52, %v2949_v9  ;;  %v2941_v28 = vadd.f32 %v2940_v60, %v8048_v46  ;;  %v3165_v49 = vpop.f32.mrf.mxu1 }
 0x1ae   : >> { %v6487_v63 = vpop.f32.mrf.mxu0 }
 0x1af   : >> { %v8104_v17 = vadd.f32 %v3165_v49, %v2941_v28  ;;  %v2952_v6 = vadd.f32 %v6487_v63, %v8052_v45  ;;  %v6519_v26 = vpop.f32.mrf.mxu1 }
 0x1b0   : >> { %v2943_v53 = vpop.f32.mrf.mxu0 }
 0x1b1   : >> { %v8107_v13 = vadd.f32 %v6519_v26, %v2952_v6  ;;  %v2944_v35 = vadd.f32 %v2943_v53, %v8058_v5  ;;  %v3168_v61 = vpop.f32.mrf.mxu1 }
 0x1b2   : >> { %v6538_v29 = vpop.f32.mrf.mxu0 }
 0x1b3   : >> { %8386 = vst [vmem:[#allocation13_spill] sm:$0xff] %v8107_v13  ;;  %v8110_v1 = vadd.f32 %v3168_v61, %v2944_v35  ;;  %v6570_v12 = vpop.f32.mrf.mxu1 }
 0x1b4   : >> { %v3358_v25 = vpop.f32.mrf.mxu0 }
 0x1b5   : >> { %8387 = vst [vmem:[#allocation15_spill] sm:$0xff] %v8110_v1  ;;  %v8112_v47 = vpop.f32.mrf.mxu1 }
 0x1b6   : >> { %v6539_v46 = vpop.f32.mrf.mxu0 }
 0x1b7   : >> { %v8114_v16 = vpop.f32.mrf.mxu1 }
 0x1b8   : >> { %v3361_v62 = vpop.f32.mrf.mxu0 }
 0x1b9   : >> { %v8116_v18 = vpop.f32.mrf.mxu1 }
 0x1ba   : >> { %v8118_v45 = vpop.f32.mrf.mxu0 }
 0x1bb   : >> { %v8120_v58 = vpop.f32.mrf.mxu1 }
 0x1bc   : >> { %v3374_v37 = vpop.f32.mrf.mxu0 }
 0x1bd   : >> { %v8122_v5 = vpop.f32.mrf.mxu1 }
 0x1be   : >> { %v8124_v24 = vpop.f32.mrf.mxu0 }
 0x1bf   : >> { %v8126_v27 = vpop.f32.mrf.mxu1 }
 0x1c0   : >> { %v8128_v56 = vpop.f32.mrf.mxu0 }
 0x1c1   : >> { %v8130_v19 = vpop.f32.mrf.mxu1 }
 0x1c2   : >> { %v8132_v40 = vpop.f32.mrf.mxu0 }
 0x1c3   : >> { %v8134_v20 = vpop.f32.mrf.mxu1 }
 0x1c4   : >> { %v8136_v32 = vpop.f32.mrf.mxu0 }
 0x1c5   : >> { %v8138_v15 = vpop.f32.mrf.mxu1 }
 0x1c6   : >> { %v8140_v14 = vpop.f32.mrf.mxu0 }
 0x1c7   : >> { %v8142_v3 = vpop.f32.mrf.mxu1 }
 0x1c8   : >> { %v8144_v41 = vpop.f32.mrf.mxu0 }
 0x1c9   : >> { %v8146_v50 = vpop.f32.mrf.mxu1 }
 0x1ca   : >> { %v8148_v55 = vpop.f32.mrf.mxu0 }
 0x1cb   : >> { %v8150_v59 = vpop.f32.mrf.mxu1 }
 0x1cc   : >> { %8388 = vst [vmem:[#allocation19_spill] sm:$0xff] %v8150_v59  ;;  %v8152_v36 = vpop.f32.mrf.mxu0 }
 0x1cd   : >> { %v8154_v4 = vpop.f32.mrf.mxu1 }
 0x1ce   : >> { %8389 = vst [vmem:[#allocation5_spill] sm:$0xff] %v8154_v4  ;;  %v8156_v38 = vpop.f32.mrf.mxu0  ;;  %v3423_v4 = vadd.f32 %v6538_v29, %v8063_v21  ;;  %v8208_v21 = vpop.permute.xlu0 %4692 }
 0x1cf   : >> { %8390 = vst [vmem:[#allocation2_spill] sm:$0xff] %v8156_v38  ;;  %v8158_v30 = vpop.f32.mrf.mxu1 }
 0x1d0   : >> { %8391 = vst [vmem:[#allocation7_spill] sm:$0xff] %v8158_v30  ;;  %v8160_v7 = vpop.f32.mrf.mxu0 }
 0x1d1   : >> { %8392 = vst [vmem:[#allocation17_spill] sm:$0xff] %v8160_v7  ;;  %v8162_v54 = vpop.f32.mrf.mxu1 }
 0x1d2   : >> { %8393 = vst [vmem:[#allocation6_spill] sm:$0xff] %v8162_v54  ;;  %v6602_v23 = vpop.f32.mrf.mxu0 }
 0x1d3   : >> { %v6634_v2 = vpop.f32.mrf.mxu1 }
 0x1d4   : >> { %v3840_v33 = vpop.f32.mrf.mxu0 }
 0x1d5   : >> { %v4081_v31 = vpop.f32.mrf.mxu1 }
 0x1d6   : >> { %v6603_v9 = vpop.f32.mrf.mxu0 }
 0x1d7   : >> { %v6635_v52 = vpop.f32.mrf.mxu1 }
 0x1d8   : >> { %v3843_v60 = vpop.f32.mrf.mxu0 }
 0x1d9   : >> { %v8164_v28 = vpop.f32.mrf.mxu1 }
 0x1da   : >> { %v8166_v49 = vpop.f32.mrf.mxu0 }
 0x1db   : >> { %v8168_v63 = vpop.f32.mrf.mxu1 }
 0x1dc   : >> { %v8170_v6 = vpop.f32.mrf.mxu0 }
 0x1dd   : >> { %v8172_v26 = vpop.f32.mrf.mxu1 }
 0x1de   : >> { %8394 = vst [vmem:[#allocation14_spill] sm:$0xff] %v8172_v26  ;;  %v8174_v53 = vpop.f32.mrf.mxu0 }
 0x1df   : >> { %v8176_v35 = vpop.f32.mrf.mxu1 }
 0x1e0   : >> { %8395 = vst [vmem:[#allocation3_spill] sm:$0xff] %v8176_v35  ;;  %v8178_v61 = vpop.f32.mrf.mxu0  ;;  %v3421_v35 = vadd.f32 %v3358_v25, %v8066_v39 }
 0x1e1   : >> { %8396 = vst [vmem:[#allocation9_spill] sm:$0xff] %v8178_v61  ;;  %v8180_v54 = vpop.f32.mrf.mxu1 }
 0x1e2   : >> { %8397 = vst [vmem:[#allocation4_spill] sm:$0xff] %v8180_v54  ;;  %v8182_v30 = vpop.f32.mrf.mxu0 }
 0x1e3   : >> { %8398 = vst [vmem:[#allocation11_spill] sm:$0xff] %v8182_v30  ;;  %v8184_v7 = vpop.f32.mrf.mxu1  ;;  %v3664_v30 = vadd.f32 %v6570_v12, %v3423_v4 }
 0x1e4   : >> { %8399 = vst [vmem:[#allocation16_spill] sm:$0xff] %v8184_v7  ;;  %v8186_v1 = vpop.f32.mrf.mxu0  ;;  %v3424_v7 = vadd.f32 %v6539_v46, %v8070_v22  ;;  %v3427_v22 = vadd.f32 %v8118_v45, %v8077_v57  ;;  %v3425_v46 = vadd.f32 %v3374_v37, %v8080_v34  ;;  %v8234_v34 = vpop.permute.xlu0 %4702 }
 0x1e5   : >> { %8400 = vst [vmem:[#allocation8_spill] sm:$0xff] %v8186_v1  ;;  %v8188_v38 = vpop.f32.mrf.mxu1  ;;  %v8203_v1 = vpop.permute.xlu1 %4697  ;;  %v3905_v39 = vadd.f32 %v6602_v23, %v3664_v30  ;;  %v3426_v23 = vadd.f32 %v8128_v56, %v8086_v8  ;;  %v3431_v8 = vadd.f32 %v8132_v40, %v8089_v42  ;;  %v3429_v56 = vadd.f32 %v8136_v32, %v8092_v10 }
 0x1e6   : >> { %8401 = vst [vmem:[#allocation18_spill] sm:$0xff] %v8188_v38  ;;  %v8190_v13 = vpop.f32.mrf.mxu0  ;;  %v3665_v12 = vadd.f32 %v8114_v16, %v3424_v7 }
 0x1e7   : >> { %8402 = vst [vmem:[#allocation20_spill] sm:$0xff] %v8190_v13  ;;  %v8193_v26 = vpop.f32.mrf.mxu1  ;;  %v3422_v13 = vadd.f32 %v3361_v62, %v8074_v43  ;;  %v4146_v16 = vadd.f32 %v6634_v2, %v3905_v39  ;;  %v3432_v2 = vadd.f32 %v8140_v14, %v8095_v44 }
 0x1e8   : >> { %v8195_v59 = vpop.f32.mrf.mxu0  ;;  %v3906_v7 = vadd.f32 %v6603_v9, %v3665_v12  ;;  %v3430_v12 = vadd.f32 %v8144_v41, %v8098_v51  ;;  %v3670_v51 = vadd.f32 %v8138_v15, %v3429_v56  ;;  %v8259_v41 = vpop.permute.xlu0 %4712  ;;  %v8405_v15 = vld [vmem:[#allocation9_spill] sm:$0xff] }
 0x1e9   : >> { %8403 = vst [vmem:[#allocation10_spill] sm:$0xff] %v8195_v59  ;;  %v8198_v61 = vpop.f32.mrf.mxu1  ;;  %v3662_v59 = vadd.f32 %v8112_v47, %v3421_v35  ;;  %v3663_v62 = vadd.f32 %v8116_v18, %v3422_v13  ;;  %v3428_v47 = vadd.f32 %v8124_v24, %v8083_v48  ;;  %v8230_v35 = vpop.permute.xlu1 %4707  ;;  %v3668_v13 = vadd.f32 %v8120_v58, %v3427_v22 }
 0x1ea   : >> { %8404 = vst [vmem:[#allocation12_spill] sm:$0xff] %v8198_v61  ;;  %v8200_v54 = vpop.f32.mrf.mxu0  ;;  %v3666_v18 = vadd.f32 %v8122_v5, %v3425_v46  ;;  %v4147_v58 = vadd.f32 %v6635_v52, %v3906_v7  ;;  %v3672_v46 = vadd.f32 %v8134_v20, %v3431_v8 }
 0x1eb   : >> { %v8205_v38 = vpop.f32.mrf.mxu1  ;;  %v3903_v4 = vadd.f32 %v3840_v33, %v3662_v59  ;;  %v3904_v45 = vadd.f32 %v3843_v60, %v3663_v62  ;;  %v3669_v33 = vadd.f32 %v8126_v27, %v3428_v47  ;;  %v3667_v60 = vadd.f32 %v8130_v19, %v3426_v23 }
 0x1ec   : >> { %v8210_v29 = vpop.f32.mrf.mxu0  ;;  %v3435_v27 = vadd.f32 %v8148_v55, %v8101_v11  ;;  %v3909_v10 = vadd.f32 %v8166_v49, %v3668_v13  ;;  %v3907_v44 = vadd.f32 %v8170_v6, %v3666_v18  ;;  %v3673_v11 = vadd.f32 %v8142_v3, %v3432_v2  ;;  %v8407_v13 = vld [vmem:[#allocation14_spill] sm:$0xff]  ;;  %v8410_v2 = vld [vmem:[#allocation3_spill] sm:$0xff] }
 0x1ed   : >> { %v8213_v25 = vpop.f32.mrf.mxu1  ;;  %v4144_v48 = vadd.f32 %v4081_v31, %v3903_v4  ;;  %v4145_v42 = vadd.f32 %v8164_v28, %v3904_v45  ;;  %v8252_v32 = vpop.permute.xlu1 %4717  ;;  %v3433_v55 = vadd.f32 %v8152_v36, %v8104_v17  ;;  %v3910_v49 = vadd.f32 %v8174_v53, %v3669_v33  ;;  %v8406_v45 = vld [vmem:[#allocation19_spill] sm:$0xff] }
 0x1ee   : >> { %v8215_v61 = vpop.f32.mrf.mxu0  ;;  %v3671_v23 = vadd.f32 %v8146_v50, %v3430_v12  ;;  %v4150_v20 = vadd.f32 %v8168_v63, %v3909_v10  ;;  %v4148_v17 = vadd.f32 %v8407_v13, %v3907_v44  ;;  %v8411_v12 = vld [vmem:[#allocation4_spill] sm:$0xff]  ;;  %v8417_v13 = vld [vmem:[#allocation15_spill] sm:$0xff] }
 0x1ef   : >> { %v8221_v43 = vpop.f32.mrf.mxu1 }
 0x1f0   : >> { %v8226_v30 = vpop.f32.mrf.mxu0 }
 0x1f1   : >> { %v8232_v57 = vpop.f32.mrf.mxu1  ;;  %v4728_v63 = vpop.permute.xlu1 %4727 }
 0x1f2   : >> { %v6666_v37 = vpop.f32.mrf.mxu0 }
 0x1f3   : >> { %v4387_v24 = vadd.f32 %v6666_v37, %v4146_v16  ;;  %v6698_v59 = vpop.f32.mrf.mxu1  ;;  %v3908_v16 = vadd.f32 %v8405_v15, %v3667_v60  ;;  %v3676_v37 = vadd.f32 %v8406_v45, %v3435_v27 }
 0x1f4   : >> { %v4322_v9 = vpop.f32.mrf.mxu0 }
 0x1f5   : >> { %v4628_v39 = vadd.f32 %v6698_v59, %v4387_v24  ;;  %v4385_v5 = vadd.f32 %v4322_v9, %v4144_v48  ;;  %v4563_v31 = vpop.f32.mrf.mxu1  ;;  %v8408_v48 = vld [vmem:[#allocation5_spill] sm:$0xff]  ;;  %v8409_v59 = vld [vmem:[#allocation11_spill] sm:$0xff]  ;;  %v4151_v9 = vadd.f32 %v8410_v2, %v3910_v49  ;;  %v4149_v27 = vadd.f32 %v8411_v12, %v3908_v16 }
 0x1f6   : >> { %v6667_v40 = vpop.f32.mrf.mxu0  ;;  %v3674_v24 = vadd.f32 %v8408_v48, %v3433_v55  ;;  %v3913_v33 = vadd.f32 %v8409_v59, %v3672_v46  ;;  %v8419_v48 = vld [vmem:[#allocation18_spill] sm:$0xff] }
 0x1f7   : >> { %v4644_v19 = vadd.f32 %v7061_v0, %v4628_v39  ;;  %v4626_v14 = vadd.f32 %v4563_v31, %v4385_v5  ;;  %v4388_v52 = vadd.f32 %v6667_v40, %v4147_v58  ;;  %v6699_v22 = vpop.f32.mrf.mxu1  ;;  %v4723_v31 = vpop.permute.xlu0 %4722 }
 0x1f8   : >> { %v4325_v28 = vpop.f32.mrf.mxu0 }
 0x1f9   : >> { %v4642_v6 = vadd.f32 %v7061_v0, %v4626_v14  ;;  %v4629_v4 = vadd.f32 %v6699_v22, %v4388_v52  ;;  %v4386_v62 = vadd.f32 %v4325_v28, %v4145_v42  ;;  %v4566_v47 = vpop.f32.mrf.mxu1  ;;  %v4660_v3 = vmax.f32 %v4644_v19, 0.0  ;;  %v8412_v42 = vld [vmem:[#allocation8_spill] sm:$0xff] }
 0x1fa   : >> { %v6670_v7 = vpop.f32.mrf.mxu0  ;;  %v3911_v10 = vadd.f32 %v8412_v42, %v3670_v51  ;;  %v8413_v28 = vld [vmem:[#allocation16_spill] sm:$0xff] }
 0x1fb   : >> { %v4645_v36 = vadd.f32 %v7061_v0, %v4629_v4  ;;  %v4627_v53 = vadd.f32 %v4566_v47, %v4386_v62  ;;  %v6702_v18 = vpop.f32.mrf.mxu1  ;;  %v4658_v8 = vmax.f32 %v4642_v6, 0.0  ;;  %v4391_v50 = vadd.f32 %v6670_v7, %v4150_v20  ;;  %v8414_v6 = vld [vmem:[#allocation20_spill] sm:$0xff]  ;;  %v8416_v7 = vld [vmem:[#allocation2_spill] sm:$0xff] }
 0x1fc   : >> { %v4338_v56 = vpop.f32.mrf.mxu0  ;;  %v4772_v40 = vmul.f32 %v8234_v34, %v4660_v3  ;;  %v4154_v49 = vadd.f32 %v8413_v28, %v3913_v33  ;;  %v3914_v4 = vadd.f32 %v8414_v6, %v3673_v11  ;;  %v8415_v3 = vld [vmem:[#allocation13_spill] sm:$0xff]  ;;  %v4152_v59 = vadd.f32 %v8419_v48, %v3911_v10  ;;  %v8422_v28 = vld [vmem:[#allocation6_spill] sm:$0xff]  ;;  %v8423_v6 = vld [vmem:[#allocation12_spill] sm:$0xff] }
 0x1fd   : >> { %v4661_v60 = vmax.f32 %v4645_v36, 0.0  ;;  %v4643_v58 = vadd.f32 %v7061_v0, %v4627_v53  ;;  %v4389_v39 = vadd.f32 %v4338_v56, %v4148_v17  ;;  %v4579_v5 = vpop.f32.mrf.mxu1  ;;  %v4632_v44 = vadd.f32 %v6702_v18, %v4391_v50  ;;  %v8418_v17 = vld [vmem:[#allocation17_spill] sm:$0xff]  ;;  %v8289_v18 = vpop.permute.xlu1 %4737 }
 0x1fe   : >> { %v6671_v19 = vpop.f32.mrf.mxu0  ;;  %v4770_v62 = vmul.f32 %v8208_v21, %v4658_v8  ;;  %v3436_v45 = vadd.f32 %v8416_v7, %v8415_v3  ;;  %v3434_v36 = vadd.f32 %v8418_v17, %v8417_v13  ;;  %v8294_v56 = vpop.permute.xlu0 %4732  ;;  %v4155_v2 = vadd.f32 %v8193_v26, %v3914_v4 }
 0x1ff   : >> { %v4773_v14 = vmul.f32 %v8230_v35, %v4661_v60  ;;  %v4659_v52 = vmax.f32 %v4643_v58, 0.0  ;;  %v4630_v22 = vadd.f32 %v4579_v5, %v4389_v39  ;;  %v4392_v46 = vadd.f32 %v6671_v19, %v4151_v9  ;;  %v6703_v55 = vpop.f32.mrf.mxu1  ;;  %v8420_v9 = vld [vmem:[#allocation10_spill] sm:$0xff] }
 0x200   : >> { %v4648_v47 = vadd.f32 %v7061_v0, %v4632_v44  ;;  %v4341_v51 = vpop.f32.mrf.mxu0  ;;  %v3912_v60 = vadd.f32 %v8420_v9, %v3671_v23  ;;  %v3917_v58 = vadd.f32 %v8200_v54, %v3676_v37  ;;  %v8421_v44 = vld [vmem:[#allocation7_spill] sm:$0xff] }
 0x201   : >> { %v5801_v20 = vpack.c.bf16 %v4773_v14, %v4772_v40  ;;  %v4771_v34 = vmul.f32 %v8203_v1, %v4659_v52  ;;  %v4646_v15 = vadd.f32 %v7061_v0, %v4630_v22  ;;  %v4633_v35 = vadd.f32 %v6703_v55, %v4392_v46  ;;  %v4582_v16 = vpop.f32.mrf.mxu1 }
 0x202   : >> { %v4664_v11 = vmax.f32 %v4648_v47, 0.0  ;;  %v4390_v53 = vadd.f32 %v4341_v51, %v4149_v27  ;;  %v6674_v21 = vpop.f32.mrf.mxu0  ;;  %v3677_v19 = vadd.f32 %v8421_v44, %v3436_v45  ;;  %v3915_v14 = vadd.f32 %v8210_v29, %v3674_v24  ;;  %v4748_v29 = vpop.permute.xlu1 %4747 }
 0x203   : >> { %5841 = vst [vmem:[%s7985_s14 + $0x48] sm:$0xff] %v5801_v20   ;;  %v5796_v1 = vpack.c.bf16 %v4771_v34, %v4770_v62  ;;  %v4649_v33 = vadd.f32 %v7061_v0, %v4633_v35  ;;  %v4395_v8 = vadd.f32 %v6674_v21, %v4154_v49  ;;  %v6706_v50 = vpop.f32.mrf.mxu1  ;;  %v4662_v12 = vmax.f32 %v4646_v15, 0.0  ;;  %v4743_v15 = vpop.permute.xlu0 %4742 }
 0x204   : >> { %v4631_v39 = vadd.f32 %v4582_v16, %v4390_v53  ;;  %v4354_v5 = vpop.f32.mrf.mxu0  ;;  %v4776_v52 = vmul.f32 %v4723_v31, %v4664_v11  ;;  %v3675_v49 = vadd.f32 %v8422_v28, %v3434_v36  ;;  %v4153_v4 = vadd.f32 %v8423_v6, %v3912_v60 }
 0x205   : >> { %5840 = vst [vmem:[%s7985_s14 + $0x40] sm:$0xff] %v5796_v1   ;;  %v4665_v27 = vmax.f32 %v4649_v33, 0.0  ;;  %v4636_v42 = vadd.f32 %v6706_v50, %v4395_v8  ;;  %v4393_v10 = vadd.f32 %v4354_v5, %v4152_v59  ;;  %v4595_v40 = vpop.f32.mrf.mxu1  ;;  %v4158_v62 = vadd.f32 %v8205_v38, %v3917_v58 }
 0x206   : >> { %v4647_v22 = vadd.f32 %v7061_v0, %v4631_v39  ;;  %v6675_v26 = vpop.f32.mrf.mxu0  ;;  %v3918_v24 = vadd.f32 %v8215_v61, %v3677_v19  ;;  %v4774_v31 = vmul.f32 %v8259_v41, %v4662_v12  ;;  %v4156_v45 = vadd.f32 %v8213_v25, %v3915_v14 }
 0x207   : >> { %v4777_v46 = vmul.f32 %v4728_v63, %v4665_v27  ;;  %v4652_v23 = vadd.f32 %v7061_v0, %v4636_v42  ;;  %v4634_v54 = vadd.f32 %v4595_v40, %v4393_v10  ;;  %v4396_v37 = vadd.f32 %v6675_v26, %v4155_v2  ;;  %v6707_v55 = vpop.f32.mrf.mxu1  ;;  %v4758_v2 = vpop.permute.xlu1 %4757 }
 0x208   : >> { %v4663_v47 = vmax.f32 %v4647_v22, 0.0  ;;  %v4357_v51 = vpop.f32.mrf.mxu0  ;;  %v3916_v41 = vadd.f32 %v8226_v30, %v3675_v49  ;;  %v4753_v5 = vpop.permute.xlu0 %4752 }
 0x209   : >> { %v5811_v63 = vpack.c.bf16 %v4777_v46, %v4776_v52  ;;  %v4637_v20 = vadd.f32 %v6707_v55, %v4396_v37  ;;  %v4598_v34 = vpop.f32.mrf.mxu1  ;;  %v4668_v16 = vmax.f32 %v4652_v23, 0.0  ;;  %v4650_v3 = vadd.f32 %v7061_v0, %v4634_v54 }
 0x20a   : >> { %v4775_v35 = vmul.f32 %v8252_v32, %v4663_v47  ;;  %v4394_v7 = vadd.f32 %v4357_v51, %v4153_v4  ;;  %v6678_v38 = vpop.f32.mrf.mxu0  ;;  %v4159_v32 = vadd.f32 %v8221_v43, %v3918_v24  ;;  %v4157_v43 = vadd.f32 %v8232_v57, %v3916_v41 }
 0x20b   : >> { %5843 = vst [vmem:[%s7985_s14 + $0x58] sm:$0xff] %v5811_v63   ;;  %v4653_v13 = vadd.f32 %v7061_v0, %v4637_v20  ;;  %v4399_v61 = vadd.f32 %v6678_v38, %v4158_v62  ;;  %v6710_v17 = vpop.f32.mrf.mxu1  ;;  %v4780_v33 = vmul.f32 %v4743_v15, %v4668_v16  ;;  %v4666_v8 = vmax.f32 %v4650_v3, 0.0  ;;  %v4768_v54 = vpop.permute.xlu1 %4767 }
 0x20c   : >> { %v5806_v36 = vpack.c.bf16 %v4775_v35, %v4774_v31  ;;  %v4635_v11 = vadd.f32 %v4598_v34, %v4394_v7  ;;  %v4370_v53 = vpop.f32.mrf.mxu0  ;;  %v4763_v37 = vpop.permute.xlu0 %4762 }
 0x20d   : >> { %v4669_v21 = vmax.f32 %v4653_v13, 0.0  ;;  %v4640_v48 = vadd.f32 %v6710_v17, %v4399_v61  ;;  %v4397_v59 = vadd.f32 %v4370_v53, %v4156_v45  ;;  %v4611_v1 = vpop.f32.mrf.mxu1  ;;  %v4778_v40 = vmul.f32 %v8294_v56, %v4666_v8 }
 0x20e   : >> { %5842 = vst [vmem:[%s7985_s14 + $0x50] sm:$0xff] %v5806_v36   ;;  %v4651_v25 = vadd.f32 %v7061_v0, %v4635_v11  ;;  %v6679_v50 = vpop.f32.mrf.mxu0 }
 0x20f   : >> { %v4781_v9 = vmul.f32 %v4748_v29, %v4669_v21  ;;  %v4656_v30 = vadd.f32 %v7061_v0, %v4640_v48  ;;  %v4638_v60 = vadd.f32 %v4611_v1, %v4397_v59  ;;  %v4400_v58 = vadd.f32 %v6679_v50, %v4159_v32  ;;  %v6711_v39 = vpop.f32.mrf.mxu1 }
 0x210   : >> { %v4667_v12 = vmax.f32 %v4651_v25, 0.0  ;;  %v4373_v27 = vpop.f32.mrf.mxu0 }
 0x211   : >> { %v5821_v42 = vpack.c.bf16 %v4781_v9, %v4780_v33  ;;  %v4641_v10 = vadd.f32 %v6711_v39, %v4400_v58  ;;  %v4654_v19 = vadd.f32 %v7061_v0, %v4638_v60  ;;  %v4398_v14 = vadd.f32 %v4373_v27, %v4157_v43  ;;  %v4614_v26 = vpop.f32.mrf.mxu1 }
 0x212   : >> { %v4779_v44 = vmul.f32 %v8289_v18, %v4667_v12  ;;  %v4672_v52 = vmax.f32 %v4656_v30, 0.0 }
 0x213   : >> { %5845 = vst [vmem:[%s7985_s14 + $0x68] sm:$0xff] %v5821_v42   ;;  %v4657_v22 = vadd.f32 %v7061_v0, %v4641_v10  ;;  %v4639_v57 = vadd.f32 %v4614_v26, %v4398_v14  ;;  %v4670_v55 = vmax.f32 %v4654_v19, 0.0 }
 0x214   : >> { %v5816_v46 = vpack.c.bf16 %v4779_v44, %v4778_v40  ;;  %v4784_v18 = vmul.f32 %v4763_v37, %v4672_v52 }
 0x215   : >> { %v4673_v23 = vmax.f32 %v4657_v22, 0.0  ;;  %v4655_v56 = vadd.f32 %v7061_v0, %v4639_v57  ;;  %v4782_v4 = vmul.f32 %v4753_v5, %v4670_v55 }
 0x216   : >> { %5844 = vst [vmem:[%s7985_s14 + $0x60] sm:$0xff] %v5816_v46  }
 0x217   : >> { %v4785_v28 = vmul.f32 %v4768_v54, %v4673_v23  ;;  %v4671_v49 = vmax.f32 %v4655_v56, 0.0 }
 0x219   : >> { %v5831_v6 = vpack.c.bf16 %v4785_v28, %v4784_v18  ;;  %v4783_v62 = vmul.f32 %v4758_v2, %v4671_v49  ;;  %224 = sbr.rel (!%p222_p4) target bundleno = 17 (0x11), region = 89 }
 0x21b   : >> { %5847 = vst [vmem:[%s7985_s14 + $0x78] sm:$0xff] %v5831_v6   ;;  %v5826_v47 = vpack.c.bf16 %v4783_v62, %v4782_v4 }
 0x21d   : >> { %5846 = vst [vmem:[%s7985_s14 + $0x70] sm:$0xff] %v5826_v47  }
 0x21e PF: > { %s14_s15 = sadd.s32 1, %s7018_s15  }
 0x21f   : > { %p11_p5 = scmp.ge.s32.totalorder %s14_s15, 4  }
 0x221   :  { %13 = sbr.rel (!%p11_p5) target bundleno = 1 (0x1), region = 100 }

// kernel: voxelnet_encoder_forward.14
= control target key start
LH: loop header
LB: loop body
LE: loop exit
PB: predicated region body
PF: predicated region fallthrough
CT: control target
= control target key end

     0   :  { %s3707_s15 = smov 0   ;;  %s3709_s16 = smov 0   ;;  %s4232_s0 = inlined_call_operand.vmem [shape: bf16[2,1024,432], index: 0, kind: input, shape index: {}]   ;;  %s4233_s1 = inlined_call_operand.vmem [shape: bf16[432,128], index: 1, kind: input, shape index: {}]   ;;  %s4234_s2 = inlined_call_operand.vmem [shape: f32[1,128], index: 2, kind: input, shape index: {}]   ;;  %s4235_s3 = inlined_call_operand.vmem [shape: f32[2,1024,1], index: 3, kind: input, shape index: {}]   ;;  %s4236_s4 = inlined_call_operand.vmem [shape: bf16[2,1024,128], index: 4, kind: output, shape index: {}]  }
   0x1   :  { %s3711_s17 = smov 0   ;;  %s3713_s18 = smov 0  }
   0x2   :  { %s3715_s19 = smov 0  }
   0x3 LB: > { %s23_s20 = sadd.s32 1, %s3671_s17  ;;  %s26_s21 = sadd.s32 1, %s3675_s18  ;;  %s3679_s19 = sphi %s3715_s19, %s14_s19   ;;  %s3675_s18 = sphi %s3713_s18, %s4240_s18   ;;  %s3671_s17 = sphi %s3711_s17, %s4239_s17   ;;  %s3667_s16 = sphi %s3709_s16, %s4238_s16   ;;  %s3663_s15 = sphi %s3707_s15, %s4237_s15  }
   0x4   : > { %p24_p0 = scmp.ge.s32.totalorder %s23_s20, 2  ;;  %p2858_p1 = scmp.ge.s32.totalorder %s3679_s19, 1 }
   0x5   : > { %p201_p2 = scmp.lt.s32.totalorder %s3679_s19, 5 }
   0x6   : > { %s4242_s20 = smov (%p24_p0, %s23_s20), 0  ;;  %s4244_s21 = smov (!%p24_p0, %s26_s21), %s3675_s18 }
   0x7   : > { %p202_p3 = pnand %p2858_p1, %p201_p2  ;;  %p28_p4 = scmp.ge.s32.totalorder %s4244_s21, 2 }
   0x8   : > { %s2859_s26 = sshll.u32 (!%p202_p3), %s3663_s15, 6  ;;  %p246_p5 = scmp.lt.s32.totalorder (!%p202_p3), %s3667_s16, 1 }
   0x9   : > { %s4246_s21 = smov (%p28_p4, %s4244_s21), 0  ;;  %205 = sbr.rel (%p202_p3) target bundleno = 535 (0x217), region = 36 }
   0xa   : > { %p248_p6 = scmp.lt.s32.totalorder (!%p202_p3), %s2859_s26, 127 }
   0xe   : > { %v3421_v0 = vld [vmem:[%s4233_s1 + $0x38] sm:$0xff]   ;;  %v3681_v1 = vmov 0   ;;  %v3422_v2 = vld [vmem:[%s4233_s1 + $0x30] sm:$0xff]   ;;  %v3423_v4 = vld [vmem:[%s4233_s1 + $0x28] sm:$0xff]   ;;  %s4248_s16 = smov (!%p246_p5, %s3667_s16), 1  ;;  %s4250_s26 = smov (!%p248_p6, %s2859_s26), 127 }
   0xf   : > { %1333 = vmatprep.subr.bf16.mxu0 %v3681_v1  ;;  %1622 = vmatprep.subr.bf16.mxu1 %v3681_v1  ;;  %v3426_v3 = vld [vmem:[%s4233_s1 + $0xb8] sm:$0xff]   ;;  %v3428_v5 = vld [vmem:[%s4233_s1 + $0xb0] sm:$0xff]   ;;  %v3424_v6 = vld [vmem:[%s4233_s1 + $0x20] sm:$0xff]   ;;  %s2861_s13 = sshll.u32 %s4248_s16, 9  ;;  %s2860_s22 = sshll.u32 %s4250_s26, 2  ;;  %vm1236_vm0 = vcmask 392192  }
  0x10   : > { %1334 = vmatpush1.bf16.msra.mxu0 %v3421_v0  ;;  %3419 = vset.pattern.permute.xlu0 %v3681_v1  ;;  %v3430_v7 = vld [vmem:[%s4233_s1 + $0xa8] sm:$0xff]   ;;  %v3425_v8 = vld [vmem:[%s4233_s1 + $0x18] sm:$0xff]   ;;  %v3432_v9 = vld [vmem:[%s4233_s1 + $0xa0] sm:$0xff]   ;;  %s252_s25 = sadd.s32 %s2861_s13, %s2860_s22  ;;  %s2864_s8 = sshll.u32 %s4248_s16, 7 }
  0x11   : > { %1335 = vmatprep.subr.bf16.mxu0 %v3681_v1  ;;  %3420 = vset.pattern.permute.xlu1 %v3681_v1  ;;  %v3427_v10 = vld [vmem:[%s4233_s1 + $0x10] sm:$0xff]   ;;  %v3434_v11 = vld [vmem:[%s4233_s1 + $0x98] sm:$0xff]   ;;  %s2862_s29 = sshll.u32 %s252_s25, 2  ;;  %v3429_v12 = vld [vmem:[%s4233_s1 + $0x8] sm:$0xff]   ;;  %s3854_s14 = sadd.s32 %s2864_s8, %s4250_s26 }
  0x12   : > { %1623 = vmatpush1.bf16.msra.mxu1 %v3426_v3  ;;  %v3436_v13 = vld [vmem:[%s4233_s1 + $0x90] sm:$0xff]   ;;  %s3807_s10 = scalar_lea.vmem %s4232_s0, %s2862_s29  ;;  %v3431_v14 = vld [vmem:[%s4233_s1] sm:$0xff]   ;;  %v3438_v15 = vld [vmem:[%s4233_s1 + $0x88] sm:$0xff]   ;;  %s2865_s22 = sshll.u32 %s3854_s14, 3 }
  0x13   : > { %1624 = vmatprep.subr.bf16.mxu1 %v3681_v1  ;;  %v3449_v16 = vld [vmem:[%s3807_s10 + $0xc] ss:$16 sps:$4 sm:$0xff]   ;;  %v3453_v17 = vld [vmem:[%s3807_s10 + $0x4] ss:$16 sps:$4 sm:$0xff]   ;;  %v3447_v27 = vld [vmem:[%s3807_s10 + $0x8] ss:$16 sps:$4 sm:$0xff]   ;;  %s3869_s27 = scalar_lea.vmem %s4235_s3, %s2865_s22 }
  0x14   : > { %1336 = vmatpush1.bf16.msra.mxu0 %v3422_v2  ;;  %3025 = vmatprep.mubr.msk.bf16.mxu1 %vm1236_vm0, %v3449_v16  ;;  %v3433_v18 = vld [vmem:[%s4233_s1 + $0x78] sm:$0xff]   ;;  %v3440_v19 = vld [vmem:[%s4233_s1 + $0x80] sm:$0xff]   ;;  %v3435_v20 = vld [vmem:[%s4233_s1 + $0x70] sm:$0xff]   ;;  %s2868_s8 = sshll.u32 %s3854_s14, 2 }
  0x15   : > { %1337 = vmatprep.subr.bf16.mxu0 %v3681_v1  ;;  %1365 = vmatprep.mubr.bf16.mxu0 %v3453_v17  ;;  %v3442_v21 = vld [vmem:[%s4233_s1 + $0xd0] sm:$0xff]   ;;  %v3437_v22 = vld [vmem:[%s4233_s1 + $0x68] sm:$0xff]   ;;  %v3439_v24 = vld [vmem:[%s4233_s1 + $0x60] sm:$0xff]   ;;  %s4092_s12 = scalar_lea.vmem %s4236_s4, %s2868_s8 }
  0x16   : > { %1625 = vmatpush1.bf16.msra.mxu1 %v3428_v5  ;;  %v3444_v23 = vld [vmem:[%s4233_s1 + $0xc8] sm:$0xff]   ;;  %v3446_v25 = vld [vmem:[%s4233_s1 + $0xc0] sm:$0xff]   ;;  %v3441_v26 = vld [vmem:[%s4233_s1 + $0x58] sm:$0xff]  }
  0x17   : > { %1626 = vmatprep.subr.bf16.mxu1 %v3681_v1  ;;  %v3454_v28 = vld [vmem:[%s3807_s10 + $0x2c] ss:$16 sps:$4 sm:$0xff]   ;;  %v3443_v29 = vld [vmem:[%s4233_s1 + $0x50] sm:$0xff]   ;;  %v1975_v31 = vld [vmem:[%s3869_s27] sm:$0xff] }
  0x18   : > { %1338 = vmatpush1.bf16.msra.mxu0 %v3423_v4  ;;  %v3445_v30 = vld [vmem:[%s4233_s1 + $0x48] sm:$0xff]   ;;  %2041 = vperm.xlu0 %3419, %v1975_v31   ;;  %v1977_v34 = vld [vmem:[%s3869_s27 + $0x10] sm:$0xff]  ;;  %v1978_v36 = vld [vmem:[%s3869_s27 + $0x18] sm:$0xff] }
  0x19   : > { %1339 = vmatprep.subr.bf16.mxu0 %v3681_v1  ;;  %v3456_v32 = vld [vmem:[%s3807_s10 + $0x28] ss:$16 sps:$4 sm:$0xff]   ;;  %v3460_v33 = vld [vmem:[%s3807_s10 + $0x4c] ss:$16 sps:$4 sm:$0xff]   ;;  %2051 = vperm.xlu1 %3420, %v1977_v34   ;;  %v3450_v37 = vld [vmem:[%s4233_s1 + $0x40] sm:$0xff]  }
  0x1a   : > { %1627 = vmatpush1.bf16.msra.mxu1 %v3430_v7  ;;  %v1976_v35 = vld [vmem:[%s3869_s27 + $0x8] sm:$0xff]  ;;  %v3451_v38 = vld [vmem:[%s3807_s10] ss:$16 sps:$4 sm:$0xff]   ;;  %v3457_v41 = vld [vmem:[%s3807_s10 + $0x24] ss:$16 sps:$4 sm:$0xff]  }
  0x1b   : > { %1628 = vmatprep.subr.bf16.mxu1 %v3681_v1  ;;  %v1980_v39 = vld [vmem:[%s3869_s27 + $0x28] sm:$0xff]  ;;  %v1979_v40 = vld [vmem:[%s3869_s27 + $0x20] sm:$0xff]  ;;  %v1982_v44 = vld [vmem:[%s3869_s27 + $0x38] sm:$0xff] }
  0x1c   : > { %1340 = vmatpush1.bf16.msra.mxu0 %v3424_v6  ;;  %2046 = vperm.xlu0 %3419, %v1976_v35   ;;  %v3462_v42 = vld [vmem:[%s3807_s10 + $0x48] ss:$16 sps:$4 sm:$0xff]   ;;  %v3466_v43 = vld [vmem:[%s3807_s10 + $0x6c] ss:$16 sps:$4 sm:$0xff]   ;;  %v1981_v45 = vld [vmem:[%s3869_s27 + $0x30] sm:$0xff] }
  0x1d   : > { %1341 = vmatprep.subr.bf16.mxu0 %v3681_v1  ;;  %2056 = vperm.xlu1 %3420, %v1978_v36   ;;  %v3459_v46 = vld [vmem:[%s3807_s10 + $0x20] ss:$16 sps:$4 sm:$0xff]   ;;  %v1984_v47 = vld [vmem:[%s3869_s27 + $0x48] sm:$0xff]  ;;  %v3463_v49 = vld [vmem:[%s3807_s10 + $0x44] ss:$16 sps:$4 sm:$0xff]  }
  0x1e   : > { %1629 = vmatpush1.bf16.msra.mxu1 %v3432_v9  ;;  %v1983_v48 = vld [vmem:[%s3869_s27 + $0x40] sm:$0xff]  ;;  %v3468_v50 = vld [vmem:[%s3807_s10 + $0x68] ss:$16 sps:$4 sm:$0xff]   ;;  %v3472_v51 = vld [vmem:[%s3807_s10 + $0x8c] ss:$16 sps:$4 sm:$0xff]  }
  0x1f   : > { %1630 = vmatprep.subr.bf16.mxu1 %v3681_v1  ;;  %v1986_v52 = vld [vmem:[%s3869_s27 + $0x58] sm:$0xff]  ;;  %v1985_v53 = vld [vmem:[%s3869_s27 + $0x50] sm:$0xff]  ;;  %v1988_v55 = vld [vmem:[%s3869_s27 + $0x68] sm:$0xff] }
  0x20   : > { %1342 = vmatpush1.bf16.msra.mxu0 %v3425_v8  ;;  %2061 = vperm.xlu0 %3419, %v1979_v40   ;;  %v3465_v54 = vld [vmem:[%s3807_s10 + $0x40] ss:$16 sps:$4 sm:$0xff]   ;;  %v3469_v57 = vld [vmem:[%s3807_s10 + $0x64] ss:$16 sps:$4 sm:$0xff]   ;;  %v3474_v58 = vld [vmem:[%s3807_s10 + $0x88] ss:$16 sps:$4 sm:$0xff]  }
  0x21   : > { %1343 = vmatprep.subr.bf16.mxu0 %v3681_v1  ;;  %2066 = vperm.xlu1 %3420, %v1980_v39   ;;  %v1987_v56 = vld [vmem:[%s3869_s27 + $0x60] sm:$0xff]  ;;  %v3478_v59 = vld [vmem:[%s3807_s10 + $0xac] ss:$16 sps:$4 sm:$0xff]   ;;  %v1989_v61 = vld [vmem:[%s3869_s27 + $0x70] sm:$0xff] }
  0x22   : > { %1631 = vmatpush1.bf16.msra.mxu1 %v3434_v11  ;;  %v1990_v60 = vld [vmem:[%s3869_s27 + $0x78] sm:$0xff]  ;;  %v3471_v62 = vld [vmem:[%s3807_s10 + $0x60] ss:$16 sps:$4 sm:$0xff]   ;;  %v1992_v63 = vld [vmem:[%s3869_s27 + $0x88] sm:$0xff] }
  0x23   : > { %1632 = vmatprep.subr.bf16.mxu1 %v3681_v1  ;;  %v1991_v0 = vld [vmem:[%s3869_s27 + $0x80] sm:$0xff]  ;;  %v3480_v2 = vld [vmem:[%s3807_s10 + $0xa8] ss:$16 sps:$4 sm:$0xff]   ;;  %v3484_v3 = vld [vmem:[%s3807_s10 + $0xcc] ss:$16 sps:$4 sm:$0xff]  }
  0x24   : > { %1344 = vmatpush1.bf16.msra.mxu0 %v3427_v10  ;;  %2071 = vperm.xlu0 %3419, %v1981_v45   ;;  %v1994_v4 = vld [vmem:[%s3869_s27 + $0x98] sm:$0xff]  ;;  %v1993_v5 = vld [vmem:[%s3869_s27 + $0x90] sm:$0xff]  ;;  %v1996_v7 = vld [vmem:[%s3869_s27 + $0xa8] sm:$0xff] }
  0x25   : > { %1345 = vmatprep.subr.bf16.mxu0 %v3681_v1  ;;  %2076 = vperm.xlu1 %3420, %v1982_v44   ;;  %v3477_v6 = vld [vmem:[%s3807_s10 + $0x80] ss:$16 sps:$4 sm:$0xff]   ;;  %v3481_v9 = vld [vmem:[%s3807_s10 + $0xa4] ss:$16 sps:$4 sm:$0xff]   ;;  %v3486_v10 = vld [vmem:[%s3807_s10 + $0xc8] ss:$16 sps:$4 sm:$0xff]  }
  0x26   : > { %1633 = vmatpush1.bf16.msra.mxu1 %v3436_v13  ;;  %v1995_v8 = vld [vmem:[%s3869_s27 + $0xa0] sm:$0xff]  ;;  %v3490_v11 = vld [vmem:[%s3807_s10 + $0xec] ss:$16 sps:$4 sm:$0xff]   ;;  %v1997_v13 = vld [vmem:[%s3869_s27 + $0xb0] sm:$0xff] }
  0x27   : > { %1634 = vmatprep.subr.bf16.mxu1 %v3681_v1  ;;  %v3492_v16 = vld [vmem:[%s3807_s10 + $0xe8] ss:$16 sps:$4 sm:$0xff]   ;;  %v3508_v35 = vld [vmem:[%s3807_s10 + $0x14c] ss:$16 sps:$4 sm:$0xff]   ;;  %v2011_v40 = vld [vmem:[%s3869_s27 + $0x120] sm:$0xff] }
  0x28   : > { %1346 = vmatpush1.bf16.msra.mxu0 %v3429_v12  ;;  %2081 = vperm.xlu0 %3419, %v1983_v48   ;;  %v1998_v12 = vld [vmem:[%s3869_s27 + $0xb8] sm:$0xff]  ;;  %v2000_v17 = vld [vmem:[%s3869_s27 + $0xc8] sm:$0xff]  ;;  %v2013_v45 = vld [vmem:[%s3869_s27 + $0x130] sm:$0xff] }
  0x29   : > { %1347 = vmatprep.subr.bf16.mxu0 %v3681_v1  ;;  %2086 = vperm.xlu1 %3420, %v1984_v47   ;;  %v2008_v31 = vld [vmem:[%s3869_s27 + $0x108] sm:$0xff]  ;;  %v2010_v36 = vld [vmem:[%s3869_s27 + $0x118] sm:$0xff]  ;;  %v2015_v48 = vld [vmem:[%s3869_s27 + $0x140] sm:$0xff] }
  0x2a   : > { %1635 = vmatpush1.bf16.msra.mxu1 %v3438_v15  ;;  %v3487_v15 = vld [vmem:[%s3807_s10 + $0xc4] ss:$16 sps:$4 sm:$0xff]   ;;  %v3504_v34 = vld [vmem:[%s3807_s10 + $0x128] ss:$16 sps:$4 sm:$0xff]  }
  0x2b   : > { %1636 = vmatprep.subr.bf16.mxu1 %v3681_v1  ;;  %v2012_v39 = vld [vmem:[%s3869_s27 + $0x128] sm:$0xff]  ;;  %v2014_v44 = vld [vmem:[%s3869_s27 + $0x138] sm:$0xff] }
  0x2c   : > { %1348 = vmatpush1.bf16.msra.mxu0 %v3431_v14  ;;  %2091 = vperm.xlu0 %3419, %v1985_v53   ;;  %v3483_v14 = vld [vmem:[%s3807_s10 + $0xa0] ss:$16 sps:$4 sm:$0xff]   ;;  %v2016_v47 = vld [vmem:[%s3869_s27 + $0x148] sm:$0xff] }
  0x2d   : > { %1349 = vmatprep.subr.bf16.mxu0 %v3681_v1  ;;  %2096 = vperm.xlu1 %3420, %v1986_v52   ;;  %v2018_v52 = vld [vmem:[%s3869_s27 + $0x158] sm:$0xff]  ;;  %v2017_v53 = vld [vmem:[%s3869_s27 + $0x150] sm:$0xff] }
  0x2e   : > { %1637 = vmatpush1.bf16.msra.mxu1 %v3440_v19  ;;  %v3496_v19 = vld [vmem:[%s3807_s10 + $0x10c] ss:$16 sps:$4 sm:$0xff]  }
  0x2f   : > { %1648 = vmatprep.subr.bf16.mxu1 %v3681_v1 }
  0x30   : > { %1350 = vmatpush2.bf16.msra.mxu0 %v3433_v18  ;;  %2101 = vperm.xlu0 %3419, %v1987_v56   ;;  %v1999_v18 = vld [vmem:[%s3869_s27 + $0xc0] sm:$0xff] }
  0x31   : > { %1351 = vmatprep.subr.bf16.mxu0 %v3681_v1  ;;  %2106 = vperm.xlu1 %3420, %v1988_v55   ;;  %v2020_v55 = vld [vmem:[%s3869_s27 + $0x168] sm:$0xff]  ;;  %v2019_v56 = vld [vmem:[%s3869_s27 + $0x160] sm:$0xff] }
  0x32   : > { %1649 = vmatpush2.bf16.msra.mxu1 %v3442_v21  ;;  %v2001_v21 = vld [vmem:[%s3869_s27 + $0xd0] sm:$0xff] }
  0x33   : > { %1650 = vmatprep.subr.bf16.mxu1 %v3681_v1 }
  0x34   : > { %1352 = vmatpush2.bf16.msra.mxu0 %v3435_v20  ;;  %2111 = vperm.xlu0 %3419, %v1989_v61   ;;  %v2002_v20 = vld [vmem:[%s3869_s27 + $0xd8] sm:$0xff]  ;;  %v2021_v61 = vld [vmem:[%s3869_s27 + $0x170] sm:$0xff] }
  0x35   : > { %1353 = vmatprep.subr.bf16.mxu0 %v3681_v1  ;;  %2116 = vperm.xlu1 %3420, %v1990_v60   ;;  %v2022_v60 = vld [vmem:[%s3869_s27 + $0x178] sm:$0xff] }
  0x36   : > { %1651 = vmatpush2.bf16.msra.mxu1 %v3444_v23  ;;  %v2004_v23 = vld [vmem:[%s3869_s27 + $0xe8] sm:$0xff] }
  0x37   : > { %1652 = vmatprep.subr.bf16.mxu1 %v3681_v1 }
  0x38   : > { %1354 = vmatpush2.bf16.msra.mxu0 %v3437_v22  ;;  %2121 = vperm.xlu0 %3419, %v1991_v0   ;;  %v3489_v22 = vld [vmem:[%s3807_s10 + $0xc0] ss:$16 sps:$4 sm:$0xff]  }
  0x39   : > { %1355 = vmatprep.subr.bf16.mxu0 %v3681_v1  ;;  %2126 = vperm.xlu1 %3420, %v1992_v63   ;;  %v2024_v63 = vld [vmem:[%s3869_s27 + $0x188] sm:$0xff]  ;;  %v2023_v0 = vld [vmem:[%s3869_s27 + $0x180] sm:$0xff] }
  0x3a   : > { %1653 = vmatpush2.bf16.msra.mxu1 %v3446_v25  ;;  %v3493_v25 = vld [vmem:[%s3807_s10 + $0xe4] ss:$16 sps:$4 sm:$0xff]  }
  0x3c   : > { %1356 = vmatpush2.bf16.msra.mxu0 %v3439_v24  ;;  %2131 = vperm.xlu0 %3419, %v1993_v5   ;;  %v2003_v24 = vld [vmem:[%s3869_s27 + $0xe0] sm:$0xff]  ;;  %v2025_v5 = vld [vmem:[%s3869_s27 + $0x190] sm:$0xff] }
  0x3d   : > { %1357 = vmatprep.subr.bf16.mxu0 %v3681_v1  ;;  %1655 = vmatmul.mubr.bf16.vlgmr.msra.gmra.mxu1 %v3447_v27  ;;  %v3502_v27 = vld [vmem:[%s3807_s10 + $0x12c] ss:$16 sps:$4 sm:$0xff]  }
  0x3e   : > { %3026 = vmatprep.mubr.msk.bf16.mxu1 %vm1236_vm0, %v3454_v28  ;;  %2136 = vperm.xlu1 %3420, %v1994_v4   ;;  %v2006_v28 = vld [vmem:[%s3869_s27 + $0xf8] sm:$0xff] }
  0x3f   : > { %v2026_v4 = vld [vmem:[%s3869_s27 + $0x198] sm:$0xff] }
  0x40   : > { %1358 = vmatpush2.bf16.msra.mxu0 %v3441_v26  ;;  %2141 = vperm.xlu0 %3419, %v1995_v8   ;;  %v3498_v26 = vld [vmem:[%s3807_s10 + $0x108] ss:$16 sps:$4 sm:$0xff]   ;;  %v2027_v8 = vld [vmem:[%s3869_s27 + $0x1a0] sm:$0xff] }
  0x41   : > { %1359 = vmatprep.subr.bf16.mxu0 %v3681_v1 }
  0x42   : > { %2146 = vperm.xlu1 %3420, %v1996_v7   ;;  %v2028_v7 = vld [vmem:[%s3869_s27 + $0x1a8] sm:$0xff] }
  0x44   : > { %1360 = vmatpush2.bf16.msra.mxu0 %v3443_v29  ;;  %2151 = vperm.xlu0 %3419, %v1997_v13   ;;  %v2005_v29 = vld [vmem:[%s3869_s27 + $0xf0] sm:$0xff] }
  0x45   : > { %1361 = vmatprep.subr.bf16.mxu0 %v3681_v1  ;;  %1663 = vmatmul.mubr.bf16.gmra.mxu1 %v3456_v32  ;;  %v2007_v32 = vld [vmem:[%s3869_s27 + $0x100] sm:$0xff]  ;;  %v2029_v13 = vld [vmem:[%s3869_s27 + $0x1b0] sm:$0xff] }
  0x46   : > { %3027 = vmatprep.mubr.msk.bf16.mxu1 %vm1236_vm0, %v3460_v33  ;;  %2156 = vperm.xlu1 %3420, %v1998_v12   ;;  %v3499_v33 = vld [vmem:[%s3807_s10 + $0x104] ss:$16 sps:$4 sm:$0xff]   ;;  %v2030_v12 = vld [vmem:[%s3869_s27 + $0x1b8] sm:$0xff] }
  0x48   : > { %1362 = vmatpush2.bf16.msra.mxu0 %v3445_v30  ;;  %2161 = vperm.xlu0 %3419, %v1999_v18   ;;  %v3495_v30 = vld [vmem:[%s3807_s10 + $0xe0] ss:$16 sps:$4 sm:$0xff]   ;;  %v3540_v18 = vld [vmem:[%s3807_s10 + $0x1e8] ss:$16 sps:$4 sm:$0xff]  }
  0x49   : > { %1363 = vmatprep.subr.bf16.mxu0 %v3681_v1  ;;  %v3475_v1 = vld [vmem:[%s3807_s10 + $0x84] ss:$16 sps:$4 sm:$0xff]  }
  0x4a   : > { %2166 = vperm.xlu1 %3420, %v2000_v17   ;;  %v3535_v17 = vld [vmem:[%s3807_s10 + $0x1c4] ss:$16 sps:$4 sm:$0xff]  }
  0x4c   : > { %1364 = vmatpush2.bf16.msra.mxu0 %v3450_v37  ;;  %2171 = vperm.xlu0 %3419, %v2001_v21   ;;  %v2009_v37 = vld [vmem:[%s3869_s27 + $0x110] sm:$0xff] }
  0x4d   : > { %1671 = vmatmul.mubr.bf16.gmra.mxu1 %v3462_v42  ;;  %v3510_v42 = vld [vmem:[%s3807_s10 + $0x148] ss:$16 sps:$4 sm:$0xff]   ;;  %v2033_v21 = vld [vmem:[%s3869_s27 + $0x1d0] sm:$0xff] }
  0x4e   : > { %3028 = vmatprep.mubr.msk.bf16.mxu1 %vm1236_vm0, %v3466_v43  ;;  %2176 = vperm.xlu1 %3420, %v2002_v20   ;;  %v3514_v43 = vld [vmem:[%s3807_s10 + $0x16c] ss:$16 sps:$4 sm:$0xff]  }
  0x4f   : > { %1366 = vmatmul.mubr.bf16.vlgmr.msra.gmra.mxu0 %v3451_v38  ;;  %v3501_v38 = vld [vmem:[%s3807_s10 + $0x100] ss:$16 sps:$4 sm:$0xff]   ;;  %v2034_v20 = vld [vmem:[%s3869_s27 + $0x1d8] sm:$0xff] }
  0x50   : > { %1373 = vmatprep.mubr.bf16.mxu0 %v3457_v41  ;;  %2181 = vperm.xlu0 %3419, %v2003_v24   ;;  %v3505_v41 = vld [vmem:[%s3807_s10 + $0x124] ss:$16 sps:$4 sm:$0xff]  }
  0x51   : > { %v2035_v24 = vld [vmem:[%s3869_s27 + $0x1e0] sm:$0xff] }
  0x52   : > { %2186 = vperm.xlu1 %3420, %v2004_v23   ;;  %v2036_v23 = vld [vmem:[%s3869_s27 + $0x1e8] sm:$0xff] }
  0x54   : > { %2191 = vperm.xlu0 %3419, %v2005_v29   ;;  %v2037_v29 = vld [vmem:[%s3869_s27 + $0x1f0] sm:$0xff] }
  0x55   : > { %1679 = vmatmul.mubr.bf16.gmra.mxu1 %v3468_v50  ;;  %v3516_v50 = vld [vmem:[%s3807_s10 + $0x168] ss:$16 sps:$4 sm:$0xff]  }
  0x56   : > { %3029 = vmatprep.mubr.msk.bf16.mxu1 %vm1236_vm0, %v3472_v51  ;;  %2196 = vperm.xlu1 %3420, %v2006_v28   ;;  %v3520_v51 = vld [vmem:[%s3807_s10 + $0x18c] ss:$16 sps:$4 sm:$0xff]  }
  0x57   : > { %1374 = vmatmul.mubr.bf16.gmra.mxu0 %v3459_v46  ;;  %v3507_v46 = vld [vmem:[%s3807_s10 + $0x120] ss:$16 sps:$4 sm:$0xff]   ;;  %v2038_v28 = vld [vmem:[%s3869_s27 + $0x1f8] sm:$0xff] }
  0x58   : > { %1381 = vmatprep.mubr.bf16.mxu0 %v3463_v49  ;;  %2201 = vperm.xlu0 %3419, %v2007_v32   ;;  %v3511_v49 = vld [vmem:[%s3807_s10 + $0x144] ss:$16 sps:$4 sm:$0xff]   ;;  %v3552_v32 = vld [vmem:[%s3807_s10 + $0x228] ss:$16 sps:$4 sm:$0xff]  }
  0x5a   : > { %2206 = vperm.xlu1 %3420, %v2008_v31   ;;  %v3547_v31 = vld [vmem:[%s3807_s10 + $0x204] ss:$16 sps:$4 sm:$0xff]  }
  0x5c   : > { %2211 = vperm.xlu0 %3419, %v2009_v37   ;;  %v3562_v37 = vld [vmem:[%s3807_s10 + $0x26c] ss:$16 sps:$4 sm:$0xff]  }
  0x5d   : > { %1687 = vmatmul.mubr.bf16.gmra.mxu1 %v3474_v58  ;;  %v3522_v58 = vld [vmem:[%s3807_s10 + $0x188] ss:$16 sps:$4 sm:$0xff]  }
  0x5e   : > { %3030 = vmatprep.mubr.msk.bf16.mxu1 %vm1236_vm0, %v3478_v59  ;;  %2216 = vperm.xlu1 %3420, %v2010_v36   ;;  %v3526_v59 = vld [vmem:[%s3807_s10 + $0x1ac] ss:$16 sps:$4 sm:$0xff]   ;;  %v3558_v36 = vld [vmem:[%s3807_s10 + $0x248] ss:$16 sps:$4 sm:$0xff]  }
  0x5f   : > { %1382 = vmatmul.mubr.bf16.gmra.mxu0 %v3465_v54  ;;  %v3513_v54 = vld [vmem:[%s3807_s10 + $0x140] ss:$16 sps:$4 sm:$0xff]  }
  0x60   : > { %1389 = vmatprep.mubr.bf16.mxu0 %v3469_v57  ;;  %2221 = vperm.xlu0 %3419, %v2011_v40   ;;  %v3517_v57 = vld [vmem:[%s3807_s10 + $0x164] ss:$16 sps:$4 sm:$0xff]   ;;  %v3564_v40 = vld [vmem:[%s3807_s10 + $0x268] ss:$16 sps:$4 sm:$0xff]  }
  0x62   : > { %2226 = vperm.xlu1 %3420, %v2012_v39   ;;  %v3559_v39 = vld [vmem:[%s3807_s10 + $0x244] ss:$16 sps:$4 sm:$0xff]  }
  0x64   : > { %2231 = vperm.xlu0 %3419, %v2013_v45   ;;  %v3574_v45 = vld [vmem:[%s3807_s10 + $0x2ac] ss:$16 sps:$4 sm:$0xff]  }
  0x65   : > { %1695 = vmatmul.mubr.bf16.gmra.mxu1 %v3480_v2  ;;  %v3528_v2 = vld [vmem:[%s3807_s10 + $0x1a8] ss:$16 sps:$4 sm:$0xff]  }
  0x66   : > { %3031 = vmatprep.mubr.msk.bf16.mxu1 %vm1236_vm0, %v3484_v3  ;;  %2236 = vperm.xlu1 %3420, %v2014_v44   ;;  %v3532_v3 = vld [vmem:[%s3807_s10 + $0x1cc] ss:$16 sps:$4 sm:$0xff]   ;;  %v3570_v44 = vld [vmem:[%s3807_s10 + $0x288] ss:$16 sps:$4 sm:$0xff]  }
  0x67   : > { %1390 = vmatmul.mubr.bf16.gmra.mxu0 %v3471_v62  ;;  %v3519_v62 = vld [vmem:[%s3807_s10 + $0x160] ss:$16 sps:$4 sm:$0xff]  }
  0x68   : > { %1397 = vmatprep.mubr.bf16.mxu0 %v3475_v1  ;;  %2241 = vperm.xlu0 %3419, %v2015_v48   ;;  %v3523_v1 = vld [vmem:[%s3807_s10 + $0x184] ss:$16 sps:$4 sm:$0xff]   ;;  %v3576_v48 = vld [vmem:[%s3807_s10 + $0x2a8] ss:$16 sps:$4 sm:$0xff]  }
  0x6a   : > { %2246 = vperm.xlu1 %3420, %v2016_v47   ;;  %v3571_v47 = vld [vmem:[%s3807_s10 + $0x284] ss:$16 sps:$4 sm:$0xff]  }
  0x6c   : > { %2251 = vperm.xlu0 %3419, %v2017_v53   ;;  %v3586_v53 = vld [vmem:[%s3807_s10 + $0x2ec] ss:$16 sps:$4 sm:$0xff]  }
  0x6d   : > { %1703 = vmatmul.mubr.bf16.gmra.mxu1 %v3486_v10  ;;  %v3534_v10 = vld [vmem:[%s3807_s10 + $0x1c8] ss:$16 sps:$4 sm:$0xff]  }
  0x6e   : > { %3032 = vmatprep.mubr.msk.bf16.mxu1 %vm1236_vm0, %v3490_v11  ;;  %2256 = vperm.xlu1 %3420, %v2018_v52   ;;  %v3538_v11 = vld [vmem:[%s3807_s10 + $0x1ec] ss:$16 sps:$4 sm:$0xff]   ;;  %v3582_v52 = vld [vmem:[%s3807_s10 + $0x2c8] ss:$16 sps:$4 sm:$0xff]  }
  0x6f   : > { %1398 = vmatmul.mubr.bf16.gmra.mxu0 %v3477_v6  ;;  %v3525_v6 = vld [vmem:[%s3807_s10 + $0x180] ss:$16 sps:$4 sm:$0xff]  }
  0x70   : > { %1405 = vmatprep.mubr.bf16.mxu0 %v3481_v9  ;;  %2261 = vperm.xlu0 %3419, %v2019_v56   ;;  %v3529_v9 = vld [vmem:[%s3807_s10 + $0x1a4] ss:$16 sps:$4 sm:$0xff]   ;;  %v3588_v56 = vld [vmem:[%s3807_s10 + $0x2e8] ss:$16 sps:$4 sm:$0xff]  }
  0x72   : > { %2266 = vperm.xlu1 %3420, %v2020_v55   ;;  %v3583_v55 = vld [vmem:[%s3807_s10 + $0x2c4] ss:$16 sps:$4 sm:$0xff]  }
  0x74   : > { %2271 = vperm.xlu0 %3419, %v2021_v61   ;;  %v3598_v61 = vld [vmem:[%s3807_s10 + $0x32c] ss:$16 sps:$4 sm:$0xff]  }
  0x75   : > { %1711 = vmatmul.mubr.bf16.gmra.mxu1 %v3492_v16  ;;  %v2031_v16 = vld [vmem:[%s3869_s27 + $0x1c0] sm:$0xff] }
  0x76   : > { %3033 = vmatprep.mubr.msk.bf16.mxu1 %vm1236_vm0, %v3496_v19  ;;  %2276 = vperm.xlu1 %3420, %v2022_v60   ;;  %v3544_v19 = vld [vmem:[%s3807_s10 + $0x20c] ss:$16 sps:$4 sm:$0xff]   ;;  %v3594_v60 = vld [vmem:[%s3807_s10 + $0x308] ss:$16 sps:$4 sm:$0xff]  }
  0x77   : > { %1406 = vmatmul.mubr.bf16.gmra.mxu0 %v3483_v14  ;;  %v3531_v14 = vld [vmem:[%s3807_s10 + $0x1a0] ss:$16 sps:$4 sm:$0xff]  }
  0x78   : > { %1413 = vmatprep.mubr.bf16.mxu0 %v3487_v15  ;;  %2281 = vperm.xlu0 %3419, %v2023_v0   ;;  %v2032_v15 = vld [vmem:[%s3869_s27 + $0x1c8] sm:$0xff]  ;;  %v3591_v0 = vld [vmem:[%s3807_s10 + $0x2e0] ss:$16 sps:$4 sm:$0xff]  }
  0x7a   : > { %2286 = vperm.xlu1 %3420, %v2024_v63  }
  0x7c   : > { %2291 = vperm.xlu0 %3419, %v2025_v5  }
  0x7d   : > { %1719 = vmatmul.mubr.bf16.gmra.mxu1 %v3498_v26  ;;  %v3546_v26 = vld [vmem:[%s3807_s10 + $0x208] ss:$16 sps:$4 sm:$0xff]  }
  0x7e   : > { %3034 = vmatprep.mubr.msk.bf16.mxu1 %vm1236_vm0, %v3502_v27  ;;  %2296 = vperm.xlu1 %3420, %v2026_v4   ;;  %v3550_v27 = vld [vmem:[%s3807_s10 + $0x22c] ss:$16 sps:$4 sm:$0xff]  }
  0x7f   : > { %1414 = vmatmul.mubr.bf16.gmra.mxu0 %v3489_v22  ;;  %v3537_v22 = vld [vmem:[%s3807_s10 + $0x1c0] ss:$16 sps:$4 sm:$0xff]   ;;  %v3604_v4 = vld [vmem:[%s3807_s10 + $0x34c] ss:$16 sps:$4 sm:$0xff]  }
  0x80   : > { %1421 = vmatprep.mubr.bf16.mxu0 %v3493_v25  ;;  %2301 = vperm.xlu0 %3419, %v2027_v8   ;;  %v3541_v25 = vld [vmem:[%s3807_s10 + $0x1e4] ss:$16 sps:$4 sm:$0xff]   ;;  %v3597_v8 = vld [vmem:[%s3807_s10 + $0x300] ss:$16 sps:$4 sm:$0xff]  }
  0x82   : > { %2306 = vperm.xlu1 %3420, %v2028_v7  }
  0x84   : > { %2311 = vperm.xlu0 %3419, %v2029_v13   ;;  %v3610_v13 = vld [vmem:[%s3807_s10 + $0x36c] ss:$16 sps:$4 sm:$0xff]  }
  0x85   : > { %1727 = vmatmul.mubr.bf16.gmra.mxu1 %v3504_v34  ;;  %v3549_v34 = vld [vmem:[%s3807_s10 + $0x200] ss:$16 sps:$4 sm:$0xff]  }
  0x86   : > { %3035 = vmatprep.mubr.msk.bf16.mxu1 %vm1236_vm0, %v3508_v35  ;;  %2316 = vperm.xlu1 %3420, %v2030_v12   ;;  %v3553_v35 = vld [vmem:[%s3807_s10 + $0x224] ss:$16 sps:$4 sm:$0xff]   ;;  %v4074_v12 = vld [vmem:[%s4234_s2] ss:$0 sm:$0xff] }
  0x87   : > { %1422 = vmatmul.mubr.bf16.gmra.mxu0 %v3495_v30  ;;  %v3543_v30 = vld [vmem:[%s3807_s10 + $0x1e0] ss:$16 sps:$4 sm:$0xff]  }
  0x88   : > { %1429 = vmatprep.mubr.bf16.mxu0 %v3499_v33  ;;  %2321 = vperm.xlu0 %3419, %v2031_v16   ;;  %v3556_v33 = vld [vmem:[%s3807_s10 + $0x24c] ss:$16 sps:$4 sm:$0xff]  }
  0x8a   : > { %2326 = vperm.xlu1 %3420, %v2032_v15  }
  0x8c   : > { %2331 = vperm.xlu0 %3419, %v2033_v21  }
  0x8d   : > { %1735 = vmatmul.mubr.bf16.gmra.mxu1 %v3510_v42  ;;  %v3561_v42 = vld [vmem:[%s3807_s10 + $0x240] ss:$16 sps:$4 sm:$0xff]  }
  0x8e   : > { %3036 = vmatprep.mubr.msk.bf16.mxu1 %vm1236_vm0, %v3514_v43  ;;  %2336 = vperm.xlu1 %3420, %v2034_v20   ;;  %v3565_v43 = vld [vmem:[%s3807_s10 + $0x264] ss:$16 sps:$4 sm:$0xff]  }
  0x8f   : > { %1430 = vmatmul.mubr.bf16.gmra.mxu0 %v3501_v38  ;;  %v3555_v38 = vld [vmem:[%s3807_s10 + $0x220] ss:$16 sps:$4 sm:$0xff]  }
  0x90   : > { %1437 = vmatprep.mubr.bf16.mxu0 %v3505_v41  ;;  %2341 = vperm.xlu0 %3419, %v2035_v24   ;;  %v3568_v41 = vld [vmem:[%s3807_s10 + $0x28c] ss:$16 sps:$4 sm:$0xff]  }
  0x92   : > { %2346 = vperm.xlu1 %3420, %v2036_v23   ;;  %v3603_v23 = vld [vmem:[%s3807_s10 + $0x320] ss:$16 sps:$4 sm:$0xff]  }
  0x94   : > { %2351 = vperm.xlu0 %3419, %v2037_v29   ;;  %v3616_v29 = vld [vmem:[%s3807_s10 + $0x38c] ss:$16 sps:$4 sm:$0xff]  }
  0x95   : > { %1743 = vmatmul.mubr.bf16.gmra.mxu1 %v3516_v50  ;;  %v3573_v50 = vld [vmem:[%s3807_s10 + $0x280] ss:$16 sps:$4 sm:$0xff]  }
  0x96   : > { %3037 = vmatprep.mubr.msk.bf16.mxu1 %vm1236_vm0, %v3520_v51  ;;  %2356 = vperm.xlu1 %3420, %v2038_v28   ;;  %v3577_v51 = vld [vmem:[%s3807_s10 + $0x2a4] ss:$16 sps:$4 sm:$0xff]  }
  0x97   : > { %1438 = vmatmul.mubr.bf16.gmra.mxu0 %v3507_v46  ;;  %v3567_v46 = vld [vmem:[%s3807_s10 + $0x260] ss:$16 sps:$4 sm:$0xff]  }
  0x98   : > { %1445 = vmatprep.mubr.bf16.mxu0 %v3511_v49  ;;  %v3580_v49 = vld [vmem:[%s3807_s10 + $0x2cc] ss:$16 sps:$4 sm:$0xff]  }
  0x9d   : > { %1751 = vmatmul.mubr.bf16.gmra.mxu1 %v3522_v58  ;;  %v3585_v58 = vld [vmem:[%s3807_s10 + $0x2c0] ss:$16 sps:$4 sm:$0xff]  }
  0x9e   : > { %3038 = vmatprep.mubr.msk.bf16.mxu1 %vm1236_vm0, %v3526_v59  ;;  %v3589_v59 = vld [vmem:[%s3807_s10 + $0x2e4] ss:$16 sps:$4 sm:$0xff]  }
  0x9f   : > { %1446 = vmatmul.mubr.bf16.gmra.mxu0 %v3513_v54  ;;  %v3579_v54 = vld [vmem:[%s3807_s10 + $0x2a0] ss:$16 sps:$4 sm:$0xff]  }
  0xa0   : > { %1453 = vmatprep.mubr.bf16.mxu0 %v3517_v57  ;;  %v3592_v57 = vld [vmem:[%s3807_s10 + $0x30c] ss:$16 sps:$4 sm:$0xff]  }
  0xa5   : > { %1759 = vmatmul.mubr.bf16.gmra.mxu1 %v3528_v2 }
  0xa6   : > { %3039 = vmatprep.mubr.msk.bf16.mxu1 %vm1236_vm0, %v3532_v3  ;;  %v3600_v3 = vld [vmem:[%s3807_s10 + $0x328] ss:$16 sps:$4 sm:$0xff]  }
  0xa7   : > { %1454 = vmatmul.mubr.bf16.gmra.mxu0 %v3519_v62 }
  0xa8   : > { %1461 = vmatprep.mubr.bf16.mxu0 %v3523_v1  ;;  %v3595_v1 = vld [vmem:[%s3807_s10 + $0x304] ss:$16 sps:$4 sm:$0xff]  }
  0xad   : > { %1767 = vmatmul.mubr.bf16.gmra.mxu1 %v3534_v10 }
  0xae   : > { %3040 = vmatprep.mubr.msk.bf16.mxu1 %vm1236_vm0, %v3538_v11  ;;  %v3606_v11 = vld [vmem:[%s3807_s10 + $0x348] ss:$16 sps:$4 sm:$0xff]  }
  0xaf   : > { %1462 = vmatmul.mubr.bf16.gmra.mxu0 %v3525_v6 }
  0xb0   : > { %1469 = vmatprep.mubr.bf16.mxu0 %v3529_v9  ;;  %v3601_v9 = vld [vmem:[%s3807_s10 + $0x324] ss:$16 sps:$4 sm:$0xff]  }
  0xb5   : > { %1775 = vmatmul.mubr.bf16.gmra.mxu1 %v3540_v18 }
  0xb6   : > { %3041 = vmatprep.mubr.msk.bf16.mxu1 %vm1236_vm0, %v3544_v19  ;;  %v2042_v19 = vpop.permute.xlu0 %2041 }
  0xb7   : > { %1470 = vmatmul.mubr.bf16.gmra.mxu0 %v3531_v14 }
  0xb8   : > { %1477 = vmatprep.mubr.bf16.mxu0 %v3535_v17 }
  0xbd   : > { %1783 = vmatmul.mubr.bf16.gmra.mxu1 %v3546_v26 }
  0xbe   : > { %3042 = vmatprep.mubr.msk.bf16.mxu1 %vm1236_vm0, %v3550_v27  ;;  %v3612_v27 = vld [vmem:[%s3807_s10 + $0x368] ss:$16 sps:$4 sm:$0xff]  }
  0xbf   : > { %1478 = vmatmul.mubr.bf16.gmra.mxu0 %v3537_v22 }
  0xc0   : > { %1485 = vmatprep.mubr.bf16.mxu0 %v3541_v25  ;;  %v3607_v25 = vld [vmem:[%s3807_s10 + $0x344] ss:$16 sps:$4 sm:$0xff]  }
  0xc5   : > { %1791 = vmatmul.mubr.bf16.gmra.mxu1 %v3552_v32 }
  0xc6   : > { %3043 = vmatprep.mubr.msk.bf16.mxu1 %vm1236_vm0, %v3556_v33 }
  0xc7   : > { %1486 = vmatmul.mubr.bf16.gmra.mxu0 %v3543_v30 }
  0xc8   : > { %1493 = vmatprep.mubr.bf16.mxu0 %v3547_v31 }
  0xcd   : > { %1799 = vmatmul.mubr.bf16.gmra.mxu1 %v3558_v36 }
  0xce   : > { %3044 = vmatprep.mubr.msk.bf16.mxu1 %vm1236_vm0, %v3562_v37 }
  0xcf   : > { %1494 = vmatmul.mubr.bf16.gmra.mxu0 %v3549_v34  ;;  %v2047_v34 = vpop.permute.xlu0 %2046 }
  0xd0   : > { %1501 = vmatprep.mubr.bf16.mxu0 %v3553_v35 }
  0xd5   : > { %1807 = vmatmul.mubr.bf16.gmra.mxu1 %v3564_v40 }
  0xd6   : > { %3045 = vmatprep.mubr.msk.bf16.mxu1 %vm1236_vm0, %v3568_v41 }
  0xd7   : > { %1502 = vmatmul.mubr.bf16.gmra.mxu0 %v3555_v38 }
  0xd8   : > { %1509 = vmatprep.mubr.bf16.mxu0 %v3559_v39 }
  0xdd   : > { %1815 = vmatmul.mubr.bf16.gmra.mxu1 %v3570_v44 }
  0xde   : > { %3046 = vmatprep.mubr.msk.bf16.mxu1 %vm1236_vm0, %v3574_v45  ;;  %v3609_v45 = vld [vmem:[%s3807_s10 + $0x340] ss:$16 sps:$4 sm:$0xff]  }
  0xdf   : > { %1510 = vmatmul.mubr.bf16.gmra.mxu0 %v3561_v42 }
  0xe0   : > { %1517 = vmatprep.mubr.bf16.mxu0 %v3565_v43  ;;  %v2052_v43 = vpop.permute.xlu1 %2051 }
  0xe5   : > { %1823 = vmatmul.mubr.bf16.gmra.mxu1 %v3576_v48  ;;  %v3613_v48 = vld [vmem:[%s3807_s10 + $0x364] ss:$16 sps:$4 sm:$0xff]  }
  0xe6   : > { %3047 = vmatprep.mubr.msk.bf16.mxu1 %vm1236_vm0, %v3580_v49 }
  0xe7   : > { %1518 = vmatmul.mubr.bf16.gmra.mxu0 %v3567_v46 }
  0xe8   : > { %1525 = vmatprep.mubr.bf16.mxu0 %v3571_v47 }
  0xed   : > { %1831 = vmatmul.mubr.bf16.gmra.mxu1 %v3582_v52  ;;  %v3622_v52 = vld [vmem:[%s3807_s10 + $0x3ac] ss:$16 sps:$4 sm:$0xff]  }
  0xee   : > { %3048 = vmatprep.mubr.msk.bf16.mxu1 %vm1236_vm0, %v3586_v53 }
  0xef   : > { %1526 = vmatmul.mubr.bf16.gmra.mxu0 %v3573_v50  ;;  %v3618_v50 = vld [vmem:[%s3807_s10 + $0x388] ss:$16 sps:$4 sm:$0xff]  }
  0xf0   : > { %1533 = vmatprep.mubr.bf16.mxu0 %v3577_v51 }
  0xf5   : > { %1839 = vmatmul.mubr.bf16.gmra.mxu1 %v3588_v56 }
  0xf6   : > { %3049 = vmatprep.mubr.msk.bf16.mxu1 %vm1236_vm0, %v3592_v57 }
  0xf7   : > { %1534 = vmatmul.mubr.bf16.gmra.mxu0 %v3579_v54 }
  0xf8   : > { %1541 = vmatprep.mubr.bf16.mxu0 %v3583_v55 }
  0xfd   : > { %v1656_v62 = vpop.f32.mrf.mxu1  ;;  %1847 = vmatmul.mubr.bf16.gmra.mxu1 %v3594_v60  ;;  %v2057_v60 = vpop.permute.xlu1 %2056 }
  0xfe   : > { %3050 = vmatprep.mubr.msk.bf16.mxu1 %vm1236_vm0, %v3598_v61 }
  0xff   : > { %1542 = vmatmul.mubr.bf16.gmra.mxu0 %v3585_v58  ;;  %v1658_v63 = vpop.f32.mrf.mxu1 }
 0x100   : > { %1549 = vmatprep.mubr.bf16.mxu0 %v3589_v59 }
 0x101   : > { %v1659_v2 = vpop.f32.mrf.mxu1 }
 0x103   : > { %v1661_v5 = vpop.f32.mrf.mxu1 }
 0x105   : > { %v1664_v6 = vpop.f32.mrf.mxu1  ;;  %1855 = vmatmul.mubr.bf16.gmra.mxu1 %v3600_v3  ;;  %v3615_v3 = vld [vmem:[%s3807_s10 + $0x360] ss:$16 sps:$4 sm:$0xff]  }
 0x106   : > { %3051 = vmatprep.mubr.msk.bf16.mxu1 %vm1236_vm0, %v3604_v4 }
 0x107   : > { %1550 = vmatmul.mubr.bf16.gmra.mxu0 %v3591_v0  ;;  %v1666_v7 = vpop.f32.mrf.mxu1 }
 0x108   : > { %1557 = vmatprep.mubr.bf16.mxu0 %v3595_v1 }
 0x109   : > { %v1667_v10 = vpop.f32.mrf.mxu1 }
 0x10b   : > { %v1669_v14 = vpop.f32.mrf.mxu1 }
 0x10d   : > { %v1672_v17 = vpop.f32.mrf.mxu1  ;;  %1863 = vmatmul.mubr.bf16.gmra.mxu1 %v3606_v11 }
 0x10e   : > { %3052 = vmatprep.mubr.msk.bf16.mxu1 %vm1236_vm0, %v3610_v13 }
 0x10f   : > { %v1367_v15 = vpop.f32.mrf.mxu0  ;;  %1558 = vmatmul.mubr.bf16.gmra.mxu0 %v3597_v8  ;;  %v1674_v21 = vpop.f32.mrf.mxu1  ;;  %v3624_v8 = vld [vmem:[%s3807_s10 + $0x3a8] ss:$16 sps:$4 sm:$0xff]  }
 0x110   : > { %v1368_v16 = vadd.f32 %v4074_v12, %v1367_v15  ;;  %1565 = vmatprep.mubr.bf16.mxu0 %v3601_v9 }
 0x111   : > { %v1369_v18 = vpop.f32.mrf.mxu0  ;;  %v1675_v26 = vpop.f32.mrf.mxu1 }
 0x112   : > { %v1657_v20 = vadd.f32 %v1656_v62, %v1368_v16  ;;  %v2067_v16 = vpop.permute.xlu1 %2066 }
 0x113   : > { %v1370_v22 = vpop.f32.mrf.mxu0  ;;  %v1677_v32 = vpop.f32.mrf.mxu1 }
 0x114   : > { %v1371_v24 = vadd.f32 %v4074_v12, %v1370_v22  ;;  %v1911_v31 = vmax.f32 %v1657_v20, 0.0  ;;  %v2062_v20 = vpop.permute.xlu0 %2061  ;;  %v3630_v32 = vld [vmem:[%s3807_s10 + $0x3c8] ss:$16 sps:$4 sm:$0xff]  }
 0x115   : > { %v1372_v28 = vpop.f32.mrf.mxu0  ;;  %v4086_v37 = vpop.f32.mrf.mxu1  ;;  %1871 = vmatmul.mubr.bf16.gmra.mxu1 %v3612_v27  ;;  %v3619_v27 = vld [vmem:[%s3807_s10 + $0x380] ss:$16 sps:$4 sm:$0xff]  }
 0x116   : > { %v1660_v30 = vadd.f32 %v1659_v2, %v1371_v24  ;;  %3053 = vmatprep.mubr.msk.bf16.mxu1 %vm1236_vm0, %v3616_v29  ;;  %v2359_v39 = vmul.f32 %v2042_v19, %v1911_v31 }
 0x117   : > { %v1375_v33 = vpop.f32.mrf.mxu0  ;;  %1566 = vmatmul.mubr.bf16.gmra.mxu0 %v3603_v23  ;;  %v1682_v42 = vpop.f32.mrf.mxu1 }
 0x118   : > { %v1376_v35 = vadd.f32 %v4074_v12, %v1375_v33  ;;  %v1912_v36 = vmax.f32 %v1660_v30, 0.0  ;;  %1573 = vmatprep.mubr.bf16.mxu0 %v3607_v25  ;;  %v3627_v30 = vld [vmem:[%s3807_s10 + $0x3a4] ss:$16 sps:$4 sm:$0xff]  }
 0x119   : > { %v1377_v38 = vpop.f32.mrf.mxu0  ;;  %v1683_v49 = vpop.f32.mrf.mxu1 }
 0x11a   : > { %v1665_v40 = vadd.f32 %v1664_v6, %v1376_v35  ;;  %v2360_v41 = vmul.f32 %v2047_v34, %v1912_v36  ;;  %v3621_v6 = vld [vmem:[%s3807_s10 + $0x384] ss:$16 sps:$4 sm:$0xff]   ;;  %v3634_v34 = vld [vmem:[%s3807_s10 + $0x3ec] ss:$16 sps:$4 sm:$0xff]  }
 0x11b   : > { %v1378_v44 = vpop.f32.mrf.mxu0  ;;  %v1685_v55 = vpop.f32.mrf.mxu1 }
 0x11c   : > { %v3190_v46 = vpack.c.bf16 %v2360_v41, %v2359_v39  ;;  %v1379_v47 = vadd.f32 %v4074_v12, %v1378_v44  ;;  %v1913_v53 = vmax.f32 %v1665_v40, 0.0  ;;  %v2077_v40 = vpop.permute.xlu1 %2076  ;;  %v3636_v55 = vld [vmem:[%s3807_s10 + $0x3e8] ss:$16 sps:$4 sm:$0xff]  }
 0x11d   : > { %v1380_v51 = vpop.f32.mrf.mxu0  ;;  %v4101_v59 = vpop.f32.mrf.mxu1  ;;  %1879 = vmatmul.mubr.bf16.gmra.mxu1 %v3618_v50  ;;  %v3625_v50 = vld [vmem:[%s3807_s10 + $0x3a0] ss:$16 sps:$4 sm:$0xff]  }
 0x11e   : > { %3191 = vst [vmem:[%s4092_s12] sm:$0xff] %v3190_v46   ;;  %v1668_v54 = vadd.f32 %v1667_v10, %v1379_v47  ;;  %3054 = vmatprep.mubr.msk.bf16.mxu1 %vm1236_vm0, %v3622_v52  ;;  %v2361_v62 = vmul.f32 %v2052_v43, %v1913_v53  ;;  %v3628_v10 = vld [vmem:[%s3807_s10 + $0x3cc] ss:$16 sps:$4 sm:$0xff]   ;;  %v2072_v43 = vpop.permute.xlu0 %2071  ;;  %v3633_v53 = vld [vmem:[%s3807_s10 + $0x3c4] ss:$16 sps:$4 sm:$0xff]  }
 0x11f   : > { %v1383_v56 = vpop.f32.mrf.mxu0  ;;  %1574 = vmatmul.mubr.bf16.gmra.mxu0 %v3609_v45  ;;  %v1690_v1 = vpop.f32.mrf.mxu1 }
 0x120   : > { %v1914_v57 = vmax.f32 %v1668_v54, 0.0  ;;  %v1384_v58 = vadd.f32 %v4074_v12, %v1383_v56  ;;  %1581 = vmatprep.mubr.bf16.mxu0 %v3613_v48 }
 0x121   : > { %v1385_v61 = vpop.f32.mrf.mxu0  ;;  %v1691_v7 = vpop.f32.mrf.mxu1 }
 0x122   : > { %v2362_v63 = vmul.f32 %v2057_v60, %v1914_v57  ;;  %v1673_v0 = vadd.f32 %v1672_v17, %v1384_v58  ;;  %v2082_v1 = vpop.permute.xlu0 %2081 }
 0x123   : > { %v1386_v2 = vpop.f32.mrf.mxu0  ;;  %v1693_v14 = vpop.f32.mrf.mxu1 }
 0x124   : > { %v3195_v4 = vpack.c.bf16 %v2362_v63, %v2361_v62  ;;  %v1387_v5 = vadd.f32 %v4074_v12, %v1386_v2  ;;  %v1915_v11 = vmax.f32 %v1673_v0, 0.0  ;;  %v2087_v62 = vpop.permute.xlu1 %2086 }
 0x125   : > { %v1388_v9 = vpop.f32.mrf.mxu0  ;;  %v1696_v19 = vpop.f32.mrf.mxu1  ;;  %1887 = vmatmul.mubr.bf16.gmra.mxu1 %v3624_v8  ;;  %v3631_v8 = vld [vmem:[%s3807_s10 + $0x3c0] ss:$16 sps:$4 sm:$0xff]  }
 0x126   : > { %3347 = vst [vmem:[%s4092_s12 + $0x8] sm:$0xff] %v3195_v4   ;;  %v1676_v13 = vadd.f32 %v1675_v26, %v1387_v5  ;;  %3055 = vmatprep.mubr.msk.bf16.mxu1 %vm1236_vm0, %v3628_v10  ;;  %v2363_v22 = vmul.f32 %v2062_v20, %v1915_v11  ;;  %v3639_v11 = vld [vmem:[%s3807_s10 + $0x3e4] ss:$16 sps:$4 sm:$0xff]  }
 0x127   : > { %v1391_v15 = vpop.f32.mrf.mxu0  ;;  %1582 = vmatmul.mubr.bf16.gmra.mxu0 %v3615_v3  ;;  %v1698_v25 = vpop.f32.mrf.mxu1 }
 0x128   : > { %v1916_v17 = vmax.f32 %v1676_v13, 0.0  ;;  %v1392_v18 = vadd.f32 %v4074_v12, %v1391_v15  ;;  %1589 = vmatprep.mubr.bf16.mxu0 %v3621_v6  ;;  %v2097_v20 = vpop.permute.xlu1 %2096 }
 0x129   : > { %v1393_v21 = vpop.f32.mrf.mxu0  ;;  %v1699_v31 = vpop.f32.mrf.mxu1 }
 0x12a   : > { %v2364_v23 = vmul.f32 %v2067_v16, %v1916_v17  ;;  %v1681_v24 = vadd.f32 %v4086_v37, %v1392_v18 }
 0x12b   : > { %v1394_v26 = vpop.f32.mrf.mxu0  ;;  %v1701_v38 = vpop.f32.mrf.mxu1 }
 0x12c   : > { %v3200_v28 = vpack.c.bf16 %v2364_v23, %v2363_v22  ;;  %v1395_v29 = vadd.f32 %v4074_v12, %v1394_v26  ;;  %v1917_v35 = vmax.f32 %v1681_v24, 0.0  ;;  %v2092_v23 = vpop.permute.xlu0 %2091 }
 0x12d   : > { %v1396_v33 = vpop.f32.mrf.mxu0  ;;  %v1704_v42 = vpop.f32.mrf.mxu1  ;;  %1895 = vmatmul.mubr.bf16.gmra.mxu1 %v3630_v32 }
 0x12e   : > { %3348 = vst [vmem:[%s4092_s12 + $0x10] sm:$0xff] %v3200_v28   ;;  %v1684_v36 = vadd.f32 %v1683_v49, %v1395_v29  ;;  %3056 = vmatprep.mubr.msk.bf16.mxu1 %vm1236_vm0, %v3634_v34  ;;  %v2365_v45 = vmul.f32 %v2072_v43, %v1917_v35 }
 0x12f   : > { %v1399_v39 = vpop.f32.mrf.mxu0  ;;  %1590 = vmatmul.mubr.bf16.gmra.mxu0 %v3619_v27  ;;  %v1706_v48 = vpop.f32.mrf.mxu1 }
 0x130   : > { %v1918_v37 = vmax.f32 %v1684_v36, 0.0  ;;  %v1400_v41 = vadd.f32 %v4074_v12, %v1399_v39  ;;  %1597 = vmatprep.mubr.bf16.mxu0 %v3627_v30  ;;  %v3637_v30 = vld [vmem:[%s3807_s10 + $0x3e0] ss:$16 sps:$4 sm:$0xff]   ;;  %v2102_v43 = vpop.permute.xlu0 %2101 }
 0x131   : > { %v1401_v44 = vpop.f32.mrf.mxu0  ;;  %v1707_v54 = vpop.f32.mrf.mxu1 }
 0x132   : > { %v2366_v46 = vmul.f32 %v2077_v40, %v1918_v37  ;;  %v1689_v47 = vadd.f32 %v4101_v59, %v1400_v41  ;;  %v2107_v40 = vpop.permute.xlu1 %2106 }
 0x133   : > { %v1402_v49 = vpop.f32.mrf.mxu0  ;;  %v1709_v60 = vpop.f32.mrf.mxu1 }
 0x134   : > { %v3205_v51 = vpack.c.bf16 %v2366_v46, %v2365_v45  ;;  %v1403_v52 = vadd.f32 %v4074_v12, %v1402_v49  ;;  %v1919_v57 = vmax.f32 %v1689_v47, 0.0 }
 0x135   : > { %v1404_v56 = vpop.f32.mrf.mxu0  ;;  %v1712_v0 = vpop.f32.mrf.mxu1  ;;  %1903 = vmatmul.mubr.bf16.gmra.mxu1 %v3636_v55 }
 0x136   : > { %3349 = vst [vmem:[%s4092_s12 + $0x18] sm:$0xff] %v3205_v51   ;;  %v1692_v58 = vadd.f32 %v1691_v7, %v1403_v52  ;;  %v2367_v3 = vmul.f32 %v2082_v1, %v1919_v57 }
 0x137   : > { %v1407_v61 = vpop.f32.mrf.mxu0  ;;  %1598 = vmatmul.mubr.bf16.gmra.mxu0 %v3625_v50  ;;  %v1714_v6 = vpop.f32.mrf.mxu1 }
 0x138   : > { %v1920_v59 = vmax.f32 %v1692_v58, 0.0  ;;  %v1408_v63 = vadd.f32 %v4074_v12, %v1407_v61  ;;  %1605 = vmatprep.mubr.bf16.mxu0 %v3633_v53  ;;  %v2117_v58 = vpop.permute.xlu1 %2116 }
 0x139   : > { %v1409_v2 = vpop.f32.mrf.mxu0  ;;  %v1715_v13 = vpop.f32.mrf.mxu1 }
 0x13a   : > { %v2368_v4 = vmul.f32 %v2087_v62, %v1920_v59  ;;  %v1697_v5 = vadd.f32 %v1696_v19, %v1408_v63  ;;  %v2112_v59 = vpop.permute.xlu0 %2111 }
 0x13b   : > { %v1410_v7 = vpop.f32.mrf.mxu0  ;;  %v1717_v17 = vpop.f32.mrf.mxu1 }
 0x13c   : > { %v3210_v9 = vpack.c.bf16 %v2368_v4, %v2367_v3  ;;  %v1411_v10 = vadd.f32 %v4074_v12, %v1410_v7  ;;  %v1921_v15 = vmax.f32 %v1697_v5, 0.0 }
 0x13d   : > { %v1412_v14 = vpop.f32.mrf.mxu0  ;;  %v1720_v22 = vpop.f32.mrf.mxu1 }
 0x13e   : > { %3350 = vst [vmem:[%s4092_s12 + $0x20] sm:$0xff] %v3210_v9   ;;  %v1700_v16 = vadd.f32 %v1699_v31, %v1411_v10  ;;  %v2369_v25 = vmul.f32 %v2092_v23, %v1921_v15  ;;  %v2127_v14 = vpop.permute.xlu1 %2126 }
 0x13f   : > { %v1415_v18 = vpop.f32.mrf.mxu0  ;;  %1606 = vmatmul.mubr.bf16.gmra.mxu0 %v3631_v8  ;;  %v1722_v28 = vpop.f32.mrf.mxu1 }
 0x140   : > { %v1922_v21 = vmax.f32 %v1700_v16, 0.0  ;;  %v1416_v19 = vadd.f32 %v4074_v12, %v1415_v18  ;;  %1613 = vmatprep.mubr.bf16.mxu0 %v3639_v11  ;;  %v2122_v18 = vpop.permute.xlu0 %2121 }
 0x141   : > { %v1417_v24 = vpop.f32.mrf.mxu0  ;;  %v1723_v33 = vpop.f32.mrf.mxu1 }
 0x142   : > { %v2370_v26 = vmul.f32 %v2097_v20, %v1922_v21  ;;  %v1705_v27 = vadd.f32 %v1704_v42, %v1416_v19 }
 0x143   : > { %v1418_v29 = vpop.f32.mrf.mxu0  ;;  %v1725_v38 = vpop.f32.mrf.mxu1 }
 0x144   : > { %v3215_v31 = vpack.c.bf16 %v2370_v26, %v2369_v25  ;;  %v1419_v32 = vadd.f32 %v4074_v12, %v1418_v29  ;;  %v1923_v35 = vmax.f32 %v1705_v27, 0.0  ;;  %v2132_v38 = vpop.permute.xlu0 %2131 }
 0x145   : > { %v1420_v34 = vpop.f32.mrf.mxu0  ;;  %v1728_v42 = vpop.f32.mrf.mxu1 }
 0x146   : > { %3351 = vst [vmem:[%s4092_s12 + $0x28] sm:$0xff] %v3215_v31   ;;  %v1708_v36 = vadd.f32 %v1707_v54, %v1419_v32  ;;  %v2371_v45 = vmul.f32 %v2102_v43, %v1923_v35 }
 0x147   : > { %v1423_v39 = vpop.f32.mrf.mxu0  ;;  %1614 = vmatmul.mubr.bf16.gmra.mxu0 %v3637_v30  ;;  %v1730_v48 = vpop.f32.mrf.mxu1 }
 0x148   : > { %v1924_v37 = vmax.f32 %v1708_v36, 0.0  ;;  %v1424_v41 = vadd.f32 %v4074_v12, %v1423_v39 }
 0x149   : > { %v1425_v44 = vpop.f32.mrf.mxu0  ;;  %v1731_v52 = vpop.f32.mrf.mxu1 }
 0x14a   : > { %v2372_v46 = vmul.f32 %v2107_v40, %v1924_v37  ;;  %v1713_v47 = vadd.f32 %v1712_v0, %v1424_v41 }
 0x14b   : > { %v1426_v49 = vpop.f32.mrf.mxu0  ;;  %v1733_v56 = vpop.f32.mrf.mxu1 }
 0x14c   : > { %v3220_v50 = vpack.c.bf16 %v2372_v46, %v2371_v45  ;;  %v1427_v51 = vadd.f32 %v4074_v12, %v1426_v49  ;;  %v1925_v54 = vmax.f32 %v1713_v47, 0.0  ;;  %v2142_v56 = vpop.permute.xlu0 %2141 }
 0x14d   : > { %v1428_v53 = vpop.f32.mrf.mxu0  ;;  %v1736_v62 = vpop.f32.mrf.mxu1 }
 0x14e   : > { %3352 = vst [vmem:[%s4092_s12 + $0x30] sm:$0xff] %v3220_v50   ;;  %v1716_v55 = vadd.f32 %v1715_v13, %v1427_v51  ;;  %v2373_v0 = vmul.f32 %v2112_v59, %v1925_v54 }
 0x14f   : > { %v1431_v57 = vpop.f32.mrf.mxu0  ;;  %v1738_v3 = vpop.f32.mrf.mxu1 }
 0x150   : > { %v1926_v60 = vmax.f32 %v1716_v55, 0.0  ;;  %v1432_v61 = vadd.f32 %v4074_v12, %v1431_v57 }
 0x151   : > { %v1433_v63 = vpop.f32.mrf.mxu0  ;;  %v1739_v7 = vpop.f32.mrf.mxu1 }
 0x152   : > { %v2374_v1 = vmul.f32 %v2117_v58, %v1926_v60  ;;  %v1721_v2 = vadd.f32 %v1720_v22, %v1432_v61 }
 0x153   : > { %v1434_v4 = vpop.f32.mrf.mxu0  ;;  %v1741_v11 = vpop.f32.mrf.mxu1 }
 0x154   : > { %v3225_v5 = vpack.c.bf16 %v2374_v1, %v2373_v0  ;;  %v1435_v6 = vadd.f32 %v4074_v12, %v1434_v4  ;;  %v1927_v9 = vmax.f32 %v1721_v2, 0.0  ;;  %v2152_v11 = vpop.permute.xlu0 %2151 }
 0x155   : > { %v1436_v8 = vpop.f32.mrf.mxu0  ;;  %v1744_v17 = vpop.f32.mrf.mxu1 }
 0x156   : > { %3353 = vst [vmem:[%s4092_s12 + $0x38] sm:$0xff] %v3225_v5   ;;  %v1724_v10 = vadd.f32 %v1723_v33, %v1435_v6  ;;  %v2375_v21 = vmul.f32 %v2122_v18, %v1927_v9  ;;  %v2137_v33 = vpop.permute.xlu1 %2136 }
 0x157   : > { %v1439_v13 = vpop.f32.mrf.mxu0  ;;  %v1746_v23 = vpop.f32.mrf.mxu1 }
 0x158   : > { %v1928_v15 = vmax.f32 %v1724_v10, 0.0  ;;  %v1440_v16 = vadd.f32 %v4074_v12, %v1439_v13 }
 0x159   : > { %v1441_v20 = vpop.f32.mrf.mxu0  ;;  %v1747_v27 = vpop.f32.mrf.mxu1 }
 0x15a   : > { %v2376_v19 = vmul.f32 %v2127_v14, %v1928_v15  ;;  %v1729_v22 = vadd.f32 %v1728_v42, %v1440_v16 }
 0x15b   : > { %v1442_v24 = vpop.f32.mrf.mxu0  ;;  %v1749_v31 = vpop.f32.mrf.mxu1 }
 0x15c   : > { %v3230_v25 = vpack.c.bf16 %v2376_v19, %v2375_v21  ;;  %v1443_v26 = vadd.f32 %v4074_v12, %v1442_v24  ;;  %v1929_v29 = vmax.f32 %v1729_v22, 0.0  ;;  %v2162_v31 = vpop.permute.xlu0 %2161 }
 0x15d   : > { %v1444_v28 = vpop.f32.mrf.mxu0  ;;  %v1752_v36 = vpop.f32.mrf.mxu1 }
 0x15e   : > { %3354 = vst [vmem:[%s4092_s12 + $0x40] sm:$0xff] %v3230_v25   ;;  %v1732_v30 = vadd.f32 %v1731_v52, %v1443_v26  ;;  %v2377_v40 = vmul.f32 %v2132_v38, %v1929_v29  ;;  %v2147_v52 = vpop.permute.xlu1 %2146 }
 0x15f   : > { %v1447_v32 = vpop.f32.mrf.mxu0  ;;  %v1754_v42 = vpop.f32.mrf.mxu1 }
 0x160   : > { %v1930_v34 = vmax.f32 %v1732_v30, 0.0  ;;  %v1448_v35 = vadd.f32 %v4074_v12, %v1447_v32 }
 0x161   : > { %v1449_v39 = vpop.f32.mrf.mxu0  ;;  %v1755_v46 = vpop.f32.mrf.mxu1 }
 0x162   : > { %v2378_v37 = vmul.f32 %v2137_v33, %v1930_v34  ;;  %v1737_v41 = vadd.f32 %v1736_v62, %v1448_v35 }
 0x163   : > { %v1450_v43 = vpop.f32.mrf.mxu0  ;;  %v1757_v50 = vpop.f32.mrf.mxu1 }
 0x164   : > { %v3235_v44 = vpack.c.bf16 %v2378_v37, %v2377_v40  ;;  %v1451_v45 = vadd.f32 %v4074_v12, %v1450_v43  ;;  %v1931_v48 = vmax.f32 %v1737_v41, 0.0  ;;  %v2172_v50 = vpop.permute.xlu0 %2171 }
 0x165   : > { %v1452_v47 = vpop.f32.mrf.mxu0  ;;  %v1760_v55 = vpop.f32.mrf.mxu1 }
 0x166   : > { %3355 = vst [vmem:[%s4092_s12 + $0x48] sm:$0xff] %v3235_v44   ;;  %v1740_v49 = vadd.f32 %v1739_v7, %v1451_v45  ;;  %v2379_v58 = vmul.f32 %v2142_v56, %v1931_v48  ;;  %v2157_v7 = vpop.permute.xlu1 %2156 }
 0x167   : > { %v1455_v51 = vpop.f32.mrf.mxu0  ;;  %v1762_v62 = vpop.f32.mrf.mxu1 }
 0x168   : > { %v1932_v53 = vmax.f32 %v1740_v49, 0.0  ;;  %v1456_v54 = vadd.f32 %v4074_v12, %v1455_v51 }
 0x169   : > { %v1457_v57 = vpop.f32.mrf.mxu0  ;;  %v1763_v1 = vpop.f32.mrf.mxu1 }
 0x16a   : > { %v2380_v60 = vmul.f32 %v2147_v52, %v1932_v53  ;;  %v1745_v61 = vadd.f32 %v1744_v17, %v1456_v54 }
 0x16b   : > { %v1458_v59 = vpop.f32.mrf.mxu0  ;;  %v1765_v5 = vpop.f32.mrf.mxu1 }
 0x16c   : > { %v3240_v63 = vpack.c.bf16 %v2380_v60, %v2379_v58  ;;  %v1459_v0 = vadd.f32 %v4074_v12, %v1458_v59  ;;  %v1933_v3 = vmax.f32 %v1745_v61, 0.0  ;;  %v2182_v5 = vpop.permute.xlu0 %2181 }
 0x16d   : > { %v1460_v2 = vpop.f32.mrf.mxu0  ;;  %v1768_v10 = vpop.f32.mrf.mxu1 }
 0x16e   : > { %3356 = vst [vmem:[%s4092_s12 + $0x50] sm:$0xff] %v3240_v63   ;;  %v1748_v4 = vadd.f32 %v1747_v27, %v1459_v0  ;;  %v2381_v14 = vmul.f32 %v2152_v11, %v1933_v3  ;;  %v2167_v27 = vpop.permute.xlu1 %2166 }
 0x16f   : > { %v1463_v6 = vpop.f32.mrf.mxu0  ;;  %v1770_v17 = vpop.f32.mrf.mxu1 }
 0x170   : > { %v1934_v8 = vmax.f32 %v1748_v4, 0.0  ;;  %v1464_v9 = vadd.f32 %v4074_v12, %v1463_v6 }
 0x171   : > { %v1465_v13 = vpop.f32.mrf.mxu0  ;;  %v1771_v19 = vpop.f32.mrf.mxu1 }
 0x172   : > { %v2382_v15 = vmul.f32 %v2157_v7, %v1934_v8  ;;  %v1753_v16 = vadd.f32 %v1752_v36, %v1464_v9 }
 0x173   : > { %v1466_v18 = vpop.f32.mrf.mxu0  ;;  %v1773_v25 = vpop.f32.mrf.mxu1 }
 0x174   : > { %v3245_v20 = vpack.c.bf16 %v2382_v15, %v2381_v14  ;;  %v1467_v21 = vadd.f32 %v4074_v12, %v1466_v18  ;;  %v1935_v23 = vmax.f32 %v1753_v16, 0.0  ;;  %v2192_v25 = vpop.permute.xlu0 %2191 }
 0x175   : > { %v1468_v22 = vpop.f32.mrf.mxu0  ;;  %v1776_v30 = vpop.f32.mrf.mxu1 }
 0x176   : > { %3357 = vst [vmem:[%s4092_s12 + $0x58] sm:$0xff] %v3245_v20   ;;  %v1756_v24 = vadd.f32 %v1755_v46, %v1467_v21  ;;  %v2383_v33 = vmul.f32 %v2162_v31, %v1935_v23  ;;  %v2177_v46 = vpop.permute.xlu1 %2176 }
 0x177   : > { %v1471_v26 = vpop.f32.mrf.mxu0  ;;  %v1778_v36 = vpop.f32.mrf.mxu1 }
 0x178   : > { %v1936_v28 = vmax.f32 %v1756_v24, 0.0  ;;  %v1472_v29 = vadd.f32 %v4074_v12, %v1471_v26 }
 0x179   : > { %v1473_v32 = vpop.f32.mrf.mxu0  ;;  %v1779_v37 = vpop.f32.mrf.mxu1 }
 0x17a   : > { %v2384_v34 = vmul.f32 %v2167_v27, %v1936_v28  ;;  %v1761_v35 = vadd.f32 %v1760_v55, %v1472_v29 }
 0x17b   : > { %v1474_v38 = vpop.f32.mrf.mxu0  ;;  %v1781_v44 = vpop.f32.mrf.mxu1 }
 0x17c   : > { %v3250_v39 = vpack.c.bf16 %v2384_v34, %v2383_v33  ;;  %v1475_v40 = vadd.f32 %v4074_v12, %v1474_v38  ;;  %v1937_v42 = vmax.f32 %v1761_v35, 0.0  ;;  %v2202_v44 = vpop.permute.xlu0 %2201 }
 0x17d   : > { %v1476_v41 = vpop.f32.mrf.mxu0  ;;  %v1784_v49 = vpop.f32.mrf.mxu1 }
 0x17e   : > { %3358 = vst [vmem:[%s4092_s12 + $0x60] sm:$0xff] %v3250_v39   ;;  %v1764_v43 = vadd.f32 %v1763_v1, %v1475_v40  ;;  %v2385_v52 = vmul.f32 %v2172_v50, %v1937_v42  ;;  %v2187_v1 = vpop.permute.xlu1 %2186 }
 0x17f   : > { %v1479_v45 = vpop.f32.mrf.mxu0  ;;  %v1786_v55 = vpop.f32.mrf.mxu1 }
 0x180   : > { %v1938_v47 = vmax.f32 %v1764_v43, 0.0  ;;  %v1480_v48 = vadd.f32 %v4074_v12, %v1479_v45 }
 0x181   : > { %v1481_v51 = vpop.f32.mrf.mxu0  ;;  %v1787_v60 = vpop.f32.mrf.mxu1 }
 0x182   : > { %v2386_v53 = vmul.f32 %v2177_v46, %v1938_v47  ;;  %v1769_v54 = vadd.f32 %v1768_v10, %v1480_v48 }
 0x183   : > { %v1482_v56 = vpop.f32.mrf.mxu0  ;;  %v1789_v63 = vpop.f32.mrf.mxu1 }
 0x184   : > { %v3255_v57 = vpack.c.bf16 %v2386_v53, %v2385_v52  ;;  %v1483_v58 = vadd.f32 %v4074_v12, %v1482_v56  ;;  %v1939_v62 = vmax.f32 %v1769_v54, 0.0  ;;  %v2212_v63 = vpop.permute.xlu0 %2211 }
 0x185   : > { %v1484_v61 = vpop.f32.mrf.mxu0  ;;  %v1792_v4 = vpop.f32.mrf.mxu1 }
 0x186   : > { %3359 = vst [vmem:[%s4092_s12 + $0x68] sm:$0xff] %v3255_v57   ;;  %v1772_v59 = vadd.f32 %v1771_v19, %v1483_v58  ;;  %v2387_v7 = vmul.f32 %v2182_v5, %v1939_v62  ;;  %v2197_v19 = vpop.permute.xlu1 %2196 }
 0x187   : > { %v1487_v0 = vpop.f32.mrf.mxu0  ;;  %v1794_v10 = vpop.f32.mrf.mxu1 }
 0x188   : > { %v1940_v2 = vmax.f32 %v1772_v59, 0.0  ;;  %v1488_v3 = vadd.f32 %v4074_v12, %v1487_v0 }
 0x189   : > { %v1489_v6 = vpop.f32.mrf.mxu0  ;;  %v1795_v15 = vpop.f32.mrf.mxu1 }
 0x18a   : > { %v2388_v8 = vmul.f32 %v2187_v1, %v1940_v2  ;;  %v1777_v9 = vadd.f32 %v1776_v30, %v1488_v3 }
 0x18b   : > { %v1490_v11 = vpop.f32.mrf.mxu0  ;;  %v1797_v20 = vpop.f32.mrf.mxu1 }
 0x18c   : > { %v3260_v13 = vpack.c.bf16 %v2388_v8, %v2387_v7  ;;  %v1491_v14 = vadd.f32 %v4074_v12, %v1490_v11  ;;  %v1941_v17 = vmax.f32 %v1777_v9, 0.0  ;;  %v2222_v20 = vpop.permute.xlu0 %2221 }
 0x18d   : > { %v1492_v16 = vpop.f32.mrf.mxu0  ;;  %v1800_v24 = vpop.f32.mrf.mxu1 }
 0x18e   : > { %3360 = vst [vmem:[%s4092_s12 + $0x70] sm:$0xff] %v3260_v13   ;;  %v1780_v18 = vadd.f32 %v1779_v37, %v1491_v14  ;;  %v2389_v27 = vmul.f32 %v2192_v25, %v1941_v17  ;;  %v2207_v37 = vpop.permute.xlu1 %2206 }
 0x18f   : > { %v1495_v21 = vpop.f32.mrf.mxu0  ;;  %v1802_v30 = vpop.f32.mrf.mxu1 }
 0x190   : > { %v1942_v22 = vmax.f32 %v1780_v18, 0.0  ;;  %v1496_v23 = vadd.f32 %v4074_v12, %v1495_v21 }
 0x191   : > { %v1497_v26 = vpop.f32.mrf.mxu0  ;;  %v1803_v34 = vpop.f32.mrf.mxu1 }
 0x192   : > { %v2390_v28 = vmul.f32 %v2197_v19, %v1942_v22  ;;  %v1785_v29 = vadd.f32 %v1784_v49, %v1496_v23 }
 0x193   : > { %v1498_v31 = vpop.f32.mrf.mxu0  ;;  %v1805_v39 = vpop.f32.mrf.mxu1 }
 0x194   : > { %v3265_v32 = vpack.c.bf16 %v2390_v28, %v2389_v27  ;;  %v1499_v33 = vadd.f32 %v4074_v12, %v1498_v31  ;;  %v1943_v36 = vmax.f32 %v1785_v29, 0.0  ;;  %v2232_v39 = vpop.permute.xlu0 %2231 }
 0x195   : > { %v1500_v35 = vpop.f32.mrf.mxu0  ;;  %v1808_v43 = vpop.f32.mrf.mxu1 }
 0x196   : > { %3361 = vst [vmem:[%s4092_s12 + $0x78] sm:$0xff] %v3265_v32   ;;  %v1788_v38 = vadd.f32 %v1787_v60, %v1499_v33  ;;  %v2391_v46 = vmul.f32 %v2202_v44, %v1943_v36  ;;  %v2217_v60 = vpop.permute.xlu1 %2216 }
 0x197   : > { %v1503_v40 = vpop.f32.mrf.mxu0  ;;  %v1810_v49 = vpop.f32.mrf.mxu1 }
 0x198   : > { %v1944_v41 = vmax.f32 %v1788_v38, 0.0  ;;  %v1504_v42 = vadd.f32 %v4074_v12, %v1503_v40 }
 0x199   : > { %v1505_v45 = vpop.f32.mrf.mxu0  ;;  %v1811_v53 = vpop.f32.mrf.mxu1 }
 0x19a   : > { %v2392_v47 = vmul.f32 %v2207_v37, %v1944_v41  ;;  %v1793_v48 = vadd.f32 %v1792_v4, %v1504_v42 }
 0x19b   : > { %v1506_v50 = vpop.f32.mrf.mxu0  ;;  %v1813_v57 = vpop.f32.mrf.mxu1 }
 0x19c   : > { %v3270_v51 = vpack.c.bf16 %v2392_v47, %v2391_v46  ;;  %v1507_v52 = vadd.f32 %v4074_v12, %v1506_v50  ;;  %v1945_v55 = vmax.f32 %v1793_v48, 0.0  ;;  %v2242_v57 = vpop.permute.xlu0 %2241 }
 0x19d   : > { %v1508_v54 = vpop.f32.mrf.mxu0  ;;  %v1816_v59 = vpop.f32.mrf.mxu1 }
 0x19e   : > { %3362 = vst [vmem:[%s4092_s12 + $0x80] sm:$0xff] %v3270_v51   ;;  %v1796_v56 = vadd.f32 %v1795_v15, %v1507_v52  ;;  %v2393_v1 = vmul.f32 %v2212_v63, %v1945_v55  ;;  %v2227_v15 = vpop.permute.xlu1 %2226 }
 0x19f   : > { %v1511_v58 = vpop.f32.mrf.mxu0  ;;  %v1818_v4 = vpop.f32.mrf.mxu1 }
 0x1a0   : > { %v1946_v61 = vmax.f32 %v1796_v56, 0.0  ;;  %v1512_v62 = vadd.f32 %v4074_v12, %v1511_v58 }
 0x1a1   : > { %v1513_v0 = vpop.f32.mrf.mxu0  ;;  %v1819_v8 = vpop.f32.mrf.mxu1 }
 0x1a2   : > { %v2394_v2 = vmul.f32 %v2217_v60, %v1946_v61  ;;  %v1801_v3 = vadd.f32 %v1800_v24, %v1512_v62 }
 0x1a3   : > { %v1514_v5 = vpop.f32.mrf.mxu0  ;;  %v1821_v13 = vpop.f32.mrf.mxu1 }
 0x1a4   : > { %v3275_v6 = vpack.c.bf16 %v2394_v2, %v2393_v1  ;;  %v1515_v7 = vadd.f32 %v4074_v12, %v1514_v5  ;;  %v1947_v10 = vmax.f32 %v1801_v3, 0.0  ;;  %v2252_v13 = vpop.permute.xlu0 %2251 }
 0x1a5   : > { %v1516_v9 = vpop.f32.mrf.mxu0  ;;  %v1824_v18 = vpop.f32.mrf.mxu1 }
 0x1a6   : > { %3363 = vst [vmem:[%s4092_s12 + $0x88] sm:$0xff] %v3275_v6   ;;  %v1804_v11 = vadd.f32 %v1803_v34, %v1515_v7  ;;  %v2395_v19 = vmul.f32 %v2222_v20, %v1947_v10  ;;  %v2237_v34 = vpop.permute.xlu1 %2236 }
 0x1a7   : > { %v1519_v14 = vpop.f32.mrf.mxu0  ;;  %v1826_v24 = vpop.f32.mrf.mxu1 }
 0x1a8   : > { %v1948_v16 = vmax.f32 %v1804_v11, 0.0  ;;  %v1520_v17 = vadd.f32 %v4074_v12, %v1519_v14 }
 0x1a9   : > { %v1521_v21 = vpop.f32.mrf.mxu0  ;;  %v1827_v28 = vpop.f32.mrf.mxu1 }
 0x1aa   : > { %v2396_v22 = vmul.f32 %v2227_v15, %v1948_v16  ;;  %v1809_v23 = vadd.f32 %v1808_v43, %v1520_v17 }
 0x1ab   : > { %v1522_v25 = vpop.f32.mrf.mxu0  ;;  %v1829_v32 = vpop.f32.mrf.mxu1 }
 0x1ac   : > { %v3280_v26 = vpack.c.bf16 %v2396_v22, %v2395_v19  ;;  %v1523_v27 = vadd.f32 %v4074_v12, %v1522_v25  ;;  %v1949_v30 = vmax.f32 %v1809_v23, 0.0  ;;  %v2262_v32 = vpop.permute.xlu0 %2261 }
 0x1ad   : > { %v1524_v29 = vpop.f32.mrf.mxu0  ;;  %v1832_v38 = vpop.f32.mrf.mxu1 }
 0x1ae   : > { %3364 = vst [vmem:[%s4092_s12 + $0x90] sm:$0xff] %v3280_v26   ;;  %v1812_v31 = vadd.f32 %v1811_v53, %v1523_v27  ;;  %v2397_v37 = vmul.f32 %v2232_v39, %v1949_v30  ;;  %v2247_v53 = vpop.permute.xlu1 %2246 }
 0x1af   : > { %v1527_v33 = vpop.f32.mrf.mxu0  ;;  %v1834_v43 = vpop.f32.mrf.mxu1 }
 0x1b0   : > { %v1950_v35 = vmax.f32 %v1812_v31, 0.0  ;;  %v1528_v36 = vadd.f32 %v4074_v12, %v1527_v33 }
 0x1b1   : > { %v1529_v40 = vpop.f32.mrf.mxu0  ;;  %v1835_v47 = vpop.f32.mrf.mxu1 }
 0x1b2   : > { %v2398_v41 = vmul.f32 %v2237_v34, %v1950_v35  ;;  %v1817_v42 = vadd.f32 %v1816_v59, %v1528_v36 }
 0x1b3   : > { %v1530_v44 = vpop.f32.mrf.mxu0  ;;  %v1837_v51 = vpop.f32.mrf.mxu1 }
 0x1b4   : > { %v3285_v45 = vpack.c.bf16 %v2398_v41, %v2397_v37  ;;  %v1531_v46 = vadd.f32 %v4074_v12, %v1530_v44  ;;  %v1951_v49 = vmax.f32 %v1817_v42, 0.0  ;;  %v4188_v37 = vld [vmem:[%s4234_s2] ss:$0 sm:$0xff]  ;;  %v2272_v51 = vpop.permute.xlu0 %2271 }
 0x1b5   : > { %v1532_v48 = vpop.f32.mrf.mxu0  ;;  %v1840_v56 = vpop.f32.mrf.mxu1 }
 0x1b6   : > { %3365 = vst [vmem:[%s4092_s12 + $0x98] sm:$0xff] %v3285_v45   ;;  %v1820_v50 = vadd.f32 %v1819_v8, %v1531_v46  ;;  %v2399_v60 = vmul.f32 %v2242_v57, %v1951_v49  ;;  %v2257_v8 = vpop.permute.xlu1 %2256 }
 0x1b7   : > { %v1535_v52 = vpop.f32.mrf.mxu0  ;;  %v1842_v59 = vpop.f32.mrf.mxu1 }
 0x1b8   : > { %v1952_v54 = vmax.f32 %v1820_v50, 0.0  ;;  %v1536_v55 = vadd.f32 %v4074_v12, %v1535_v52 }
 0x1b9   : > { %v1537_v58 = vpop.f32.mrf.mxu0  ;;  %v1843_v2 = vpop.f32.mrf.mxu1 }
 0x1ba   : > { %v2400_v61 = vmul.f32 %v2247_v53, %v1952_v54  ;;  %v1825_v62 = vadd.f32 %v1824_v18, %v1536_v55 }
 0x1bb   : > { %v1538_v63 = vpop.f32.mrf.mxu0  ;;  %v1845_v6 = vpop.f32.mrf.mxu1 }
 0x1bc   : > { %v3290_v0 = vpack.c.bf16 %v2400_v61, %v2399_v60  ;;  %v1539_v1 = vadd.f32 %v4074_v12, %v1538_v63  ;;  %v1953_v4 = vmax.f32 %v1825_v62, 0.0  ;;  %v2282_v6 = vpop.permute.xlu0 %2281 }
 0x1bd   : > { %v1540_v3 = vpop.f32.mrf.mxu0  ;;  %v1848_v11 = vpop.f32.mrf.mxu1 }
 0x1be   : > { %3366 = vst [vmem:[%s4092_s12 + $0xa0] sm:$0xff] %v3290_v0   ;;  %v1828_v5 = vadd.f32 %v1827_v28, %v1539_v1  ;;  %v2401_v15 = vmul.f32 %v2252_v13, %v1953_v4  ;;  %v2267_v28 = vpop.permute.xlu1 %2266 }
 0x1bf   : > { %v1543_v7 = vpop.f32.mrf.mxu0  ;;  %v1850_v18 = vpop.f32.mrf.mxu1 }
 0x1c0   : > { %v1954_v9 = vmax.f32 %v1828_v5, 0.0  ;;  %v1544_v10 = vadd.f32 %v4074_v12, %v1543_v7 }
 0x1c1   : > { %v1545_v14 = vpop.f32.mrf.mxu0  ;;  %v1851_v22 = vpop.f32.mrf.mxu1 }
 0x1c2   : > { %v2402_v16 = vmul.f32 %v2257_v8, %v1954_v9  ;;  %v1833_v17 = vadd.f32 %v1832_v38, %v1544_v10 }
 0x1c3   : > { %v1546_v20 = vpop.f32.mrf.mxu0  ;;  %v1853_v26 = vpop.f32.mrf.mxu1 }
 0x1c4   : > { %v3295_v21 = vpack.c.bf16 %v2402_v16, %v2401_v15  ;;  %v1547_v19 = vadd.f32 %v4074_v12, %v1546_v20  ;;  %v1955_v24 = vmax.f32 %v1833_v17, 0.0  ;;  %v2292_v26 = vpop.permute.xlu0 %2291 }
 0x1c5   : > { %v1548_v23 = vpop.f32.mrf.mxu0  ;;  %v1856_v31 = vpop.f32.mrf.mxu1 }
 0x1c6   : > { %3367 = vst [vmem:[%s4092_s12 + $0xa8] sm:$0xff] %v3295_v21   ;;  %v1836_v25 = vadd.f32 %v1835_v47, %v1547_v19  ;;  %v2403_v34 = vmul.f32 %v2262_v32, %v1955_v24  ;;  %v2277_v47 = vpop.permute.xlu1 %2276 }
 0x1c7   : > { %v1551_v27 = vpop.f32.mrf.mxu0  ;;  %v1858_v38 = vpop.f32.mrf.mxu1 }
 0x1c8   : > { %v1956_v29 = vmax.f32 %v1836_v25, 0.0  ;;  %v1552_v30 = vadd.f32 %v4074_v12, %v1551_v27 }
 0x1c9   : > { %v1553_v33 = vpop.f32.mrf.mxu0  ;;  %v1859_v42 = vpop.f32.mrf.mxu1 }
 0x1ca   : > { %v2404_v35 = vmul.f32 %v2267_v28, %v1956_v29  ;;  %v1841_v36 = vadd.f32 %v1840_v56, %v1552_v30 }
 0x1cb   : > { %v1554_v39 = vpop.f32.mrf.mxu0  ;;  %v1861_v45 = vpop.f32.mrf.mxu1 }
 0x1cc   : > { %v3300_v40 = vpack.c.bf16 %v2404_v35, %v2403_v34  ;;  %v1555_v41 = vadd.f32 %v4188_v37, %v1554_v39  ;;  %v1957_v12 = vmax.f32 %v1841_v36, 0.0  ;;  %v2302_v45 = vpop.permute.xlu0 %2301 }
 0x1cd   : > { %v1556_v43 = vpop.f32.mrf.mxu0  ;;  %v1864_v50 = vpop.f32.mrf.mxu1 }
 0x1ce   : > { %3368 = vst [vmem:[%s4092_s12 + $0xb0] sm:$0xff] %v3300_v40   ;;  %v1844_v44 = vadd.f32 %v1843_v2, %v1555_v41  ;;  %v2405_v53 = vmul.f32 %v2272_v51, %v1957_v12  ;;  %v2287_v2 = vpop.permute.xlu1 %2286 }
 0x1cf   : > { %v1559_v46 = vpop.f32.mrf.mxu0  ;;  %v1866_v56 = vpop.f32.mrf.mxu1 }
 0x1d0   : > { %v1958_v48 = vmax.f32 %v1844_v44, 0.0  ;;  %v1560_v49 = vadd.f32 %v4188_v37, %v1559_v46 }
 0x1d1   : > { %v1561_v52 = vpop.f32.mrf.mxu0  ;;  %v1867_v61 = vpop.f32.mrf.mxu1 }
 0x1d2   : > { %v2406_v54 = vmul.f32 %v2277_v47, %v1958_v48  ;;  %v1849_v55 = vadd.f32 %v1848_v11, %v1560_v49 }
 0x1d3   : > { %v1562_v57 = vpop.f32.mrf.mxu0  ;;  %v1869_v0 = vpop.f32.mrf.mxu1 }
 0x1d4   : > { %v3305_v58 = vpack.c.bf16 %v2406_v54, %v2405_v53  ;;  %v1563_v60 = vadd.f32 %v4188_v37, %v1562_v57  ;;  %v1959_v59 = vmax.f32 %v1849_v55, 0.0  ;;  %v2312_v0 = vpop.permute.xlu0 %2311 }
 0x1d5   : > { %v1564_v62 = vpop.f32.mrf.mxu0  ;;  %v1872_v5 = vpop.f32.mrf.mxu1 }
 0x1d6   : > { %3369 = vst [vmem:[%s4092_s12 + $0xb8] sm:$0xff] %v3305_v58   ;;  %v1852_v63 = vadd.f32 %v1851_v22, %v1563_v60  ;;  %v2407_v8 = vmul.f32 %v2282_v6, %v1959_v59  ;;  %v2297_v22 = vpop.permute.xlu1 %2296 }
 0x1d7   : > { %v1567_v1 = vpop.f32.mrf.mxu0  ;;  %v1874_v11 = vpop.f32.mrf.mxu1 }
 0x1d8   : > { %v1960_v3 = vmax.f32 %v1852_v63, 0.0  ;;  %v1568_v4 = vadd.f32 %v4188_v37, %v1567_v1 }
 0x1d9   : > { %v1569_v7 = vpop.f32.mrf.mxu0  ;;  %v1875_v16 = vpop.f32.mrf.mxu1 }
 0x1da   : > { %v2408_v9 = vmul.f32 %v2287_v2, %v1960_v3  ;;  %v1857_v10 = vadd.f32 %v1856_v31, %v1568_v4 }
 0x1db   : > { %v1570_v13 = vpop.f32.mrf.mxu0  ;;  %v1877_v21 = vpop.f32.mrf.mxu1 }
 0x1dc   : > { %v3310_v14 = vpack.c.bf16 %v2408_v9, %v2407_v8  ;;  %v1571_v15 = vadd.f32 %v4188_v37, %v1570_v13  ;;  %v1961_v18 = vmax.f32 %v1857_v10, 0.0  ;;  %v2322_v21 = vpop.permute.xlu0 %2321 }
 0x1dd   : > { %v1572_v17 = vpop.f32.mrf.mxu0  ;;  %v1880_v25 = vpop.f32.mrf.mxu1 }
 0x1de   : > { %3370 = vst [vmem:[%s4092_s12 + $0xc0] sm:$0xff] %v3310_v14   ;;  %v1860_v20 = vadd.f32 %v1859_v42, %v1571_v15  ;;  %v2409_v28 = vmul.f32 %v2292_v26, %v1961_v18  ;;  %v2307_v42 = vpop.permute.xlu1 %2306 }
 0x1df   : > { %v1575_v19 = vpop.f32.mrf.mxu0  ;;  %v1882_v31 = vpop.f32.mrf.mxu1 }
 0x1e0   : > { %v1962_v23 = vmax.f32 %v1860_v20, 0.0  ;;  %v1576_v24 = vadd.f32 %v4188_v37, %v1575_v19 }
 0x1e1   : > { %v1577_v27 = vpop.f32.mrf.mxu0  ;;  %v1883_v35 = vpop.f32.mrf.mxu1 }
 0x1e2   : > { %v2410_v29 = vmul.f32 %v2297_v22, %v1962_v23  ;;  %v1865_v30 = vadd.f32 %v1864_v50, %v1576_v24 }
 0x1e3   : > { %v1578_v32 = vpop.f32.mrf.mxu0  ;;  %v1885_v40 = vpop.f32.mrf.mxu1 }
 0x1e4   : > { %v3315_v33 = vpack.c.bf16 %v2410_v29, %v2409_v28  ;;  %v1579_v34 = vadd.f32 %v4188_v37, %v1578_v32  ;;  %v1963_v38 = vmax.f32 %v1865_v30, 0.0 }
 0x1e5   : > { %v1580_v36 = vpop.f32.mrf.mxu0  ;;  %v1888_v44 = vpop.f32.mrf.mxu1 }
 0x1e6   : > { %3371 = vst [vmem:[%s4092_s12 + $0xc8] sm:$0xff] %v3315_v33   ;;  %v1868_v39 = vadd.f32 %v1867_v61, %v1579_v34  ;;  %v2411_v47 = vmul.f32 %v2302_v45, %v1963_v38  ;;  %v2317_v61 = vpop.permute.xlu1 %2316 }
 0x1e7   : > { %v1583_v41 = vpop.f32.mrf.mxu0  ;;  %v1890_v50 = vpop.f32.mrf.mxu1 }
 0x1e8   : > { %v1964_v43 = vmax.f32 %v1868_v39, 0.0  ;;  %v1584_v12 = vadd.f32 %v4188_v37, %v1583_v41  ;;  %v2332_v39 = vpop.permute.xlu0 %2331 }
 0x1e9   : > { %v1585_v46 = vpop.f32.mrf.mxu0  ;;  %v1891_v54 = vpop.f32.mrf.mxu1 }
 0x1ea   : > { %v2412_v48 = vmul.f32 %v2307_v42, %v1964_v43  ;;  %v1873_v49 = vadd.f32 %v1872_v5, %v1584_v12 }
 0x1eb   : > { %v1586_v51 = vpop.f32.mrf.mxu0  ;;  %v1893_v58 = vpop.f32.mrf.mxu1 }
 0x1ec   : > { %v3320_v52 = vpack.c.bf16 %v2412_v48, %v2411_v47  ;;  %v1587_v53 = vadd.f32 %v4188_v37, %v1586_v51  ;;  %v1965_v56 = vmax.f32 %v1873_v49, 0.0 }
 0x1ed   : > { %v1588_v55 = vpop.f32.mrf.mxu0  ;;  %v1896_v63 = vpop.f32.mrf.mxu1 }
 0x1ee   : > { %3372 = vst [vmem:[%s4092_s12 + $0xd0] sm:$0xff] %v3320_v52   ;;  %v1876_v57 = vadd.f32 %v1875_v16, %v1587_v53  ;;  %v2413_v2 = vmul.f32 %v2312_v0, %v1965_v56  ;;  %v2327_v16 = vpop.permute.xlu1 %2326  ;;  %v2342_v53 = vpop.permute.xlu0 %2341 }
 0x1ef   : > { %v1591_v60 = vpop.f32.mrf.mxu0  ;;  %v1898_v5 = vpop.f32.mrf.mxu1 }
 0x1f0   : > { %v1966_v62 = vmax.f32 %v1876_v57, 0.0  ;;  %v1592_v59 = vadd.f32 %v4188_v37, %v1591_v60 }
 0x1f1   : > { %v1593_v1 = vpop.f32.mrf.mxu0  ;;  %v1899_v9 = vpop.f32.mrf.mxu1 }
 0x1f2   : > { %v2414_v3 = vmul.f32 %v2317_v61, %v1966_v62  ;;  %v1881_v4 = vadd.f32 %v1880_v25, %v1592_v59 }
 0x1f3   : > { %v1594_v6 = vpop.f32.mrf.mxu0  ;;  %v1901_v14 = vpop.f32.mrf.mxu1 }
 0x1f4   : > { %v3325_v7 = vpack.c.bf16 %v2414_v3, %v2413_v2  ;;  %v1595_v8 = vadd.f32 %v4188_v37, %v1594_v6  ;;  %v1967_v11 = vmax.f32 %v1881_v4, 0.0  ;;  %v2352_v2 = vpop.permute.xlu0 %2351 }
 0x1f5   : > { %v1596_v10 = vpop.f32.mrf.mxu0  ;;  %v1904_v20 = vpop.f32.mrf.mxu1 }
 0x1f6   : > { %3373 = vst [vmem:[%s4092_s12 + $0xd8] sm:$0xff] %v3325_v7   ;;  %v1884_v13 = vadd.f32 %v1883_v35, %v1595_v8  ;;  %v2415_v22 = vmul.f32 %v2322_v21, %v1967_v11  ;;  %v2337_v35 = vpop.permute.xlu1 %2336 }
 0x1f7   : > { %v1599_v15 = vpop.f32.mrf.mxu0  ;;  %v1906_v25 = vpop.f32.mrf.mxu1 }
 0x1f8   : > { %v1968_v17 = vmax.f32 %v1884_v13, 0.0  ;;  %v1600_v18 = vadd.f32 %v4188_v37, %v1599_v15 }
 0x1f9   : > { %v1601_v19 = vpop.f32.mrf.mxu0  ;;  %v1907_v29 = vpop.f32.mrf.mxu1 }
 0x1fa   : > { %v2416_v23 = vmul.f32 %v2327_v16, %v1968_v17  ;;  %v1889_v24 = vadd.f32 %v1888_v44, %v1600_v18  ;;  %v2347_v50 = vpop.permute.xlu1 %2346 }
 0x1fb   : > { %v1602_v26 = vpop.f32.mrf.mxu0  ;;  %v1909_v33 = vpop.f32.mrf.mxu1 }
 0x1fc   : > { %v3330_v27 = vpack.c.bf16 %v2416_v23, %v2415_v22  ;;  %v1603_v28 = vadd.f32 %v4188_v37, %v1602_v26  ;;  %v1969_v31 = vmax.f32 %v1889_v24, 0.0 }
 0x1fd   : > { %v1604_v30 = vpop.f32.mrf.mxu0 }
 0x1fe   : > { %3374 = vst [vmem:[%s4092_s12 + $0xe0] sm:$0xff] %v3330_v27   ;;  %v1892_v32 = vadd.f32 %v1891_v54, %v1603_v28  ;;  %v2417_v41 = vmul.f32 %v2332_v39, %v1969_v31  ;;  %v2357_v1 = vpop.permute.xlu1 %2356 }
 0x1ff   : > { %v1607_v34 = vpop.f32.mrf.mxu0 }
 0x200   : > { %v1970_v36 = vmax.f32 %v1892_v32, 0.0  ;;  %v1608_v38 = vadd.f32 %v4188_v37, %v1607_v34 }
 0x201   : > { %v1609_v40 = vpop.f32.mrf.mxu0 }
 0x202   : > { %v2418_v42 = vmul.f32 %v2337_v35, %v1970_v36  ;;  %v1897_v43 = vadd.f32 %v1896_v63, %v1608_v38 }
 0x203   : > { %v1610_v12 = vpop.f32.mrf.mxu0 }
 0x204   : > { %v3335_v44 = vpack.c.bf16 %v2418_v42, %v2417_v41  ;;  %v1611_v45 = vadd.f32 %v4188_v37, %v1610_v12  ;;  %v1971_v47 = vmax.f32 %v1897_v43, 0.0 }
 0x205   : > { %v1612_v46 = vpop.f32.mrf.mxu0 }
 0x206   : > { %3375 = vst [vmem:[%s4092_s12 + $0xe8] sm:$0xff] %v3335_v44   ;;  %v1900_v48 = vadd.f32 %v1899_v9, %v1611_v45  ;;  %v2419_v55 = vmul.f32 %v2342_v53, %v1971_v47 }
 0x207   : > { %v1615_v49 = vpop.f32.mrf.mxu0 }
 0x208   : > { %v1972_v51 = vmax.f32 %v1900_v48, 0.0  ;;  %v1616_v52 = vadd.f32 %v4188_v37, %v1615_v49 }
 0x209   : > { %v1617_v54 = vpop.f32.mrf.mxu0 }
 0x20a   : > { %v2420_v56 = vmul.f32 %v2347_v50, %v1972_v51  ;;  %v1905_v57 = vadd.f32 %v1904_v20, %v1616_v52 }
 0x20b   : > { %v1618_v58 = vpop.f32.mrf.mxu0 }
 0x20c   : > { %v3340_v60 = vpack.c.bf16 %v2420_v56, %v2419_v55  ;;  %v1619_v61 = vadd.f32 %v4188_v37, %v1618_v58  ;;  %v1973_v59 = vmax.f32 %v1905_v57, 0.0 }
 0x20d   : > { %v1620_v62 = vpop.f32.mrf.mxu0 }
 0x20e   : > { %3376 = vst [vmem:[%s4092_s12 + $0xf0] sm:$0xff] %v3340_v60   ;;  %v1908_v63 = vadd.f32 %v1907_v29, %v1619_v61  ;;  %v2421_v3 = vmul.f32 %v2352_v2, %v1973_v59 }
 0x210   : > { %v1974_v0 = vmax.f32 %v1908_v63, 0.0 }
 0x212   : > { %v2422_v4 = vmul.f32 %v2357_v1, %v1974_v0 }
 0x214   : > { %v3345_v5 = vpack.c.bf16 %v2422_v4, %v2421_v3 }
 0x216   : > { %3377 = vst [vmem:[%s4092_s12 + $0xf8] sm:$0xff] %v3345_v5  }
 0x217 PF: > { %s14_s19 = sadd.s32 1, %s3679_s19   ;;  %s4237_s15 = smov %s3671_s17 }
 0x218   : > { %p11_p7 = scmp.ge.s32.totalorder %s14_s19, 6   ;;  %s4238_s16 = smov %s3675_s18 }
 0x219   : > { %s4239_s17 = smov %s4242_s20  ;;  %s4240_s18 = smov %s4246_s21 }
 0x21a   :  { %13 = sbr.rel (!%p11_p7) target bundleno = 3 (0x3), region = 69 }

// kernel: voxelnet_encoder_forward.15
= control target key start
LH: loop header
LB: loop body
LE: loop exit
PB: predicated region body
PF: predicated region fallthrough
CT: control target
= control target key end

     0   :  { %s2788_s15 = smov 0   ;;  %s3133_s0 = inlined_call_operand.vmem [shape: bf16[2,11,80,128], index: 0, kind: input, shape index: {}]   ;;  %s3134_s1 = inlined_call_operand.vmem [shape: bf16[9,128,128], index: 1, kind: input, shape index: {}]   ;;  %s3135_s2 = inlined_call_operand.vmem [shape: f32[1,128], index: 2, kind: input, shape index: {}]   ;;  %s3136_s3 = inlined_call_operand.vmem [shape: f32[2,9,64,1], index: 3, kind: input, shape index: {}]   ;;  %s3137_s4 = inlined_call_operand.vmem [shape: bf16[2,9,64,128], index: 4, kind: output, shape index: {}]  }
   0x1 LB: > { %s1936_s16 = sadd.s32 4294967295, %s2756_s15   ;;  %p1940_p0 = scmp.ge.s32.totalorder %s2756_s15, 1  ;;  %s2756_s15 = sphi %s2788_s15, %s14_s15  }
   0x2   : > { %p172_p1 = scmp.lt.s32.totalorder %s2756_s15, 3 }
   0x4   : > { %p173_p2 = pnand %p1940_p0, %p172_p1 }
   0x5   : > { %p203_p3 = scmp.lt.s32.totalorder (!%p173_p2), %s1936_s16, 1  ;;  %s2816_s5 = smov (!%p173_p2), 0  }
   0x6   : > { %176 = sbr.rel (%p173_p2) target bundleno = 389 (0x185), region = 36 }
   0xb   : > { %v2799_v0 = vld [vmem:[%s3135_s2] ss:$0 sm:$0xff]  ;;  %s3154_s16 = smov (!%p203_p3, %s1936_s16), 1 }
   0xc   : > { %3139 = vst [vmem:[#allocation2_spill] sm:$0xff] %v2799_v0  ;;  %s2616_s19 = smul.u32 440, %s3154_s16 }
   0xd   : > { %s2617_s20 = smul.u32 576, %s3154_s16 }
   0xe   : > { %s2804_s23 = scalar_lea.vmem %s3133_s0, %s2616_s19  ;;  %s2618_s24 = smul.u32 288, %s3154_s16 }
   0xf   : > { %s2809_s27 = scalar_lea.vmem %s3136_s3, %s2617_s20 }
  0x10   : > { %s2814_s30 = scalar_lea.vmem %s3137_s4, %s2618_s24 }
  0x11 LB: >> { %v2638_v1 = vld [vmem:[%s3134_s1 + $0x78] sm:$0xff]   ;;  %v2640_v3 = vld [vmem:[%s3134_s1 + $0x70] sm:$0xff]   ;;  %v2642_v5 = vld [vmem:[%s3134_s1 + $0x68] sm:$0xff]   ;;  %s2243_s24 = smul.u32 40, %s2760_s5  ;;  %v2762_v39 = vmov 0   ;;  %s2230_s11 = sshll.u32 %s2760_s5, 6  ;;  %s2760_s5 = sphi %s2816_s5, %s225_s5  }
  0x12   : >> { %v2639_v2 = vld [vmem:[%s3134_s1 + $0x38] sm:$0xff]   ;;  %2384 = vmatprep.subr.bf16.mxu0 %v2638_v1  ;;  %v2641_v4 = vld [vmem:[%s3134_s1 + $0x30] sm:$0xff]   ;;  %v2643_v6 = vld [vmem:[%s3134_s1 + $0x28] sm:$0xff]   ;;  %2637 = vset.pattern.permute.xlu1 %v2762_v39  ;;  %s3009_s14 = scalar_lea.vmem %s2809_s27, %s2230_s11 }
  0x13   : >> { %2408 = vmatprep.subr.bf16.mxu1 %v2639_v2  ;;  %2385 = vmatpush3.bf16.msra.mxu0 %v2638_v1  ;;  %v2644_v7 = vld [vmem:[%s3134_s1 + $0x60] sm:$0xff]   ;;  %v2646_v9 = vld [vmem:[%s3134_s1 + $0x58] sm:$0xff]   ;;  %s2853_s6 = scalar_lea.vmem %s2804_s23, %s2243_s24  ;;  %v2648_v11 = vld [vmem:[%s3134_s1 + $0x50] sm:$0xff]  }
  0x14   : >> { %2409 = vmatpush3.bf16.msra.mxu1 %v2639_v2  ;;  %2386 = vmatprep.subr.bf16.mxu0 %v2640_v3  ;;  %v2645_v8 = vld [vmem:[%s3134_s1 + $0x20] sm:$0xff]   ;;  %v2647_v10 = vld [vmem:[%s3134_s1 + $0x18] sm:$0xff]   ;;  %v231_v13 = vld [vmem:[%s2853_s6 + $0x8] sm:$0xf] }
  0x15   : >> { %2410 = vmatprep.subr.bf16.mxu1 %v2641_v4  ;;  %v230_v12 = vld [vmem:[%s2853_s6 + $0x4] sm:$0xf]  ;;  %v2649_v14 = vld [vmem:[%s3134_s1 + $0x10] sm:$0xff]   ;;  %v229_v16 = vld [vmem:[%s2853_s6] sm:$0xf]  ;;  %2636 = vset.pattern.permute.xlu0 %v2762_v39 }
  0x16   : >> { %v1961_v15 = vcombine.low %v230_v12, %v231_v13  ;;  %v1973_v17 = vcombine.low %v229_v16, %v230_v12  ;;  %v2650_v18 = vld [vmem:[%s3134_s1 + $0x48] sm:$0xff]   ;;  %v2652_v20 = vld [vmem:[%s3134_s1 + $0x40] sm:$0xff]   ;;  %v233_v23 = vld [vmem:[%s2853_s6 + $0x10] sm:$0xf] }
  0x17   : >> { %2387 = vmatpush3.bf16.msra.mxu0 %v2640_v3  ;;  %v2651_v19 = vld [vmem:[%s3134_s1 + $0x8] sm:$0xff]   ;;  %v2653_v21 = vld [vmem:[%s3134_s1] sm:$0xff]   ;;  %v2658_v24 = vld [vmem:[%s3134_s1 + $0xb8] sm:$0xff]  }
  0x18   : >> { %2411 = vmatpush3.bf16.msra.mxu1 %v2641_v4  ;;  %2388 = vmatprep.subr.bf16.mxu0 %v2642_v5  ;;  %v232_v22 = vld [vmem:[%s2853_s6 + $0xc] sm:$0xf]  ;;  %v2659_v25 = vld [vmem:[%s3134_s1 + $0xf8] sm:$0xff]   ;;  %v234_v26 = vld [vmem:[%s2853_s6 + $0x14] sm:$0xf] }
  0x19   : >> { %2412 = vmatprep.subr.bf16.mxu1 %v2643_v6  ;;  %2400 = vmatprep.mubr.bf16.mxu0 %v1961_v15  ;;  %v1962_v27 = vcombine.low %v232_v22, %v233_v23  ;;  %v235_v28 = vld [vmem:[%s2853_s6 + $0x18] sm:$0xf]  ;;  %v1974_v29 = vcombine.low %v231_v13, %v232_v22  ;;  %v2660_v30 = vld [vmem:[%s3134_s1 + $0xb0] sm:$0xff]   ;;  %v236_v33 = vld [vmem:[%s2853_s6 + $0x1c] sm:$0xf]  ;;  %v1975_v34 = vcombine.low %v233_v23, %v234_v26 }
  0x1a   : >> { %2424 = vmatprep.mubr.bf16.mxu1 %v1973_v17  ;;  %v2661_v31 = vld [vmem:[%s3134_s1 + $0xf0] sm:$0xff]   ;;  %v1963_v32 = vcombine.low %v234_v26, %v235_v28  ;;  %v253_v35 = vld [vmem:[%s2853_s6 + $0x20] sm:$0xf]  ;;  %v2662_v36 = vld [vmem:[%s3134_s1 + $0xa8] sm:$0xff]   ;;  %v1976_v41 = vcombine.low %v235_v28, %v236_v33 }
  0x1b   : >> { %2389 = vmatpush3.bf16.msra.mxu0 %v2642_v5  ;;  %v2663_v37 = vld [vmem:[%s3134_s1 + $0xe8] sm:$0xff]   ;;  %v1964_v38 = vcombine.low %v236_v33, %v253_v35  ;;  %v2664_v40 = vld [vmem:[%s3134_s1 + $0xa0] sm:$0xff]   ;;  %v2666_v45 = vld [vmem:[%s3134_s1 + $0x98] sm:$0xff]  }
  0x1c   : >> { %2413 = vmatpush3.bf16.msra.mxu1 %v2643_v6  ;;  %2390 = vmatprep.subr.bf16.mxu0 %v2644_v7  ;;  %v2665_v42 = vld [vmem:[%s3134_s1 + $0xe0] sm:$0xff]   ;;  %v2678_v43 = vld [vmem:[%s2853_s6 + $0x8] sm:$0xff]   ;;  %v2667_v46 = vld [vmem:[%s3134_s1 + $0xd8] sm:$0xff]  }
  0x1d   : >> { %2414 = vmatprep.subr.bf16.mxu1 %v2645_v8  ;;  %v2679_v44 = vld [vmem:[%s2853_s6 + $0x28] sm:$0xff]   ;;  %v2672_v47 = vld [vmem:[%s3134_s1 + $0x90] sm:$0xff]   ;;  %v2676_v51 = vld [vmem:[%s3134_s1 + $0x80] sm:$0xff]  }
  0x1e   : >> { %v2673_v48 = vld [vmem:[%s3134_s1 + $0xd0] sm:$0xff]   ;;  %v2674_v49 = vld [vmem:[%s3134_s1 + $0x88] sm:$0xff]   ;;  %v2677_v52 = vld [vmem:[%s3134_s1 + $0xc0] sm:$0xff]  }
  0x1f   : >> { %2391 = vmatpush3.bf16.msra.mxu0 %v2644_v7  ;;  %v2675_v50 = vld [vmem:[%s3134_s1 + $0xc8] sm:$0xff]   ;;  %v2680_v53 = vld [vmem:[%s2853_s6 + $0x10] sm:$0xff]   ;;  %v2682_v54 = vld [vmem:[%s3134_s1 + $0x138] sm:$0xff]  }
  0x20   : >> { %2415 = vmatpush3.bf16.msra.mxu1 %v2645_v8  ;;  %2392 = vmatprep.subr.bf16.mxu0 %v2646_v9  ;;  %v2683_v55 = vld [vmem:[%s3134_s1 + $0x178] sm:$0xff]   ;;  %v2681_v56 = vld [vmem:[%s2853_s6 + $0x30] sm:$0xff]   ;;  %v2687_v61 = vld [vmem:[%s2853_s6 + $0x20] sm:$0xff]  }
  0x21   : >> { %2416 = vmatprep.subr.bf16.mxu1 %v2647_v10  ;;  %v2684_v57 = vld [vmem:[%s3134_s1 + $0x130] sm:$0xff]   ;;  %v2686_v59 = vld [vmem:[%s2853_s6 + $0x18] sm:$0xff]   ;;  %v2688_v62 = vld [vmem:[%s3134_s1 + $0x128] sm:$0xff]  }
  0x22   : >> { %v2685_v58 = vld [vmem:[%s3134_s1 + $0x170] sm:$0xff]   ;;  %v2690_v60 = vld [vmem:[%s2853_s6 + $0x38] sm:$0xff]   ;;  %v2689_v63 = vld [vmem:[%s3134_s1 + $0x168] sm:$0xff]  }
  0x23   : >> { %2393 = vmatpush3.bf16.msra.mxu0 %v2646_v9  ;;  %v2691_v1 = vld [vmem:[%s2853_s6 + $0x40] sm:$0xff]   ;;  %v2702_v4 = vld [vmem:[%s2853_s6 + $0x2c] sm:$0xff]   ;;  %v2694_v6 = vld [vmem:[%s3134_s1 + $0x118] sm:$0xff]  }
  0x24   : >> { %2417 = vmatpush3.bf16.msra.mxu1 %v2647_v10  ;;  %2394 = vmatprep.subr.bf16.mxu0 %v2648_v11  ;;  %v2692_v2 = vld [vmem:[%s3134_s1 + $0x120] sm:$0xff]   ;;  %v2703_v5 = vld [vmem:[%s2853_s6 + $0x30] sm:$0xff]   ;;  %v2695_v7 = vld [vmem:[%s3134_s1 + $0x158] sm:$0xff]  }
  0x25   : >> { %2418 = vmatprep.subr.bf16.mxu1 %v2649_v14  ;;  %v2693_v3 = vld [vmem:[%s3134_s1 + $0x160] sm:$0xff]   ;;  %v2696_v8 = vld [vmem:[%s3134_s1 + $0x110] sm:$0xff]   ;;  %v2698_v10 = vld [vmem:[%s3134_s1 + $0x108] sm:$0xff]  }
  0x26   : >> { %v2697_v9 = vld [vmem:[%s3134_s1 + $0x150] sm:$0xff]   ;;  %v2700_v12 = vld [vmem:[%s3134_s1 + $0x100] sm:$0xff]   ;;  %v2706_v15 = vld [vmem:[%s3134_s1 + $0x1b8] sm:$0xff]  }
  0x27   : >> { %2395 = vmatpush3.bf16.msra.mxu0 %v2648_v11  ;;  %v2699_v11 = vld [vmem:[%s3134_s1 + $0x148] sm:$0xff]   ;;  %v2701_v13 = vld [vmem:[%s3134_s1 + $0x140] sm:$0xff]   ;;  %v2707_v16 = vld [vmem:[%s3134_s1 + $0x1f8] sm:$0xff]  }
  0x28   : >> { %2419 = vmatpush3.bf16.msra.mxu1 %v2649_v14  ;;  %2396 = vmatprep.subr.bf16.mxu0 %v2650_v18  ;;  %v2704_v14 = vld [vmem:[%s2853_s6 + $0x34] sm:$0xff]   ;;  %v2712_v22 = vld [vmem:[%s3134_s1 + $0x1a8] sm:$0xff]   ;;  %v2716_v28 = vld [vmem:[%s3134_s1 + $0x1a0] sm:$0xff]  }
  0x29   : >> { %2420 = vmatprep.subr.bf16.mxu1 %v2651_v19  ;;  %v2705_v17 = vld [vmem:[%s2853_s6 + $0x38] sm:$0xff]   ;;  %v2713_v23 = vld [vmem:[%s3134_s1 + $0x1e8] sm:$0xff]   ;;  %v1755_v26 = vld [vmem:[%s3009_s14 + $0x10] sm:$0xff] }
  0x2a   : >> { %1773 = vperm.xlu1 %2637, %v1755_v26   ;;  %v2718_v33 = vld [vmem:[%s3134_s1 + $0x198] sm:$0xff]   ;;  %v2721_v39 = vld [vmem:[%s3134_s1 + $0x1d0] sm:$0xff]  }
  0x2b   : >> { %2397 = vmatpush3.bf16.msra.mxu0 %v2650_v18  ;;  %v2708_v18 = vld [vmem:[%s3134_s1 + $0x1b0] sm:$0xff]   ;;  %v2719_v35 = vld [vmem:[%s3134_s1 + $0x1d8] sm:$0xff]  }
  0x2c   : >> { %2421 = vmatpush3.bf16.msra.mxu1 %v2651_v19  ;;  %2398 = vmatprep.subr.bf16.mxu0 %v2652_v20  ;;  %v2709_v19 = vld [vmem:[%s3134_s1 + $0x1f0] sm:$0xff]  }
  0x2d   : >> { %2422 = vmatprep.subr.bf16.mxu1 %v2653_v21 }
  0x2f   : >> { %2399 = vmatpush3.bf16.msra.mxu0 %v2652_v20  ;;  %v2710_v20 = vld [vmem:[%s2853_s6 + $0x3c] sm:$0xff]  }
  0x30   : >> { %2423 = vmatpush3.bf16.msra.mxu1 %v2653_v21  ;;  %2432 = vmatprep.subr.bf16.mxu0 %v2658_v24  ;;  %v2714_v21 = vld [vmem:[%s2853_s6 + $0x40] sm:$0xff]  }
  0x31   : >> { %2456 = vmatprep.subr.bf16.mxu1 %v2659_v25 }
  0x32   : >> { %2401 = vmatmul.mubr.bf16.vlgmr.msra.gmra.mxu0 %v1962_v27  ;;  %v1753_v27 = vld [vmem:[%s3009_s14] sm:$0xff] }
  0x33   : >> { %2425 = vmatmul.mubr.bf16.vlgmr.msra.gmra.mxu1 %v1974_v29  ;;  %2433 = vmatpush3.bf16.msra.mxu0 %v2658_v24  ;;  %v2711_v24 = vld [vmem:[%s2853_s6 + $0x44] sm:$0xff]  }
  0x34   : >> { %2457 = vmatpush3.bf16.msra.mxu1 %v2659_v25  ;;  %2434 = vmatprep.subr.bf16.mxu0 %v2660_v30  ;;  %v2715_v25 = vld [vmem:[%s2853_s6 + $0x48] sm:$0xff]   ;;  %v2717_v29 = vld [vmem:[%s3134_s1 + $0x1e0] sm:$0xff]  }
  0x35   : >> { %2458 = vmatprep.subr.bf16.mxu1 %v2661_v31  ;;  %2404 = vmatprep.mubr.bf16.mxu0 %v1963_v32  ;;  %v1756_v32 = vld [vmem:[%s3009_s14 + $0x18] sm:$0xff] }
  0x36   : >> { %2428 = vmatprep.mubr.bf16.mxu1 %v1975_v34  ;;  %1763 = vperm.xlu0 %2636, %v1753_v27   ;;  %v1754_v34 = vld [vmem:[%s3009_s14 + $0x8] sm:$0xff] }
  0x37   : >> { %2435 = vmatpush3.bf16.msra.mxu0 %v2660_v30  ;;  %v2726_v30 = vld [vmem:[%s2853_s6 + $0x50] sm:$0xff]   ;;  %1778 = vperm.xlu1 %2637, %v1756_v32  }
  0x38   : >> { %2459 = vmatpush3.bf16.msra.mxu1 %v2661_v31  ;;  %2436 = vmatprep.subr.bf16.mxu0 %v2662_v36  ;;  %v2727_v31 = vld [vmem:[%s2853_s6 + $0x54] sm:$0xff]  }
  0x39   : >> { %2460 = vmatprep.subr.bf16.mxu1 %v2663_v37 }
  0x3a   : >> { %2405 = vmatmul.mubr.bf16.gmra.mxu0 %v1964_v38  ;;  %1768 = vperm.xlu0 %2636, %v1754_v34   ;;  %v1757_v38 = vld [vmem:[%s3009_s14 + $0x20] sm:$0xff] }
  0x3b   : >> { %2437 = vmatpush3.bf16.msra.mxu0 %v2662_v36  ;;  %2429 = vmatmul.mubr.bf16.gmra.mxu1 %v1976_v41  ;;  %v1758_v36 = vld [vmem:[%s3009_s14 + $0x28] sm:$0xff] }
  0x3c   : >> { %2461 = vmatpush3.bf16.msra.mxu1 %v2663_v37  ;;  %2438 = vmatprep.subr.bf16.mxu0 %v2664_v40  ;;  %v2720_v37 = vld [vmem:[%s3134_s1 + $0x190] sm:$0xff]   ;;  %v2722_v41 = vld [vmem:[%s3134_s1 + $0x188] sm:$0xff]  }
  0x3d   : >> { %2462 = vmatprep.subr.bf16.mxu1 %v2665_v42  ;;  %2448 = vmatprep.mubr.bf16.mxu0 %v2678_v43  ;;  %v2723_v43 = vld [vmem:[%s3134_s1 + $0x1c8] sm:$0xff]  }
  0x3e   : >> { %2472 = vmatprep.mubr.bf16.mxu1 %v2679_v44  ;;  %1788 = vperm.xlu1 %2637, %v1758_v36   ;;  %v2724_v44 = vld [vmem:[%s3134_s1 + $0x180] sm:$0xff]  }
  0x3f   : >> { %2439 = vmatpush3.bf16.msra.mxu0 %v2664_v40  ;;  %1783 = vperm.xlu0 %2636, %v1757_v38   ;;  %v1760_v40 = vld [vmem:[%s3009_s14 + $0x38] sm:$0xff] }
  0x40   : >> { %2463 = vmatpush3.bf16.msra.mxu1 %v2665_v42  ;;  %2440 = vmatprep.subr.bf16.mxu0 %v2666_v45  ;;  %v1759_v42 = vld [vmem:[%s3009_s14 + $0x30] sm:$0xff] }
  0x41   : >> { %2464 = vmatprep.subr.bf16.mxu1 %v2667_v46 }
  0x42   : >> { %1798 = vperm.xlu1 %2637, %v1760_v40  }
  0x43   : >> { %2441 = vmatpush3.bf16.msra.mxu0 %v2666_v45  ;;  %1793 = vperm.xlu0 %2636, %v1759_v42   ;;  %v2725_v45 = vld [vmem:[%s3134_s1 + $0x1c0] sm:$0xff]  }
  0x44   : >> { %2465 = vmatpush3.bf16.msra.mxu1 %v2667_v46  ;;  %2442 = vmatprep.subr.bf16.mxu0 %v2672_v47  ;;  %v2730_v46 = vld [vmem:[%s3134_s1 + $0x238] sm:$0xff]  }
  0x45   : >> { %2466 = vmatprep.subr.bf16.mxu1 %v2673_v48 }
  0x47   : >> { %2443 = vmatpush3.bf16.msra.mxu0 %v2672_v47  ;;  %v2728_v47 = vld [vmem:[%s2853_s6 + $0x58] sm:$0xff]  }
  0x48   : >> { %2467 = vmatpush3.bf16.msra.mxu1 %v2673_v48  ;;  %2444 = vmatprep.subr.bf16.mxu0 %v2674_v49  ;;  %v2729_v48 = vld [vmem:[%s2853_s6 + $0x5c] sm:$0xff]  }
  0x49   : >> { %2468 = vmatprep.subr.bf16.mxu1 %v2675_v50 }
  0x4b   : >> { %2445 = vmatpush3.bf16.msra.mxu0 %v2674_v49  ;;  %v2731_v49 = vld [vmem:[%s3134_s1 + $0x230] sm:$0xff]  }
  0x4c   : >> { %2469 = vmatpush3.bf16.msra.mxu1 %v2675_v50  ;;  %2446 = vmatprep.subr.bf16.mxu0 %v2676_v51  ;;  %v2732_v50 = vld [vmem:[%s2853_s6 + $0x60] sm:$0xff]  }
  0x4d   : >> { %2470 = vmatprep.subr.bf16.mxu1 %v2677_v52 }
  0x4f   : >> { %2447 = vmatpush3.bf16.msra.mxu0 %v2676_v51  ;;  %v2735_v51 = vld [vmem:[%s2853_s6 + $0x64] sm:$0xff]  }
  0x50   : >> { %2471 = vmatpush3.bf16.msra.mxu1 %v2677_v52  ;;  %2480 = vmatprep.subr.bf16.mxu0 %v2682_v54  ;;  %v2734_v52 = vld [vmem:[%s3134_s1 + $0x228] sm:$0xff]  }
  0x51   : >> { %2504 = vmatprep.subr.bf16.mxu1 %v2683_v55 }
  0x52   : >> { %2449 = vmatmul.mubr.bf16.vlgmr.msra.gmra.mxu0 %v2680_v53  ;;  %v2733_v53 = vld [vmem:[%s2853_s6 + $0x68] sm:$0xff]  }
  0x53   : >> { %2473 = vmatmul.mubr.bf16.vlgmr.msra.gmra.mxu1 %v2681_v56  ;;  %2481 = vmatpush3.bf16.msra.mxu0 %v2682_v54  ;;  %v2736_v54 = vld [vmem:[%s2853_s6 + $0x6c] sm:$0xff]   ;;  %v2742_v56 = vld [vmem:[%s2853_s6 + $0x58] sm:$0xff]  }
  0x54   : >> { %2505 = vmatpush3.bf16.msra.mxu1 %v2683_v55  ;;  %2482 = vmatprep.subr.bf16.mxu0 %v2684_v57  ;;  %v2737_v55 = vld [vmem:[%s3134_s1 + $0x220] sm:$0xff]  }
  0x55   : >> { %2506 = vmatprep.subr.bf16.mxu1 %v2685_v58  ;;  %2452 = vmatprep.mubr.bf16.mxu0 %v2686_v59  ;;  %v2739_v59 = vld [vmem:[%s3134_s1 + $0x210] sm:$0xff]  }
  0x56   : >> { %2476 = vmatprep.mubr.bf16.mxu1 %v2690_v60  ;;  %v2740_v60 = vld [vmem:[%s3134_s1 + $0x208] sm:$0xff]  }
  0x57   : >> { %2483 = vmatpush3.bf16.msra.mxu0 %v2684_v57  ;;  %v2743_v57 = vld [vmem:[%s2853_s6 + $0x68] sm:$0xff]  }
  0x58   : >> { %2507 = vmatpush3.bf16.msra.mxu1 %v2685_v58  ;;  %2484 = vmatprep.subr.bf16.mxu0 %v2688_v62  ;;  %v2738_v58 = vld [vmem:[%s3134_s1 + $0x218] sm:$0xff]  }
  0x59   : >> { %2508 = vmatprep.subr.bf16.mxu1 %v2689_v63 }
  0x5a   : >> { %2453 = vmatmul.mubr.bf16.gmra.mxu0 %v2687_v61  ;;  %v2741_v61 = vld [vmem:[%s3134_s1 + $0x200] sm:$0xff]  }
  0x5b   : >> { %2485 = vmatpush3.bf16.msra.mxu0 %v2688_v62  ;;  %2477 = vmatmul.mubr.bf16.gmra.mxu1 %v2691_v1  ;;  %v2744_v62 = vld [vmem:[%s2853_s6 + $0x60] sm:$0xff]  }
  0x5c   : >> { %2509 = vmatpush3.bf16.msra.mxu1 %v2689_v63  ;;  %2486 = vmatprep.subr.bf16.mxu0 %v2692_v2  ;;  %v2745_v63 = vld [vmem:[%s2853_s6 + $0x70] sm:$0xff]   ;;  %s2252_s6 = sshll.u32 %s2760_s5, 5  ;;  %s225_s5 = sadd.s32 1, %s2760_s5  }
  0x5d   : >> { %2510 = vmatprep.subr.bf16.mxu1 %v2693_v3  ;;  %2496 = vmatprep.mubr.bf16.mxu0 %v2702_v4  ;;  %s1843_s13 = scalar_lea.vmem %s2814_s30, %s2252_s6  ;;  %p222_p4 = scmp.ge.s32.totalorder %s225_s5, 9  }
  0x5e   : >> { %2520 = vmatprep.mubr.bf16.mxu1 %v2703_v5 }
  0x5f   : >> { %2487 = vmatpush3.bf16.msra.mxu0 %v2692_v2 }
  0x60   : >> { %2511 = vmatpush3.bf16.msra.mxu1 %v2693_v3  ;;  %2488 = vmatprep.subr.bf16.mxu0 %v2694_v6 }
  0x61   : >> { %2512 = vmatprep.subr.bf16.mxu1 %v2695_v7 }
  0x63   : >> { %2489 = vmatpush3.bf16.msra.mxu0 %v2694_v6 }
  0x64   : >> { %2513 = vmatpush3.bf16.msra.mxu1 %v2695_v7  ;;  %2490 = vmatprep.subr.bf16.mxu0 %v2696_v8 }
  0x65   : >> { %2514 = vmatprep.subr.bf16.mxu1 %v2697_v9 }
  0x67   : >> { %2491 = vmatpush3.bf16.msra.mxu0 %v2696_v8 }
  0x68   : >> { %2515 = vmatpush3.bf16.msra.mxu1 %v2697_v9  ;;  %2492 = vmatprep.subr.bf16.mxu0 %v2698_v10 }
  0x69   : >> { %2516 = vmatprep.subr.bf16.mxu1 %v2699_v11 }
  0x6b   : >> { %2493 = vmatpush3.bf16.msra.mxu0 %v2698_v10 }
  0x6c   : >> { %2517 = vmatpush3.bf16.msra.mxu1 %v2699_v11  ;;  %2494 = vmatprep.subr.bf16.mxu0 %v2700_v12 }
  0x6d   : >> { %2518 = vmatprep.subr.bf16.mxu1 %v2701_v13 }
  0x6f   : >> { %2495 = vmatpush3.bf16.msra.mxu0 %v2700_v12 }
  0x70   : >> { %2519 = vmatpush3.bf16.msra.mxu1 %v2701_v13  ;;  %2528 = vmatprep.subr.bf16.mxu0 %v2706_v15 }
  0x71   : >> { %2552 = vmatprep.subr.bf16.mxu1 %v2707_v16 }
  0x72   : >> { %2497 = vmatmul.mubr.bf16.vlgmr.msra.gmra.mxu0 %v2704_v14 }
  0x73   : >> { %2521 = vmatmul.mubr.bf16.vlgmr.msra.gmra.mxu1 %v2705_v17  ;;  %2529 = vmatpush3.bf16.msra.mxu0 %v2706_v15 }
  0x74   : >> { %2553 = vmatpush3.bf16.msra.mxu1 %v2707_v16  ;;  %2530 = vmatprep.subr.bf16.mxu0 %v2708_v18 }
  0x75   : >> { %2554 = vmatprep.subr.bf16.mxu1 %v2709_v19  ;;  %2500 = vmatprep.mubr.bf16.mxu0 %v2710_v20 }
  0x76   : >> { %2524 = vmatprep.mubr.bf16.mxu1 %v2714_v21 }
  0x77   : >> { %2531 = vmatpush3.bf16.msra.mxu0 %v2708_v18 }
  0x78   : >> { %2555 = vmatpush3.bf16.msra.mxu1 %v2709_v19  ;;  %2532 = vmatprep.subr.bf16.mxu0 %v2712_v22 }
  0x79   : >> { %2556 = vmatprep.subr.bf16.mxu1 %v2713_v23 }
  0x7a   : >> { %2501 = vmatmul.mubr.bf16.gmra.mxu0 %v2711_v24 }
  0x7b   : >> { %2533 = vmatpush3.bf16.msra.mxu0 %v2712_v22  ;;  %2525 = vmatmul.mubr.bf16.gmra.mxu1 %v2715_v25 }
  0x7c   : >> { %2557 = vmatpush3.bf16.msra.mxu1 %v2713_v23  ;;  %2534 = vmatprep.subr.bf16.mxu0 %v2716_v28 }
  0x7d   : >> { %2558 = vmatprep.subr.bf16.mxu1 %v2717_v29  ;;  %2544 = vmatprep.mubr.bf16.mxu0 %v2726_v30 }
  0x7e   : >> { %2568 = vmatprep.mubr.bf16.mxu1 %v2727_v31 }
  0x7f   : >> { %2535 = vmatpush3.bf16.msra.mxu0 %v2716_v28 }
  0x80   : >> { %2559 = vmatpush3.bf16.msra.mxu1 %v2717_v29  ;;  %2536 = vmatprep.subr.bf16.mxu0 %v2718_v33 }
  0x81   : >> { %2560 = vmatprep.subr.bf16.mxu1 %v2719_v35 }
  0x83   : >> { %2537 = vmatpush3.bf16.msra.mxu0 %v2718_v33 }
  0x84   : >> { %2561 = vmatpush3.bf16.msra.mxu1 %v2719_v35  ;;  %2538 = vmatprep.subr.bf16.mxu0 %v2720_v37 }
  0x85   : >> { %2562 = vmatprep.subr.bf16.mxu1 %v2721_v39 }
  0x87   : >> { %2539 = vmatpush3.bf16.msra.mxu0 %v2720_v37 }
  0x88   : >> { %2563 = vmatpush3.bf16.msra.mxu1 %v2721_v39  ;;  %2540 = vmatprep.subr.bf16.mxu0 %v2722_v41 }
  0x89   : >> { %2564 = vmatprep.subr.bf16.mxu1 %v2723_v43 }
  0x8b   : >> { %2541 = vmatpush3.bf16.msra.mxu0 %v2722_v41 }
  0x8c   : >> { %2565 = vmatpush3.bf16.msra.mxu1 %v2723_v43  ;;  %2542 = vmatprep.subr.bf16.mxu0 %v2724_v44 }
  0x8d   : >> { %2566 = vmatprep.subr.bf16.mxu1 %v2725_v45 }
  0x8f   : >> { %2543 = vmatpush3.bf16.msra.mxu0 %v2724_v44 }
  0x90   : >> { %2567 = vmatpush3.bf16.msra.mxu1 %v2725_v45  ;;  %2576 = vmatprep.subr.bf16.mxu0 %v2730_v46 }
  0x91   : >> { %2600 = vmatprep.subr.bf16.mxu1 %v2730_v46 }
  0x92   : >> { %2545 = vmatmul.mubr.bf16.vlgmr.msra.gmra.mxu0 %v2728_v47 }
  0x93   : >> { %2569 = vmatmul.mubr.bf16.vlgmr.msra.gmra.mxu1 %v2729_v48  ;;  %2577 = vmatpush3.bf16.msra.mxu0 %v2730_v46 }
  0x94   : >> { %2608 = vmatpush3.bf16.msra.mxu1 %v2730_v46  ;;  %2578 = vmatprep.subr.bf16.mxu0 %v2731_v49 }
  0x95   : >> { %2601 = vmatprep.subr.bf16.mxu1 %v2731_v49  ;;  %2548 = vmatprep.mubr.bf16.mxu0 %v2732_v50 }
  0x96   : >> { %2572 = vmatprep.mubr.bf16.mxu1 %v2735_v51 }
  0x97   : >> { %2579 = vmatpush3.bf16.msra.mxu0 %v2731_v49 }
  0x98   : >> { %2609 = vmatpush3.bf16.msra.mxu1 %v2731_v49  ;;  %2580 = vmatprep.subr.bf16.mxu0 %v2734_v52 }
  0x99   : >> { %2602 = vmatprep.subr.bf16.mxu1 %v2734_v52 }
  0x9a   : >> { %2549 = vmatmul.mubr.bf16.gmra.mxu0 %v2733_v53 }
  0x9b   : >> { %2581 = vmatpush3.bf16.msra.mxu0 %v2734_v52  ;;  %2573 = vmatmul.mubr.bf16.gmra.mxu1 %v2736_v54 }
  0x9c   : >> { %2610 = vmatpush3.bf16.msra.mxu1 %v2734_v52  ;;  %2582 = vmatprep.subr.bf16.mxu0 %v2737_v55 }
  0x9d   : >> { %2603 = vmatprep.subr.bf16.mxu1 %v2737_v55  ;;  %2592 = vmatprep.mubr.bf16.mxu0 %v2742_v56 }
  0x9e   : >> { %2596 = vmatprep.mubr.bf16.mxu1 %v2743_v57 }
  0x9f   : >> { %2583 = vmatpush3.bf16.msra.mxu0 %v2737_v55 }
  0xa0   : >> { %2611 = vmatpush3.bf16.msra.mxu1 %v2737_v55  ;;  %2584 = vmatprep.subr.bf16.mxu0 %v2738_v58 }
  0xa1   : >> { %2604 = vmatprep.subr.bf16.mxu1 %v2738_v58 }
  0xa3   : >> { %2585 = vmatpush3.bf16.msra.mxu0 %v2738_v58 }
  0xa4   : >> { %2612 = vmatpush3.bf16.msra.mxu1 %v2738_v58  ;;  %2586 = vmatprep.subr.bf16.mxu0 %v2739_v59 }
  0xa5   : >> { %2605 = vmatprep.subr.bf16.mxu1 %v2739_v59 }
  0xa7   : >> { %2587 = vmatpush3.bf16.msra.mxu0 %v2739_v59 }
  0xa8   : >> { %2613 = vmatpush3.bf16.msra.mxu1 %v2739_v59  ;;  %2588 = vmatprep.subr.bf16.mxu0 %v2740_v60 }
  0xa9   : >> { %2606 = vmatprep.subr.bf16.mxu1 %v2740_v60 }
  0xab   : >> { %2589 = vmatpush3.bf16.msra.mxu0 %v2740_v60 }
  0xac   : >> { %2614 = vmatpush3.bf16.msra.mxu1 %v2740_v60  ;;  %2590 = vmatprep.subr.bf16.mxu0 %v2741_v61 }
  0xad   : >> { %2607 = vmatprep.subr.bf16.mxu1 %v2741_v61 }
  0xaf   : >> { %2591 = vmatpush3.bf16.msra.mxu0 %v2741_v61 }
  0xb0   : >> { %2615 = vmatpush3.bf16.msra.mxu1 %v2741_v61 }
  0xb2   : >> { %2593 = vmatmul.mubr.bf16.vlgmr.msra.gmra.mxu0 %v2744_v62 }
  0xb3   : >> { %2597 = vmatmul.mubr.bf16.vlgmr.msra.gmra.mxu1 %v2745_v63 }
  0xf2   : >> { %v2402_v1 = vpop.f32.mrf.mxu0 }
  0xf3   : >> { %v2426_v3 = vpop.f32.mrf.mxu1 }
  0xf4   : >> { %v377_v2 = vpop.f32.mrf.mxu0  ;;  %v509_v54 = vadd.f32 %v2426_v3, %v2402_v1 }
  0xf5   : >> { %v500_v5 = vpop.f32.mrf.mxu1 }
  0xf6   : >> { %v2403_v4 = vpop.f32.mrf.mxu0  ;;  %v501_v58 = vadd.f32 %v500_v5, %v377_v2 }
  0xf7   : >> { %v2427_v8 = vpop.f32.mrf.mxu1 }
  0xf8   : >> { %v380_v6 = vpop.f32.mrf.mxu0  ;;  %v512_v62 = vadd.f32 %v2427_v8, %v2403_v4 }
  0xf9   : >> { %v503_v10 = vpop.f32.mrf.mxu1 }
  0xfa   : >> { %v2406_v7 = vpop.f32.mrf.mxu0 }
  0xfb   : >> { %v2430_v11 = vpop.f32.mrf.mxu1 }
  0xfc   : >> { %v393_v9 = vpop.f32.mrf.mxu0  ;;  %v525_v56 = vadd.f32 %v2430_v11, %v2406_v7 }
  0xfd   : >> { %v516_v13 = vpop.f32.mrf.mxu1 }
  0xfe   : >> { %v2407_v12 = vpop.f32.mrf.mxu0  ;;  %v517_v60 = vadd.f32 %v516_v13, %v393_v9 }
  0xff   : >> { %v2431_v16 = vpop.f32.mrf.mxu1 }
 0x100   : >> { %v396_v14 = vpop.f32.mrf.mxu0 }
 0x101   : >> { %v519_v18 = vpop.f32.mrf.mxu1 }
 0x112   : >> { %v2450_v15 = vpop.f32.mrf.mxu0 }
 0x113   : >> { %v2474_v19 = vpop.f32.mrf.mxu1  ;;  %v695_v59 = vadd.f32 %v2450_v15, %v509_v54 }
 0x114   : >> { %v662_v17 = vpop.f32.mrf.mxu0 }
 0x115   : >> { %v836_v21 = vpop.f32.mrf.mxu1  ;;  %v693_v63 = vadd.f32 %v662_v17, %v501_v58 }
 0x116   : >> { %v2451_v20 = vpop.f32.mrf.mxu0 }
 0x117   : >> { %v2475_v23 = vpop.f32.mrf.mxu1  ;;  %v696_v1 = vadd.f32 %v2451_v20, %v512_v62  ;;  %v867_v2 = vadd.f32 %v836_v21, %v693_v63 }
 0x118   : >> { %v665_v22 = vpop.f32.mrf.mxu0 }
 0x119   : >> { %v3090_v25 = vpop.f32.mrf.mxu1  ;;  %v870_v8 = vadd.f32 %v2475_v23, %v696_v1 }
 0x11a   : >> { %v2454_v24 = vpop.f32.mrf.mxu0  ;;  %3140 = vst [vmem:[#allocation3_spill] sm:$0xff] %v3090_v25  ;;  %v504_v25 = vadd.f32 %v503_v10, %v380_v6 }
 0x11b   : >> { %v2478_v27 = vpop.f32.mrf.mxu1  ;;  %v699_v61 = vadd.f32 %v2454_v24, %v525_v56 }
 0x11c   : >> { %v678_v26 = vpop.f32.mrf.mxu0  ;;  %v694_v5 = vadd.f32 %v665_v22, %v504_v25 }
 0x11d   : >> { %v852_v29 = vpop.f32.mrf.mxu1  ;;  %v873_v7 = vadd.f32 %v2478_v27, %v699_v61 }
 0x11e   : >> { %v2455_v28 = vpop.f32.mrf.mxu0 }
 0x11f   : >> { %v2479_v31 = vpop.f32.mrf.mxu1 }
 0x120   : >> { %v681_v30 = vpop.f32.mrf.mxu0 }
 0x121   : >> { %v855_v33 = vpop.f32.mrf.mxu1  ;;  %v3146_v6 = vld [vmem:[#allocation3_spill] sm:$0xff] }
 0x122   : >> { %v868_v10 = vadd.f32 %v3146_v6, %v694_v5 }
 0x132   : >> { %v2498_v32 = vpop.f32.mrf.mxu0 }
 0x133   : >> { %v2522_v35 = vpop.f32.mrf.mxu1 }
 0x134   : >> { %v1006_v34 = vpop.f32.mrf.mxu0 }
 0x135   : >> { %v1176_v37 = vpop.f32.mrf.mxu1  ;;  %v1037_v17 = vadd.f32 %v1006_v34, %v867_v2 }
 0x136   : >> { %v2499_v36 = vpop.f32.mrf.mxu0 }
 0x137   : >> { %v3092_v39 = vpop.f32.mrf.mxu1  ;;  %v1207_v27 = vadd.f32 %v1176_v37, %v1037_v17 }
 0x138   : >> { %v1009_v38 = vpop.f32.mrf.mxu0  ;;  %3141 = vst [vmem:[#allocation4_spill] sm:$0xff] %v3092_v39 }
 0x139   : >> { %v3094_v41 = vpop.f32.mrf.mxu1 }
 0x13a   : >> { %v2502_v40 = vpop.f32.mrf.mxu0  ;;  %3142 = vst [vmem:[#allocation5_spill] sm:$0xff] %v3094_v41  ;;  %v528_v41 = vadd.f32 %v2431_v16, %v2407_v12 }
 0x13b   : >> { %v2526_v42 = vpop.f32.mrf.mxu1  ;;  %v1043_v13 = vadd.f32 %v2502_v40, %v873_v7 }
 0x13c   : >> { %v1022_v43 = vpop.f32.mrf.mxu0  ;;  %v700_v11 = vadd.f32 %v2455_v28, %v528_v41  ;;  %v1038_v28 = vadd.f32 %v1009_v38, %v868_v10 }
 0x13d   : >> { %v1192_v44 = vpop.f32.mrf.mxu1  ;;  %v1213_v21 = vadd.f32 %v2526_v42, %v1043_v13 }
 0x13e   : >> { %v2503_v45 = vpop.f32.mrf.mxu0  ;;  %v874_v12 = vadd.f32 %v2479_v31, %v700_v11 }
 0x13f   : >> { %v2527_v46 = vpop.f32.mrf.mxu1  ;;  %v3147_v34 = vld [vmem:[#allocation4_spill] sm:$0xff] }
 0x140   : >> { %v1025_v47 = vpop.f32.mrf.mxu0  ;;  %v1044_v22 = vadd.f32 %v2503_v45, %v874_v12 }
 0x141   : >> { %v3096_v49 = vpop.f32.mrf.mxu1 }
 0x142   : >> { %3143 = vst [vmem:[#allocation6_spill] sm:$0xff] %v3096_v49  ;;  %v697_v49 = vadd.f32 %v678_v26, %v517_v60  ;;  %v3104_v26 = vpop.permute.xlu1 %1773 }
 0x144   : >> { %v871_v54 = vadd.f32 %v852_v29, %v697_v49 }
 0x146   : >> { %v1041_v16 = vadd.f32 %v1022_v43, %v871_v54  ;;  %v1214_v43 = vadd.f32 %v2527_v46, %v1044_v22 }
 0x149   : >> { %v3149_v37 = vld [vmem:[#allocation6_spill] sm:$0xff] }
 0x152   : >> { %v2546_v48 = vpop.f32.mrf.mxu0 }
 0x153   : >> { %v2570_v50 = vpop.f32.mrf.mxu1 }
 0x154   : >> { %v1350_v51 = vpop.f32.mrf.mxu0 }
 0x155   : >> { %v3098_v52 = vpop.f32.mrf.mxu1  ;;  %v1381_v41 = vadd.f32 %v1350_v51, %v1207_v27 }
 0x156   : >> { %3144 = vst [vmem:[#allocation7_spill] sm:$0xff] %v3098_v52  ;;  %v2547_v53 = vpop.f32.mrf.mxu0  ;;  %v869_v52 = vadd.f32 %v2474_v19, %v695_v59 }
 0x157   : >> { %v3100_v55 = vpop.f32.mrf.mxu1 }
 0x158   : >> { %3145 = vst [vmem:[#allocation8_spill] sm:$0xff] %v3100_v55  ;;  %v1353_v57 = vpop.f32.mrf.mxu0  ;;  %v520_v55 = vadd.f32 %v519_v18, %v396_v14  ;;  %v1039_v15 = vadd.f32 %v2498_v32, %v869_v52  ;;  %v1040_v14 = vadd.f32 %v2499_v36, %v870_v8  ;;  %v3107_v18 = vpop.permute.xlu0 %1763  ;;  %v3148_v52 = vld [vmem:[#allocation5_spill] sm:$0xff] }
 0x159   : >> { %v3102_v0 = vpop.f32.mrf.mxu1  ;;  %v1779_v36 = vpop.permute.xlu1 %1778 }
 0x15a   : >> { %v2550_v39 = vpop.f32.mrf.mxu0  ;;  %v698_v9 = vadd.f32 %v681_v30, %v520_v55  ;;  %v1209_v19 = vadd.f32 %v2522_v35, %v1039_v15  ;;  %v1211_v30 = vadd.f32 %v1192_v44, %v1041_v16  ;;  %v1210_v40 = vadd.f32 %v3147_v34, %v1040_v14 }
 0x15b   : >> { %v2574_v3 = vpop.f32.mrf.mxu1  ;;  %v1387_v31 = vadd.f32 %v2550_v39, %v1213_v21  ;;  %v1208_v55 = vadd.f32 %v3148_v52, %v1038_v28 }
 0x15c   : >> { %v1366_v4 = vpop.f32.mrf.mxu0  ;;  %v872_v20 = vadd.f32 %v855_v33, %v698_v9  ;;  %v1383_v29 = vadd.f32 %v2546_v48, %v1209_v19  ;;  %v1384_v42 = vadd.f32 %v2547_v53, %v1210_v40  ;;  %v1769_v56 = vpop.permute.xlu0 %1768 }
 0x15d   : >> { %v1536_v24 = vpop.f32.mrf.mxu1  ;;  %v1385_v49 = vadd.f32 %v1366_v4, %v1211_v30  ;;  %v1557_v48 = vadd.f32 %v2574_v3, %v1387_v31  ;;  %v1382_v59 = vadd.f32 %v1353_v57, %v1208_v55  ;;  %v1789_v15 = vpop.permute.xlu1 %1788 }
 0x15e   : >> { %v2551_v25 = vpop.f32.mrf.mxu0  ;;  %v1042_v32 = vadd.f32 %v1025_v47, %v872_v20  ;;  %v1553_v33 = vadd.f32 %v2570_v50, %v1383_v29  ;;  %v3150_v47 = vld [vmem:[#allocation7_spill] sm:$0xff]  ;;  %v3152_v50 = vld [vmem:[#allocation2_spill] sm:$0xff] }
 0x15f   : >> { %v2575_v23 = vpop.f32.mrf.mxu1  ;;  %v1388_v58 = vadd.f32 %v2551_v25, %v1214_v43  ;;  %v1551_v39 = vadd.f32 %v3150_v47, %v1381_v41  ;;  %v1555_v46 = vadd.f32 %v1536_v24, %v1385_v49  ;;  %v3151_v1 = vld [vmem:[#allocation8_spill] sm:$0xff]  ;;  %v1552_v57 = vadd.f32 %v3102_v0, %v1382_v59 }
 0x160   : >> { %v1369_v35 = vpop.f32.mrf.mxu0  ;;  %v1212_v38 = vadd.f32 %v3149_v37, %v1042_v32  ;;  %v1554_v7 = vadd.f32 %v3151_v1, %v1384_v42  ;;  %v1784_v13 = vpop.permute.xlu0 %1783 }
 0x161   : >> { %v1539_v45 = vpop.f32.mrf.mxu1  ;;  %v1558_v5 = vadd.f32 %v2575_v23, %v1388_v58  ;;  %v1799_v32 = vpop.permute.xlu1 %1798 }
 0x162   : >> { %v1386_v61 = vadd.f32 %v1369_v35, %v1212_v38 }
 0x164   : >> { %v1556_v24 = vadd.f32 %v1539_v45, %v1386_v61  ;;  %v1794_v31 = vpop.permute.xlu0 %1793 }
 0x172   : >> { %v2594_v44 = vpop.f32.mrf.mxu0 }
 0x173   : >> { %v1723_v60 = vadd.f32 %v2594_v44, %v1553_v33  ;;  %v2598_v51 = vpop.f32.mrf.mxu1 }
 0x174   : >> { %v1727_v62 = vadd.f32 %v2598_v51, %v1557_v48  ;;  %v1690_v63 = vpop.f32.mrf.mxu0 }
 0x175   : >> { %v1737_v53 = vadd.f32 %v3152_v50, %v1723_v60  ;;  %v1721_v11 = vadd.f32 %v1690_v63, %v1551_v39  ;;  %v1706_v2 = vpop.f32.mrf.mxu1 }
 0x176   : >> { %v1741_v3 = vadd.f32 %v3152_v50, %v1727_v62  ;;  %v1725_v54 = vadd.f32 %v1706_v2, %v1555_v46  ;;  %v2595_v9 = vpop.f32.mrf.mxu0 }
 0x177   : >> { %v1735_v4 = vadd.f32 %v3152_v50, %v1721_v11  ;;  %v1724_v8 = vadd.f32 %v2595_v9, %v1554_v7  ;;  %v2599_v17 = vpop.f32.mrf.mxu1  ;;  %v1745_v10 = vmax.f32 %v1737_v53, 0.0 }
 0x178   : >> { %v1739_v12 = vadd.f32 %v3152_v50, %v1725_v54  ;;  %v1728_v16 = vadd.f32 %v2599_v17, %v1558_v5  ;;  %v1693_v6 = vpop.f32.mrf.mxu0  ;;  %v1749_v21 = vmax.f32 %v1741_v3, 0.0 }
 0x179   : >> { %v1738_v19 = vadd.f32 %v3152_v50, %v1724_v8  ;;  %v1722_v14 = vadd.f32 %v1693_v6, %v1552_v57  ;;  %v1709_v20 = vpop.f32.mrf.mxu1  ;;  %v1743_v25 = vmax.f32 %v1735_v4, 0.0  ;;  %v1803_v34 = vmul.f32 %v3104_v26, %v1745_v10 }
 0x17a   : >> { %v1742_v0 = vadd.f32 %v3152_v50, %v1728_v16  ;;  %v1726_v22 = vadd.f32 %v1709_v20, %v1556_v24  ;;  %v1747_v29 = vmax.f32 %v1739_v12, 0.0  ;;  %v1807_v43 = vmul.f32 %v1794_v31, %v1749_v21 }
 0x17b   : >> { %v1746_v27 = vmax.f32 %v1738_v19, 0.0  ;;  %v1736_v28 = vadd.f32 %v3152_v50, %v1722_v14  ;;  %v1801_v52 = vmul.f32 %v3107_v18, %v1743_v25 }
 0x17c   : >> { %v1750_v23 = vmax.f32 %v1742_v0, 0.0  ;;  %v1740_v30 = vadd.f32 %v3152_v50, %v1726_v22  ;;  %v1805_v42 = vmul.f32 %v1784_v13, %v1747_v29 }
 0x17d   : >> { %v1804_v40 = vmul.f32 %v1779_v36, %v1746_v27  ;;  %v1744_v41 = vmax.f32 %v1736_v28, 0.0 }
 0x17e   : >> { %v1808_v49 = vmul.f32 %v1799_v32, %v1750_v23  ;;  %v1748_v35 = vmax.f32 %v1740_v30, 0.0 }
 0x17f   : >> { %v2261_v55 = vpack.c.bf16 %v1804_v40, %v1803_v34  ;;  %v1802_v33 = vmul.f32 %v1769_v56, %v1744_v41 }
 0x180   : >> { %v2271_v45 = vpack.c.bf16 %v1808_v49, %v1807_v43  ;;  %v1806_v37 = vmul.f32 %v1789_v15, %v1748_v35  ;;  %224 = sbr.rel (!%p222_p4) target bundleno = 17 (0x11), region = 89 }
 0x181   : >> { %2273 = vst [vmem:[%s1843_s13 + $0x8] sm:$0xff] %v2261_v55   ;;  %v2256_v38 = vpack.c.bf16 %v1802_v33, %v1801_v52 }
 0x182   : >> { %2275 = vst [vmem:[%s1843_s13 + $0x18] sm:$0xff] %v2271_v45   ;;  %v2266_v48 = vpack.c.bf16 %v1806_v37, %v1805_v42 }
 0x183   : >> { %2257 = vst [vmem:[%s1843_s13] sm:$0xff] %v2256_v38  }
 0x184   : >> { %2274 = vst [vmem:[%s1843_s13 + $0x10] sm:$0xff] %v2266_v48  }
 0x185 PF: > { %s14_s15 = sadd.s32 1, %s2756_s15  }
 0x186   : > { %p11_p5 = scmp.ge.s32.totalorder %s14_s15, 4  }
 0x188   :  { %13 = sbr.rel (!%p11_p5) target bundleno = 1 (0x1), region = 100 }

// kernel: voxelnet_encoder_forward.17
= control target key start
LH: loop header
LB: loop body
LE: loop exit
PB: predicated region body
PF: predicated region fallthrough
CT: control target
= control target key end

     0   :  { %s2000_s15 = smov 0   ;;  %s2002_s16 = smov 0   ;;  %s2368_s0 = inlined_call_operand.vmem [shape: bf16[2,80,864], index: 0, kind: input, shape index: {}]   ;;  %s2369_s1 = inlined_call_operand.vmem [shape: bf16[864,128], index: 1, kind: input, shape index: {}]   ;;  %s2370_s2 = inlined_call_operand.vmem [shape: f32[1,128], index: 2, kind: input, shape index: {}]   ;;  %s2371_s3 = inlined_call_operand.vmem [shape: f32[2,80,1], index: 3, kind: input, shape index: {}]   ;;  %s2372_s4 = inlined_call_operand.vmem [shape: bf16[2,80,128], index: 4, kind: output, shape index: {}]  }
   0x1   :  { %s2004_s17 = smov 0  }
   0x2 LB: > { %s26_s18 = sadd.s32 1, %s1966_s16  ;;  %p1481_p0 = scmp.ge.s32.totalorder %s1970_s17, 1  ;;  %s1970_s17 = sphi %s2004_s17, %s14_s17   ;;  %s1966_s16 = sphi %s2002_s16, %s2374_s16   ;;  %s1962_s15 = sphi %s2000_s15, %s2373_s15  }
   0x3   : > { %p28_p1 = scmp.ge.s32.totalorder %s26_s18, 2  ;;  %p201_p2 = scmp.lt.s32.totalorder %s1970_s17, 3 }
   0x5   : > { %s2376_s18 = smov (%p28_p1, %s26_s18), 0  ;;  %p202_p3 = pnand %p1481_p0, %p201_p2 }
   0x6   : > { %p246_p4 = scmp.lt.s32.totalorder (!%p202_p3), %s1962_s15, 1 }
   0x7   : > { %205 = sbr.rel (%p202_p3) target bundleno = 329 (0x149), region = 36 }
   0xc   : > { %v1844_v0 = vld [vmem:[%s2369_s1 + $0x78] sm:$0xff]   ;;  %v1848_v4 = vld [vmem:[%s2369_s1 + $0x70] sm:$0xff]   ;;  %v1972_v8 = vmov 0   ;;  %v1852_v9 = vld [vmem:[%s2369_s1 + $0x68] sm:$0xff]   ;;  %s2378_s15 = smov (!%p246_p4, %s1962_s15), 1  ;;  %v1973_v37 = vmov 0.0  }
   0xd   : > { %v1845_v1 = vld [vmem:[%s2369_s1 + $0x38] sm:$0xff]   ;;  %1631 = vmatprep.subr.bf16.mxu0 %v1844_v0  ;;  %v1849_v5 = vld [vmem:[%s2369_s1 + $0x30] sm:$0xff]   ;;  %1842 = vset.pattern.permute.xlu0 %v1972_v8  ;;  %v1853_v10 = vld [vmem:[%s2369_s1 + $0x28] sm:$0xff]   ;;  %s1812_s27 = smul.u32 280, %s2378_s15  ;;  %vm1974_vm0 = vmmov 0   ;;  %vm931_vm1 = vcmask 785408  }
   0xe   : > { %v1846_v2 = vld [vmem:[%s2369_s1 + $0xf8] sm:$0xff]   ;;  %1632 = vmatpush3.bf16.msra.mxu0 %v1845_v1  ;;  %v1850_v6 = vld [vmem:[%s2369_s1 + $0xf0] sm:$0xff]   ;;  %1843 = vset.pattern.permute.xlu1 %v1972_v8  ;;  %v1854_v11 = vld [vmem:[%s2369_s1 + $0xe8] sm:$0xff]   ;;  %s1813_s23 = smul.u32 80, %s2378_s15 }
   0xf   : > { %v1847_v3 = vld [vmem:[%s2369_s1 + $0xb8] sm:$0xff]   ;;  %1677 = vmatprep.subr.bf16.mxu1 %v1846_v2  ;;  %1633 = vmatprep.subr.bf16.mxu0 %v1848_v4  ;;  %v1851_v7 = vld [vmem:[%s2369_s1 + $0xb0] sm:$0xff]   ;;  %v1855_v12 = vld [vmem:[%s2369_s1 + $0xa8] sm:$0xff]   ;;  %s2118_s12 = scalar_lea.vmem %s2368_s0, %s1812_s27  ;;  %s1814_s28 = smul.u32 40, %s2378_s15 }
  0x10   : > { %1678 = vmatpush3.bf16.msra.mxu1 %v1847_v3  ;;  %v1856_v13 = vld [vmem:[%s2369_s1 + $0x60] sm:$0xff]   ;;  %v1860_v17 = vld [vmem:[%s2369_s1 + $0x58] sm:$0xff]   ;;  %v1864_v21 = vld [vmem:[%s2369_s1 + $0x50] sm:$0xff]   ;;  %s2228_s26 = scalar_lea.vmem %s2371_s3, %s1813_s23 }
  0x11   : > { %1679 = vmatprep.subr.bf16.mxu1 %v1850_v6  ;;  %v1857_v14 = vld [vmem:[%s2369_s1 + $0x20] sm:$0xff]   ;;  %v1861_v18 = vld [vmem:[%s2369_s1 + $0x18] sm:$0xff]   ;;  %v1865_v22 = vld [vmem:[%s2369_s1 + $0x10] sm:$0xff]   ;;  %s2329_s30 = scalar_lea.vmem %s2372_s4, %s1814_s28 }
  0x12   : > { %1634 = vmatpush3.bf16.msra.mxu0 %v1849_v5  ;;  %v1858_v15 = vld [vmem:[%s2369_s1 + $0xe0] sm:$0xff]   ;;  %v1862_v19 = vld [vmem:[%s2369_s1 + $0xd8] sm:$0xff]   ;;  %v1866_v23 = vld [vmem:[%s2369_s1 + $0xd0] sm:$0xff]  }
  0x13   : > { %1635 = vmatprep.subr.bf16.mxu0 %v1852_v9  ;;  %v1859_v16 = vld [vmem:[%s2369_s1 + $0xa0] sm:$0xff]   ;;  %v1863_v20 = vld [vmem:[%s2369_s1 + $0x98] sm:$0xff]   ;;  %v1867_v24 = vld [vmem:[%s2369_s1 + $0x90] sm:$0xff]  }
  0x14   : > { %1680 = vmatpush3.bf16.msra.mxu1 %v1851_v7  ;;  %v1868_v25 = vld [vmem:[%s2369_s1 + $0x48] sm:$0xff]   ;;  %v1872_v29 = vld [vmem:[%s2369_s1 + $0x40] sm:$0xff]   ;;  %v1882_v38 = vld [vmem:[%s2369_s1 + $0x178] sm:$0xff]  }
  0x15   : > { %1681 = vmatprep.subr.bf16.mxu1 %v1854_v11  ;;  %v1869_v26 = vld [vmem:[%s2369_s1 + $0x8] sm:$0xff]   ;;  %v1873_v30 = vld [vmem:[%s2369_s1] sm:$0xff]   ;;  %v1883_v39 = vld [vmem:[%s2369_s1 + $0x138] sm:$0xff]  }
  0x16   : > { %1636 = vmatpush3.bf16.msra.mxu0 %v1853_v10  ;;  %v1870_v27 = vld [vmem:[%s2369_s1 + $0xc8] sm:$0xff]   ;;  %v1874_v31 = vld [vmem:[%s2369_s1 + $0xc0] sm:$0xff]   ;;  %v1884_v40 = vld [vmem:[%s2369_s1 + $0x170] sm:$0xff]  }
  0x17   : > { %1637 = vmatprep.subr.bf16.mxu0 %v1856_v13  ;;  %v1871_v28 = vld [vmem:[%s2369_s1 + $0x88] sm:$0xff]   ;;  %v1875_v32 = vld [vmem:[%s2369_s1 + $0x80] sm:$0xff]   ;;  %v1885_v41 = vld [vmem:[%s2369_s1 + $0x130] sm:$0xff]  }
  0x18   : > { %1682 = vmatpush3.bf16.msra.mxu1 %v1855_v12  ;;  %v1876_v33 = vld [vmem:[%s2118_s12] ss:$28 sps:$4 sm:$0xff]   ;;  %v1879_v35 = vld [vmem:[%s2118_s12 + $0x8] ss:$28 sps:$4 sm:$0xff]   ;;  %v1889_v44 = vld [vmem:[%s2118_s12 + $0x38] ss:$28 sps:$4 sm:$0xff]  }
  0x19   : > { %1683 = vmatprep.subr.bf16.mxu1 %v1858_v15  ;;  %v1878_v34 = vld [vmem:[%s2118_s12 + $0x4] ss:$28 sps:$4 sm:$0xff]   ;;  %v1881_v36 = vld [vmem:[%s2118_s12 + $0xc] ss:$28 sps:$4 sm:$0xff]   ;;  %v1886_v42 = vld [vmem:[%s2118_s12 + $0x3c] ss:$28 sps:$4 sm:$0xff]  }
  0x1a   : > { %1638 = vmatpush3.bf16.msra.mxu0 %v1857_v14  ;;  %979 = vmatprep.mubr.bf16.mxu0 %v1878_v34  ;;  %v1888_v43 = vld [vmem:[%s2369_s1 + $0x1a8] sm:$0xff]   ;;  %v1890_v45 = vld [vmem:[%s2118_s12 + $0x44] ss:$28 sps:$4 sm:$0xff]   ;;  %v1896_v50 = vld [vmem:[%s2118_s12 + $0x74] ss:$28 sps:$4 sm:$0xff]  }
  0x1b   : > { %1639 = vmatprep.subr.bf16.mxu0 %v1860_v17  ;;  %1052 = vmatprep.mubr.bf16.mxu1 %v1881_v36  ;;  %v1892_v46 = vld [vmem:[%s2118_s12 + $0x40] ss:$28 sps:$4 sm:$0xff]   ;;  %v1893_v47 = vld [vmem:[%s2369_s1 + $0x168] sm:$0xff]   ;;  %v1903_v55 = vld [vmem:[%s2118_s12 + $0x78] ss:$28 sps:$4 sm:$0xff]  }
  0x1c   : > { %1684 = vmatpush3.bf16.msra.mxu1 %v1859_v16  ;;  %v1894_v48 = vld [vmem:[%s2369_s1 + $0x128] sm:$0xff]   ;;  %v1895_v49 = vld [vmem:[%s2369_s1 + $0x1a0] sm:$0xff]   ;;  %v1900_v53 = vld [vmem:[%s2118_s12 + $0x7c] ss:$28 sps:$4 sm:$0xff]  }
  0x1d   : > { %1685 = vmatprep.subr.bf16.mxu1 %v1862_v19  ;;  %v1898_v51 = vld [vmem:[%s2369_s1 + $0x160] sm:$0xff]   ;;  %v1899_v52 = vld [vmem:[%s2118_s12 + $0x70] ss:$28 sps:$4 sm:$0xff]   ;;  %v1904_v56 = vld [vmem:[%s2369_s1 + $0x158] sm:$0xff]  }
  0x1e   : > { %1640 = vmatpush3.bf16.msra.mxu0 %v1861_v18  ;;  %v1902_v54 = vld [vmem:[%s2369_s1 + $0x120] sm:$0xff]   ;;  %v1905_v57 = vld [vmem:[%s2369_s1 + $0x118] sm:$0xff]   ;;  %v1907_v59 = vld [vmem:[%s2118_s12 + $0xac] ss:$28 sps:$4 sm:$0xff]  }
  0x1f   : > { %1641 = vmatprep.subr.bf16.mxu0 %v1864_v21  ;;  %v1906_v58 = vld [vmem:[%s2369_s1 + $0x198] sm:$0xff]   ;;  %v1909_v60 = vld [vmem:[%s2118_s12 + $0xa8] ss:$28 sps:$4 sm:$0xff]   ;;  %v1910_v61 = vld [vmem:[%s2118_s12 + $0xb4] ss:$28 sps:$4 sm:$0xff]  }
  0x20   : > { %1686 = vmatpush3.bf16.msra.mxu1 %v1863_v20  ;;  %v1912_v62 = vld [vmem:[%s2118_s12 + $0xb0] ss:$28 sps:$4 sm:$0xff]   ;;  %v1917_v3 = vld [vmem:[%s2118_s12 + $0xe4] ss:$28 sps:$4 sm:$0xff]   ;;  %v1931_v14 = vld [vmem:[%s2118_s12 + $0x18] ss:$28 sps:$4 sm:$0xff]  }
  0x21   : > { %1687 = vmatprep.subr.bf16.mxu1 %v1866_v23  ;;  %v1913_v63 = vld [vmem:[%s2369_s1 + $0x150] sm:$0xff]   ;;  %v1916_v2 = vld [vmem:[%s2369_s1 + $0x148] sm:$0xff]   ;;  %v1920_v5 = vld [vmem:[%s2118_s12 + $0xe0] ss:$28 sps:$4 sm:$0xff]  }
  0x22   : > { %1642 = vmatpush3.bf16.msra.mxu0 %v1865_v22  ;;  %v1914_v0 = vld [vmem:[%s2369_s1 + $0x110] sm:$0xff]   ;;  %v1919_v4 = vld [vmem:[%s2369_s1 + $0x108] sm:$0xff]   ;;  %v1925_v9 = vld [vmem:[%s2369_s1 + $0x140] sm:$0xff]  }
  0x23   : > { %1643 = vmatprep.subr.bf16.mxu0 %v1868_v25  ;;  %v1915_v1 = vld [vmem:[%s2369_s1 + $0x190] sm:$0xff]   ;;  %v1921_v6 = vld [vmem:[%s2118_s12 + $0xec] ss:$28 sps:$4 sm:$0xff]   ;;  %v1926_v10 = vld [vmem:[%s2369_s1 + $0x100] sm:$0xff]  }
  0x24   : > { %1688 = vmatpush3.bf16.msra.mxu1 %v1867_v24  ;;  %v1923_v7 = vld [vmem:[%s2118_s12 + $0xe8] ss:$28 sps:$4 sm:$0xff]   ;;  %v1930_v12 = vld [vmem:[%s2118_s12 + $0x14] ss:$28 sps:$4 sm:$0xff]   ;;  %v1252_v22 = vld [vmem:[%s2228_s26 + $0x18] sm:$0xff] }
  0x25   : > { %1689 = vmatprep.subr.bf16.mxu1 %v1870_v27  ;;  %v1924_v8 = vld [vmem:[%s2369_s1 + $0x188] sm:$0xff]   ;;  %v1927_v11 = vld [vmem:[%s2369_s1 + $0x180] sm:$0xff]   ;;  %v1251_v17 = vld [vmem:[%s2228_s26 + $0x10] sm:$0xff] }
  0x26   : > { %1644 = vmatpush3.bf16.msra.mxu0 %v1869_v26  ;;  %v1928_v13 = vld [vmem:[%s2118_s12 + $0x10] ss:$28 sps:$4 sm:$0xff]   ;;  %v1249_v16 = vld [vmem:[%s2228_s26] sm:$0xff]  ;;  %1271 = vperm.xlu1 %1843, %v1251_v17   ;;  %v1940_v27 = vld [vmem:[%s2118_s12 + $0xbc] ss:$28 sps:$4 sm:$0xff]  }
  0x27   : > { %1645 = vmatprep.subr.bf16.mxu0 %v1872_v29  ;;  %v1932_v15 = vld [vmem:[%s2118_s12 + $0x4c] ss:$28 sps:$4 sm:$0xff]   ;;  %1261 = vperm.xlu0 %1842, %v1249_v16   ;;  %v1936_v20 = vld [vmem:[%s2118_s12 + $0x84] ss:$28 sps:$4 sm:$0xff]   ;;  %v1256_v29 = vld [vmem:[%s2228_s26 + $0x38] sm:$0xff] }
  0x28   : > { %1690 = vmatpush3.bf16.msra.mxu1 %v1871_v28  ;;  %v1934_v18 = vld [vmem:[%s2118_s12 + $0x48] ss:$28 sps:$4 sm:$0xff]   ;;  %v1935_v19 = vld [vmem:[%s2118_s12 + $0x50] ss:$28 sps:$4 sm:$0xff]   ;;  %v1938_v25 = vld [vmem:[%s2118_s12 + $0x80] ss:$28 sps:$4 sm:$0xff]  }
  0x29   : > { %1691 = vmatprep.subr.bf16.mxu1 %v1874_v31  ;;  %v1250_v21 = vld [vmem:[%s2228_s26 + $0x8] sm:$0xff]  ;;  %v1253_v23 = vld [vmem:[%s2228_s26 + $0x20] sm:$0xff]  ;;  %v1255_v28 = vld [vmem:[%s2228_s26 + $0x30] sm:$0xff] }
  0x2a   : > { %1646 = vmatpush3.bf16.msra.mxu0 %v1873_v30  ;;  %1276 = vperm.xlu1 %1843, %v1252_v22   ;;  %v1254_v24 = vld [vmem:[%s2228_s26 + $0x28] sm:$0xff]  ;;  %v1257_v30 = vld [vmem:[%s2228_s26 + $0x40] sm:$0xff]  ;;  %v1944_v34 = vld [vmem:[%s2118_s12 + $0xf4] ss:$28 sps:$4 sm:$0xff]  }
  0x2b   : > { %1723 = vmatprep.subr.bf16.mxu0 %v1882_v38  ;;  %1266 = vperm.xlu0 %1842, %v1250_v21   ;;  %v1939_v26 = vld [vmem:[%s2118_s12 + $0x88] ss:$28 sps:$4 sm:$0xff]   ;;  %v1947_v36 = vld [vmem:[%s2118_s12 + $0xf8] ss:$28 sps:$4 sm:$0xff]  }
  0x2c   : > { %1692 = vmatpush3.bf16.msra.mxu1 %v1875_v32  ;;  %v1258_v31 = vld [vmem:[%s2228_s26 + $0x48] sm:$0xff]  ;;  %v1942_v32 = vld [vmem:[%s2118_s12 + $0xb8] ss:$28 sps:$4 sm:$0xff]  }
  0x2d   : > { %1780 = vmatprep.subr.bf16.mxu1 %v1973_v37  ;;  %980 = vmatmul.mubr.bf16.vlgmr.msra.gmra.mxu0 %v1876_v33  ;;  %v1943_v33 = vld [vmem:[%s2118_s12 + $0xc0] ss:$28 sps:$4 sm:$0xff]  }
  0x2e   : > { %1724 = vmatpush3.bf16.msra.mxu0 %v1883_v39  ;;  %987 = vmatprep.mubr.bf16.mxu0 %v1886_v42 }
  0x2f   : > { %1053 = vmatmul.mubr.bf16.vlgmr.msra.gmra.mxu1 %v1879_v35  ;;  %1725 = vmatprep.subr.bf16.mxu0 %v1884_v40  ;;  %v1946_v35 = vld [vmem:[%s2118_s12 + $0xf0] ss:$28 sps:$4 sm:$0xff]  }
  0x30   : > { %1781 = vmatpush3.bf16.msra.mxu1 %v1888_v43  ;;  %1060 = vmatprep.mubr.bf16.mxu1 %v1890_v45 }
  0x31   : > { %1782 = vmatprep.subr.bf16.mxu1 %v1973_v37  ;;  %1281 = vperm.xlu0 %1842, %v1253_v23  }
  0x32   : > { %1726 = vmatpush3.bf16.msra.mxu0 %v1885_v41  ;;  %1286 = vperm.xlu1 %1843, %v1254_v24  }
  0x33   : > { %1727 = vmatprep.subr.bf16.mxu0 %v1893_v47 }
  0x34   : > { %1783 = vmatpush3.bf16.msra.mxu1 %v1895_v49 }
  0x35   : > { %988 = vmatmul.mubr.bf16.gmra.mxu0 %v1889_v44  ;;  %1784 = vmatprep.subr.bf16.mxu1 %v1973_v37 }
  0x36   : > { %1728 = vmatpush3.bf16.msra.mxu0 %v1894_v48  ;;  %995 = vmatprep.mubr.bf16.mxu0 %v1896_v50 }
  0x37   : > { %1061 = vmatmul.mubr.bf16.gmra.mxu1 %v1892_v46  ;;  %1729 = vmatprep.subr.bf16.mxu0 %v1898_v51 }
  0x38   : > { %1068 = vmatprep.mubr.bf16.mxu1 %v1900_v53  ;;  %1785 = vmatpush3.bf16.msra.mxu1 %v1906_v58 }
  0x39   : > { %1786 = vmatprep.subr.bf16.mxu1 %v1973_v37  ;;  %1291 = vperm.xlu0 %1842, %v1255_v28  }
  0x3a   : > { %1730 = vmatpush3.bf16.msra.mxu0 %v1902_v54  ;;  %1296 = vperm.xlu1 %1843, %v1256_v29  }
  0x3b   : > { %1731 = vmatprep.subr.bf16.mxu0 %v1904_v56 }
  0x3c   : > { %1787 = vmatpush3.bf16.msra.mxu1 %v1915_v1 }
  0x3d   : > { %996 = vmatmul.mubr.bf16.gmra.mxu0 %v1899_v52  ;;  %1788 = vmatprep.subr.bf16.mxu1 %v1973_v37 }
  0x3e   : > { %1732 = vmatpush3.bf16.msra.mxu0 %v1905_v57  ;;  %1003 = vmatprep.mubr.bf16.mxu0 %v1907_v59 }
  0x3f   : > { %1069 = vmatmul.mubr.bf16.gmra.mxu1 %v1903_v55  ;;  %1733 = vmatprep.subr.bf16.mxu0 %v1913_v63 }
  0x40   : > { %1076 = vmatprep.mubr.bf16.mxu1 %v1910_v61  ;;  %1789 = vmatpush3.bf16.msra.mxu1 %v1924_v8 }
  0x41   : > { %1790 = vmatprep.subr.bf16.mxu1 %v1973_v37  ;;  %1301 = vperm.xlu0 %1842, %v1257_v30  }
  0x42   : > { %1734 = vmatpush3.bf16.msra.mxu0 %v1914_v0  ;;  %1306 = vperm.xlu1 %1843, %v1258_v31  }
  0x43   : > { %1735 = vmatprep.subr.bf16.mxu0 %v1916_v2 }
  0x44   : > { %1791 = vmatpush3.bf16.msra.mxu1 %v1927_v11 }
  0x45   : > { %1004 = vmatmul.mubr.bf16.gmra.mxu0 %v1909_v60 }
  0x46   : > { %1011 = vmatprep.mubr.bf16.mxu0 %v1917_v3  ;;  %1736 = vmatpush3.bf16.msra.mxu0 %v1919_v4 }
  0x47   : > { %1077 = vmatmul.mubr.bf16.gmra.mxu1 %v1912_v62  ;;  %1737 = vmatprep.subr.bf16.mxu0 %v1925_v9 }
  0x48   : > { %1084 = vmatprep.mubr.bf16.mxu1 %v1921_v6 }
  0x4a   : > { %1738 = vmatpush3.bf16.msra.mxu0 %v1926_v10  ;;  %v2305_v10 = vld [vmem:[%s2370_s2] ss:$0 sm:$0xff] }
  0x4d   : > { %1012 = vmatmul.mubr.bf16.gmra.mxu0 %v1920_v5 }
  0x4e   : > { %1125 = vmatprep.mubr.bf16.mxu0 %v1930_v12 }
  0x4f   : > { %1085 = vmatmul.mubr.bf16.gmra.mxu1 %v1923_v7 }
  0x50   : > { %1792 = vmatprep.mubr.msk.bf16.mxu1 %vm1974_vm0, %v1973_v37 }
  0x55   : > { %1126 = vmatmul.mubr.bf16.vlgmr.msra.gmra.mxu0 %v1928_v13 }
  0x56   : > { %1133 = vmatprep.mubr.bf16.mxu0 %v1932_v15 }
  0x57   : > { %1793 = vmatmul.mubr.msk.bf16.vlgmr.msra.gmra.mxu1 %vm931_vm1, %v1931_v14 }
  0x58   : > { %1796 = vmatprep.mubr.msk.bf16.mxu1 %vm1974_vm0, %v1973_v37 }
  0x5d   : > { %1134 = vmatmul.mubr.bf16.gmra.mxu0 %v1934_v18 }
  0x5e   : > { %1141 = vmatprep.mubr.bf16.mxu0 %v1936_v20 }
  0x5f   : > { %1797 = vmatmul.mubr.msk.bf16.gmra.mxu1 %vm931_vm1, %v1935_v19 }
  0x60   : > { %1800 = vmatprep.mubr.msk.bf16.mxu1 %vm1974_vm0, %v1973_v37 }
  0x65   : > { %1142 = vmatmul.mubr.bf16.gmra.mxu0 %v1938_v25 }
  0x66   : > { %1149 = vmatprep.mubr.bf16.mxu0 %v1940_v27 }
  0x67   : > { %1801 = vmatmul.mubr.msk.bf16.gmra.mxu1 %vm931_vm1, %v1939_v26 }
  0x68   : > { %1804 = vmatprep.mubr.msk.bf16.mxu1 %vm1974_vm0, %v1973_v37 }
  0x6d   : > { %1150 = vmatmul.mubr.bf16.gmra.mxu0 %v1942_v32 }
  0x6e   : > { %1157 = vmatprep.mubr.bf16.mxu0 %v1944_v34 }
  0x6f   : > { %1805 = vmatmul.mubr.msk.bf16.gmra.mxu1 %vm931_vm1, %v1943_v33 }
  0x70   : > { %1808 = vmatprep.mubr.msk.bf16.mxu1 %vm1974_vm0, %v1973_v37 }
  0x75   : > { %1158 = vmatmul.mubr.bf16.gmra.mxu0 %v1946_v35 }
  0x77   : > { %1809 = vmatmul.mubr.msk.bf16.gmra.mxu1 %vm931_vm1, %v1947_v36 }
  0xa2   : > { %v1262_v33 = vpop.permute.xlu0 %1261 }
  0xed   : > { %v1647_v38 = vpop.f32.mrf.mxu0 }
  0xef   : > { %v1693_v39 = vpop.f32.mrf.mxu1  ;;  %v1648_v40 = vpop.f32.mrf.mxu0 }
  0xf0   : > { %v1649_v8 = vadd.f32 %v1648_v40, %v1647_v38 }
  0xf1   : > { %v1694_v41 = vpop.f32.mrf.mxu1  ;;  %v1650_v42 = vpop.f32.mrf.mxu0 }
  0xf2   : > { %v982_v15 = vadd.f32 %v1649_v8, %v2305_v10  ;;  %v1695_v16 = vadd.f32 %v1694_v41, %v1693_v39 }
  0xf3   : > { %v1696_v43 = vpop.f32.mrf.mxu1  ;;  %v1651_v44 = vpop.f32.mrf.mxu0 }
  0xf4   : > { %v1652_v13 = vadd.f32 %v1651_v44, %v1650_v42  ;;  %v1055_v22 = vadd.f32 %v1695_v16, %v982_v15 }
  0xf5   : > { %v1697_v45 = vpop.f32.mrf.mxu1  ;;  %v1653_v46 = vpop.f32.mrf.mxu0 }
  0xf6   : > { %v985_v20 = vadd.f32 %v1652_v13, %v2305_v10  ;;  %v1698_v26 = vadd.f32 %v1697_v45, %v1696_v43 }
  0xf7   : > { %v1699_v47 = vpop.f32.mrf.mxu1  ;;  %v1654_v48 = vpop.f32.mrf.mxu0 }
  0xf8   : > { %v1655_v23 = vadd.f32 %v1654_v48, %v1653_v46  ;;  %v1058_v30 = vadd.f32 %v1698_v26, %v985_v20 }
  0xf9   : > { %v1700_v49 = vpop.f32.mrf.mxu1  ;;  %v1656_v50 = vpop.f32.mrf.mxu0 }
  0xfa   : > { %v990_v34 = vadd.f32 %v1655_v23, %v2305_v10  ;;  %v1701_v35 = vadd.f32 %v1700_v49, %v1699_v47  ;;  %v1267_v47 = vpop.permute.xlu0 %1266 }
  0xfb   : > { %v2264_v51 = vpop.f32.mrf.mxu1  ;;  %v1657_v37 = vpop.f32.mrf.mxu0 }
  0xfc   : > { %v1658_v31 = vadd.f32 %v1657_v37, %v1656_v50  ;;  %v1063_v46 = vadd.f32 %v1701_v35, %v990_v34 }
  0xfd   : > { %v1703_v52 = vpop.f32.mrf.mxu1  ;;  %v1659_v53 = vpop.f32.mrf.mxu0 }
  0xfe   : > { %v993_v44 = vadd.f32 %v1658_v31, %v2305_v10  ;;  %v1704_v13 = vadd.f32 %v1703_v52, %v2264_v51 }
  0xff   : > { %v2266_v54 = vpop.f32.mrf.mxu1  ;;  %v1660_v55 = vpop.f32.mrf.mxu0 }
 0x100   : > { %v1661_v43 = vadd.f32 %v1660_v55, %v1659_v53 }
 0x101   : > { %v2268_v56 = vpop.f32.mrf.mxu1  ;;  %v2270_v57 = vpop.f32.mrf.mxu0 }
 0x102   : > { %v998_v20 = vadd.f32 %v1661_v43, %v2305_v10  ;;  %v1707_v53 = vadd.f32 %v2268_v56, %v2266_v54 }
 0x103   : > { %v2272_v58 = vpop.f32.mrf.mxu1  ;;  %v2274_v59 = vpop.f32.mrf.mxu0 }
 0x104   : > { %v1664_v55 = vadd.f32 %v2274_v59, %v2270_v57 }
 0x105   : > { %v2276_v60 = vpop.f32.mrf.mxu1  ;;  %v2278_v61 = vpop.f32.mrf.mxu0 }
 0x106   : > { %v1001_v56 = vadd.f32 %v1664_v55, %v2305_v10  ;;  %v1710_v34 = vadd.f32 %v2276_v60, %v2272_v58 }
 0x107   : > { %v2280_v62 = vpop.f32.mrf.mxu1  ;;  %v2282_v63 = vpop.f32.mrf.mxu0 }
 0x108   : > { %v1667_v57 = vadd.f32 %v2282_v63, %v2278_v61 }
 0x109   : > { %v2284_v0 = vpop.f32.mrf.mxu1  ;;  %v2286_v1 = vpop.f32.mrf.mxu0 }
 0x10a   : > { %v1713_v61 = vadd.f32 %v2284_v0, %v2280_v62 }
 0x10b   : > { %v2288_v2 = vpop.f32.mrf.mxu1  ;;  %v2290_v3 = vpop.f32.mrf.mxu0 }
 0x10c   : > { %v1670_v63 = vadd.f32 %v2290_v3, %v2286_v1 }
 0x10d   : > { %v2292_v4 = vpop.f32.mrf.mxu1  ;;  %v2294_v5 = vpop.f32.mrf.mxu0 }
 0x10f   : > { %v2296_v6 = vpop.f32.mrf.mxu1  ;;  %v2298_v7 = vpop.f32.mrf.mxu0 }
 0x110   : > { %v1673_v62 = vadd.f32 %v2298_v7, %v2294_v5 }
 0x111   : > { %v2300_v9 = vpop.f32.mrf.mxu1  ;;  %v2307_v11 = vpop.f32.mrf.mxu0 }
 0x112   : > { %v1719_v5 = vadd.f32 %v2300_v9, %v2296_v6 }
 0x113   : > { %v2309_v12 = vpop.f32.mrf.mxu1  ;;  %v2311_v14 = vpop.f32.mrf.mxu0 }
 0x114   : > { %v1676_v7 = vadd.f32 %v2311_v14, %v2307_v11 }
 0x115   : > { %v2314_v17 = vpop.f32.mrf.mxu1  ;;  %v1739_v18 = vpop.f32.mrf.mxu0 }
 0x116   : > { %v1722_v14 = vadd.f32 %v2314_v17, %v2309_v12 }
 0x117   : > { %v1200_v19 = vpop.f32.mrf.mxu1  ;;  %v1740_v21 = vpop.f32.mrf.mxu0 }
 0x118   : > { %v1741_v24 = vadd.f32 %v1740_v21, %v1739_v18 }
 0x119   : > { %v1794_v25 = vpop.f32.mrf.mxu1  ;;  %v1742_v27 = vpop.f32.mrf.mxu0 }
 0x11a   : > { %v1128_v28 = vadd.f32 %v1741_v24, %v1055_v22  ;;  %v1272_v25 = vpop.permute.xlu1 %1271 }
 0x11b   : > { %v1203_v29 = vpop.f32.mrf.mxu1  ;;  %v1743_v32 = vpop.f32.mrf.mxu0 }
 0x11c   : > { %v1744_v36 = vadd.f32 %v1743_v32, %v1742_v27  ;;  %v1201_v39 = vadd.f32 %v1200_v19, %v1128_v28  ;;  %v1066_v19 = vadd.f32 %v1704_v13, %v993_v44  ;;  %v1009_v13 = vadd.f32 %v1670_v63, %v2305_v10 }
 0x11d   : > { %v1795_v38 = vpop.f32.mrf.mxu1  ;;  %v1745_v40 = vpop.f32.mrf.mxu0 }
 0x11e   : > { %v1131_v41 = vadd.f32 %v1744_v36, %v1058_v30  ;;  %v1239_v48 = vmax.f32 %v1201_v39, 0.0 }
 0x11f   : > { %v1208_v42 = vpop.f32.mrf.mxu1  ;;  %v1746_v45 = vpop.f32.mrf.mxu0 }
 0x120   : > { %v1747_v8 = vadd.f32 %v1746_v45, %v1745_v40  ;;  %v1204_v37 = vadd.f32 %v1203_v29, %v1131_v41  ;;  %v1309_v22 = vmul.f32 %v1262_v33, %v1239_v48  ;;  %v1071_v29 = vadd.f32 %v1707_v53, %v998_v20  ;;  %v1282_v20 = vpop.permute.xlu0 %1281 }
 0x121   : > { %v1798_v50 = vpop.f32.mrf.mxu1  ;;  %v1748_v15 = vpop.f32.mrf.mxu0  ;;  %v1074_v40 = vadd.f32 %v1710_v34, %v1001_v56  ;;  %v1006_v41 = vadd.f32 %v1667_v57, %v2305_v10  ;;  %v1017_v56 = vadd.f32 %v1676_v7, %v2305_v10 }
 0x122   : > { %v1136_v49 = vadd.f32 %v1747_v8, %v1063_v46  ;;  %v1240_v18 = vmax.f32 %v1204_v37, 0.0 }
 0x123   : > { %v1211_v16 = vpop.f32.mrf.mxu1  ;;  %v1749_v21 = vpop.f32.mrf.mxu0 }
 0x124   : > { %v1310_v23 = vmul.f32 %v1267_v47, %v1240_v18  ;;  %v1750_v24 = vadd.f32 %v1749_v21, %v1748_v15  ;;  %v1209_v51 = vadd.f32 %v1208_v42, %v1136_v49  ;;  %v1277_v42 = vpop.permute.xlu1 %1276  ;;  %v1079_v15 = vadd.f32 %v1713_v61, %v1006_v41 }
 0x125   : > { %v1799_v52 = vpop.f32.mrf.mxu1  ;;  %v1751_v26 = vpop.f32.mrf.mxu0 }
 0x126   : > { %v1605_v27 = vpack.c.bf16 %v1310_v23, %v1309_v22  ;;  %v1139_v28 = vadd.f32 %v1750_v24, %v1066_v19  ;;  %v1241_v30 = vmax.f32 %v1209_v51, 0.0  ;;  %v1014_v22 = vadd.f32 %v1673_v62, %v2305_v10 }
 0x127   : > { %v1216_v54 = vpop.f32.mrf.mxu1  ;;  %v1752_v59 = vpop.f32.mrf.mxu0 }
 0x128   : > { %1606 = vst [vmem:[%s2329_s30] sm:$0xff] %v1605_v27   ;;  %v1753_v31 = vadd.f32 %v1752_v59, %v1751_v26  ;;  %v1212_v32 = vadd.f32 %v1211_v16, %v1139_v28  ;;  %v1311_v43 = vmul.f32 %v1272_v25, %v1241_v30  ;;  %v1716_v16 = vadd.f32 %v2292_v4, %v2288_v2  ;;  %v1287_v23 = vpop.permute.xlu1 %1286 }
 0x129   : > { %v1802_v33 = vpop.f32.mrf.mxu1  ;;  %v1754_v35 = vpop.f32.mrf.mxu0  ;;  %v1087_v59 = vadd.f32 %v1719_v5, %v1014_v22 }
 0x12a   : > { %v1144_v36 = vadd.f32 %v1753_v31, %v1071_v29  ;;  %v1242_v38 = vmax.f32 %v1212_v32, 0.0  ;;  %v1082_v21 = vadd.f32 %v1716_v16, %v1009_v13  ;;  %v1292_v31 = vpop.permute.xlu0 %1291 }
 0x12b   : > { %v1219_v39 = vpop.f32.mrf.mxu1  ;;  %v1755_v44 = vpop.f32.mrf.mxu0 }
 0x12c   : > { %v1312_v45 = vmul.f32 %v1277_v42, %v1242_v38  ;;  %v1756_v46 = vadd.f32 %v1755_v44, %v1754_v35  ;;  %v1217_v58 = vadd.f32 %v1216_v54, %v1144_v36  ;;  %v1090_v35 = vadd.f32 %v1722_v14, %v1017_v56  ;;  %v1297_v36 = vpop.permute.xlu1 %1296 }
 0x12d   : > { %v1803_v60 = vpop.f32.mrf.mxu1  ;;  %v1757_v48 = vpop.f32.mrf.mxu0 }
 0x12e   : > { %v1610_v8 = vpack.c.bf16 %v1312_v45, %v1311_v43  ;;  %v1147_v50 = vadd.f32 %v1756_v46, %v1074_v40  ;;  %v1243_v3 = vmax.f32 %v1217_v58, 0.0  ;;  %v1302_v45 = vpop.permute.xlu0 %1301 }
 0x12f   : > { %v1224_v37 = vpop.f32.mrf.mxu1  ;;  %v1758_v0 = vpop.f32.mrf.mxu0 }
 0x130   : > { %1627 = vst [vmem:[%s2329_s30 + $0x8] sm:$0xff] %v1610_v8   ;;  %v1220_v1 = vadd.f32 %v1219_v39, %v1147_v50  ;;  %v1759_v47 = vadd.f32 %v1758_v0, %v1757_v48  ;;  %v1313_v52 = vmul.f32 %v1282_v20, %v1243_v3  ;;  %v1307_v43 = vpop.permute.xlu1 %1306 }
 0x131   : > { %v1806_v49 = vpop.f32.mrf.mxu1  ;;  %v1760_v18 = vpop.f32.mrf.mxu0 }
 0x132   : > { %v1244_v19 = vmax.f32 %v1220_v1, 0.0  ;;  %v1152_v53 = vadd.f32 %v1759_v47, %v1079_v15 }
 0x133   : > { %v1227_v55 = vpop.f32.mrf.mxu1  ;;  %v1761_v24 = vpop.f32.mrf.mxu0 }
 0x134   : > { %v1314_v51 = vmul.f32 %v1287_v23, %v1244_v19  ;;  %v1225_v2 = vadd.f32 %v1224_v37, %v1152_v53  ;;  %v1762_v4 = vadd.f32 %v1761_v24, %v1760_v18 }
 0x135   : > { %v1807_v25 = vpop.f32.mrf.mxu1  ;;  %v1763_v26 = vpop.f32.mrf.mxu0 }
 0x136   : > { %v1615_v27 = vpack.c.bf16 %v1314_v51, %v1313_v52  ;;  %v1155_v28 = vadd.f32 %v1762_v4, %v1082_v21  ;;  %v1245_v6 = vmax.f32 %v1225_v2, 0.0 }
 0x137   : > { %v1232_v54 = vpop.f32.mrf.mxu1  ;;  %v1764_v57 = vpop.f32.mrf.mxu0 }
 0x138   : > { %1628 = vst [vmem:[%s2329_s30 + $0x10] sm:$0xff] %v1615_v27   ;;  %v1228_v9 = vadd.f32 %v1227_v55, %v1155_v28  ;;  %v1765_v29 = vadd.f32 %v1764_v57, %v1763_v26  ;;  %v1315_v10 = vmul.f32 %v1292_v31, %v1245_v6 }
 0x139   : > { %v1810_v11 = vpop.f32.mrf.mxu1  ;;  %v1766_v30 = vpop.f32.mrf.mxu0 }
 0x13a   : > { %v1246_v32 = vmax.f32 %v1228_v9, 0.0  ;;  %v1160_v33 = vadd.f32 %v1765_v29, %v1087_v59 }
 0x13b   : > { %v1235_v34 = vpop.f32.mrf.mxu1  ;;  %v1767_v38 = vpop.f32.mrf.mxu0 }
 0x13c   : > { %v1316_v39 = vmul.f32 %v1297_v36, %v1246_v32  ;;  %v1233_v40 = vadd.f32 %v1232_v54, %v1160_v33  ;;  %v1768_v41 = vadd.f32 %v1767_v38, %v1766_v30 }
 0x13d   : > { %v1811_v61 = vpop.f32.mrf.mxu1 }
 0x13e   : > { %v1620_v63 = vpack.c.bf16 %v1316_v39, %v1315_v10  ;;  %v1163_v42 = vadd.f32 %v1768_v41, %v1090_v35  ;;  %v1247_v44 = vmax.f32 %v1233_v40, 0.0 }
 0x140   : > { %1629 = vst [vmem:[%s2329_s30 + $0x18] sm:$0xff] %v1620_v63   ;;  %v1236_v12 = vadd.f32 %v1235_v34, %v1163_v42  ;;  %v1317_v46 = vmul.f32 %v1302_v45, %v1247_v44 }
 0x142   : > { %v1248_v17 = vmax.f32 %v1236_v12, 0.0 }
 0x144   : > { %v1318_v58 = vmul.f32 %v1307_v43, %v1248_v17 }
 0x146   : > { %v1625_v60 = vpack.c.bf16 %v1318_v58, %v1317_v46 }
 0x148   : > { %1630 = vst [vmem:[%s2329_s30 + $0x20] sm:$0xff] %v1625_v60  }
 0x149 PF: > { %s14_s17 = sadd.s32 1, %s1970_s17   ;;  %s2373_s15 = smov %s1966_s16 }
 0x14a   : > { %p11_p5 = scmp.ge.s32.totalorder %s14_s17, 4   ;;  %s2374_s16 = smov %s2376_s18 }
 0x14c   :  { %13 = sbr.rel (!%p11_p5) target bundleno = 2 (0x2), region = 69 }

// kernel: voxelnet_encoder_forward.18
= control target key start
LH: loop header
LB: loop body
LE: loop exit
PB: predicated region body
PF: predicated region fallthrough
CT: control target
= control target key end

     0   :  { %s3164_s15 = smov 0   ;;  %s3166_s16 = smov 0   ;;  %s3787_s0 = inlined_call_operand.vmem [shape: bf16[2,80,1728], index: 0, kind: input, shape index: {}]   ;;  %s3788_s1 = inlined_call_operand.vmem [shape: bf16[1728,128], index: 1, kind: input, shape index: {}]   ;;  %s3789_s2 = inlined_call_operand.vmem [shape: f32[1,128], index: 2, kind: input, shape index: {}]   ;;  %s3790_s3 = inlined_call_operand.vmem [shape: f32[2,80,1], index: 3, kind: input, shape index: {}]   ;;  %s3791_s4 = inlined_call_operand.vmem [shape: bf16[2,80,128], index: 4, kind: output, shape index: {}]  }
   0x1   :  { %s3168_s17 = smov 0  }
   0x2 LB: > { %s26_s18 = sadd.s32 1, %s3132_s16  ;;  %p2332_p0 = scmp.ge.s32.totalorder %s3136_s17, 1  ;;  %s3136_s17 = sphi %s3168_s17, %s14_s17   ;;  %s3132_s16 = sphi %s3166_s16, %s3819_s16   ;;  %s3128_s15 = sphi %s3164_s15, %s3818_s15  }
   0x3   : > { %p28_p1 = scmp.ge.s32.totalorder %s26_s18, 2  ;;  %p201_p2 = scmp.lt.s32.totalorder %s3136_s17, 3 }
   0x5   : > { %s3821_s18 = smov (%p28_p1, %s26_s18), 0  ;;  %p202_p3 = pnand %p2332_p0, %p201_p2 }
   0x7   : > { %205 = sbr.rel (%p202_p3) target bundleno = 396 (0x18c), region = 36 }
   0xc   : > { %v2901_v0 = vld [vmem:[%s3788_s1 + $0x78] sm:$0xff]   ;;  %v3138_v3 = vmov 0   ;;  %v2905_v5 = vld [vmem:[%s3788_s1 + $0x70] sm:$0xff]   ;;  %v2909_v9 = vld [vmem:[%s3788_s1 + $0x68] sm:$0xff]   ;;  %p246_p4 = scmp.lt.s32.totalorder %s3128_s15, 1  ;;  %vm1563_vm0 = vcmask 523264  }
   0xd   : > { %v2902_v1 = vld [vmem:[%s3788_s1 + $0xf8] sm:$0xff]   ;;  %2571 = vmatprep.subr.bf16.mxu0 %v2901_v0  ;;  %2899 = vset.pattern.permute.xlu0 %v3138_v3  ;;  %v2906_v6 = vld [vmem:[%s3788_s1 + $0xf0] sm:$0xff]   ;;  %v2910_v10 = vld [vmem:[%s3788_s1 + $0xe8] sm:$0xff]  }
   0xe   : > { %v2903_v2 = vld [vmem:[%s3788_s1 + $0x38] sm:$0xff]   ;;  %2617 = vmatprep.subr.bf16.mxu1 %v2902_v1  ;;  %2900 = vset.pattern.permute.xlu1 %v3138_v3  ;;  %v2907_v7 = vld [vmem:[%s3788_s1 + $0x30] sm:$0xff]   ;;  %v2911_v11 = vld [vmem:[%s3788_s1 + $0x28] sm:$0xff]   ;;  %s3823_s15 = smov (!%p246_p4, %s3128_s15), 1 }
   0xf   : > { %v2904_v4 = vld [vmem:[%s3788_s1 + $0xb8] sm:$0xff]   ;;  %2572 = vmatpush3.bf16.msra.mxu0 %v2903_v2  ;;  %v2908_v8 = vld [vmem:[%s3788_s1 + $0xb0] sm:$0xff]   ;;  %v2912_v12 = vld [vmem:[%s3788_s1 + $0xa8] sm:$0xff]   ;;  %s2871_s27 = smul.u32 560, %s3823_s15 }
  0x10   : > { %2618 = vmatpush3.bf16.msra.mxu1 %v2904_v4  ;;  %2573 = vmatprep.subr.bf16.mxu0 %v2905_v5  ;;  %v2913_v13 = vld [vmem:[%s3788_s1 + $0x60] sm:$0xff]   ;;  %v2917_v17 = vld [vmem:[%s3788_s1 + $0x58] sm:$0xff]   ;;  %v2921_v21 = vld [vmem:[%s3788_s1 + $0x50] sm:$0xff]   ;;  %s2872_s11 = smul.u32 80, %s3823_s15 }
  0x11   : > { %2619 = vmatprep.subr.bf16.mxu1 %v2906_v6  ;;  %v2914_v14 = vld [vmem:[%s3788_s1 + $0xe0] sm:$0xff]   ;;  %v2918_v18 = vld [vmem:[%s3788_s1 + $0xd8] sm:$0xff]   ;;  %v2922_v22 = vld [vmem:[%s3788_s1 + $0xd0] sm:$0xff]   ;;  %s3284_s12 = scalar_lea.vmem %s3787_s0, %s2871_s27 }
  0x12   : > { %v2915_v15 = vld [vmem:[%s3788_s1 + $0x20] sm:$0xff]   ;;  %v2919_v19 = vld [vmem:[%s3788_s1 + $0x18] sm:$0xff]   ;;  %v2923_v23 = vld [vmem:[%s3788_s1 + $0x10] sm:$0xff]   ;;  %s3581_s19 = scalar_lea.vmem %s3790_s3, %s2872_s11 }
  0x13   : > { %2574 = vmatpush3.bf16.msra.mxu0 %v2907_v7  ;;  %v2916_v16 = vld [vmem:[%s3788_s1 + $0xa0] sm:$0xff]   ;;  %v2920_v20 = vld [vmem:[%s3788_s1 + $0x98] sm:$0xff]   ;;  %v2924_v24 = vld [vmem:[%s3788_s1 + $0x90] sm:$0xff]  }
  0x14   : > { %2620 = vmatpush3.bf16.msra.mxu1 %v2908_v8  ;;  %2575 = vmatprep.subr.bf16.mxu0 %v2909_v9  ;;  %v2925_v25 = vld [vmem:[%s3788_s1 + $0x48] sm:$0xff]   ;;  %v2929_v29 = vld [vmem:[%s3788_s1 + $0x40] sm:$0xff]   ;;  %v2939_v37 = vld [vmem:[%s3788_s1 + $0x178] sm:$0xff]  }
  0x15   : > { %2621 = vmatprep.subr.bf16.mxu1 %v2910_v10  ;;  %v2926_v26 = vld [vmem:[%s3788_s1 + $0xc8] sm:$0xff]   ;;  %v2930_v30 = vld [vmem:[%s3788_s1 + $0xc0] sm:$0xff]   ;;  %v2940_v38 = vld [vmem:[%s3788_s1 + $0x138] sm:$0xff]  }
  0x16   : > { %v2927_v27 = vld [vmem:[%s3788_s1 + $0x8] sm:$0xff]   ;;  %v2931_v31 = vld [vmem:[%s3788_s1] sm:$0xff]   ;;  %v2941_v39 = vld [vmem:[%s3788_s1 + $0x170] sm:$0xff]  }
  0x17   : > { %2576 = vmatpush3.bf16.msra.mxu0 %v2911_v11  ;;  %v2928_v28 = vld [vmem:[%s3788_s1 + $0x88] sm:$0xff]   ;;  %v2932_v32 = vld [vmem:[%s3788_s1 + $0x80] sm:$0xff]   ;;  %v2942_v40 = vld [vmem:[%s3788_s1 + $0x130] sm:$0xff]  }
  0x18   : > { %2622 = vmatpush3.bf16.msra.mxu1 %v2912_v12  ;;  %2577 = vmatprep.subr.bf16.mxu0 %v2913_v13  ;;  %v2933_v33 = vld [vmem:[%s3284_s12] ss:$56 sps:$4 sm:$0xff]   ;;  %v2935_v34 = vld [vmem:[%s3284_s12 + $0x4] ss:$56 sps:$4 sm:$0xff]   ;;  %v2943_v41 = vld [vmem:[%s3284_s12 + $0x74] ss:$56 sps:$4 sm:$0xff]  }
  0x19   : > { %2623 = vmatprep.subr.bf16.mxu1 %v2914_v14  ;;  %v2936_v35 = vld [vmem:[%s3284_s12 + $0x8] ss:$56 sps:$4 sm:$0xff]   ;;  %v2938_v36 = vld [vmem:[%s3284_s12 + $0xc] ss:$56 sps:$4 sm:$0xff]   ;;  %1611 = vmatprep.mubr.bf16.mxu0 %v2935_v34  ;;  %v2945_v42 = vld [vmem:[%s3284_s12 + $0x7c] ss:$56 sps:$4 sm:$0xff]  }
  0x1a   : > { %1684 = vmatprep.mubr.bf16.mxu1 %v2938_v36  ;;  %v2947_v43 = vld [vmem:[%s3284_s12 + $0x70] ss:$56 sps:$4 sm:$0xff]   ;;  %v2949_v45 = vld [vmem:[%s3788_s1 + $0x1f8] sm:$0xff]   ;;  %v2957_v52 = vld [vmem:[%s3284_s12 + $0xec] ss:$56 sps:$4 sm:$0xff]  }
  0x1b   : > { %2578 = vmatpush3.bf16.msra.mxu0 %v2915_v15  ;;  %v2948_v44 = vld [vmem:[%s3284_s12 + $0x78] ss:$56 sps:$4 sm:$0xff]   ;;  %v2951_v47 = vld [vmem:[%s3788_s1 + $0x168] sm:$0xff]   ;;  %v2955_v51 = vld [vmem:[%s3284_s12 + $0xe4] ss:$56 sps:$4 sm:$0xff]  }
  0x1c   : > { %2624 = vmatpush3.bf16.msra.mxu1 %v2916_v16  ;;  %2579 = vmatprep.subr.bf16.mxu0 %v2917_v17  ;;  %v2950_v46 = vld [vmem:[%s3788_s1 + $0x1b8] sm:$0xff]   ;;  %v2952_v48 = vld [vmem:[%s3788_s1 + $0x128] sm:$0xff]   ;;  %v2953_v49 = vld [vmem:[%s3788_s1 + $0x1f0] sm:$0xff]  }
  0x1d   : > { %2625 = vmatprep.subr.bf16.mxu1 %v2918_v18  ;;  %v2954_v50 = vld [vmem:[%s3788_s1 + $0x1b0] sm:$0xff]   ;;  %v2959_v53 = vld [vmem:[%s3788_s1 + $0x160] sm:$0xff]   ;;  %v2963_v57 = vld [vmem:[%s3788_s1 + $0x1e8] sm:$0xff]  }
  0x1e   : > { %v2960_v54 = vld [vmem:[%s3284_s12 + $0xe0] ss:$56 sps:$4 sm:$0xff]   ;;  %v2964_v58 = vld [vmem:[%s3788_s1 + $0x1a8] sm:$0xff]   ;;  %v2971_v0 = vld [vmem:[%s3284_s12 + $0x15c] ss:$56 sps:$4 sm:$0xff]  }
  0x1f   : > { %2580 = vmatpush3.bf16.msra.mxu0 %v2919_v19  ;;  %v2961_v55 = vld [vmem:[%s3284_s12 + $0xe8] ss:$56 sps:$4 sm:$0xff]   ;;  %v2965_v59 = vld [vmem:[%s3788_s1 + $0x158] sm:$0xff]   ;;  %v2969_v63 = vld [vmem:[%s3284_s12 + $0x154] ss:$56 sps:$4 sm:$0xff]  }
  0x20   : > { %2626 = vmatpush3.bf16.msra.mxu1 %v2920_v20  ;;  %2581 = vmatprep.subr.bf16.mxu0 %v2921_v21  ;;  %v2962_v56 = vld [vmem:[%s3788_s1 + $0x120] sm:$0xff]   ;;  %v2967_v61 = vld [vmem:[%s3788_s1 + $0x118] sm:$0xff]   ;;  %v2973_v1 = vld [vmem:[%s3284_s12 + $0x150] ss:$56 sps:$4 sm:$0xff]  }
  0x21   : > { %2627 = vmatprep.subr.bf16.mxu1 %v2922_v22  ;;  %v2966_v60 = vld [vmem:[%s3788_s1 + $0x1e0] sm:$0xff]   ;;  %v2974_v2 = vld [vmem:[%s3284_s12 + $0x158] ss:$56 sps:$4 sm:$0xff]   ;;  %v2981_v10 = vld [vmem:[%s3788_s1 + $0x148] sm:$0xff]  }
  0x22   : > { %v2968_v62 = vld [vmem:[%s3788_s1 + $0x1a0] sm:$0xff]   ;;  %v2975_v4 = vld [vmem:[%s3788_s1 + $0x1d8] sm:$0xff]   ;;  %v2976_v5 = vld [vmem:[%s3788_s1 + $0x150] sm:$0xff]  }
  0x23   : > { %2582 = vmatpush3.bf16.msra.mxu0 %v2923_v23  ;;  %v2977_v6 = vld [vmem:[%s3788_s1 + $0x198] sm:$0xff]   ;;  %v2978_v7 = vld [vmem:[%s3788_s1 + $0x110] sm:$0xff]   ;;  %v2984_v12 = vld [vmem:[%s3284_s12 + $0x1cc] ss:$56 sps:$4 sm:$0xff]  }
  0x24   : > { %2628 = vmatpush3.bf16.msra.mxu1 %v2924_v24  ;;  %2583 = vmatprep.subr.bf16.mxu0 %v2925_v25  ;;  %v2979_v8 = vld [vmem:[%s3788_s1 + $0x1d0] sm:$0xff]   ;;  %v2982_v11 = vld [vmem:[%s3284_s12 + $0x1c4] ss:$56 sps:$4 sm:$0xff]   ;;  %v2986_v13 = vld [vmem:[%s3788_s1 + $0x108] sm:$0xff]  }
  0x25   : > { %2629 = vmatprep.subr.bf16.mxu1 %v2926_v26  ;;  %v2980_v9 = vld [vmem:[%s3788_s1 + $0x190] sm:$0xff]   ;;  %v2987_v14 = vld [vmem:[%s3284_s12 + $0x1c0] ss:$56 sps:$4 sm:$0xff]   ;;  %v2989_v16 = vld [vmem:[%s3788_s1 + $0x1c8] sm:$0xff]  }
  0x26   : > { %v2988_v15 = vld [vmem:[%s3284_s12 + $0x1c8] ss:$56 sps:$4 sm:$0xff]   ;;  %v2997_v23 = vld [vmem:[%s3284_s12 + $0x14] ss:$56 sps:$4 sm:$0xff]   ;;  %v2998_v24 = vld [vmem:[%s3284_s12 + $0x18] ss:$56 sps:$4 sm:$0xff]  }
  0x27   : > { %2584 = vmatpush3.bf16.msra.mxu0 %v2927_v27  ;;  %v2990_v17 = vld [vmem:[%s3788_s1 + $0x188] sm:$0xff]   ;;  %v2991_v18 = vld [vmem:[%s3788_s1 + $0x140] sm:$0xff]   ;;  %v3000_v25 = vld [vmem:[%s3284_s12 + $0x1c] ss:$56 sps:$4 sm:$0xff]  }
  0x28   : > { %2630 = vmatpush3.bf16.msra.mxu1 %v2928_v28  ;;  %2585 = vmatprep.subr.bf16.mxu0 %v2929_v29  ;;  %v2992_v19 = vld [vmem:[%s3788_s1 + $0x100] sm:$0xff]   ;;  %v2995_v22 = vld [vmem:[%s3284_s12 + $0x10] ss:$56 sps:$4 sm:$0xff]   ;;  %v3001_v26 = vld [vmem:[%s3788_s1 + $0x278] sm:$0xff]  }
  0x29   : > { %2631 = vmatprep.subr.bf16.mxu1 %v2930_v30  ;;  %v2993_v20 = vld [vmem:[%s3788_s1 + $0x1c0] sm:$0xff]   ;;  %v3002_v27 = vld [vmem:[%s3788_s1 + $0x238] sm:$0xff]   ;;  %v3003_v28 = vld [vmem:[%s3788_s1 + $0x270] sm:$0xff]  }
  0x2a   : > { %v2994_v21 = vld [vmem:[%s3788_s1 + $0x180] sm:$0xff]   ;;  %v3004_v29 = vld [vmem:[%s3788_s1 + $0x230] sm:$0xff]   ;;  %v3013_v36 = vld [vmem:[%s3788_s1 + $0x268] sm:$0xff]  }
  0x2b   : > { %2586 = vmatpush3.bf16.msra.mxu0 %v2931_v31  ;;  %v3005_v30 = vld [vmem:[%s3284_s12 + $0x84] ss:$56 sps:$4 sm:$0xff]   ;;  %v3011_v34 = vld [vmem:[%s3284_s12 + $0x88] ss:$56 sps:$4 sm:$0xff]  }
  0x2c   : > { %2632 = vmatpush3.bf16.msra.mxu1 %v2932_v32  ;;  %2663 = vmatprep.subr.bf16.mxu0 %v2939_v37  ;;  %v3007_v31 = vld [vmem:[%s3284_s12 + $0x8c] ss:$56 sps:$4 sm:$0xff]   ;;  %v3009_v32 = vld [vmem:[%s3788_s1 + $0x2f8] sm:$0xff]  }
  0x2d   : > { %2709 = vmatprep.subr.bf16.mxu1 %v2949_v45  ;;  %v3014_v37 = vld [vmem:[%s3788_s1 + $0x228] sm:$0xff]   ;;  %v3024_v45 = vld [vmem:[%s3284_s12 + $0xf8] ss:$56 sps:$4 sm:$0xff]  }
  0x2e   : > { %1612 = vmatmul.mubr.bf16.vlgmr.msra.gmra.mxu0 %v2933_v33  ;;  %v3010_v33 = vld [vmem:[%s3284_s12 + $0x80] ss:$56 sps:$4 sm:$0xff]  }
  0x2f   : > { %1685 = vmatmul.mubr.bf16.vlgmr.msra.gmra.mxu1 %v2936_v35  ;;  %2664 = vmatpush3.bf16.msra.mxu0 %v2940_v38  ;;  %v3012_v35 = vld [vmem:[%s3788_s1 + $0x2b8] sm:$0xff]   ;;  %v3015_v38 = vld [vmem:[%s3788_s1 + $0x2f0] sm:$0xff]  }
  0x30   : > { %2665 = vmatprep.subr.bf16.mxu0 %v2941_v39  ;;  %1619 = vmatprep.mubr.bf16.mxu0 %v2943_v41  ;;  %v3016_v39 = vld [vmem:[%s3788_s1 + $0x2b0] sm:$0xff]  }
  0x31   : > { %1692 = vmatprep.mubr.bf16.mxu1 %v2945_v42  ;;  %2710 = vmatpush3.bf16.msra.mxu1 %v2950_v46  ;;  %v3019_v41 = vld [vmem:[%s3284_s12 + $0xfc] ss:$56 sps:$4 sm:$0xff]   ;;  %v3021_v42 = vld [vmem:[%s3788_s1 + $0x260] sm:$0xff]  }
  0x32   : > { %2711 = vmatprep.subr.bf16.mxu1 %v2953_v49  ;;  %v3025_v46 = vld [vmem:[%s3788_s1 + $0x220] sm:$0xff]   ;;  %v3028_v49 = vld [vmem:[%s3788_s1 + $0x258] sm:$0xff]  }
  0x33   : > { %2666 = vmatpush3.bf16.msra.mxu0 %v2942_v40  ;;  %v3017_v40 = vld [vmem:[%s3284_s12 + $0xf4] ss:$56 sps:$4 sm:$0xff]  }
  0x34   : > { %2667 = vmatprep.subr.bf16.mxu0 %v2951_v47  ;;  %v3026_v47 = vld [vmem:[%s3788_s1 + $0x2a8] sm:$0xff]  }
  0x35   : > { %2712 = vmatpush3.bf16.msra.mxu1 %v2954_v50  ;;  %v3029_v50 = vld [vmem:[%s3788_s1 + $0x2a0] sm:$0xff]  }
  0x36   : > { %1620 = vmatmul.mubr.bf16.gmra.mxu0 %v2947_v43  ;;  %2713 = vmatprep.subr.bf16.mxu1 %v2963_v57  ;;  %v3022_v43 = vld [vmem:[%s3788_s1 + $0x2e8] sm:$0xff]   ;;  %v3038_v57 = vld [vmem:[%s3788_s1 + $0x298] sm:$0xff]  }
  0x37   : > { %1693 = vmatmul.mubr.bf16.gmra.mxu1 %v2948_v44  ;;  %2668 = vmatpush3.bf16.msra.mxu0 %v2952_v48  ;;  %v3023_v44 = vld [vmem:[%s3284_s12 + $0xf0] ss:$56 sps:$4 sm:$0xff]   ;;  %v3027_v48 = vld [vmem:[%s3788_s1 + $0x2e0] sm:$0xff]  }
  0x38   : > { %1627 = vmatprep.mubr.bf16.mxu0 %v2955_v51  ;;  %1700 = vmatprep.mubr.bf16.mxu1 %v2957_v52  ;;  %v3030_v51 = vld [vmem:[%s3788_s1 + $0x218] sm:$0xff]  }
  0x39   : > { %2669 = vmatprep.subr.bf16.mxu0 %v2959_v53  ;;  %2714 = vmatpush3.bf16.msra.mxu1 %v2964_v58  ;;  %v3031_v52 = vld [vmem:[%s3284_s12 + $0x164] ss:$56 sps:$4 sm:$0xff]   ;;  %v3039_v58 = vld [vmem:[%s3788_s1 + $0x250] sm:$0xff]  }
  0x3a   : > { %2715 = vmatprep.subr.bf16.mxu1 %v2966_v60  ;;  %v3033_v53 = vld [vmem:[%s3284_s12 + $0x16c] ss:$56 sps:$4 sm:$0xff]   ;;  %v3041_v60 = vld [vmem:[%s3788_s1 + $0x2d0] sm:$0xff]  }
  0x3b   : > { %2670 = vmatpush3.bf16.msra.mxu0 %v2962_v56  ;;  %v3037_v56 = vld [vmem:[%s3284_s12 + $0x168] ss:$56 sps:$4 sm:$0xff]  }
  0x3c   : > { %2671 = vmatprep.subr.bf16.mxu0 %v2965_v59  ;;  %v3040_v59 = vld [vmem:[%s3788_s1 + $0x210] sm:$0xff]  }
  0x3d   : > { %2716 = vmatpush3.bf16.msra.mxu1 %v2968_v62  ;;  %v3043_v62 = vld [vmem:[%s3788_s1 + $0x248] sm:$0xff]  }
  0x3e   : > { %1628 = vmatmul.mubr.bf16.gmra.mxu0 %v2960_v54  ;;  %2717 = vmatprep.subr.bf16.mxu1 %v2975_v4  ;;  %v3035_v54 = vld [vmem:[%s3788_s1 + $0x2d8] sm:$0xff]   ;;  %v3050_v4 = vld [vmem:[%s3284_s12 + $0x1d0] ss:$56 sps:$4 sm:$0xff]  }
  0x3f   : > { %1701 = vmatmul.mubr.bf16.gmra.mxu1 %v2961_v55  ;;  %2672 = vmatpush3.bf16.msra.mxu0 %v2967_v61  ;;  %v3036_v55 = vld [vmem:[%s3284_s12 + $0x160] ss:$56 sps:$4 sm:$0xff]   ;;  %v3042_v61 = vld [vmem:[%s3788_s1 + $0x290] sm:$0xff]  }
  0x40   : > { %1635 = vmatprep.mubr.bf16.mxu0 %v2969_v63  ;;  %1708 = vmatprep.mubr.bf16.mxu1 %v2971_v0  ;;  %v3044_v63 = vld [vmem:[%s3284_s12 + $0x1d4] ss:$56 sps:$4 sm:$0xff]  }
  0x41   : > { %2673 = vmatprep.subr.bf16.mxu0 %v2976_v5  ;;  %2718 = vmatpush3.bf16.msra.mxu1 %v2977_v6  ;;  %v3046_v0 = vld [vmem:[%s3284_s12 + $0x1dc] ss:$56 sps:$4 sm:$0xff]   ;;  %v3051_v5 = vld [vmem:[%s3284_s12 + $0x1d8] ss:$56 sps:$4 sm:$0xff]   ;;  %v3052_v6 = vld [vmem:[%s3788_s1 + $0x288] sm:$0xff]  }
  0x42   : > { %2719 = vmatprep.subr.bf16.mxu1 %v2979_v8  ;;  %v3054_v8 = vld [vmem:[%s3788_s1 + $0x2c0] sm:$0xff]  }
  0x43   : > { %2674 = vmatpush3.bf16.msra.mxu0 %v2978_v7  ;;  %v3053_v7 = vld [vmem:[%s3788_s1 + $0x240] sm:$0xff]  }
  0x44   : > { %2675 = vmatprep.subr.bf16.mxu0 %v2981_v10  ;;  %v3056_v10 = vld [vmem:[%s3788_s1 + $0x280] sm:$0xff]  }
  0x45   : > { %2720 = vmatpush3.bf16.msra.mxu1 %v2980_v9  ;;  %v3055_v9 = vld [vmem:[%s3788_s1 + $0x200] sm:$0xff]  }
  0x46   : > { %1636 = vmatmul.mubr.bf16.gmra.mxu0 %v2973_v1  ;;  %2721 = vmatprep.subr.bf16.mxu1 %v2989_v16  ;;  %v3048_v1 = vld [vmem:[%s3788_s1 + $0x208] sm:$0xff]   ;;  %v3064_v16 = vld [vmem:[%s3788_s1 + $0x330] sm:$0xff]  }
  0x47   : > { %1709 = vmatmul.mubr.bf16.gmra.mxu1 %v2974_v2  ;;  %1643 = vmatprep.mubr.bf16.mxu0 %v2982_v11  ;;  %v3049_v2 = vld [vmem:[%s3788_s1 + $0x2c8] sm:$0xff]   ;;  %v3057_v11 = vld [vmem:[%s3284_s12 + $0x20] ss:$56 sps:$4 sm:$0xff]  }
  0x48   : > { %1716 = vmatprep.mubr.bf16.mxu1 %v2984_v12  ;;  %2676 = vmatpush3.bf16.msra.mxu0 %v2986_v13  ;;  %v3059_v12 = vld [vmem:[%s3284_s12 + $0x24] ss:$56 sps:$4 sm:$0xff]   ;;  %v3060_v13 = vld [vmem:[%s3284_s12 + $0x28] ss:$56 sps:$4 sm:$0xff]  }
  0x49   : > { %2722 = vmatpush3.bf16.msra.mxu1 %v2990_v17  ;;  %2677 = vmatprep.subr.bf16.mxu0 %v2991_v18  ;;  %v3065_v17 = vld [vmem:[%s3284_s12 + $0x94] ss:$56 sps:$4 sm:$0xff]   ;;  %v3067_v18 = vld [vmem:[%s3284_s12 + $0x90] ss:$56 sps:$4 sm:$0xff]  }
  0x4a   : > { %2723 = vmatprep.subr.bf16.mxu1 %v2993_v20  ;;  %v3068_v20 = vld [vmem:[%s3788_s1 + $0x328] sm:$0xff]  }
  0x4c   : > { %2678 = vmatpush3.bf16.msra.mxu0 %v2992_v19  ;;  %v3069_v19 = vld [vmem:[%s3284_s12 + $0x9c] ss:$56 sps:$4 sm:$0xff]  }
  0x4d   : > { %2724 = vmatpush3.bf16.msra.mxu1 %v2994_v21  ;;  %2755 = vmatprep.subr.bf16.mxu0 %v3001_v26  ;;  %v3071_v21 = vld [vmem:[%s3284_s12 + $0x98] ss:$56 sps:$4 sm:$0xff]  }
  0x4e   : > { %1644 = vmatmul.mubr.bf16.gmra.mxu0 %v2987_v14  ;;  %2801 = vmatprep.subr.bf16.mxu1 %v3009_v32  ;;  %v3062_v14 = vld [vmem:[%s3284_s12 + $0x2c] ss:$56 sps:$4 sm:$0xff]   ;;  %v3076_v26 = vld [vmem:[%s3788_s1 + $0x318] sm:$0xff]  }
  0x4f   : > { %1717 = vmatmul.mubr.bf16.gmra.mxu1 %v2988_v15  ;;  %1757 = vmatprep.mubr.bf16.mxu0 %v2997_v23  ;;  %v3063_v15 = vld [vmem:[%s3788_s1 + $0x338] sm:$0xff]   ;;  %v3077_v23 = vld [vmem:[%s3284_s12 + $0x10c] ss:$56 sps:$4 sm:$0xff]  }
  0x50   : > { %1830 = vmatprep.mubr.bf16.mxu1 %v3000_v25  ;;  %v3075_v25 = vld [vmem:[%s3284_s12 + $0x100] ss:$56 sps:$4 sm:$0xff]   ;;  %v3084_v32 = vld [vmem:[%s3788_s1 + $0x308] sm:$0xff]  }
  0x56   : > { %1758 = vmatmul.mubr.bf16.vlgmr.msra.gmra.mxu0 %v2995_v22  ;;  %v3073_v22 = vld [vmem:[%s3284_s12 + $0x104] ss:$56 sps:$4 sm:$0xff]  }
  0x57   : > { %1831 = vmatmul.mubr.bf16.vlgmr.msra.gmra.mxu1 %v2998_v24  ;;  %2756 = vmatpush3.bf16.msra.mxu0 %v3002_v27  ;;  %v3072_v24 = vld [vmem:[%s3788_s1 + $0x320] sm:$0xff]  }
  0x58   : > { %2757 = vmatprep.subr.bf16.mxu0 %v3003_v28  ;;  %1765 = vmatprep.mubr.bf16.mxu0 %v3005_v30  ;;  %v3079_v27 = vld [vmem:[%s3284_s12 + $0x108] ss:$56 sps:$4 sm:$0xff]   ;;  %v3081_v28 = vld [vmem:[%s3284_s12 + $0x174] ss:$56 sps:$4 sm:$0xff]  }
  0x59   : > { %1838 = vmatprep.mubr.bf16.mxu1 %v3007_v31  ;;  %2802 = vmatpush3.bf16.msra.mxu1 %v3012_v35  ;;  %v3080_v30 = vld [vmem:[%s3788_s1 + $0x310] sm:$0xff]   ;;  %v3093_v35 = vld [vmem:[%s3284_s12 + $0x1ec] ss:$56 sps:$4 sm:$0xff]  }
  0x5a   : > { %2803 = vmatprep.subr.bf16.mxu1 %v3015_v38  ;;  %v3083_v31 = vld [vmem:[%s3284_s12 + $0x170] ss:$56 sps:$4 sm:$0xff]   ;;  %v3091_v38 = vld [vmem:[%s3284_s12 + $0x1e0] ss:$56 sps:$4 sm:$0xff]  }
  0x5b   : > { %2758 = vmatpush3.bf16.msra.mxu0 %v3004_v29  ;;  %v3085_v29 = vld [vmem:[%s3284_s12 + $0x17c] ss:$56 sps:$4 sm:$0xff]  }
  0x5c   : > { %2759 = vmatprep.subr.bf16.mxu0 %v3013_v36  ;;  %v3088_v36 = vld [vmem:[%s3788_s1 + $0x300] sm:$0xff]  }
  0x5d   : > { %2804 = vmatpush3.bf16.msra.mxu1 %v3016_v39  ;;  %v2102_v39 = vld [vmem:[%s3581_s19 + $0x10] sm:$0xff] }
  0x5e   : > { %1766 = vmatmul.mubr.bf16.gmra.mxu0 %v3010_v33  ;;  %2805 = vmatprep.subr.bf16.mxu1 %v3022_v43  ;;  %v3087_v33 = vld [vmem:[%s3284_s12 + $0x178] ss:$56 sps:$4 sm:$0xff]   ;;  %v3101_v43 = vld [vmem:[%s3284_s12 + $0x34] ss:$56 sps:$4 sm:$0xff]  }
  0x5f   : > { %1839 = vmatmul.mubr.bf16.gmra.mxu1 %v3011_v34  ;;  %2760 = vmatpush3.bf16.msra.mxu0 %v3014_v37  ;;  %v3089_v34 = vld [vmem:[%s3284_s12 + $0x1e4] ss:$56 sps:$4 sm:$0xff]  }
  0x60   : > { %1773 = vmatprep.mubr.bf16.mxu0 %v3017_v40  ;;  %1846 = vmatprep.mubr.bf16.mxu1 %v3019_v41  ;;  %v2100_v37 = vld [vmem:[%s3581_s19] sm:$0xff]  ;;  %v3092_v40 = vld [vmem:[%s3788_s1 + $0x358] sm:$0xff]  }
  0x61   : > { %2761 = vmatprep.subr.bf16.mxu0 %v3021_v42  ;;  %2806 = vmatpush3.bf16.msra.mxu1 %v3026_v47  ;;  %v3095_v41 = vld [vmem:[%s3284_s12 + $0x1e8] ss:$56 sps:$4 sm:$0xff]  }
  0x62   : > { %2807 = vmatprep.subr.bf16.mxu1 %v3027_v48  ;;  %2112 = vperm.xlu0 %2899, %v2100_v37   ;;  %v2101_v42 = vld [vmem:[%s3581_s19 + $0x8] sm:$0xff]  ;;  %v2104_v47 = vld [vmem:[%s3581_s19 + $0x20] sm:$0xff] }
  0x63   : > { %2762 = vmatpush3.bf16.msra.mxu0 %v3025_v46  ;;  %2122 = vperm.xlu1 %2900, %v2102_v39   ;;  %v2103_v46 = vld [vmem:[%s3581_s19 + $0x18] sm:$0xff]  ;;  %v3097_v48 = vld [vmem:[%s3788_s1 + $0x348] sm:$0xff]  }
  0x64   : > { %2763 = vmatprep.subr.bf16.mxu0 %v3028_v49  ;;  %v2105_v49 = vld [vmem:[%s3581_s19 + $0x28] sm:$0xff] }
  0x65   : > { %2808 = vmatpush3.bf16.msra.mxu1 %v3029_v50  ;;  %v2106_v50 = vld [vmem:[%s3581_s19 + $0x30] sm:$0xff] }
  0x66   : > { %1774 = vmatmul.mubr.bf16.gmra.mxu0 %v3023_v44  ;;  %2809 = vmatprep.subr.bf16.mxu1 %v3035_v54  ;;  %v3104_v44 = vld [vmem:[%s3284_s12 + $0x184] ss:$56 sps:$4 sm:$0xff]   ;;  %v3099_v54 = vld [vmem:[%s3284_s12 + $0x30] ss:$56 sps:$4 sm:$0xff]  }
  0x67   : > { %1847 = vmatmul.mubr.bf16.gmra.mxu1 %v3024_v45  ;;  %2764 = vmatpush3.bf16.msra.mxu0 %v3030_v51  ;;  %v3096_v45 = vld [vmem:[%s3788_s1 + $0x350] sm:$0xff]   ;;  %v3098_v51 = vld [vmem:[%s3788_s1 + $0x340] sm:$0xff]  }
  0x68   : > { %1781 = vmatprep.mubr.bf16.mxu0 %v3031_v52  ;;  %1854 = vmatprep.mubr.bf16.mxu1 %v3033_v53  ;;  %v2107_v52 = vld [vmem:[%s3581_s19 + $0x38] sm:$0xff]  ;;  %v2108_v53 = vld [vmem:[%s3581_s19 + $0x40] sm:$0xff] }
  0x69   : > { %2810 = vmatpush3.bf16.msra.mxu1 %v3038_v57  ;;  %2765 = vmatprep.subr.bf16.mxu0 %v3039_v58  ;;  %v2109_v57 = vld [vmem:[%s3581_s19 + $0x48] sm:$0xff] }
  0x6a   : > { %2811 = vmatprep.subr.bf16.mxu1 %v3041_v60  ;;  %2117 = vperm.xlu0 %2899, %v2101_v42   ;;  %v3107_v58 = vld [vmem:[%s3284_s12 + $0x1f4] ss:$56 sps:$4 sm:$0xff]  }
  0x6b   : > { %2766 = vmatpush3.bf16.msra.mxu0 %v3040_v59  ;;  %2127 = vperm.xlu1 %2900, %v2103_v46   ;;  %v3110_v59 = vld [vmem:[%s3284_s12 + $0x1f0] ss:$56 sps:$4 sm:$0xff]   ;;  %v3111_v60 = vld [vmem:[%s3284_s12 + $0x114] ss:$56 sps:$4 sm:$0xff]  }
  0x6c   : > { %2767 = vmatprep.subr.bf16.mxu0 %v3043_v62 }
  0x6d   : > { %2812 = vmatpush3.bf16.msra.mxu1 %v3042_v61  ;;  %v3113_v61 = vld [vmem:[%s3284_s12 + $0x110] ss:$56 sps:$4 sm:$0xff]  }
  0x6e   : > { %1782 = vmatmul.mubr.bf16.gmra.mxu0 %v3036_v55  ;;  %2813 = vmatprep.subr.bf16.mxu1 %v3049_v2  ;;  %v3102_v55 = vld [vmem:[%s3284_s12 + $0x180] ss:$56 sps:$4 sm:$0xff]  }
  0x6f   : > { %1855 = vmatmul.mubr.bf16.gmra.mxu1 %v3037_v56  ;;  %1789 = vmatprep.mubr.bf16.mxu0 %v3044_v63  ;;  %v3105_v56 = vld [vmem:[%s3284_s12 + $0xa4] ss:$56 sps:$4 sm:$0xff]  }
  0x70   : > { %1862 = vmatprep.mubr.bf16.mxu1 %v3046_v0  ;;  %2768 = vmatpush3.bf16.msra.mxu0 %v3048_v1  ;;  %v3638_v0 = vld [vmem:[%s3789_s2] ss:$0 sm:$0xff] }
  0x71   : > { %2814 = vmatpush3.bf16.msra.mxu1 %v3052_v6  ;;  %2769 = vmatprep.subr.bf16.mxu0 %v3053_v7 }
  0x72   : > { %2815 = vmatprep.subr.bf16.mxu1 %v3054_v8  ;;  %2132 = vperm.xlu0 %2899, %v2104_v47  }
  0x73   : > { %2137 = vperm.xlu1 %2900, %v2105_v49  }
  0x74   : > { %2770 = vmatpush3.bf16.msra.mxu0 %v3055_v9 }
  0x75   : > { %2816 = vmatpush3.bf16.msra.mxu1 %v3056_v10  ;;  %2017 = vmatprep.subr.bf16.mxu0 %v3138_v3 }
  0x76   : > { %1790 = vmatmul.mubr.bf16.gmra.mxu0 %v3050_v4  ;;  %2847 = vmatprep.subr.bf16.mxu1 %v3138_v3 }
  0x77   : > { %1863 = vmatmul.mubr.bf16.gmra.mxu1 %v3051_v5  ;;  %1903 = vmatprep.mubr.bf16.mxu0 %v3059_v12 }
  0x78   : > { %1976 = vmatprep.mubr.bf16.mxu1 %v3062_v14  ;;  %2142 = vperm.xlu0 %2899, %v2106_v50  }
  0x79   : > { %2147 = vperm.xlu1 %2900, %v2107_v52  }
  0x7c   : > { %2152 = vperm.xlu0 %2899, %v2108_v53  }
  0x7d   : > { %2157 = vperm.xlu1 %2900, %v2109_v57  }
  0x7e   : > { %1904 = vmatmul.mubr.bf16.vlgmr.msra.gmra.mxu0 %v3057_v11 }
  0x7f   : > { %1977 = vmatmul.mubr.bf16.vlgmr.msra.gmra.mxu1 %v3060_v13  ;;  %2018 = vmatpush1.bf16.msra.mxu0 %v3063_v15 }
  0x80   : > { %2859 = vmatpush1.bf16.msra.mxu1 %v3063_v15  ;;  %2019 = vmatprep.subr.bf16.mxu0 %v3138_v3 }
  0x81   : > { %2848 = vmatprep.subr.bf16.mxu1 %v3138_v3  ;;  %1911 = vmatprep.mubr.bf16.mxu0 %v3065_v17 }
  0x82   : > { %1984 = vmatprep.mubr.bf16.mxu1 %v3069_v19 }
  0x83   : > { %2020 = vmatpush1.bf16.msra.mxu0 %v3064_v16 }
  0x84   : > { %2860 = vmatpush1.bf16.msra.mxu1 %v3064_v16  ;;  %2021 = vmatprep.subr.bf16.mxu0 %v3138_v3 }
  0x85   : > { %2849 = vmatprep.subr.bf16.mxu1 %v3138_v3 }
  0x86   : > { %1912 = vmatmul.mubr.bf16.gmra.mxu0 %v3067_v18 }
  0x87   : > { %2022 = vmatpush1.bf16.msra.mxu0 %v3068_v20  ;;  %1985 = vmatmul.mubr.bf16.gmra.mxu1 %v3071_v21 }
  0x88   : > { %2861 = vmatpush1.bf16.msra.mxu1 %v3068_v20  ;;  %2023 = vmatprep.subr.bf16.mxu0 %v3138_v3 }
  0x89   : > { %2850 = vmatprep.subr.bf16.mxu1 %v3138_v3  ;;  %1919 = vmatprep.mubr.bf16.mxu0 %v3073_v22 }
  0x8a   : > { %1992 = vmatprep.mubr.bf16.mxu1 %v3077_v23 }
  0x8b   : > { %2024 = vmatpush1.bf16.msra.mxu0 %v3072_v24 }
  0x8c   : > { %2862 = vmatpush1.bf16.msra.mxu1 %v3072_v24  ;;  %2025 = vmatprep.subr.bf16.mxu0 %v3138_v3 }
  0x8d   : > { %2851 = vmatprep.subr.bf16.mxu1 %v3138_v3 }
  0x8e   : > { %1920 = vmatmul.mubr.bf16.gmra.mxu0 %v3075_v25 }
  0x8f   : > { %2026 = vmatpush1.bf16.msra.mxu0 %v3076_v26  ;;  %1993 = vmatmul.mubr.bf16.gmra.mxu1 %v3079_v27 }
  0x90   : > { %2863 = vmatpush1.bf16.msra.mxu1 %v3076_v26  ;;  %2027 = vmatprep.subr.bf16.mxu0 %v3138_v3 }
  0x91   : > { %2852 = vmatprep.subr.bf16.mxu1 %v3138_v3  ;;  %1927 = vmatprep.mubr.bf16.mxu0 %v3081_v28 }
  0x92   : > { %2000 = vmatprep.mubr.bf16.mxu1 %v3085_v29 }
  0x93   : > { %2028 = vmatpush1.bf16.msra.mxu0 %v3080_v30 }
  0x94   : > { %2864 = vmatpush1.bf16.msra.mxu1 %v3080_v30  ;;  %2029 = vmatprep.subr.bf16.mxu0 %v3138_v3 }
  0x95   : > { %2853 = vmatprep.subr.bf16.mxu1 %v3138_v3 }
  0x96   : > { %1928 = vmatmul.mubr.bf16.gmra.mxu0 %v3083_v31 }
  0x97   : > { %2030 = vmatpush1.bf16.msra.mxu0 %v3084_v32  ;;  %2001 = vmatmul.mubr.bf16.gmra.mxu1 %v3087_v33 }
  0x98   : > { %2865 = vmatpush1.bf16.msra.mxu1 %v3084_v32  ;;  %2031 = vmatprep.subr.bf16.mxu0 %v3138_v3 }
  0x99   : > { %2854 = vmatprep.subr.bf16.mxu1 %v3138_v3  ;;  %1935 = vmatprep.mubr.bf16.mxu0 %v3089_v34 }
  0x9a   : > { %2008 = vmatprep.mubr.bf16.mxu1 %v3093_v35 }
  0x9b   : > { %2032 = vmatpush1.bf16.msra.mxu0 %v3088_v36 }
  0x9c   : > { %2866 = vmatpush1.bf16.msra.mxu1 %v3088_v36  ;;  %2041 = vmatprep.subr.bf16.mxu0 %v3138_v3 }
  0x9d   : > { %2855 = vmatprep.subr.bf16.mxu1 %v3138_v3 }
  0x9e   : > { %1936 = vmatmul.mubr.bf16.gmra.mxu0 %v3091_v38 }
  0x9f   : > { %2042 = vmatpush2.bf16.msra.mxu0 %v3092_v40  ;;  %2009 = vmatmul.mubr.bf16.gmra.mxu1 %v3095_v41 }
  0xa0   : > { %2867 = vmatpush2.bf16.msra.mxu1 %v3092_v40  ;;  %2043 = vmatprep.subr.bf16.mxu0 %v3138_v3 }
  0xa1   : > { %2856 = vmatprep.subr.bf16.mxu1 %v3138_v3  ;;  %2515 = vmatprep.mubr.msk.bf16.mxu0 %vm1563_vm0, %v3101_v43 }
  0xa2   : > { %2518 = vmatprep.mubr.msk.bf16.mxu1 %vm1563_vm0, %v3104_v44 }
  0xa3   : > { %2044 = vmatpush2.bf16.msra.mxu0 %v3096_v45 }
  0xa4   : > { %2868 = vmatpush2.bf16.msra.mxu1 %v3096_v45  ;;  %2045 = vmatprep.subr.bf16.mxu0 %v3138_v3 }
  0xa5   : > { %2857 = vmatprep.subr.bf16.mxu1 %v3138_v3 }
  0xa7   : > { %2046 = vmatpush2.bf16.msra.mxu0 %v3097_v48 }
  0xa8   : > { %2869 = vmatpush2.bf16.msra.mxu1 %v3097_v48  ;;  %2047 = vmatprep.subr.bf16.mxu0 %v3138_v3 }
  0xa9   : > { %2858 = vmatprep.subr.bf16.mxu1 %v3138_v3  ;;  %v3109_v3 = vld [vmem:[%s3284_s12 + $0xa0] ss:$56 sps:$4 sm:$0xff]   ;;  %s2873_s12 = smul.u32 40, %s3823_s15 }
  0xab   : > { %2048 = vmatpush2.bf16.msra.mxu0 %v3098_v51  ;;  %s3759_s7 = scalar_lea.vmem %s3791_s4, %s2873_s12 }
  0xac   : > { %2870 = vmatpush2.bf16.msra.mxu1 %v3098_v51 }
  0xae   : > { %2050 = vmatmul.mubr.bf16.vlgmr.msra.gmra.mxu0 %v3099_v54 }
  0xaf   : > { %2074 = vmatmul.mubr.bf16.vlgmr.msra.gmra.mxu1 %v3102_v55  ;;  %2516 = vmatprep.mubr.msk.bf16.mxu0 %vm1563_vm0, %v3105_v56 }
  0xb0   : > { %2519 = vmatprep.mubr.msk.bf16.mxu1 %vm1563_vm0, %v3107_v58 }
  0xb6   : > { %2058 = vmatmul.mubr.bf16.gmra.mxu0 %v3109_v3 }
  0xb7   : > { %2082 = vmatmul.mubr.bf16.gmra.mxu1 %v3110_v59  ;;  %2517 = vmatprep.mubr.msk.bf16.mxu0 %vm1563_vm0, %v3111_v60 }
  0xbe   : > { %2066 = vmatmul.mubr.bf16.gmra.mxu0 %v3113_v61 }
  0xee   : > { %v2587_v62 = vpop.f32.mrf.mxu0 }
  0xef   : > { %v2633_v63 = vpop.f32.mrf.mxu1 }
  0xf0   : > { %v2588_v1 = vpop.f32.mrf.mxu0 }
  0xf1   : > { %v2589_v2 = vadd.f32 %v2588_v1, %v2587_v62  ;;  %v2634_v4 = vpop.f32.mrf.mxu1 }
  0xf2   : > { %v2590_v5 = vpop.f32.mrf.mxu0  ;;  %v2635_v6 = vadd.f32 %v2634_v4, %v2633_v63 }
  0xf3   : > { %v1614_v7 = vadd.f32 %v2589_v2, %v3638_v0  ;;  %v2636_v8 = vpop.f32.mrf.mxu1 }
  0xf4   : > { %v2591_v9 = vpop.f32.mrf.mxu0 }
  0xf5   : > { %v3641_v10 = vadd.f32 %v2635_v6, %v1614_v7  ;;  %v2592_v11 = vadd.f32 %v2591_v9, %v2590_v5  ;;  %v2637_v12 = vpop.f32.mrf.mxu1 }
  0xf6   : > { %v2593_v13 = vpop.f32.mrf.mxu0  ;;  %v2638_v14 = vadd.f32 %v2637_v12, %v2636_v8 }
  0xf7   : > { %v1617_v15 = vadd.f32 %v2592_v11, %v3638_v0  ;;  %v2639_v16 = vpop.f32.mrf.mxu1 }
  0xf8   : > { %v2594_v17 = vpop.f32.mrf.mxu0 }
  0xf9   : > { %v3644_v18 = vadd.f32 %v2638_v14, %v1617_v15  ;;  %v2595_v19 = vadd.f32 %v2594_v17, %v2593_v13  ;;  %v2640_v20 = vpop.f32.mrf.mxu1 }
  0xfa   : > { %v2596_v21 = vpop.f32.mrf.mxu0  ;;  %v2641_v22 = vadd.f32 %v2640_v20, %v2639_v16 }
  0xfb   : > { %v1622_v23 = vadd.f32 %v2595_v19, %v3638_v0  ;;  %v2642_v24 = vpop.f32.mrf.mxu1 }
  0xfc   : > { %v2597_v25 = vpop.f32.mrf.mxu0 }
  0xfd   : > { %v3647_v26 = vadd.f32 %v2641_v22, %v1622_v23  ;;  %v2598_v27 = vadd.f32 %v2597_v25, %v2596_v21  ;;  %v2643_v28 = vpop.f32.mrf.mxu1 }
  0xfe   : > { %v2599_v29 = vpop.f32.mrf.mxu0  ;;  %v2644_v30 = vadd.f32 %v2643_v28, %v2642_v24 }
  0xff   : > { %v1625_v31 = vadd.f32 %v2598_v27, %v3638_v0  ;;  %v2645_v32 = vpop.f32.mrf.mxu1 }
 0x100   : > { %v2600_v33 = vpop.f32.mrf.mxu0 }
 0x101   : > { %v3650_v34 = vadd.f32 %v2644_v30, %v1625_v31  ;;  %v2601_v35 = vadd.f32 %v2600_v33, %v2599_v29  ;;  %v2646_v36 = vpop.f32.mrf.mxu1 }
 0x102   : > { %v2602_v37 = vpop.f32.mrf.mxu0  ;;  %v2647_v38 = vadd.f32 %v2646_v36, %v2645_v32 }
 0x103   : > { %v1630_v39 = vadd.f32 %v2601_v35, %v3638_v0  ;;  %v2648_v40 = vpop.f32.mrf.mxu1 }
 0x104   : > { %v2603_v41 = vpop.f32.mrf.mxu0 }
 0x105   : > { %v3653_v42 = vadd.f32 %v2647_v38, %v1630_v39  ;;  %v2604_v43 = vadd.f32 %v2603_v41, %v2602_v37  ;;  %v2649_v44 = vpop.f32.mrf.mxu1 }
 0x106   : > { %v2650_v45 = vadd.f32 %v2649_v44, %v2648_v40  ;;  %v2605_v47 = vpop.f32.mrf.mxu0 }
 0x107   : > { %v1633_v46 = vadd.f32 %v2604_v43, %v3638_v0  ;;  %v2651_v48 = vpop.f32.mrf.mxu1 }
 0x108   : > { %v2606_v50 = vpop.f32.mrf.mxu0 }
 0x109   : > { %v3656_v49 = vadd.f32 %v2650_v45, %v1633_v46  ;;  %v2652_v51 = vpop.f32.mrf.mxu1  ;;  %v2607_v52 = vadd.f32 %v2606_v50, %v2605_v47 }
 0x10a   : > { %v2653_v53 = vadd.f32 %v2652_v51, %v2651_v48  ;;  %v2608_v54 = vpop.f32.mrf.mxu0 }
 0x10b   : > { %v2654_v55 = vpop.f32.mrf.mxu1  ;;  %v1638_v56 = vadd.f32 %v2607_v52, %v3638_v0 }
 0x10c   : > { %v2609_v57 = vpop.f32.mrf.mxu0 }
 0x10d   : > { %v2655_v58 = vpop.f32.mrf.mxu1  ;;  %v3659_v3 = vadd.f32 %v2653_v53, %v1638_v56  ;;  %v2610_v59 = vadd.f32 %v2609_v57, %v2608_v54 }
 0x10e   : > { %v2656_v60 = vadd.f32 %v2655_v58, %v2654_v55  ;;  %v2611_v62 = vpop.f32.mrf.mxu0 }
 0x10f   : > { %v1641_v61 = vadd.f32 %v2610_v59, %v3638_v0  ;;  %v2657_v1 = vpop.f32.mrf.mxu1 }
 0x110   : > { %v2612_v2 = vpop.f32.mrf.mxu0 }
 0x111   : > { %v3662_v63 = vadd.f32 %v2656_v60, %v1641_v61  ;;  %v2658_v4 = vpop.f32.mrf.mxu1  ;;  %v2613_v5 = vadd.f32 %v2612_v2, %v2611_v62 }
 0x112   : > { %v2659_v6 = vadd.f32 %v2658_v4, %v2657_v1  ;;  %v2614_v7 = vpop.f32.mrf.mxu0 }
 0x113   : > { %v2660_v8 = vpop.f32.mrf.mxu1  ;;  %v1646_v9 = vadd.f32 %v2613_v5, %v3638_v0 }
 0x114   : > { %v2615_v11 = vpop.f32.mrf.mxu0 }
 0x115   : > { %v2661_v12 = vpop.f32.mrf.mxu1  ;;  %v3665_v13 = vadd.f32 %v2659_v6, %v1646_v9  ;;  %v2616_v14 = vadd.f32 %v2615_v11, %v2614_v7 }
 0x116   : > { %v2662_v15 = vadd.f32 %v2661_v12, %v2660_v8  ;;  %v2679_v16 = vpop.f32.mrf.mxu0 }
 0x117   : > { %v1649_v17 = vadd.f32 %v2616_v14, %v3638_v0  ;;  %v2725_v19 = vpop.f32.mrf.mxu1 }
 0x118   : > { %v2680_v20 = vpop.f32.mrf.mxu0 }
 0x119   : > { %v3668_v21 = vadd.f32 %v2662_v15, %v1649_v17  ;;  %v2681_v22 = vadd.f32 %v2680_v20, %v2679_v16  ;;  %v2726_v23 = vpop.f32.mrf.mxu1 }
 0x11a   : > { %v2682_v24 = vpop.f32.mrf.mxu0  ;;  %v2727_v25 = vadd.f32 %v2726_v23, %v2725_v19 }
 0x11b   : > { %v1760_v27 = vadd.f32 %v2681_v22, %v3641_v10  ;;  %v2728_v28 = vpop.f32.mrf.mxu1 }
 0x11c   : > { %v2683_v29 = vpop.f32.mrf.mxu0 }
 0x11d   : > { %v3671_v30 = vadd.f32 %v2727_v25, %v1760_v27  ;;  %v2684_v31 = vadd.f32 %v2683_v29, %v2682_v24  ;;  %v2729_v32 = vpop.f32.mrf.mxu1 }
 0x11e   : > { %v2685_v33 = vpop.f32.mrf.mxu0  ;;  %v2730_v35 = vadd.f32 %v2729_v32, %v2728_v28 }
 0x11f   : > { %v1763_v0 = vadd.f32 %v2684_v31, %v3644_v18  ;;  %v2731_v36 = vpop.f32.mrf.mxu1 }
 0x120   : > { %v2686_v37 = vpop.f32.mrf.mxu0 }
 0x121   : > { %v3674_v38 = vadd.f32 %v2730_v35, %v1763_v0  ;;  %v2687_v39 = vadd.f32 %v2686_v37, %v2685_v33  ;;  %v2732_v40 = vpop.f32.mrf.mxu1 }
 0x122   : > { %v2688_v41 = vpop.f32.mrf.mxu0  ;;  %v2733_v43 = vadd.f32 %v2732_v40, %v2731_v36 }
 0x123   : > { %v1768_v10 = vadd.f32 %v2687_v39, %v3647_v26  ;;  %v2734_v44 = vpop.f32.mrf.mxu1 }
 0x124   : > { %v2689_v45 = vpop.f32.mrf.mxu0 }
 0x125   : > { %v3677_v46 = vadd.f32 %v2733_v43, %v1768_v10  ;;  %v2690_v47 = vadd.f32 %v2689_v45, %v2688_v41  ;;  %v2735_v48 = vpop.f32.mrf.mxu1 }
 0x126   : > { %v2736_v50 = vadd.f32 %v2735_v48, %v2734_v44  ;;  %v2691_v18 = vpop.f32.mrf.mxu0 }
 0x127   : > { %v1771_v51 = vadd.f32 %v2690_v47, %v3650_v34  ;;  %v2737_v52 = vpop.f32.mrf.mxu1 }
 0x128   : > { %v2692_v54 = vpop.f32.mrf.mxu0 }
 0x129   : > { %v3680_v53 = vadd.f32 %v2736_v50, %v1771_v51  ;;  %v2693_v55 = vadd.f32 %v2692_v54, %v2691_v18  ;;  %v2738_v56 = vpop.f32.mrf.mxu1 }
 0x12a   : > { %v2694_v57 = vpop.f32.mrf.mxu0  ;;  %v2739_v58 = vadd.f32 %v2738_v56, %v2737_v52 }
 0x12b   : > { %v1776_v26 = vadd.f32 %v2693_v55, %v3653_v42  ;;  %v2740_v59 = vpop.f32.mrf.mxu1 }
 0x12c   : > { %v2695_v60 = vpop.f32.mrf.mxu0 }
 0x12d   : > { %v3683_v61 = vadd.f32 %v2739_v58, %v1776_v26  ;;  %v2696_v62 = vadd.f32 %v2695_v60, %v2694_v57  ;;  %v2741_v1 = vpop.f32.mrf.mxu1 }
 0x12e   : > { %v2742_v2 = vadd.f32 %v2741_v1, %v2740_v59  ;;  %v2697_v4 = vpop.f32.mrf.mxu0  ;;  %v3724_v1 = vpop.permute.xlu0 %2112 }
 0x12f   : > { %3792 = vst [vmem:[#allocation2_spill] sm:$0xff] %v3683_v61  ;;  %v1779_v34 = vadd.f32 %v2696_v62, %v3656_v49  ;;  %v2743_v6 = vpop.f32.mrf.mxu1  ;;  %3804 = vst [vmem:[#allocation14_spill] sm:$0xff] %v3724_v1 }
 0x130   : > { %v2698_v7 = vpop.f32.mrf.mxu0 }
 0x131   : > { %v3686_v5 = vadd.f32 %v2742_v2, %v1779_v34  ;;  %v2744_v8 = vpop.f32.mrf.mxu1  ;;  %v2699_v59 = vadd.f32 %v2698_v7, %v2697_v4 }
 0x132   : > { %v2700_v9 = vpop.f32.mrf.mxu0  ;;  %v2745_v34 = vadd.f32 %v2744_v8, %v2743_v6 }
 0x133   : > { %3793 = vst [vmem:[#allocation3_spill] sm:$0xff] %v3686_v5  ;;  %v2746_v11 = vpop.f32.mrf.mxu1  ;;  %v1784_v2 = vadd.f32 %v2699_v59, %v3659_v3  ;;  %v2118_v3 = vpop.permute.xlu0 %2117 }
 0x134   : > { %v2701_v12 = vpop.f32.mrf.mxu0 }
 0x135   : > { %v2747_v14 = vpop.f32.mrf.mxu1 }
 0x136   : > { %v2703_v42 = vpop.f32.mrf.mxu0 }
 0x137   : > { %v3688_v15 = vpop.f32.mrf.mxu1 }
 0x138   : > { %v2704_v16 = vpop.f32.mrf.mxu0 }
 0x139   : > { %v3690_v17 = vpop.f32.mrf.mxu1 }
 0x13a   : > { %v2706_v19 = vpop.f32.mrf.mxu0 }
 0x13b   : > { %v3692_v20 = vpop.f32.mrf.mxu1 }
 0x13c   : > { %v2707_v49 = vpop.f32.mrf.mxu0 }
 0x13d   : > { %v3694_v22 = vpop.f32.mrf.mxu1 }
 0x13e   : > { %v2771_v23 = vpop.f32.mrf.mxu0 }
 0x13f   : > { %v2817_v24 = vpop.f32.mrf.mxu1 }
 0x140   : > { %v2772_v25 = vpop.f32.mrf.mxu0 }
 0x141   : > { %v2818_v27 = vpop.f32.mrf.mxu1 }
 0x142   : > { %v2774_v28 = vpop.f32.mrf.mxu0 }
 0x143   : > { %v2820_v29 = vpop.f32.mrf.mxu1 }
 0x144   : > { %v2775_v31 = vpop.f32.mrf.mxu0 }
 0x145   : > { %v2821_v32 = vpop.f32.mrf.mxu1  ;;  %v2776_v1 = vadd.f32 %v2775_v31, %v2774_v28 }
 0x146   : > { %v2777_v33 = vpop.f32.mrf.mxu0 }
 0x147   : > { %v3696_v35 = vpop.f32.mrf.mxu1 }
 0x148   : > { %v2778_v0 = vpop.f32.mrf.mxu0 }
 0x149   : > { %v3698_v36 = vpop.f32.mrf.mxu1 }
 0x14a   : > { %v3700_v37 = vpop.f32.mrf.mxu0 }
 0x14b   : > { %v3702_v39 = vpop.f32.mrf.mxu1 }
 0x14c   : > { %3794 = vst [vmem:[#allocation4_spill] sm:$0xff] %v3702_v39  ;;  %v3704_v40 = vpop.f32.mrf.mxu0 }
 0x14d   : > { %v3706_v41 = vpop.f32.mrf.mxu1 }
 0x14e   : > { %3795 = vst [vmem:[#allocation5_spill] sm:$0xff] %v3706_v41  ;;  %v3708_v43 = vpop.f32.mrf.mxu0  ;;  %v2819_v41 = vadd.f32 %v2818_v27, %v2817_v24 }
 0x14f   : > { %3796 = vst [vmem:[#allocation6_spill] sm:$0xff] %v3708_v43  ;;  %v3710_v10 = vpop.f32.mrf.mxu1  ;;  %v2705_v43 = vadd.f32 %v2704_v16, %v2703_v42  ;;  %v2779_v42 = vadd.f32 %v2778_v0, %v2777_v33 }
 0x150   : > { %3797 = vst [vmem:[#allocation7_spill] sm:$0xff] %v3710_v10  ;;  %v3712_v44 = vpop.f32.mrf.mxu0  ;;  %v1857_v10 = vadd.f32 %v2745_v34, %v1784_v2 }
 0x151   : > { %3798 = vst [vmem:[#allocation8_spill] sm:$0xff] %v3712_v44  ;;  %v3714_v45 = vpop.f32.mrf.mxu1  ;;  %v2748_v44 = vadd.f32 %v2747_v14, %v2746_v11  ;;  %v1909_v14 = vadd.f32 %v2776_v1, %v3674_v38  ;;  %v2782_v38 = vadd.f32 %v3704_v40, %v3700_v37  ;;  %v1914_v33 = vadd.f32 %v2779_v42, %v3677_v46  ;;  %v3810_v42 = vld [vmem:[#allocation2_spill] sm:$0xff] }
 0x152   : > { %3799 = vst [vmem:[#allocation9_spill] sm:$0xff] %v3714_v45  ;;  %v3716_v47 = vpop.f32.mrf.mxu0 }
 0x153   : > { %3800 = vst [vmem:[#allocation10_spill] sm:$0xff] %v3716_v47  ;;  %v3718_v48 = vpop.f32.mrf.mxu1  ;;  %v3727_v47 = vpop.permute.xlu1 %2122  ;;  %v3805_v46 = vld [vmem:[#allocation4_spill] sm:$0xff] }
 0x154   : > { %3801 = vst [vmem:[#allocation11_spill] sm:$0xff] %v3718_v48  ;;  %v3720_v50 = vpop.f32.mrf.mxu0  ;;  %v2702_v48 = vadd.f32 %v2701_v12, %v2700_v9  ;;  %v2708_v12 = vadd.f32 %v2707_v49, %v2706_v19 }
 0x155   : > { %3802 = vst [vmem:[#allocation12_spill] sm:$0xff] %v3720_v50  ;;  %v3722_v51 = vpop.f32.mrf.mxu1  ;;  %v2773_v50 = vadd.f32 %v2772_v25, %v2771_v23 }
 0x156   : > { %3803 = vst [vmem:[#allocation13_spill] sm:$0xff] %v3722_v51  ;;  %v2789_v18 = vpop.f32.mrf.mxu0  ;;  %v1787_v61 = vadd.f32 %v2702_v48, %v3662_v63  ;;  %v2751_v63 = vadd.f32 %v3690_v17, %v3688_v15  ;;  %v1795_v49 = vadd.f32 %v2708_v12, %v3668_v21 }
 0x157   : > { %v2835_v52 = vpop.f32.mrf.mxu1  ;;  %v1906_v7 = vadd.f32 %v2773_v50, %v3671_v30  ;;  %v3731_v23 = vpop.permute.xlu1 %2127  ;;  %v2822_v30 = vadd.f32 %v2821_v32, %v2820_v29 }
 0x158   : > { %v2790_v54 = vpop.f32.mrf.mxu0  ;;  %v1860_v25 = vadd.f32 %v2748_v44, %v1787_v61  ;;  %v3740_v61 = vpop.permute.xlu0 %2132 }
 0x159   : > { %v2836_v55 = vpop.f32.mrf.mxu1  ;;  %v2791_v45 = vadd.f32 %v2790_v54, %v2789_v18  ;;  %v1792_v18 = vadd.f32 %v2705_v43, %v3665_v13  ;;  %v1979_v24 = vadd.f32 %v2819_v41, %v1906_v7  ;;  %v2754_v13 = vadd.f32 %v3694_v22, %v3692_v20 }
 0x15a   : > { %v2792_v56 = vpop.f32.mrf.mxu0  ;;  %v2837_v8 = vadd.f32 %v2836_v55, %v2835_v52  ;;  %v1982_v20 = vadd.f32 %v2822_v30, %v1909_v14  ;;  %v1917_v54 = vadd.f32 %v2782_v38, %v3680_v53  ;;  %v3806_v55 = vld [vmem:[#allocation5_spill] sm:$0xff]  ;;  %v3809_v53 = vld [vmem:[#allocation14_spill] sm:$0xff] }
 0x15b   : > { %v2838_v57 = vpop.f32.mrf.mxu1  ;;  %v1930_v6 = vadd.f32 %v2791_v45, %v1857_v10  ;;  %v1865_v43 = vadd.f32 %v2751_v63, %v1792_v18  ;;  %v3747_v21 = vpop.permute.xlu1 %2137  ;;  %v1868_v50 = vadd.f32 %v2754_v13, %v1795_v49 }
 0x15c   : > { %v2793_v58 = vpop.f32.mrf.mxu0 }
 0x15d   : > { %v2839_v26 = vpop.f32.mrf.mxu1  ;;  %v2794_v9 = vadd.f32 %v2793_v58, %v2792_v56  ;;  %v2003_v19 = vadd.f32 %v2837_v8, %v1930_v6  ;;  %v2828_v56 = vadd.f32 %v3806_v55, %v3805_v46  ;;  %v3807_v58 = vld [vmem:[#allocation6_spill] sm:$0xff] }
 0x15e   : > { %v2795_v60 = vpop.f32.mrf.mxu0  ;;  %v2840_v28 = vadd.f32 %v2839_v26, %v2838_v57  ;;  %v3808_v26 = vld [vmem:[#allocation8_spill] sm:$0xff] }
 0x15f   : > { %v2841_v62 = vpop.f32.mrf.mxu1  ;;  %v1933_v27 = vadd.f32 %v2794_v9, %v1860_v25  ;;  %v2785_v59 = vadd.f32 %v3808_v26, %v3807_v58  ;;  %v2148_v12 = vpop.permute.xlu1 %2147  ;;  %v1990_v30 = vadd.f32 %v2828_v56, %v1917_v54 }
 0x160   : > { %v2796_v5 = vpop.f32.mrf.mxu0 }
 0x161   : > { %v2842_v51 = vpop.f32.mrf.mxu1  ;;  %v2797_v31 = vadd.f32 %v2796_v5, %v2795_v60  ;;  %v2825_v5 = vadd.f32 %v3698_v36, %v3696_v35  ;;  %v2006_v48 = vadd.f32 %v2840_v28, %v1933_v27  ;;  %v3812_v27 = vld [vmem:[#allocation9_spill] sm:$0xff]  ;;  %v3813_v28 = vld [vmem:[#allocation10_spill] sm:$0xff] }
 0x162   : > { %v2798_v4 = vpop.f32.mrf.mxu0  ;;  %v2843_v41 = vadd.f32 %v2842_v51, %v2841_v62  ;;  %v2143_v51 = vpop.permute.xlu0 %2142 }
 0x163   : > { %v2844_v39 = vpop.f32.mrf.mxu1  ;;  %v1938_v22 = vadd.f32 %v2797_v31, %v1865_v43  ;;  %v1987_v1 = vadd.f32 %v2825_v5, %v1914_v33  ;;  %v3814_v31 = vld [vmem:[#allocation12_spill] sm:$0xff]  ;;  %v2158_v54 = vpop.permute.xlu1 %2157 }
 0x164   : > { %v2799_v11 = vpop.f32.mrf.mxu0 }
 0x165   : > { %v2845_v16 = vpop.f32.mrf.mxu1  ;;  %v2800_v44 = vadd.f32 %v2799_v11, %v2798_v4  ;;  %v2011_v6 = vadd.f32 %v2843_v41, %v1938_v22  ;;  %v3816_v22 = vld [vmem:[#allocation11_spill] sm:$0xff]  ;;  %v3817_v41 = vld [vmem:[#allocation13_spill] sm:$0xff] }
 0x166   : > { %v2846_v34 = vadd.f32 %v2845_v16, %v2844_v39  ;;  %v1922_v16 = vadd.f32 %v2785_v59, %v3810_v42  ;;  %v2153_v46 = vpop.permute.xlu0 %2152 }
 0x167   : > { %v1941_v2 = vadd.f32 %v2800_v44, %v1868_v50  ;;  %v2834_v44 = vadd.f32 %v3817_v41, %v3816_v22 }
 0x16e   : > { %v2051_v10 = vpop.f32.mrf.mxu0 }
 0x16f   : > { %v2052_v15 = vadd.f32 %v2051_v10, %v1979_v24  ;;  %v2075_v17 = vpop.f32.mrf.mxu1  ;;  %v3811_v24 = vld [vmem:[#allocation7_spill] sm:$0xff]  ;;  %v2788_v10 = vadd.f32 %v3814_v31, %v3813_v28 }
 0x170   : > { %v2076_v29 = vadd.f32 %v2075_v17, %v2003_v19  ;;  %v2053_v32 = vpop.f32.mrf.mxu0  ;;  %v2014_v17 = vadd.f32 %v2846_v34, %v1941_v2 }
 0x171   : > { %v2077_v0 = vpop.f32.mrf.mxu1  ;;  %v2090_v52 = vmax.f32 %v2052_v15, 0.0 }
 0x172   : > { %v2054_v45 = vpop.f32.mrf.mxu0  ;;  %v2096_v35 = vmax.f32 %v2076_v29, 0.0  ;;  %v3815_v0 = vld [vmem:[#allocation3_spill] sm:$0xff] }
 0x173   : > { %v2055_v37 = vadd.f32 %v2054_v45, %v1982_v20  ;;  %v2078_v40 = vpop.f32.mrf.mxu1  ;;  %v2160_v8 = vmul.f32 %v3809_v53, %v2090_v52  ;;  %v1925_v20 = vadd.f32 %v2788_v10, %v3815_v0 }
 0x174   : > { %v2079_v36 = vadd.f32 %v2078_v40, %v2006_v48  ;;  %v2056_v57 = vpop.f32.mrf.mxu0  ;;  %v2166_v63 = vmul.f32 %v2143_v51, %v2096_v35 }
 0x175   : > { %v2091_v60 = vmax.f32 %v2055_v37, 0.0  ;;  %v2080_v62 = vpop.f32.mrf.mxu1  ;;  %v1998_v26 = vadd.f32 %v2834_v44, %v1925_v20 }
 0x176   : > { %v2097_v4 = vmax.f32 %v2079_v36, 0.0  ;;  %v2059_v7 = vpop.f32.mrf.mxu0 }
 0x177   : > { %v2161_v9 = vmul.f32 %v2118_v3, %v2091_v60  ;;  %v2060_v25 = vadd.f32 %v2059_v7, %v1987_v1  ;;  %v2083_v18 = vpop.f32.mrf.mxu1  ;;  %v2831_v3 = vadd.f32 %v3812_v27, %v3811_v24 }
 0x178   : > { %v2167_v11 = vmul.f32 %v2148_v12, %v2097_v4  ;;  %v2084_v14 = vadd.f32 %v2083_v18, %v2011_v6  ;;  %v2061_v39 = vpop.f32.mrf.mxu0 }
 0x179   : > { %v2545_v19 = vpack.c.bf16 %v2161_v9, %v2160_v8  ;;  %v2085_v49 = vpop.f32.mrf.mxu1  ;;  %v2092_v43 = vmax.f32 %v2060_v25, 0.0  ;;  %v1995_v48 = vadd.f32 %v2831_v3, %v1922_v16 }
 0x17a   : > { %v2560_v13 = vpack.c.bf16 %v2167_v11, %v2166_v63  ;;  %v2062_v15 = vpop.f32.mrf.mxu0  ;;  %v2098_v32 = vmax.f32 %v2084_v14, 0.0 }
 0x17b   : > { %2546 = vst [vmem:[%s3759_s7] sm:$0xff] %v2545_v19   ;;  %v2063_v38 = vadd.f32 %v2062_v15, %v1990_v30  ;;  %v2086_v29 = vpop.f32.mrf.mxu1  ;;  %v2162_v40 = vmul.f32 %v3727_v47, %v2092_v43 }
 0x17c   : > { %2569 = vst [vmem:[%s3759_s7 + $0x18] sm:$0xff] %v2560_v13   ;;  %v2087_v33 = vadd.f32 %v2086_v29, %v2014_v17  ;;  %v2064_v5 = vpop.f32.mrf.mxu0  ;;  %v2168_v35 = vmul.f32 %v2153_v46, %v2098_v32 }
 0x17d   : > { %v2093_v45 = vmax.f32 %v2063_v38, 0.0  ;;  %v2088_v50 = vpop.f32.mrf.mxu1 }
 0x17e   : > { %v2099_v52 = vmax.f32 %v2087_v33, 0.0  ;;  %v2067_v37 = vpop.f32.mrf.mxu0 }
 0x17f   : > { %v2163_v55 = vmul.f32 %v3731_v23, %v2093_v45  ;;  %v2068_v56 = vadd.f32 %v2067_v37, %v1995_v48 }
 0x180   : > { %v2169_v36 = vmul.f32 %v2158_v54, %v2099_v52  ;;  %v2069_v57 = vpop.f32.mrf.mxu0 }
 0x181   : > { %v2550_v58 = vpack.c.bf16 %v2163_v55, %v2162_v40  ;;  %v2094_v60 = vmax.f32 %v2068_v56, 0.0 }
 0x182   : > { %v2565_v59 = vpack.c.bf16 %v2169_v36, %v2168_v35  ;;  %v2070_v51 = vpop.f32.mrf.mxu0 }
 0x183   : > { %2567 = vst [vmem:[%s3759_s7 + $0x8] sm:$0xff] %v2550_v58   ;;  %v2071_v62 = vadd.f32 %v2070_v51, %v1998_v26  ;;  %v2164_v47 = vmul.f32 %v3740_v61, %v2094_v60 }
 0x184   : > { %2570 = vst [vmem:[%s3759_s7 + $0x20] sm:$0xff] %v2565_v59   ;;  %v2072_v1 = vpop.f32.mrf.mxu0 }
 0x185   : > { %v2095_v2 = vmax.f32 %v2071_v62, 0.0 }
 0x187   : > { %v2165_v34 = vmul.f32 %v3747_v21, %v2095_v2 }
 0x189   : > { %v2555_v23 = vpack.c.bf16 %v2165_v34, %v2164_v47 }
 0x18b   : > { %2568 = vst [vmem:[%s3759_s7 + $0x10] sm:$0xff] %v2555_v23  }
 0x18c PF: > { %s14_s17 = sadd.s32 1, %s3136_s17   ;;  %s3818_s15 = smov %s3132_s16 }
 0x18d   : > { %p11_p5 = scmp.ge.s32.totalorder %s14_s17, 4   ;;  %s3819_s16 = smov %s3821_s18 }
 0x18f   :  { %13 = sbr.rel (!%p11_p5) target bundleno = 2 (0x2), region = 69 }

// kernel: voxelnet_encoder_forward.20
= control target key start
LH: loop header
LB: loop body
LE: loop exit
PB: predicated region body
PF: predicated region fallthrough
CT: control target
= control target key end

     0   :  { %s2141_s15 = smov 0   ;;  %s2143_s16 = smov 0   ;;  %s2542_s0 = inlined_call_operand.vmem [shape: bf16[2,16,1728], index: 0, kind: input, shape index: {}]   ;;  %s2543_s1 = inlined_call_operand.vmem [shape: bf16[1728,128], index: 1, kind: input, shape index: {}]   ;;  %s2544_s2 = inlined_call_operand.vmem [shape: f32[1,128], index: 2, kind: input, shape index: {}]   ;;  %s2545_s3 = inlined_call_operand.vmem [shape: f32[2,16,1], index: 3, kind: input, shape index: {}]   ;;  %s2546_s4 = inlined_call_operand.vmem [shape: bf16[2,16,128], index: 4, kind: output, shape index: {}]  }
   0x1   :  { %s2145_s17 = smov 0  }
   0x2 LB: > { %s26_s18 = sadd.s32 1, %s2109_s16  ;;  %p1660_p0 = scmp.ge.s32.totalorder %s2113_s17, 1  ;;  %s2113_s17 = sphi %s2145_s17, %s14_s17   ;;  %s2109_s16 = sphi %s2143_s16, %s2548_s16   ;;  %s2105_s15 = sphi %s2141_s15, %s2547_s15  }
   0x3   : > { %p28_p1 = scmp.ge.s32.totalorder %s26_s18, 2  ;;  %p201_p2 = scmp.lt.s32.totalorder %s2113_s17, 3 }
   0x5   : > { %s2550_s18 = smov (%p28_p1, %s26_s18), 0  ;;  %p202_p3 = pnand %p1660_p0, %p201_p2 }
   0x6   : > { %p246_p4 = scmp.lt.s32.totalorder (!%p202_p3), %s2105_s15, 1 }
   0x7   : > { %205 = sbr.rel (%p202_p3) target bundleno = 353 (0x161), region = 36 }
   0xc   : > { %v1962_v0 = vld [vmem:[%s2543_s1 + $0x78] sm:$0xff]   ;;  %v1964_v2 = vld [vmem:[%s2543_s1 + $0x70] sm:$0xff]   ;;  %v2115_v3 = vmov 0   ;;  %v1966_v5 = vld [vmem:[%s2543_s1 + $0x68] sm:$0xff]   ;;  %s2552_s15 = smov (!%p246_p4, %s2105_s15), 1  ;;  %vm1231_vm0 = vcmask 523264  }
   0xd   : > { %v1963_v1 = vld [vmem:[%s2543_s1 + $0x38] sm:$0xff]   ;;  %1803 = vmatprep.subr.bf16.mxu1 %v1962_v0  ;;  %1961 = vset.pattern.permute.xlu0 %v2115_v3  ;;  %v1965_v4 = vld [vmem:[%s2543_s1 + $0x30] sm:$0xff]   ;;  %v1967_v6 = vld [vmem:[%s2543_s1 + $0x28] sm:$0xff]   ;;  %s1935_s5 = smul.u32 112, %s2552_s15  ;;  %s1794_s30 = sshll.u32 %s2552_s15, 4 }
   0xe   : > { %1804 = vmatpush3.bf16.msra.mxu1 %v1963_v1  ;;  %v1968_v7 = vld [vmem:[%s2543_s1 + $0x60] sm:$0xff]   ;;  %v1971_v8 = vld [vmem:[%s2543_s1 + $0x178] sm:$0xff]   ;;  %v1975_v12 = vld [vmem:[%s2543_s1 + $0x170] sm:$0xff]   ;;  %s264_s13 = scalar_lea.vmem %s2545_s3, %s1794_s30  ;;  %s1795_s6 = sshll.u32 %s2552_s15, 3 }
   0xf   : > { %1805 = vmatprep.subr.bf16.mxu1 %v1964_v2  ;;  %v1969_v9 = vld [vmem:[%s2543_s1 + $0x20] sm:$0xff]   ;;  %1847 = vmatprep.subr.bf16.mxu0 %v1971_v8  ;;  %v1973_v10 = vld [vmem:[%s2543_s1 + $0x138] sm:$0xff]   ;;  %v1977_v14 = vld [vmem:[%s2543_s1 + $0x130] sm:$0xff]   ;;  %s2233_s20 = scalar_lea.vmem %s2542_s0, %s1935_s5  ;;  %s274_s9 = scalar_lea.vmem %s2546_s4, %s1795_s6 }
  0x10   : > { %v1970_v11 = vld [vmem:[%s2543_s1 + $0x58] sm:$0xff]   ;;  %1848 = vmatpush3.bf16.msra.mxu0 %v1973_v10  ;;  %v1974_v15 = vld [vmem:[%s2543_s1 + $0x50] sm:$0xff]   ;;  %v1979_v16 = vld [vmem:[%s2543_s1 + $0x168] sm:$0xff]  }
  0x11   : > { %v1972_v13 = vld [vmem:[%s2543_s1 + $0x18] sm:$0xff]   ;;  %1849 = vmatprep.subr.bf16.mxu0 %v1975_v12  ;;  %v1976_v17 = vld [vmem:[%s2543_s1 + $0x10] sm:$0xff]   ;;  %v1981_v18 = vld [vmem:[%s2543_s1 + $0x128] sm:$0xff]  }
  0x12   : > { %1806 = vmatpush3.bf16.msra.mxu1 %v1965_v4  ;;  %v1978_v19 = vld [vmem:[%s2543_s1 + $0x48] sm:$0xff]   ;;  %v1983_v20 = vld [vmem:[%s2543_s1 + $0x160] sm:$0xff]   ;;  %v1990_v26 = vld [vmem:[%s2543_s1 + $0x158] sm:$0xff]  }
  0x13   : > { %1807 = vmatprep.subr.bf16.mxu1 %v1966_v5  ;;  %v1980_v21 = vld [vmem:[%s2543_s1 + $0x8] sm:$0xff]   ;;  %v1985_v22 = vld [vmem:[%s2543_s1 + $0x120] sm:$0xff]   ;;  %v1989_v28 = vld [vmem:[%s2543_s1 + $0xf8] sm:$0xff]  }
  0x14   : > { %1850 = vmatpush3.bf16.msra.mxu0 %v1977_v14  ;;  %v1982_v23 = vld [vmem:[%s2543_s1 + $0x40] sm:$0xff]   ;;  %v1992_v29 = vld [vmem:[%s2543_s1 + $0x118] sm:$0xff]   ;;  %v1994_v31 = vld [vmem:[%s2543_s1 + $0x150] sm:$0xff]  }
  0x15   : > { %1851 = vmatprep.subr.bf16.mxu0 %v1979_v16  ;;  %v1988_v24 = vld [vmem:[%s2233_s20 + $0x4] ss:$56 sps:$4 sm:$0xff]   ;;  %v1986_v27 = vld [vmem:[%s2233_s20] ss:$56 sps:$4 sm:$0xff]   ;;  %v1993_v32 = vld [vmem:[%s2543_s1 + $0xf0] sm:$0xff]  }
  0x16   : > { %1808 = vmatpush3.bf16.msra.mxu1 %v1967_v6  ;;  %v1984_v25 = vld [vmem:[%s2543_s1] sm:$0xff]   ;;  %1267 = vmatprep.mubr.bf16.mxu1 %v1988_v24  ;;  %v1991_v30 = vld [vmem:[%s2543_s1 + $0xb8] sm:$0xff]   ;;  %v1996_v33 = vld [vmem:[%s2543_s1 + $0x110] sm:$0xff]  }
  0x17   : > { %1809 = vmatprep.subr.bf16.mxu1 %v1968_v7  ;;  %v1995_v34 = vld [vmem:[%s2543_s1 + $0xb0] sm:$0xff]   ;;  %v1998_v35 = vld [vmem:[%s2543_s1 + $0x148] sm:$0xff]   ;;  %v2002_v39 = vld [vmem:[%s2543_s1 + $0x140] sm:$0xff]  }
  0x18   : > { %1852 = vmatpush3.bf16.msra.mxu0 %v1981_v18  ;;  %v1997_v36 = vld [vmem:[%s2543_s1 + $0xe8] sm:$0xff]   ;;  %v2001_v40 = vld [vmem:[%s2543_s1 + $0xe0] sm:$0xff]   ;;  %v2005_v43 = vld [vmem:[%s2543_s1 + $0xd8] sm:$0xff]  }
  0x19   : > { %1853 = vmatprep.subr.bf16.mxu0 %v1983_v20  ;;  %v2000_v37 = vld [vmem:[%s2543_s1 + $0x108] sm:$0xff]   ;;  %v2003_v41 = vld [vmem:[%s2543_s1 + $0xa0] sm:$0xff]   ;;  %v2009_v46 = vld [vmem:[%s2543_s1 + $0x278] sm:$0xff]  }
  0x1a   : > { %1810 = vmatpush3.bf16.msra.mxu1 %v1969_v9  ;;  %v1999_v38 = vld [vmem:[%s2543_s1 + $0xa8] sm:$0xff]   ;;  %v2004_v42 = vld [vmem:[%s2543_s1 + $0x100] sm:$0xff]   ;;  %v2010_v47 = vld [vmem:[%s2543_s1 + $0x98] sm:$0xff]  }
  0x1b   : > { %1811 = vmatprep.subr.bf16.mxu1 %v1970_v11  ;;  %v2006_v44 = vld [vmem:[%s2233_s20 + $0x10] ss:$56 sps:$4 sm:$0xff]   ;;  %v2008_v45 = vld [vmem:[%s2233_s20 + $0x14] ss:$56 sps:$4 sm:$0xff]   ;;  %v2011_v48 = vld [vmem:[%s2543_s1 + $0x238] sm:$0xff]  }
  0x1c   : > { %1854 = vmatpush3.bf16.msra.mxu0 %v1985_v22  ;;  %1349 = vmatprep.mubr.bf16.mxu0 %v2008_v45  ;;  %v2012_v49 = vld [vmem:[%s2543_s1 + $0xd0] sm:$0xff]   ;;  %v2016_v53 = vld [vmem:[%s2543_s1 + $0xc8] sm:$0xff]   ;;  %v2020_v57 = vld [vmem:[%s2543_s1 + $0xc0] sm:$0xff]  }
  0x1d   : > { %1855 = vmatprep.subr.bf16.mxu0 %v1990_v26  ;;  %v2013_v50 = vld [vmem:[%s2543_s1 + $0x270] sm:$0xff]   ;;  %v2017_v54 = vld [vmem:[%s2543_s1 + $0x268] sm:$0xff]   ;;  %v2021_v58 = vld [vmem:[%s2543_s1 + $0x260] sm:$0xff]  }
  0x1e   : > { %1812 = vmatpush3.bf16.msra.mxu1 %v1972_v13  ;;  %v2014_v51 = vld [vmem:[%s2543_s1 + $0x90] sm:$0xff]   ;;  %v2018_v55 = vld [vmem:[%s2543_s1 + $0x88] sm:$0xff]   ;;  %v2023_v59 = vld [vmem:[%s2543_s1 + $0x220] sm:$0xff]  }
  0x1f   : > { %1813 = vmatprep.subr.bf16.mxu1 %v1974_v15  ;;  %v2015_v52 = vld [vmem:[%s2543_s1 + $0x230] sm:$0xff]   ;;  %v2019_v56 = vld [vmem:[%s2543_s1 + $0x228] sm:$0xff]   ;;  %v2022_v60 = vld [vmem:[%s2543_s1 + $0x80] sm:$0xff]  }
  0x20   : > { %1856 = vmatpush3.bf16.msra.mxu0 %v1992_v29  ;;  %v2026_v61 = vld [vmem:[%s2233_s20 + $0xc] ss:$56 sps:$4 sm:$0xff]   ;;  %v2024_v62 = vld [vmem:[%s2233_s20 + $0x8] ss:$56 sps:$4 sm:$0xff]   ;;  %v2027_v63 = vld [vmem:[%s2543_s1 + $0x1f8] sm:$0xff]  }
  0x21   : > { %1857 = vmatprep.subr.bf16.mxu0 %v1994_v31  ;;  %v2028_v0 = vld [vmem:[%s2543_s1 + $0x258] sm:$0xff]   ;;  %v2031_v4 = vld [vmem:[%s2543_s1 + $0x1f0] sm:$0xff]   ;;  %v2035_v8 = vld [vmem:[%s2543_s1 + $0x1e8] sm:$0xff]  }
  0x22   : > { %1814 = vmatpush3.bf16.msra.mxu1 %v1976_v17  ;;  %v2029_v1 = vld [vmem:[%s2543_s1 + $0x1b8] sm:$0xff]   ;;  %v2032_v5 = vld [vmem:[%s2543_s1 + $0x250] sm:$0xff]   ;;  %v2036_v9 = vld [vmem:[%s2543_s1 + $0x248] sm:$0xff]  }
  0x23   : > { %1815 = vmatprep.subr.bf16.mxu1 %v1978_v19  ;;  %v2030_v2 = vld [vmem:[%s2543_s1 + $0x218] sm:$0xff]   ;;  %v2033_v6 = vld [vmem:[%s2543_s1 + $0x1b0] sm:$0xff]   ;;  %v2037_v10 = vld [vmem:[%s2543_s1 + $0x1a8] sm:$0xff]  }
  0x24   : > { %1858 = vmatpush3.bf16.msra.mxu0 %v1996_v33  ;;  %v2034_v7 = vld [vmem:[%s2543_s1 + $0x210] sm:$0xff]   ;;  %v2038_v11 = vld [vmem:[%s2543_s1 + $0x208] sm:$0xff]   ;;  %v2039_v12 = vld [vmem:[%s2543_s1 + $0x1e0] sm:$0xff]  }
  0x25   : > { %1859 = vmatprep.subr.bf16.mxu0 %v1998_v35  ;;  %v2040_v13 = vld [vmem:[%s2543_s1 + $0x240] sm:$0xff]   ;;  %v2043_v16 = vld [vmem:[%s2543_s1 + $0x1d8] sm:$0xff]   ;;  %v2050_v22 = vld [vmem:[%s2543_s1 + $0x190] sm:$0xff]  }
  0x26   : > { %1816 = vmatpush3.bf16.msra.mxu1 %v1980_v21  ;;  %v2041_v14 = vld [vmem:[%s2543_s1 + $0x1a0] sm:$0xff]   ;;  %v2047_v19 = vld [vmem:[%s2543_s1 + $0x198] sm:$0xff]   ;;  %v2049_v21 = vld [vmem:[%s2543_s1 + $0x1d0] sm:$0xff]  }
  0x27   : > { %1817 = vmatprep.subr.bf16.mxu1 %v1982_v23  ;;  %v2042_v15 = vld [vmem:[%s2543_s1 + $0x200] sm:$0xff]   ;;  %v2048_v20 = vld [vmem:[%s2543_s1 + $0x338] sm:$0xff]   ;;  %v2051_v23 = vld [vmem:[%s2543_s1 + $0x330] sm:$0xff]  }
  0x28   : > { %1860 = vmatpush3.bf16.msra.mxu0 %v2000_v37  ;;  %v2044_v17 = vld [vmem:[%s2233_s20 + $0x20] ss:$56 sps:$4 sm:$0xff]   ;;  %v2046_v18 = vld [vmem:[%s2233_s20 + $0x24] ss:$56 sps:$4 sm:$0xff]   ;;  %v2052_v24 = vld [vmem:[%s2543_s1 + $0x1c8] sm:$0xff]  }
  0x29   : > { %1861 = vmatprep.subr.bf16.mxu0 %v2002_v39  ;;  %v2053_v26 = vld [vmem:[%s2543_s1 + $0x188] sm:$0xff]   ;;  %v2060_v29 = vld [vmem:[%s2233_s20 + $0x1c] ss:$56 sps:$4 sm:$0xff]  }
  0x2a   : > { %1818 = vmatpush3.bf16.msra.mxu1 %v1984_v25  ;;  %v2054_v25 = vld [vmem:[%s2543_s1 + $0x328] sm:$0xff]   ;;  %v2061_v31 = vld [vmem:[%s2543_s1 + $0x2f8] sm:$0xff]   ;;  %v2064_v35 = vld [vmem:[%s2543_s1 + $0x2f0] sm:$0xff]  }
  0x2b   : > { %1825 = vmatprep.subr.bf16.mxu1 %v1989_v28  ;;  %v2057_v28 = vld [vmem:[%s2543_s1 + $0x320] sm:$0xff]   ;;  %v2063_v33 = vld [vmem:[%s2543_s1 + $0x318] sm:$0xff]   ;;  %v2065_v37 = vld [vmem:[%s2543_s1 + $0x2b0] sm:$0xff]  }
  0x2c   : > { %1862 = vmatpush3.bf16.msra.mxu0 %v2004_v42  ;;  %v2069_v39 = vld [vmem:[%s2543_s1 + $0x308] sm:$0xff]   ;;  %v2072_v42 = vld [vmem:[%s2543_s1 + $0x300] sm:$0xff]   ;;  %v2075_v45 = vld [vmem:[%s2543_s1 + $0x358] sm:$0xff]  }
  0x2d   : > { %1268 = vmatmul.mubr.bf16.vlgmr.msra.gmra.mxu1 %v1986_v27  ;;  %1891 = vmatprep.subr.bf16.mxu0 %v2009_v46  ;;  %v2055_v27 = vld [vmem:[%s2543_s1 + $0x1c0] sm:$0xff]   ;;  %v2074_v46 = vld [vmem:[%s2543_s1 + $0x298] sm:$0xff]  }
  0x2e   : > { %1826 = vmatpush3.bf16.msra.mxu1 %v1991_v30  ;;  %1308 = vmatprep.mubr.bf16.mxu1 %v2026_v61  ;;  %v2056_v30 = vld [vmem:[%s2543_s1 + $0x180] sm:$0xff]  }
  0x2f   : > { %1827 = vmatprep.subr.bf16.mxu1 %v1993_v32  ;;  %1350 = vmatmul.mubr.bf16.vlgmr.msra.gmra.mxu0 %v2006_v44  ;;  %v2058_v32 = vld [vmem:[%s2233_s20 + $0x18] ss:$56 sps:$4 sm:$0xff]   ;;  %v2085_v61 = vld [vmem:[%s2233_s20 + $0x28] ss:$56 sps:$4 sm:$0xff]  }
  0x30   : > { %1892 = vmatpush3.bf16.msra.mxu0 %v2011_v48  ;;  %1431 = vmatprep.mubr.bf16.mxu0 %v2046_v18  ;;  %v2073_v44 = vld [vmem:[%s2543_s1 + $0x2d8] sm:$0xff]   ;;  %v2077_v48 = vld [vmem:[%s2543_s1 + $0x290] sm:$0xff]  }
  0x31   : > { %1893 = vmatprep.subr.bf16.mxu0 %v2013_v50  ;;  %v2079_v50 = vld [vmem:[%s2543_s1 + $0x2c8] sm:$0xff]  }
  0x32   : > { %1828 = vmatpush3.bf16.msra.mxu1 %v1995_v34  ;;  %v2062_v34 = vld [vmem:[%s2543_s1 + $0x2b8] sm:$0xff]  }
  0x33   : > { %1829 = vmatprep.subr.bf16.mxu1 %v1997_v36  ;;  %v2066_v36 = vld [vmem:[%s2543_s1 + $0x310] sm:$0xff]  }
  0x34   : > { %1894 = vmatpush3.bf16.msra.mxu0 %v2015_v52  ;;  %v2088_v52 = vld [vmem:[%s2233_s20 + $0x34] ss:$56 sps:$4 sm:$0xff]  }
  0x35   : > { %1895 = vmatprep.subr.bf16.mxu0 %v2017_v54  ;;  %v2081_v54 = vld [vmem:[%s2543_s1 + $0x348] sm:$0xff]  }
  0x36   : > { %1830 = vmatpush3.bf16.msra.mxu1 %v1999_v38  ;;  %v2067_v38 = vld [vmem:[%s2543_s1 + $0x2e8] sm:$0xff]  }
  0x37   : > { %1831 = vmatprep.subr.bf16.mxu1 %v2001_v40  ;;  %v2068_v40 = vld [vmem:[%s2543_s1 + $0x2a8] sm:$0xff]  }
  0x38   : > { %1896 = vmatpush3.bf16.msra.mxu0 %v2019_v56  ;;  %v2082_v56 = vld [vmem:[%s2543_s1 + $0x2c0] sm:$0xff]  }
  0x39   : > { %1897 = vmatprep.subr.bf16.mxu0 %v2021_v58  ;;  %v2084_v58 = vld [vmem:[%s2543_s1 + $0x340] sm:$0xff]  }
  0x3a   : > { %1832 = vmatpush3.bf16.msra.mxu1 %v2003_v41  ;;  %v2070_v41 = vld [vmem:[%s2543_s1 + $0x2e0] sm:$0xff]  }
  0x3b   : > { %1833 = vmatprep.subr.bf16.mxu1 %v2005_v43  ;;  %v2071_v43 = vld [vmem:[%s2543_s1 + $0x2a0] sm:$0xff]  }
  0x3c   : > { %1898 = vmatpush3.bf16.msra.mxu0 %v2023_v59  ;;  %v2083_v59 = vld [vmem:[%s2543_s1 + $0x280] sm:$0xff]  }
  0x3d   : > { %1899 = vmatprep.subr.bf16.mxu0 %v2028_v0 }
  0x3e   : > { %1834 = vmatpush3.bf16.msra.mxu1 %v2010_v47  ;;  %v2076_v47 = vld [vmem:[%s2543_s1 + $0x2d0] sm:$0xff]  }
  0x3f   : > { %1835 = vmatprep.subr.bf16.mxu1 %v2012_v49  ;;  %v2078_v49 = vld [vmem:[%s2543_s1 + $0x350] sm:$0xff]  }
  0x40   : > { %1900 = vmatpush3.bf16.msra.mxu0 %v2030_v2 }
  0x41   : > { %1901 = vmatprep.subr.bf16.mxu0 %v2032_v5 }
  0x42   : > { %1836 = vmatpush3.bf16.msra.mxu1 %v2014_v51  ;;  %v2087_v51 = vld [vmem:[%s2233_s20 + $0x2c] ss:$56 sps:$4 sm:$0xff]  }
  0x43   : > { %1837 = vmatprep.subr.bf16.mxu1 %v2016_v53  ;;  %v1524_v53 = vld [vmem:[%s264_s13] sm:$0xff] }
  0x44   : > { %1902 = vmatpush3.bf16.msra.mxu0 %v2034_v7  ;;  %1528 = vperm.xlu0 %1961, %v1524_v53  }
  0x45   : > { %1903 = vmatprep.subr.bf16.mxu0 %v2036_v9 }
  0x46   : > { %1838 = vmatpush3.bf16.msra.mxu1 %v2018_v55  ;;  %v2080_v55 = vld [vmem:[%s2543_s1 + $0x288] sm:$0xff]  }
  0x47   : > { %1839 = vmatprep.subr.bf16.mxu1 %v2020_v57  ;;  %v1525_v57 = vld [vmem:[%s264_s13 + $0x8] sm:$0xff] }
  0x48   : > { %1904 = vmatpush3.bf16.msra.mxu0 %v2038_v11  ;;  %1533 = vperm.xlu0 %1961, %v1525_v57  }
  0x49   : > { %1905 = vmatprep.subr.bf16.mxu0 %v2040_v13  ;;  %v1666_v13 = vld [vmem:[%s2544_s2] ss:$0 sm:$0xff] }
  0x4a   : > { %1840 = vmatpush3.bf16.msra.mxu1 %v2022_v60  ;;  %v2090_v60 = vld [vmem:[%s2233_s20 + $0x30] ss:$56 sps:$4 sm:$0xff]  }
  0x4b   : > { %1869 = vmatprep.subr.bf16.mxu1 %v2027_v63 }
  0x4c   : > { %1906 = vmatpush3.bf16.msra.mxu0 %v2042_v15 }
  0x4d   : > { %1309 = vmatmul.mubr.bf16.vlgmr.msra.gmra.mxu1 %v2024_v62  ;;  %1481 = vmatprep.subr.bf16.mxu0 %v2115_v3 }
  0x4e   : > { %1870 = vmatpush3.bf16.msra.mxu1 %v2029_v1  ;;  %1390 = vmatprep.mubr.bf16.mxu1 %v2060_v29 }
  0x4f   : > { %1871 = vmatprep.subr.bf16.mxu1 %v2031_v4  ;;  %1432 = vmatmul.mubr.bf16.vlgmr.msra.gmra.mxu0 %v2044_v17 }
  0x50   : > { %1482 = vmatpush1.bf16.msra.mxu0 %v2048_v20  ;;  %1789 = vmatprep.mubr.msk.bf16.mxu0 %vm1231_vm0, %v2088_v52 }
  0x51   : > { %1483 = vmatprep.subr.bf16.mxu0 %v2115_v3 }
  0x52   : > { %1872 = vmatpush3.bf16.msra.mxu1 %v2033_v6 }
  0x53   : > { %1873 = vmatprep.subr.bf16.mxu1 %v2035_v8 }
  0x54   : > { %1484 = vmatpush1.bf16.msra.mxu0 %v2051_v23 }
  0x55   : > { %1485 = vmatprep.subr.bf16.mxu0 %v2115_v3 }
  0x56   : > { %1874 = vmatpush3.bf16.msra.mxu1 %v2037_v10 }
  0x57   : > { %1875 = vmatprep.subr.bf16.mxu1 %v2039_v12 }
  0x58   : > { %1486 = vmatpush1.bf16.msra.mxu0 %v2054_v25 }
  0x59   : > { %1487 = vmatprep.subr.bf16.mxu0 %v2115_v3 }
  0x5a   : > { %1876 = vmatpush3.bf16.msra.mxu1 %v2041_v14 }
  0x5b   : > { %1877 = vmatprep.subr.bf16.mxu1 %v2043_v16 }
  0x5c   : > { %1488 = vmatpush1.bf16.msra.mxu0 %v2057_v28 }
  0x5d   : > { %1489 = vmatprep.subr.bf16.mxu0 %v2115_v3 }
  0x5e   : > { %1878 = vmatpush3.bf16.msra.mxu1 %v2047_v19 }
  0x5f   : > { %1879 = vmatprep.subr.bf16.mxu1 %v2049_v21 }
  0x60   : > { %1490 = vmatpush1.bf16.msra.mxu0 %v2063_v33 }
  0x61   : > { %1491 = vmatprep.subr.bf16.mxu0 %v2115_v3 }
  0x62   : > { %1880 = vmatpush3.bf16.msra.mxu1 %v2050_v22 }
  0x63   : > { %1881 = vmatprep.subr.bf16.mxu1 %v2052_v24 }
  0x64   : > { %1492 = vmatpush1.bf16.msra.mxu0 %v2066_v36 }
  0x65   : > { %1493 = vmatprep.subr.bf16.mxu0 %v2115_v3 }
  0x66   : > { %1882 = vmatpush3.bf16.msra.mxu1 %v2053_v26 }
  0x67   : > { %1883 = vmatprep.subr.bf16.mxu1 %v2055_v27 }
  0x68   : > { %1494 = vmatpush1.bf16.msra.mxu0 %v2069_v39 }
  0x69   : > { %1495 = vmatprep.subr.bf16.mxu0 %v2115_v3 }
  0x6a   : > { %1884 = vmatpush3.bf16.msra.mxu1 %v2056_v30 }
  0x6b   : > { %1913 = vmatprep.subr.bf16.mxu1 %v2061_v31 }
  0x6c   : > { %1496 = vmatpush1.bf16.msra.mxu0 %v2072_v42 }
  0x6d   : > { %1391 = vmatmul.mubr.bf16.vlgmr.msra.gmra.mxu1 %v2058_v32  ;;  %1505 = vmatprep.subr.bf16.mxu0 %v2115_v3 }
  0x6e   : > { %1914 = vmatpush3.bf16.msra.mxu1 %v2062_v34  ;;  %1472 = vmatprep.mubr.bf16.mxu1 %v2087_v51 }
  0x6f   : > { %1915 = vmatprep.subr.bf16.mxu1 %v2064_v35 }
  0x70   : > { %1506 = vmatpush2.bf16.msra.mxu0 %v2075_v45 }
  0x71   : > { %1507 = vmatprep.subr.bf16.mxu0 %v2115_v3 }
  0x72   : > { %1916 = vmatpush3.bf16.msra.mxu1 %v2065_v37 }
  0x73   : > { %1917 = vmatprep.subr.bf16.mxu1 %v2067_v38 }
  0x74   : > { %1508 = vmatpush2.bf16.msra.mxu0 %v2078_v49 }
  0x75   : > { %1509 = vmatprep.subr.bf16.mxu0 %v2115_v3 }
  0x76   : > { %1918 = vmatpush3.bf16.msra.mxu1 %v2068_v40 }
  0x77   : > { %1919 = vmatprep.subr.bf16.mxu1 %v2070_v41 }
  0x78   : > { %1510 = vmatpush2.bf16.msra.mxu0 %v2081_v54 }
  0x79   : > { %1511 = vmatprep.subr.bf16.mxu0 %v2115_v3 }
  0x7a   : > { %1920 = vmatpush3.bf16.msra.mxu1 %v2071_v43 }
  0x7b   : > { %1921 = vmatprep.subr.bf16.mxu1 %v2073_v44 }
  0x7c   : > { %1512 = vmatpush2.bf16.msra.mxu0 %v2084_v58 }
  0x7e   : > { %1922 = vmatpush3.bf16.msra.mxu1 %v2074_v46 }
  0x7f   : > { %1923 = vmatprep.subr.bf16.mxu1 %v2076_v47  ;;  %1514 = vmatmul.mubr.bf16.vlgmr.msra.gmra.mxu0 %v2090_v60 }
  0x82   : > { %1924 = vmatpush3.bf16.msra.mxu1 %v2077_v48 }
  0x83   : > { %1925 = vmatprep.subr.bf16.mxu1 %v2079_v50 }
  0x86   : > { %1926 = vmatpush3.bf16.msra.mxu1 %v2080_v55 }
  0x87   : > { %1927 = vmatprep.subr.bf16.mxu1 %v2082_v56 }
  0x8a   : > { %1928 = vmatpush3.bf16.msra.mxu1 %v2083_v59 }
  0x8d   : > { %1473 = vmatmul.mubr.bf16.vlgmr.msra.gmra.mxu1 %v2085_v61 }
  0xbf   : > { %v1529_v51 = vpop.permute.xlu0 %1528 }
  0xc3   : > { %v1534_v56 = vpop.permute.xlu0 %1533 }
  0xed   : > { %v1819_v62 = vpop.f32.mrf.mxu1 }
  0xef   : > { %v1820_v63 = vpop.f32.mrf.mxu1  ;;  %v1863_v4 = vpop.f32.mrf.mxu0 }
  0xf0   : > { %v1821_v12 = vadd.f32 %v1820_v63, %v1819_v62 }
  0xf1   : > { %v1822_v0 = vpop.f32.mrf.mxu1  ;;  %v1864_v3 = vpop.f32.mrf.mxu0 }
  0xf2   : > { %v1270_v17 = vadd.f32 %v1821_v12, %v1666_v13  ;;  %v1865_v24 = vadd.f32 %v1864_v3, %v1863_v4 }
  0xf3   : > { %v1823_v1 = vpop.f32.mrf.mxu1  ;;  %v1866_v7 = vpop.f32.mrf.mxu0 }
  0xf4   : > { %v1824_v18 = vadd.f32 %v1823_v1, %v1822_v0 }
  0xf5   : > { %v1867_v9 = vpop.f32.mrf.mxu0 }
  0xf6   : > { %v1273_v23 = vadd.f32 %v1824_v18, %v1666_v13  ;;  %v1868_v30 = vadd.f32 %v1867_v9, %v1866_v7 }
 0x10d   : > { %v1841_v2 = vpop.f32.mrf.mxu1 }
 0x10f   : > { %v1842_v5 = vpop.f32.mrf.mxu1  ;;  %v1907_v11 = vpop.f32.mrf.mxu0 }
 0x110   : > { %v1843_v15 = vadd.f32 %v1842_v5, %v1841_v2 }
 0x111   : > { %v1844_v6 = vpop.f32.mrf.mxu1  ;;  %v1908_v16 = vpop.f32.mrf.mxu0 }
 0x112   : > { %v1311_v20 = vadd.f32 %v1843_v15, %v1270_v17  ;;  %v1909_v35 = vadd.f32 %v1908_v16, %v1907_v11 }
 0x113   : > { %v1845_v8 = vpop.f32.mrf.mxu1  ;;  %v1910_v22 = vpop.f32.mrf.mxu0 }
 0x114   : > { %v1846_v21 = vadd.f32 %v1845_v8, %v1844_v6  ;;  %v1352_v29 = vadd.f32 %v1865_v24, %v1311_v20 }
 0x115   : > { %v1911_v28 = vpop.f32.mrf.mxu0 }
 0x116   : > { %v1314_v27 = vadd.f32 %v1846_v21, %v1273_v23  ;;  %v1912_v44 = vadd.f32 %v1911_v28, %v1910_v22 }
 0x118   : > { %v1355_v36 = vadd.f32 %v1868_v30, %v1314_v27 }
 0x12d   : > { %v1885_v10 = vpop.f32.mrf.mxu1 }
 0x12f   : > { %v1886_v14 = vpop.f32.mrf.mxu1 }
 0x130   : > { %v1887_v25 = vadd.f32 %v1886_v14, %v1885_v10 }
 0x131   : > { %v1888_v19 = vpop.f32.mrf.mxu1 }
 0x132   : > { %v1393_v31 = vadd.f32 %v1887_v25, %v1352_v29 }
 0x133   : > { %v1889_v26 = vpop.f32.mrf.mxu1 }
 0x134   : > { %v1890_v32 = vadd.f32 %v1889_v26, %v1888_v19  ;;  %v1434_v40 = vadd.f32 %v1909_v35, %v1393_v31 }
 0x136   : > { %v1396_v39 = vadd.f32 %v1890_v32, %v1355_v36 }
 0x138   : > { %v1437_v49 = vadd.f32 %v1912_v44, %v1396_v39 }
 0x13f   : > { %v1515_v33 = vpop.f32.mrf.mxu0 }
 0x141   : > { %v1517_v37 = vpop.f32.mrf.mxu0 }
 0x143   : > { %v1518_v42 = vpop.f32.mrf.mxu0 }
 0x145   : > { %v1520_v46 = vpop.f32.mrf.mxu0 }
 0x14d   : > { %v1929_v34 = vpop.f32.mrf.mxu1 }
 0x14f   : > { %v1930_v38 = vpop.f32.mrf.mxu1 }
 0x150   : > { %v1931_v41 = vadd.f32 %v1930_v38, %v1929_v34 }
 0x151   : > { %v1932_v43 = vpop.f32.mrf.mxu1 }
 0x152   : > { %v1475_v45 = vadd.f32 %v1931_v41, %v1434_v40 }
 0x153   : > { %v1933_v47 = vpop.f32.mrf.mxu1 }
 0x154   : > { %v1516_v48 = vadd.f32 %v1515_v33, %v1475_v45  ;;  %v1934_v50 = vadd.f32 %v1933_v47, %v1932_v43 }
 0x156   : > { %v1478_v52 = vadd.f32 %v1934_v50, %v1437_v49  ;;  %v1522_v53 = vmax.f32 %v1516_v48, 0.0 }
 0x158   : > { %v1519_v54 = vadd.f32 %v1518_v42, %v1478_v52  ;;  %v1536_v57 = vmul.f32 %v1529_v51, %v1522_v53 }
 0x15a   : > { %v1523_v55 = vmax.f32 %v1519_v54, 0.0 }
 0x15c   : > { %v1537_v58 = vmul.f32 %v1534_v56, %v1523_v55 }
 0x15e   : > { %v1801_v59 = vpack.c.bf16 %v1537_v58, %v1536_v57 }
 0x160   : > { %1802 = vst [vmem:[%s274_s9] sm:$0xff] %v1801_v59  }
 0x161 PF: > { %s14_s17 = sadd.s32 1, %s2113_s17   ;;  %s2547_s15 = smov %s2109_s16 }
 0x162   : > { %p11_p5 = scmp.ge.s32.totalorder %s14_s17, 4   ;;  %s2548_s16 = smov %s2550_s18 }
 0x164   :  { %13 = sbr.rel (!%p11_p5) target bundleno = 2 (0x2), region = 69 }

// kernel: voxelnet_encoder_forward.23
= control target key start
LH: loop header
LB: loop body
LE: loop exit
PB: predicated region body
PF: predicated region fallthrough
CT: control target
= control target key end

     0   :  { %s767_s12 = smov 0   ;;  %s769_s13 = smov 0   ;;  %s883_s0 = inlined_call_operand.vmem [shape: bf16[2,8,384], index: 0, kind: input, shape index: {}]   ;;  %s884_s1 = inlined_call_operand.vmem [shape: bf16[384,128], index: 1, kind: input, shape index: {}]   ;;  %s885_s2 = inlined_call_operand.vmem [shape: f32[1,128], index: 2, kind: input, shape index: {}]   ;;  %s886_s3 = inlined_call_operand.vmem [shape: bf16[2,8,128], index: 3, kind: output, shape index: {}]  }
   0x1   :  { %s771_s14 = smov 0  }
   0x2 LB: > { %s25_s15 = sadd.s32 1, %s739_s13  ;;  %p583_p0 = scmp.ge.s32.totalorder %s743_s14, 1  ;;  %s743_s14 = sphi %s771_s14, %s13_s14   ;;  %s739_s13 = sphi %s769_s13, %s888_s13   ;;  %s735_s12 = sphi %s767_s12, %s887_s12  }
   0x3   : > { %p27_p1 = scmp.ge.s32.totalorder %s25_s15, 2  ;;  %p157_p2 = scmp.lt.s32.totalorder %s743_s14, 3 }
   0x5   : > { %s890_s15 = smov (%p27_p1, %s25_s15), 0  ;;  %p158_p3 = pnand %p583_p0, %p157_p2 }
   0x6   : > { %p187_p4 = scmp.lt.s32.totalorder (!%p158_p3), %s735_s12, 1 }
   0x7   : > { %161 = sbr.rel (%p158_p3) target bundleno = 251 (0xfb), region = 32 }
   0xc   : > { %v694_v0 = vld [vmem:[%s884_s1 + $0x78] sm:$0xff]   ;;  %v745_v1 = vmov 0.0   ;;  %v697_v4 = vld [vmem:[%s884_s1 + $0x70] sm:$0xff]   ;;  %vm746_vm0 = vmmov 0   ;;  %v700_v7 = vld [vmem:[%s884_s1 + $0x68] sm:$0xff]   ;;  %s892_s12 = smov (!%p187_p4, %s735_s12), 1 }
   0xd   : > { %647 = vmatprep.subr.bf16.mxu1 %v745_v1  ;;  %v695_v2 = vld [vmem:[%s884_s1 + $0x38] sm:$0xff]   ;;  %616 = vmatprep.subr.bf16.mxu0 %v694_v0  ;;  %v698_v5 = vld [vmem:[%s884_s1 + $0x30] sm:$0xff]   ;;  %v701_v8 = vld [vmem:[%s884_s1 + $0x28] sm:$0xff]   ;;  %s667_s25 = smul.u32 12, %s892_s12  ;;  %s585_s24 = sshll.u32 %s892_s12, 2 }
   0xe   : > { %v696_v3 = vld [vmem:[%s884_s1 + $0xb8] sm:$0xff]   ;;  %617 = vmatpush3.bf16.msra.mxu0 %v695_v2  ;;  %663 = vmatprep.mubr.msk.bf16.mxu1 %vm746_vm0, %v745_v1  ;;  %v699_v6 = vld [vmem:[%s884_s1 + $0xb0] sm:$0xff]   ;;  %v702_v9 = vld [vmem:[%s884_s1 + $0xa8] sm:$0xff]   ;;  %s202_s27 = scalar_lea.vmem %s886_s3, %s585_s24 }
   0xf   : > { %648 = vmatpush3.bf16.msra.mxu1 %v696_v3  ;;  %618 = vmatprep.subr.bf16.mxu0 %v697_v4  ;;  %v703_v10 = vld [vmem:[%s884_s1 + $0x60] sm:$0xff]   ;;  %v706_v13 = vld [vmem:[%s884_s1 + $0x58] sm:$0xff]   ;;  %v709_v16 = vld [vmem:[%s884_s1 + $0x50] sm:$0xff]   ;;  %s195_s7 = scalar_lea.vmem %s883_s0, %s667_s25 }
  0x10   : > { %649 = vmatprep.subr.bf16.mxu1 %v745_v1  ;;  %v704_v11 = vld [vmem:[%s884_s1 + $0x20] sm:$0xff]   ;;  %v707_v14 = vld [vmem:[%s884_s1 + $0x18] sm:$0xff]   ;;  %v710_v17 = vld [vmem:[%s884_s1 + $0x10] sm:$0xff]  }
  0x11   : > { %v705_v12 = vld [vmem:[%s884_s1 + $0xa0] sm:$0xff]   ;;  %v708_v15 = vld [vmem:[%s884_s1 + $0x98] sm:$0xff]   ;;  %v711_v18 = vld [vmem:[%s884_s1 + $0x90] sm:$0xff]  }
  0x12   : > { %619 = vmatpush3.bf16.msra.mxu0 %v698_v5  ;;  %v712_v19 = vld [vmem:[%s884_s1 + $0x48] sm:$0xff]   ;;  %v715_v22 = vld [vmem:[%s884_s1 + $0x40] sm:$0xff]  }
  0x13   : > { %650 = vmatpush3.bf16.msra.mxu1 %v699_v6  ;;  %620 = vmatprep.subr.bf16.mxu0 %v700_v7  ;;  %v713_v20 = vld [vmem:[%s884_s1 + $0x8] sm:$0xff]   ;;  %v204_v23 = vld [vmem:[%s195_s7] sm:$0xff] }
  0x14   : > { %651 = vmatprep.subr.bf16.mxu1 %v745_v1  ;;  %v714_v21 = vld [vmem:[%s884_s1 + $0x88] sm:$0xff]   ;;  %v588_v24 = vcombine.high %v204_v23, %v204_v23  ;;  %v716_v25 = vld [vmem:[%s884_s1] sm:$0xff]   ;;  %v587_v27 = vcombine.low %v204_v23, %v204_v23 }
  0x15   : > { %v717_v26 = vld [vmem:[%s884_s1 + $0x80] sm:$0xff]   ;;  %v720_v28 = vld [vmem:[%s195_s7 + $0x8] ss:$0 sps:$4 sm:$0xff]  }
  0x16   : > { %621 = vmatpush3.bf16.msra.mxu0 %v701_v8  ;;  %448 = vmatprep.mubr.bf16.mxu0 %v588_v24  ;;  %v586_v31 = vld [vmem:[%s885_s2] ss:$0 sm:$0xff] }
  0x17   : > { %652 = vmatpush3.bf16.msra.mxu1 %v702_v9  ;;  %622 = vmatprep.subr.bf16.mxu0 %v703_v10 }
  0x18   : > { %653 = vmatprep.subr.bf16.mxu1 %v745_v1 }
  0x1a   : > { %623 = vmatpush3.bf16.msra.mxu0 %v704_v11 }
  0x1b   : > { %654 = vmatpush3.bf16.msra.mxu1 %v705_v12  ;;  %624 = vmatprep.subr.bf16.mxu0 %v706_v13 }
  0x1c   : > { %655 = vmatprep.subr.bf16.mxu1 %v745_v1 }
  0x1e   : > { %625 = vmatpush3.bf16.msra.mxu0 %v707_v14 }
  0x1f   : > { %656 = vmatpush3.bf16.msra.mxu1 %v708_v15  ;;  %626 = vmatprep.subr.bf16.mxu0 %v709_v16 }
  0x20   : > { %657 = vmatprep.subr.bf16.mxu1 %v745_v1 }
  0x22   : > { %627 = vmatpush3.bf16.msra.mxu0 %v710_v17 }
  0x23   : > { %658 = vmatpush3.bf16.msra.mxu1 %v711_v18  ;;  %628 = vmatprep.subr.bf16.mxu0 %v712_v19 }
  0x24   : > { %659 = vmatprep.subr.bf16.mxu1 %v745_v1 }
  0x26   : > { %629 = vmatpush3.bf16.msra.mxu0 %v713_v20 }
  0x27   : > { %660 = vmatpush3.bf16.msra.mxu1 %v714_v21  ;;  %630 = vmatprep.subr.bf16.mxu0 %v715_v22 }
  0x28   : > { %661 = vmatprep.subr.bf16.mxu1 %v745_v1 }
  0x2a   : > { %631 = vmatpush3.bf16.msra.mxu0 %v716_v25 }
  0x2b   : > { %662 = vmatpush3.bf16.msra.mxu1 %v717_v26 }
  0x2d   : > { %449 = vmatmul.mubr.bf16.vlgmr.msra.gmra.mxu0 %v587_v27 }
  0x2e   : > { %664 = vmatmul.mubr.bf16.vlgmr.msra.gmra.mxu1 %v720_v28 }
  0xed   : > { %v632_v29 = vpop.f32.mrf.mxu0 }
  0xee   : > { %v490_v30 = vpop.f32.mrf.mxu1 }
  0xef   : > { %v633_v32 = vpop.f32.mrf.mxu0 }
  0xf0   : > { %v634_v33 = vadd.f32 %v633_v32, %v632_v29  ;;  %v665_v34 = vpop.f32.mrf.mxu1 }
  0xf1   : > { %v635_v35 = vpop.f32.mrf.mxu0 }
  0xf2   : > { %v451_v36 = vadd.f32 %v634_v33, %v586_v31  ;;  %v493_v37 = vpop.f32.mrf.mxu1 }
  0xf3   : > { %v636_v38 = vpop.f32.mrf.mxu0 }
  0xf4   : > { %v491_v39 = vadd.f32 %v490_v30, %v451_v36  ;;  %v666_v40 = vpop.f32.mrf.mxu1 }
  0xf6   : > { %v496_v41 = vmax.f32 %v491_v39, 0.0 }
  0xf8   : > { %v497_v42 = vpack.c.bf16 %v496_v41, %v496_v41 }
  0xfa   : > { %498 = vst [vmem:[%s202_s27] sm:$0xf] %v497_v42 }
  0xfb PF: > { %s13_s14 = sadd.s32 1, %s743_s14   ;;  %s887_s12 = smov %s739_s13 }
  0xfc   : > { %p10_p5 = scmp.ge.s32.totalorder %s13_s14, 4   ;;  %s888_s13 = smov %s890_s15 }
  0xfe   :  { %12 = sbr.rel (!%p10_p5) target bundleno = 2 (0x2), region = 62 }

// kernel: voxelnet_encoder_forward.21
= control target key start
LH: loop header
LB: loop body
LE: loop exit
PB: predicated region body
PF: predicated region fallthrough
CT: control target
= control target key end

     0   :  { %s3803_s15 = smov 0   ;;  %s3805_s16 = smov 0   ;;  %s4528_s0 = inlined_call_operand.vmem [shape: bf16[2,16,3456], index: 0, kind: input, shape index: {}]   ;;  %s4529_s1 = inlined_call_operand.vmem [shape: bf16[3456,128], index: 1, kind: input, shape index: {}]   ;;  %s4530_s2 = inlined_call_operand.vmem [shape: f32[1,128], index: 2, kind: input, shape index: {}]   ;;  %s4531_s3 = inlined_call_operand.vmem [shape: f32[2,16,1], index: 3, kind: input, shape index: {}]   ;;  %s4532_s4 = inlined_call_operand.vmem [shape: bf16[2,16,128], index: 4, kind: output, shape index: {}]  }
   0x1   :  { %s3807_s17 = smov 0  }
   0x2 LB: > { %s26_s18 = sadd.s32 1, %s3769_s16  ;;  %p2888_p0 = scmp.ge.s32.totalorder %s3773_s17, 1  ;;  %s3773_s17 = sphi %s3807_s17, %s14_s17   ;;  %s3769_s16 = sphi %s3805_s16, %s4534_s16   ;;  %s3765_s15 = sphi %s3803_s15, %s4533_s15  }
   0x3   : > { %p28_p1 = scmp.ge.s32.totalorder %s26_s18, 2  ;;  %p201_p2 = scmp.lt.s32.totalorder %s3773_s17, 3 }
   0x5   : > { %s4536_s18 = smov (%p28_p1, %s26_s18), 0  ;;  %p202_p3 = pnand %p2888_p0, %p201_p2 }
   0x6   : > { %p246_p4 = scmp.lt.s32.totalorder (!%p202_p3), %s3765_s15, 1 }
   0x7   : > { %205 = sbr.rel (%p202_p3) target bundleno = 450 (0x1c2), region = 36 }
   0xc   : > { %v3495_v0 = vld [vmem:[%s4529_s1 + $0x78] sm:$0xff]   ;;  %v3499_v4 = vld [vmem:[%s4529_s1 + $0x70] sm:$0xff]   ;;  %v3503_v8 = vld [vmem:[%s4529_s1 + $0x68] sm:$0xff]   ;;  %s4538_s15 = smov (!%p246_p4, %s3765_s15), 1  ;;  %vm3777_vm0 = vmmov 0  }
   0xd   : > { %v3496_v1 = vld [vmem:[%s4529_s1 + $0xf8] sm:$0xff]   ;;  %3151 = vmatprep.subr.bf16.mxu0 %v3495_v0  ;;  %v3500_v5 = vld [vmem:[%s4529_s1 + $0xf0] sm:$0xff]   ;;  %v3504_v9 = vld [vmem:[%s4529_s1 + $0xe8] sm:$0xff]   ;;  %s3466_s27 = smul.u32 216, %s4538_s15  ;;  %s3142_s22 = sshll.u32 %s4538_s15, 4 }
   0xe   : > { %v3497_v2 = vld [vmem:[%s4529_s1 + $0x38] sm:$0xff]   ;;  %3173 = vmatprep.subr.bf16.mxu1 %v3496_v1  ;;  %v3501_v6 = vld [vmem:[%s4529_s1 + $0x30] sm:$0xff]   ;;  %v3505_v10 = vld [vmem:[%s4529_s1 + $0x28] sm:$0xff]   ;;  %s264_s29 = scalar_lea.vmem %s4531_s3, %s3142_s22  ;;  %s3143_s11 = sshll.u32 %s4538_s15, 3 }
   0xf   : > { %v3498_v3 = vld [vmem:[%s4529_s1 + $0xb8] sm:$0xff]   ;;  %3152 = vmatpush3.bf16.msra.mxu0 %v3497_v2  ;;  %v3502_v7 = vld [vmem:[%s4529_s1 + $0xb0] sm:$0xff]   ;;  %v3506_v11 = vld [vmem:[%s4529_s1 + $0xa8] sm:$0xff]   ;;  %s3921_s12 = scalar_lea.vmem %s4528_s0, %s3466_s27  ;;  %s274_s19 = scalar_lea.vmem %s4532_s4, %s3143_s11 }
  0x10   : > { %3174 = vmatpush3.bf16.msra.mxu1 %v3498_v3  ;;  %3153 = vmatprep.subr.bf16.mxu0 %v3499_v4  ;;  %v3507_v12 = vld [vmem:[%s4529_s1 + $0x60] sm:$0xff]   ;;  %v3511_v16 = vld [vmem:[%s4529_s1 + $0x58] sm:$0xff]   ;;  %v3515_v20 = vld [vmem:[%s4529_s1 + $0x50] sm:$0xff]  }
  0x11   : > { %3175 = vmatprep.subr.bf16.mxu1 %v3500_v5  ;;  %v3508_v13 = vld [vmem:[%s4529_s1 + $0xe0] sm:$0xff]   ;;  %v3512_v17 = vld [vmem:[%s4529_s1 + $0xd8] sm:$0xff]   ;;  %v3516_v21 = vld [vmem:[%s4529_s1 + $0xd0] sm:$0xff]  }
  0x12   : > { %v3509_v14 = vld [vmem:[%s4529_s1 + $0x20] sm:$0xff]   ;;  %v3513_v18 = vld [vmem:[%s4529_s1 + $0x18] sm:$0xff]   ;;  %v3517_v22 = vld [vmem:[%s4529_s1 + $0x10] sm:$0xff]  }
  0x13   : > { %3154 = vmatpush3.bf16.msra.mxu0 %v3501_v6  ;;  %v3510_v15 = vld [vmem:[%s4529_s1 + $0xa0] sm:$0xff]   ;;  %v3514_v19 = vld [vmem:[%s4529_s1 + $0x98] sm:$0xff]   ;;  %v3518_v23 = vld [vmem:[%s4529_s1 + $0x90] sm:$0xff]  }
  0x14   : > { %3176 = vmatpush3.bf16.msra.mxu1 %v3502_v7  ;;  %3155 = vmatprep.subr.bf16.mxu0 %v3503_v8  ;;  %v3519_v24 = vld [vmem:[%s4529_s1 + $0x48] sm:$0xff]   ;;  %v3523_v28 = vld [vmem:[%s4529_s1 + $0x40] sm:$0xff]   ;;  %v3533_v36 = vld [vmem:[%s4529_s1 + $0x178] sm:$0xff]  }
  0x15   : > { %3177 = vmatprep.subr.bf16.mxu1 %v3504_v9  ;;  %v3520_v25 = vld [vmem:[%s4529_s1 + $0xc8] sm:$0xff]   ;;  %v3524_v29 = vld [vmem:[%s4529_s1 + $0xc0] sm:$0xff]   ;;  %v3534_v37 = vld [vmem:[%s4529_s1 + $0x1f8] sm:$0xff]  }
  0x16   : > { %v3521_v26 = vld [vmem:[%s4529_s1 + $0x8] sm:$0xff]   ;;  %v3525_v30 = vld [vmem:[%s4529_s1] sm:$0xff]   ;;  %v3535_v38 = vld [vmem:[%s4529_s1 + $0x138] sm:$0xff]  }
  0x17   : > { %3156 = vmatpush3.bf16.msra.mxu0 %v3505_v10  ;;  %v3522_v27 = vld [vmem:[%s4529_s1 + $0x88] sm:$0xff]   ;;  %v3526_v31 = vld [vmem:[%s4529_s1 + $0x80] sm:$0xff]   ;;  %v3536_v39 = vld [vmem:[%s4529_s1 + $0x1b8] sm:$0xff]  }
  0x18   : > { %3178 = vmatpush3.bf16.msra.mxu1 %v3506_v11  ;;  %3157 = vmatprep.subr.bf16.mxu0 %v3507_v12  ;;  %v3527_v32 = vld [vmem:[%s3921_s12] ss:$108 sps:$4 sm:$0xff]   ;;  %v3529_v33 = vld [vmem:[%s3921_s12 + $0x4] ss:$108 sps:$4 sm:$0xff]   ;;  %v3530_v34 = vld [vmem:[%s3921_s12 + $0x8] ss:$108 sps:$4 sm:$0xff]  }
  0x19   : > { %3179 = vmatprep.subr.bf16.mxu1 %v3508_v13  ;;  %v3532_v35 = vld [vmem:[%s3921_s12 + $0xc] ss:$108 sps:$4 sm:$0xff]   ;;  %2208 = vmatprep.mubr.bf16.mxu0 %v3529_v33  ;;  %v3537_v40 = vld [vmem:[%s4529_s1 + $0x170] sm:$0xff]   ;;  %v3545_v48 = vld [vmem:[%s4529_s1 + $0x160] sm:$0xff]  }
  0x1a   : > { %2249 = vmatprep.mubr.bf16.mxu1 %v3532_v35  ;;  %v3538_v41 = vld [vmem:[%s4529_s1 + $0x1f0] sm:$0xff]   ;;  %v3541_v44 = vld [vmem:[%s4529_s1 + $0x168] sm:$0xff]   ;;  %v3546_v49 = vld [vmem:[%s4529_s1 + $0x1e0] sm:$0xff]  }
  0x1b   : > { %3158 = vmatpush3.bf16.msra.mxu0 %v3509_v14  ;;  %v3539_v42 = vld [vmem:[%s4529_s1 + $0x130] sm:$0xff]   ;;  %v3542_v45 = vld [vmem:[%s4529_s1 + $0x1e8] sm:$0xff]   ;;  %v3547_v50 = vld [vmem:[%s4529_s1 + $0x120] sm:$0xff]  }
  0x1c   : > { %3180 = vmatpush3.bf16.msra.mxu1 %v3510_v15  ;;  %3159 = vmatprep.subr.bf16.mxu0 %v3511_v16  ;;  %v3540_v43 = vld [vmem:[%s4529_s1 + $0x1b0] sm:$0xff]   ;;  %v3543_v46 = vld [vmem:[%s4529_s1 + $0x128] sm:$0xff]   ;;  %v3548_v51 = vld [vmem:[%s4529_s1 + $0x1a0] sm:$0xff]  }
  0x1d   : > { %3181 = vmatprep.subr.bf16.mxu1 %v3512_v17  ;;  %v3544_v47 = vld [vmem:[%s4529_s1 + $0x1a8] sm:$0xff]   ;;  %v3549_v52 = vld [vmem:[%s4529_s1 + $0x158] sm:$0xff]   ;;  %v3553_v56 = vld [vmem:[%s4529_s1 + $0x150] sm:$0xff]  }
  0x1e   : > { %v3550_v53 = vld [vmem:[%s4529_s1 + $0x1d8] sm:$0xff]   ;;  %v3554_v57 = vld [vmem:[%s4529_s1 + $0x1d0] sm:$0xff]   ;;  %v3557_v60 = vld [vmem:[%s4529_s1 + $0x148] sm:$0xff]  }
  0x1f   : > { %3160 = vmatpush3.bf16.msra.mxu0 %v3513_v18  ;;  %v3551_v54 = vld [vmem:[%s4529_s1 + $0x118] sm:$0xff]   ;;  %v3555_v58 = vld [vmem:[%s4529_s1 + $0x110] sm:$0xff]   ;;  %v3558_v61 = vld [vmem:[%s4529_s1 + $0x1c8] sm:$0xff]  }
  0x20   : > { %3182 = vmatpush3.bf16.msra.mxu1 %v3514_v19  ;;  %3161 = vmatprep.subr.bf16.mxu0 %v3515_v20  ;;  %v3552_v55 = vld [vmem:[%s4529_s1 + $0x198] sm:$0xff]   ;;  %v3556_v59 = vld [vmem:[%s4529_s1 + $0x190] sm:$0xff]   ;;  %v3559_v62 = vld [vmem:[%s4529_s1 + $0x108] sm:$0xff]  }
  0x21   : > { %3183 = vmatprep.subr.bf16.mxu1 %v3516_v21  ;;  %v3560_v63 = vld [vmem:[%s4529_s1 + $0x188] sm:$0xff]   ;;  %v3561_v0 = vld [vmem:[%s4529_s1 + $0x140] sm:$0xff]   ;;  %v3565_v4 = vld [vmem:[%s3921_s12 + $0x10] ss:$108 sps:$4 sm:$0xff]  }
  0x22   : > { %v3562_v1 = vld [vmem:[%s4529_s1 + $0x1c0] sm:$0xff]   ;;  %v3570_v7 = vld [vmem:[%s3921_s12 + $0x1c] ss:$108 sps:$4 sm:$0xff]   ;;  %v3575_v12 = vld [vmem:[%s4529_s1 + $0x270] sm:$0xff]  }
  0x23   : > { %3162 = vmatpush3.bf16.msra.mxu0 %v3517_v22  ;;  %v3563_v2 = vld [vmem:[%s4529_s1 + $0x100] sm:$0xff]   ;;  %v3571_v8 = vld [vmem:[%s4529_s1 + $0x278] sm:$0xff]   ;;  %v3576_v13 = vld [vmem:[%s4529_s1 + $0x2f0] sm:$0xff]  }
  0x24   : > { %3184 = vmatpush3.bf16.msra.mxu1 %v3518_v23  ;;  %3163 = vmatprep.subr.bf16.mxu0 %v3519_v24  ;;  %v3564_v3 = vld [vmem:[%s4529_s1 + $0x180] sm:$0xff]   ;;  %v3572_v9 = vld [vmem:[%s4529_s1 + $0x2f8] sm:$0xff]   ;;  %v3577_v14 = vld [vmem:[%s4529_s1 + $0x230] sm:$0xff]  }
  0x25   : > { %3185 = vmatprep.subr.bf16.mxu1 %v3520_v25  ;;  %v3567_v5 = vld [vmem:[%s3921_s12 + $0x14] ss:$108 sps:$4 sm:$0xff]   ;;  %v3568_v6 = vld [vmem:[%s3921_s12 + $0x18] ss:$108 sps:$4 sm:$0xff]   ;;  %v3579_v16 = vld [vmem:[%s4529_s1 + $0x268] sm:$0xff]  }
  0x26   : > { %v3573_v10 = vld [vmem:[%s4529_s1 + $0x238] sm:$0xff]   ;;  %v3578_v15 = vld [vmem:[%s4529_s1 + $0x2b0] sm:$0xff]   ;;  %v3580_v17 = vld [vmem:[%s4529_s1 + $0x2e8] sm:$0xff]  }
  0x27   : > { %3164 = vmatpush3.bf16.msra.mxu0 %v3521_v26  ;;  %v3574_v11 = vld [vmem:[%s4529_s1 + $0x2b8] sm:$0xff]   ;;  %v3581_v18 = vld [vmem:[%s4529_s1 + $0x228] sm:$0xff]   ;;  %v3583_v20 = vld [vmem:[%s4529_s1 + $0x260] sm:$0xff]  }
  0x28   : > { %3186 = vmatpush3.bf16.msra.mxu1 %v3522_v27  ;;  %3165 = vmatprep.subr.bf16.mxu0 %v3523_v28  ;;  %v3582_v19 = vld [vmem:[%s4529_s1 + $0x2a8] sm:$0xff]   ;;  %v3584_v21 = vld [vmem:[%s4529_s1 + $0x2e0] sm:$0xff]   ;;  %v3587_v24 = vld [vmem:[%s4529_s1 + $0x258] sm:$0xff]  }
  0x29   : > { %3187 = vmatprep.subr.bf16.mxu1 %v3524_v29  ;;  %v3585_v22 = vld [vmem:[%s4529_s1 + $0x220] sm:$0xff]   ;;  %v3588_v25 = vld [vmem:[%s4529_s1 + $0x2d8] sm:$0xff]   ;;  %v3591_v28 = vld [vmem:[%s4529_s1 + $0x250] sm:$0xff]  }
  0x2a   : > { %v3586_v23 = vld [vmem:[%s4529_s1 + $0x2a0] sm:$0xff]   ;;  %v3589_v26 = vld [vmem:[%s4529_s1 + $0x218] sm:$0xff]   ;;  %v3592_v29 = vld [vmem:[%s4529_s1 + $0x2d0] sm:$0xff]  }
  0x2b   : > { %3166 = vmatpush3.bf16.msra.mxu0 %v3525_v30  ;;  %v3590_v27 = vld [vmem:[%s4529_s1 + $0x298] sm:$0xff]   ;;  %v3593_v30 = vld [vmem:[%s4529_s1 + $0x210] sm:$0xff]   ;;  %v3596_v33 = vld [vmem:[%s4529_s1 + $0x2c8] sm:$0xff]  }
  0x2c   : > { %3188 = vmatpush3.bf16.msra.mxu1 %v3526_v31  ;;  %3195 = vmatprep.subr.bf16.mxu0 %v3533_v36  ;;  %v3594_v31 = vld [vmem:[%s4529_s1 + $0x290] sm:$0xff]   ;;  %v3598_v35 = vld [vmem:[%s4529_s1 + $0x288] sm:$0xff]   ;;  %v3599_v36 = vld [vmem:[%s4529_s1 + $0x240] sm:$0xff]  }
  0x2d   : > { %3217 = vmatprep.subr.bf16.mxu1 %v3534_v37  ;;  %v3600_v37 = vld [vmem:[%s4529_s1 + $0x2c0] sm:$0xff]  }
  0x2e   : > { %2209 = vmatmul.mubr.bf16.vlgmr.msra.gmra.mxu0 %v3527_v32  ;;  %v3595_v32 = vld [vmem:[%s4529_s1 + $0x248] sm:$0xff]  }
  0x2f   : > { %2250 = vmatmul.mubr.bf16.vlgmr.msra.gmra.mxu1 %v3530_v34  ;;  %3196 = vmatpush3.bf16.msra.mxu0 %v3535_v38  ;;  %v3597_v34 = vld [vmem:[%s4529_s1 + $0x208] sm:$0xff]   ;;  %v3601_v38 = vld [vmem:[%s4529_s1 + $0x200] sm:$0xff]  }
  0x30   : > { %3218 = vmatpush3.bf16.msra.mxu1 %v3536_v39  ;;  %3197 = vmatprep.subr.bf16.mxu0 %v3537_v40  ;;  %v3602_v39 = vld [vmem:[%s4529_s1 + $0x280] sm:$0xff]  }
  0x31   : > { %3219 = vmatprep.subr.bf16.mxu1 %v3538_v41  ;;  %2290 = vmatprep.mubr.bf16.mxu0 %v3567_v5  ;;  %v3603_v40 = vld [vmem:[%s3921_s12 + $0x20] ss:$108 sps:$4 sm:$0xff]   ;;  %v3605_v41 = vld [vmem:[%s3921_s12 + $0x24] ss:$108 sps:$4 sm:$0xff]  }
  0x32   : > { %2331 = vmatprep.mubr.bf16.mxu1 %v3570_v7  ;;  %v3634_v5 = vld [vmem:[%s4529_s1 + $0x3c8] sm:$0xff]  }
  0x33   : > { %3198 = vmatpush3.bf16.msra.mxu0 %v3539_v42  ;;  %v3606_v42 = vld [vmem:[%s3921_s12 + $0x28] ss:$108 sps:$4 sm:$0xff]  }
  0x34   : > { %3220 = vmatpush3.bf16.msra.mxu1 %v3540_v43  ;;  %3199 = vmatprep.subr.bf16.mxu0 %v3541_v44  ;;  %v3608_v43 = vld [vmem:[%s3921_s12 + $0x2c] ss:$108 sps:$4 sm:$0xff]  }
  0x35   : > { %3221 = vmatprep.subr.bf16.mxu1 %v3542_v45  ;;  %v3609_v44 = vld [vmem:[%s4529_s1 + $0x378] sm:$0xff]   ;;  %v3636_v7 = vld [vmem:[%s4529_s1 + $0x388] sm:$0xff]  }
  0x36   : > { %v3610_v45 = vld [vmem:[%s4529_s1 + $0x3f8] sm:$0xff]  }
  0x37   : > { %3200 = vmatpush3.bf16.msra.mxu0 %v3543_v46  ;;  %v3611_v46 = vld [vmem:[%s4529_s1 + $0x338] sm:$0xff]  }
  0x38   : > { %3222 = vmatpush3.bf16.msra.mxu1 %v3544_v47  ;;  %3201 = vmatprep.subr.bf16.mxu0 %v3545_v48  ;;  %v3612_v47 = vld [vmem:[%s4529_s1 + $0x3b8] sm:$0xff]   ;;  %v3613_v48 = vld [vmem:[%s4529_s1 + $0x370] sm:$0xff]  }
  0x39   : > { %3223 = vmatprep.subr.bf16.mxu1 %v3546_v49  ;;  %v3614_v49 = vld [vmem:[%s4529_s1 + $0x3f0] sm:$0xff]  }
  0x3b   : > { %3202 = vmatpush3.bf16.msra.mxu0 %v3547_v50  ;;  %v3615_v50 = vld [vmem:[%s4529_s1 + $0x330] sm:$0xff]  }
  0x3c   : > { %3224 = vmatpush3.bf16.msra.mxu1 %v3548_v51  ;;  %3203 = vmatprep.subr.bf16.mxu0 %v3549_v52  ;;  %v3616_v51 = vld [vmem:[%s4529_s1 + $0x3b0] sm:$0xff]   ;;  %v3617_v52 = vld [vmem:[%s4529_s1 + $0x368] sm:$0xff]  }
  0x3d   : > { %3225 = vmatprep.subr.bf16.mxu1 %v3550_v53  ;;  %v3618_v53 = vld [vmem:[%s4529_s1 + $0x3e8] sm:$0xff]  }
  0x3f   : > { %3204 = vmatpush3.bf16.msra.mxu0 %v3551_v54  ;;  %v3619_v54 = vld [vmem:[%s4529_s1 + $0x328] sm:$0xff]  }
  0x40   : > { %3226 = vmatpush3.bf16.msra.mxu1 %v3552_v55  ;;  %3205 = vmatprep.subr.bf16.mxu0 %v3553_v56  ;;  %v3620_v55 = vld [vmem:[%s4529_s1 + $0x3a8] sm:$0xff]   ;;  %v3621_v56 = vld [vmem:[%s4529_s1 + $0x360] sm:$0xff]  }
  0x41   : > { %3227 = vmatprep.subr.bf16.mxu1 %v3554_v57  ;;  %v3622_v57 = vld [vmem:[%s4529_s1 + $0x3e0] sm:$0xff]  }
  0x43   : > { %3206 = vmatpush3.bf16.msra.mxu0 %v3555_v58  ;;  %v3623_v58 = vld [vmem:[%s4529_s1 + $0x320] sm:$0xff]  }
  0x44   : > { %3228 = vmatpush3.bf16.msra.mxu1 %v3556_v59  ;;  %3207 = vmatprep.subr.bf16.mxu0 %v3557_v60  ;;  %v3624_v59 = vld [vmem:[%s4529_s1 + $0x3a0] sm:$0xff]   ;;  %v3625_v60 = vld [vmem:[%s4529_s1 + $0x358] sm:$0xff]  }
  0x45   : > { %3229 = vmatprep.subr.bf16.mxu1 %v3558_v61  ;;  %v3626_v61 = vld [vmem:[%s4529_s1 + $0x3d8] sm:$0xff]  }
  0x47   : > { %3208 = vmatpush3.bf16.msra.mxu0 %v3559_v62  ;;  %v3627_v62 = vld [vmem:[%s4529_s1 + $0x318] sm:$0xff]  }
  0x48   : > { %3230 = vmatpush3.bf16.msra.mxu1 %v3560_v63  ;;  %3209 = vmatprep.subr.bf16.mxu0 %v3561_v0  ;;  %v3628_v63 = vld [vmem:[%s4529_s1 + $0x398] sm:$0xff]   ;;  %v3629_v0 = vld [vmem:[%s4529_s1 + $0x350] sm:$0xff]  }
  0x49   : > { %3231 = vmatprep.subr.bf16.mxu1 %v3562_v1  ;;  %v3630_v1 = vld [vmem:[%s4529_s1 + $0x3d0] sm:$0xff]  }
  0x4b   : > { %3210 = vmatpush3.bf16.msra.mxu0 %v3563_v2  ;;  %v3631_v2 = vld [vmem:[%s4529_s1 + $0x310] sm:$0xff]  }
  0x4c   : > { %3232 = vmatpush3.bf16.msra.mxu1 %v3564_v3  ;;  %3239 = vmatprep.subr.bf16.mxu0 %v3571_v8  ;;  %v3632_v3 = vld [vmem:[%s4529_s1 + $0x390] sm:$0xff]   ;;  %v3637_v8 = vld [vmem:[%s4529_s1 + $0x340] sm:$0xff]  }
  0x4d   : > { %3261 = vmatprep.subr.bf16.mxu1 %v3572_v9  ;;  %v3638_v9 = vld [vmem:[%s4529_s1 + $0x3c0] sm:$0xff]  }
  0x4e   : > { %2291 = vmatmul.mubr.bf16.vlgmr.msra.gmra.mxu0 %v3565_v4  ;;  %v3633_v4 = vld [vmem:[%s4529_s1 + $0x348] sm:$0xff]  }
  0x4f   : > { %2332 = vmatmul.mubr.bf16.vlgmr.msra.gmra.mxu1 %v3568_v6  ;;  %3240 = vmatpush3.bf16.msra.mxu0 %v3573_v10  ;;  %v3635_v6 = vld [vmem:[%s4529_s1 + $0x308] sm:$0xff]   ;;  %v3639_v10 = vld [vmem:[%s4529_s1 + $0x300] sm:$0xff]  }
  0x50   : > { %3262 = vmatpush3.bf16.msra.mxu1 %v3574_v11  ;;  %3241 = vmatprep.subr.bf16.mxu0 %v3575_v12  ;;  %v3640_v11 = vld [vmem:[%s4529_s1 + $0x380] sm:$0xff]   ;;  %v3641_v12 = vld [vmem:[%s3921_s12 + $0x30] ss:$108 sps:$4 sm:$0xff]  }
  0x51   : > { %3263 = vmatprep.subr.bf16.mxu1 %v3576_v13  ;;  %2372 = vmatprep.mubr.bf16.mxu0 %v3605_v41  ;;  %v3643_v13 = vld [vmem:[%s3921_s12 + $0x34] ss:$108 sps:$4 sm:$0xff]   ;;  %v3672_v41 = vld [vmem:[%s4529_s1 + $0x4c8] sm:$0xff]  }
  0x52   : > { %2413 = vmatprep.mubr.bf16.mxu1 %v3608_v43  ;;  %v3674_v43 = vld [vmem:[%s4529_s1 + $0x488] sm:$0xff]  }
  0x53   : > { %3242 = vmatpush3.bf16.msra.mxu0 %v3577_v14  ;;  %v3644_v14 = vld [vmem:[%s3921_s12 + $0x38] ss:$108 sps:$4 sm:$0xff]  }
  0x54   : > { %3264 = vmatpush3.bf16.msra.mxu1 %v3578_v15  ;;  %3243 = vmatprep.subr.bf16.mxu0 %v3579_v16  ;;  %v3646_v15 = vld [vmem:[%s3921_s12 + $0x3c] ss:$108 sps:$4 sm:$0xff]  }
  0x55   : > { %3265 = vmatprep.subr.bf16.mxu1 %v3580_v17  ;;  %v3647_v16 = vld [vmem:[%s4529_s1 + $0x478] sm:$0xff]  }
  0x56   : > { %v3648_v17 = vld [vmem:[%s4529_s1 + $0x4f8] sm:$0xff]  }
  0x57   : > { %3244 = vmatpush3.bf16.msra.mxu0 %v3581_v18  ;;  %v3649_v18 = vld [vmem:[%s4529_s1 + $0x438] sm:$0xff]  }
  0x58   : > { %3266 = vmatpush3.bf16.msra.mxu1 %v3582_v19  ;;  %3245 = vmatprep.subr.bf16.mxu0 %v3583_v20  ;;  %v3650_v19 = vld [vmem:[%s4529_s1 + $0x4b8] sm:$0xff]   ;;  %v3651_v20 = vld [vmem:[%s4529_s1 + $0x470] sm:$0xff]  }
  0x59   : > { %3267 = vmatprep.subr.bf16.mxu1 %v3584_v21  ;;  %v3652_v21 = vld [vmem:[%s4529_s1 + $0x4f0] sm:$0xff]  }
  0x5b   : > { %3246 = vmatpush3.bf16.msra.mxu0 %v3585_v22  ;;  %v3653_v22 = vld [vmem:[%s4529_s1 + $0x430] sm:$0xff]  }
  0x5c   : > { %3268 = vmatpush3.bf16.msra.mxu1 %v3586_v23  ;;  %3247 = vmatprep.subr.bf16.mxu0 %v3587_v24  ;;  %v3654_v23 = vld [vmem:[%s4529_s1 + $0x4b0] sm:$0xff]   ;;  %v3655_v24 = vld [vmem:[%s4529_s1 + $0x468] sm:$0xff]  }
  0x5d   : > { %3269 = vmatprep.subr.bf16.mxu1 %v3588_v25  ;;  %v3656_v25 = vld [vmem:[%s4529_s1 + $0x4e8] sm:$0xff]  }
  0x5f   : > { %3248 = vmatpush3.bf16.msra.mxu0 %v3589_v26  ;;  %v3657_v26 = vld [vmem:[%s4529_s1 + $0x428] sm:$0xff]  }
  0x60   : > { %3270 = vmatpush3.bf16.msra.mxu1 %v3590_v27  ;;  %3249 = vmatprep.subr.bf16.mxu0 %v3591_v28  ;;  %v3658_v27 = vld [vmem:[%s4529_s1 + $0x4a8] sm:$0xff]   ;;  %v3659_v28 = vld [vmem:[%s4529_s1 + $0x460] sm:$0xff]  }
  0x61   : > { %3271 = vmatprep.subr.bf16.mxu1 %v3592_v29  ;;  %v3660_v29 = vld [vmem:[%s4529_s1 + $0x4e0] sm:$0xff]  }
  0x63   : > { %3250 = vmatpush3.bf16.msra.mxu0 %v3593_v30  ;;  %v3661_v30 = vld [vmem:[%s4529_s1 + $0x420] sm:$0xff]  }
  0x64   : > { %3272 = vmatpush3.bf16.msra.mxu1 %v3594_v31  ;;  %3251 = vmatprep.subr.bf16.mxu0 %v3595_v32  ;;  %v3662_v31 = vld [vmem:[%s4529_s1 + $0x4a0] sm:$0xff]   ;;  %v3663_v32 = vld [vmem:[%s4529_s1 + $0x458] sm:$0xff]  }
  0x65   : > { %3273 = vmatprep.subr.bf16.mxu1 %v3596_v33  ;;  %v3664_v33 = vld [vmem:[%s4529_s1 + $0x4d8] sm:$0xff]  }
  0x67   : > { %3252 = vmatpush3.bf16.msra.mxu0 %v3597_v34  ;;  %v3665_v34 = vld [vmem:[%s4529_s1 + $0x418] sm:$0xff]  }
  0x68   : > { %3274 = vmatpush3.bf16.msra.mxu1 %v3598_v35  ;;  %3253 = vmatprep.subr.bf16.mxu0 %v3599_v36  ;;  %v3666_v35 = vld [vmem:[%s4529_s1 + $0x498] sm:$0xff]   ;;  %v3667_v36 = vld [vmem:[%s4529_s1 + $0x450] sm:$0xff]  }
  0x69   : > { %3275 = vmatprep.subr.bf16.mxu1 %v3600_v37  ;;  %v3668_v37 = vld [vmem:[%s4529_s1 + $0x4d0] sm:$0xff]  }
  0x6b   : > { %3254 = vmatpush3.bf16.msra.mxu0 %v3601_v38  ;;  %v3669_v38 = vld [vmem:[%s4529_s1 + $0x410] sm:$0xff]  }
  0x6c   : > { %3276 = vmatpush3.bf16.msra.mxu1 %v3602_v39  ;;  %3283 = vmatprep.subr.bf16.mxu0 %v3609_v44  ;;  %v3670_v39 = vld [vmem:[%s4529_s1 + $0x490] sm:$0xff]   ;;  %v3675_v44 = vld [vmem:[%s4529_s1 + $0x440] sm:$0xff]  }
  0x6d   : > { %3305 = vmatprep.subr.bf16.mxu1 %v3610_v45  ;;  %v3676_v45 = vld [vmem:[%s4529_s1 + $0x4c0] sm:$0xff]  }
  0x6e   : > { %2373 = vmatmul.mubr.bf16.vlgmr.msra.gmra.mxu0 %v3603_v40  ;;  %v3671_v40 = vld [vmem:[%s4529_s1 + $0x448] sm:$0xff]  }
  0x6f   : > { %2414 = vmatmul.mubr.bf16.vlgmr.msra.gmra.mxu1 %v3606_v42  ;;  %3284 = vmatpush3.bf16.msra.mxu0 %v3611_v46  ;;  %v3673_v42 = vld [vmem:[%s4529_s1 + $0x408] sm:$0xff]   ;;  %v3677_v46 = vld [vmem:[%s4529_s1 + $0x400] sm:$0xff]  }
  0x70   : > { %3306 = vmatpush3.bf16.msra.mxu1 %v3612_v47  ;;  %3285 = vmatprep.subr.bf16.mxu0 %v3613_v48  ;;  %v3678_v47 = vld [vmem:[%s4529_s1 + $0x480] sm:$0xff]  }
  0x71   : > { %3307 = vmatprep.subr.bf16.mxu1 %v3614_v49  ;;  %2454 = vmatprep.mubr.bf16.mxu0 %v3643_v13  ;;  %v3679_v48 = vld [vmem:[%s3921_s12 + $0x40] ss:$108 sps:$4 sm:$0xff]   ;;  %v3681_v49 = vld [vmem:[%s3921_s12 + $0x44] ss:$108 sps:$4 sm:$0xff]  }
  0x72   : > { %2495 = vmatprep.mubr.bf16.mxu1 %v3646_v15  ;;  %v3709_v13 = vld [vmem:[%s4529_s1 + $0x548] sm:$0xff]  }
  0x73   : > { %3286 = vmatpush3.bf16.msra.mxu0 %v3615_v50  ;;  %v3682_v50 = vld [vmem:[%s3921_s12 + $0x48] ss:$108 sps:$4 sm:$0xff]  }
  0x74   : > { %3308 = vmatpush3.bf16.msra.mxu1 %v3616_v51  ;;  %3287 = vmatprep.subr.bf16.mxu0 %v3617_v52  ;;  %v3684_v51 = vld [vmem:[%s3921_s12 + $0x4c] ss:$108 sps:$4 sm:$0xff]  }
  0x75   : > { %3309 = vmatprep.subr.bf16.mxu1 %v3618_v53  ;;  %v3685_v52 = vld [vmem:[%s4529_s1 + $0x578] sm:$0xff]   ;;  %v3711_v15 = vld [vmem:[%s4529_s1 + $0x508] sm:$0xff]  }
  0x76   : > { %v3686_v53 = vld [vmem:[%s4529_s1 + $0x5f8] sm:$0xff]  }
  0x77   : > { %3288 = vmatpush3.bf16.msra.mxu0 %v3619_v54  ;;  %v3687_v54 = vld [vmem:[%s4529_s1 + $0x538] sm:$0xff]  }
  0x78   : > { %3310 = vmatpush3.bf16.msra.mxu1 %v3620_v55  ;;  %3289 = vmatprep.subr.bf16.mxu0 %v3621_v56  ;;  %v3688_v55 = vld [vmem:[%s4529_s1 + $0x5b8] sm:$0xff]   ;;  %v3689_v56 = vld [vmem:[%s4529_s1 + $0x570] sm:$0xff]  }
  0x79   : > { %3311 = vmatprep.subr.bf16.mxu1 %v3622_v57  ;;  %v3690_v57 = vld [vmem:[%s4529_s1 + $0x5f0] sm:$0xff]  }
  0x7b   : > { %3290 = vmatpush3.bf16.msra.mxu0 %v3623_v58  ;;  %v3691_v58 = vld [vmem:[%s4529_s1 + $0x530] sm:$0xff]  }
  0x7c   : > { %3312 = vmatpush3.bf16.msra.mxu1 %v3624_v59  ;;  %3291 = vmatprep.subr.bf16.mxu0 %v3625_v60  ;;  %v3692_v59 = vld [vmem:[%s4529_s1 + $0x5b0] sm:$0xff]   ;;  %v3775_v60 = vmov 0  }
  0x7d   : > { %3313 = vmatprep.subr.bf16.mxu1 %v3626_v61  ;;  %3494 = vset.pattern.permute.xlu0 %v3775_v60  ;;  %v3693_v61 = vld [vmem:[%s4529_s1 + $0x568] sm:$0xff]  }
  0x7f   : > { %3292 = vmatpush3.bf16.msra.mxu0 %v3627_v62  ;;  %v3694_v62 = vld [vmem:[%s4529_s1 + $0x5e8] sm:$0xff]  }
  0x80   : > { %3314 = vmatpush3.bf16.msra.mxu1 %v3628_v63  ;;  %3293 = vmatprep.subr.bf16.mxu0 %v3629_v0  ;;  %v3695_v63 = vld [vmem:[%s4529_s1 + $0x528] sm:$0xff]  }
  0x81   : > { %3315 = vmatprep.subr.bf16.mxu1 %v3630_v1  ;;  %v3696_v0 = vld [vmem:[%s4529_s1 + $0x5a8] sm:$0xff]   ;;  %v3697_v1 = vld [vmem:[%s4529_s1 + $0x560] sm:$0xff]  }
  0x83   : > { %3294 = vmatpush3.bf16.msra.mxu0 %v3631_v2  ;;  %v3698_v2 = vld [vmem:[%s4529_s1 + $0x5e0] sm:$0xff]  }
  0x84   : > { %3316 = vmatpush3.bf16.msra.mxu1 %v3632_v3  ;;  %3295 = vmatprep.subr.bf16.mxu0 %v3633_v4  ;;  %v3699_v3 = vld [vmem:[%s4529_s1 + $0x520] sm:$0xff]  }
  0x85   : > { %3317 = vmatprep.subr.bf16.mxu1 %v3634_v5  ;;  %v3700_v4 = vld [vmem:[%s4529_s1 + $0x5a0] sm:$0xff]   ;;  %v3701_v5 = vld [vmem:[%s4529_s1 + $0x558] sm:$0xff]  }
  0x87   : > { %3296 = vmatpush3.bf16.msra.mxu0 %v3635_v6  ;;  %v3702_v6 = vld [vmem:[%s4529_s1 + $0x5d8] sm:$0xff]  }
  0x88   : > { %3318 = vmatpush3.bf16.msra.mxu1 %v3636_v7  ;;  %3297 = vmatprep.subr.bf16.mxu0 %v3637_v8  ;;  %v3703_v7 = vld [vmem:[%s4529_s1 + $0x518] sm:$0xff]  }
  0x89   : > { %3319 = vmatprep.subr.bf16.mxu1 %v3638_v9  ;;  %v3704_v8 = vld [vmem:[%s4529_s1 + $0x598] sm:$0xff]   ;;  %v3705_v9 = vld [vmem:[%s4529_s1 + $0x550] sm:$0xff]  }
  0x8b   : > { %3298 = vmatpush3.bf16.msra.mxu0 %v3639_v10  ;;  %v3706_v10 = vld [vmem:[%s4529_s1 + $0x5d0] sm:$0xff]  }
  0x8c   : > { %3320 = vmatpush3.bf16.msra.mxu1 %v3640_v11  ;;  %3327 = vmatprep.subr.bf16.mxu0 %v3647_v16  ;;  %v3707_v11 = vld [vmem:[%s4529_s1 + $0x510] sm:$0xff]   ;;  %v3712_v16 = vld [vmem:[%s4529_s1 + $0x588] sm:$0xff]  }
  0x8d   : > { %3349 = vmatprep.subr.bf16.mxu1 %v3648_v17  ;;  %v3713_v17 = vld [vmem:[%s4529_s1 + $0x540] sm:$0xff]  }
  0x8e   : > { %2455 = vmatmul.mubr.bf16.vlgmr.msra.gmra.mxu0 %v3641_v12  ;;  %v3708_v12 = vld [vmem:[%s4529_s1 + $0x590] sm:$0xff]  }
  0x8f   : > { %2496 = vmatmul.mubr.bf16.vlgmr.msra.gmra.mxu1 %v3644_v14  ;;  %3328 = vmatpush3.bf16.msra.mxu0 %v3649_v18  ;;  %v3710_v14 = vld [vmem:[%s4529_s1 + $0x5c8] sm:$0xff]   ;;  %v3714_v18 = vld [vmem:[%s4529_s1 + $0x5c0] sm:$0xff]  }
  0x90   : > { %3350 = vmatpush3.bf16.msra.mxu1 %v3650_v19  ;;  %3329 = vmatprep.subr.bf16.mxu0 %v3651_v20  ;;  %v3715_v19 = vld [vmem:[%s4529_s1 + $0x500] sm:$0xff]  }
  0x91   : > { %3351 = vmatprep.subr.bf16.mxu1 %v3652_v21  ;;  %2536 = vmatprep.mubr.bf16.mxu0 %v3681_v49  ;;  %v3716_v20 = vld [vmem:[%s4529_s1 + $0x580] sm:$0xff]   ;;  %v3717_v21 = vld [vmem:[%s3921_s12 + $0x50] ss:$108 sps:$4 sm:$0xff]  }
  0x92   : > { %2577 = vmatprep.mubr.bf16.mxu1 %v3684_v51  ;;  %v2752_v49 = vld [vmem:[%s264_s29] sm:$0xff] }
  0x93   : > { %3330 = vmatpush3.bf16.msra.mxu0 %v3653_v22  ;;  %v3719_v22 = vld [vmem:[%s3921_s12 + $0x54] ss:$108 sps:$4 sm:$0xff]   ;;  %2756 = vperm.xlu0 %3494, %v2752_v49  }
  0x94   : > { %3352 = vmatpush3.bf16.msra.mxu1 %v3654_v23  ;;  %3331 = vmatprep.subr.bf16.mxu0 %v3655_v24  ;;  %v3720_v23 = vld [vmem:[%s3921_s12 + $0x58] ss:$108 sps:$4 sm:$0xff]   ;;  %v3722_v24 = vld [vmem:[%s3921_s12 + $0x5c] ss:$108 sps:$4 sm:$0xff]  }
  0x95   : > { %3353 = vmatprep.subr.bf16.mxu1 %v3656_v25  ;;  %v3723_v25 = vld [vmem:[%s4529_s1 + $0x678] sm:$0xff]   ;;  %v3746_v51 = vld [vmem:[%s4529_s1 + $0x680] sm:$0xff]  }
  0x97   : > { %3332 = vmatpush3.bf16.msra.mxu0 %v3657_v26  ;;  %v3776_v26 = vmov 0.0  }
  0x98   : > { %3354 = vmatpush3.bf16.msra.mxu1 %v3658_v27  ;;  %3333 = vmatprep.subr.bf16.mxu0 %v3659_v28  ;;  %v3724_v27 = vld [vmem:[%s4529_s1 + $0x638] sm:$0xff]  }
  0x99   : > { %3355 = vmatprep.subr.bf16.mxu1 %v3660_v29  ;;  %v3725_v28 = vld [vmem:[%s4529_s1 + $0x6b8] sm:$0xff]   ;;  %v3726_v29 = vld [vmem:[%s4529_s1 + $0x670] sm:$0xff]  }
  0x9b   : > { %3334 = vmatpush3.bf16.msra.mxu0 %v3661_v30  ;;  %v3727_v30 = vld [vmem:[%s4529_s1 + $0x630] sm:$0xff]  }
  0x9c   : > { %3356 = vmatpush3.bf16.msra.mxu1 %v3662_v31  ;;  %3335 = vmatprep.subr.bf16.mxu0 %v3663_v32  ;;  %v3728_v31 = vld [vmem:[%s4529_s1 + $0x6b0] sm:$0xff]   ;;  %v3729_v32 = vld [vmem:[%s4529_s1 + $0x668] sm:$0xff]  }
  0x9d   : > { %3357 = vmatprep.subr.bf16.mxu1 %v3664_v33  ;;  %v3730_v33 = vld [vmem:[%s4529_s1 + $0x628] sm:$0xff]  }
  0x9f   : > { %3336 = vmatpush3.bf16.msra.mxu0 %v3665_v34  ;;  %v3731_v34 = vld [vmem:[%s4529_s1 + $0x6a8] sm:$0xff]  }
  0xa0   : > { %3358 = vmatpush3.bf16.msra.mxu1 %v3666_v35  ;;  %3337 = vmatprep.subr.bf16.mxu0 %v3667_v36  ;;  %v3732_v35 = vld [vmem:[%s4529_s1 + $0x660] sm:$0xff]  }
  0xa1   : > { %3359 = vmatprep.subr.bf16.mxu1 %v3668_v37  ;;  %v3733_v36 = vld [vmem:[%s4529_s1 + $0x620] sm:$0xff]  }
  0xa2   : > { %v3734_v37 = vld [vmem:[%s4529_s1 + $0x6a0] sm:$0xff]  }
  0xa3   : > { %3338 = vmatpush3.bf16.msra.mxu0 %v3669_v38  ;;  %v3735_v38 = vld [vmem:[%s4529_s1 + $0x658] sm:$0xff]  }
  0xa4   : > { %3360 = vmatpush3.bf16.msra.mxu1 %v3670_v39  ;;  %3339 = vmatprep.subr.bf16.mxu0 %v3671_v40  ;;  %v3736_v39 = vld [vmem:[%s4529_s1 + $0x618] sm:$0xff]  }
  0xa5   : > { %3361 = vmatprep.subr.bf16.mxu1 %v3672_v41  ;;  %v3737_v40 = vld [vmem:[%s4529_s1 + $0x698] sm:$0xff]   ;;  %v3738_v41 = vld [vmem:[%s4529_s1 + $0x650] sm:$0xff]  }
  0xa7   : > { %3340 = vmatpush3.bf16.msra.mxu0 %v3673_v42  ;;  %v3739_v42 = vld [vmem:[%s4529_s1 + $0x610] sm:$0xff]  }
  0xa8   : > { %3362 = vmatpush3.bf16.msra.mxu1 %v3674_v43  ;;  %3341 = vmatprep.subr.bf16.mxu0 %v3675_v44  ;;  %v3740_v43 = vld [vmem:[%s4529_s1 + $0x690] sm:$0xff]   ;;  %v3741_v44 = vld [vmem:[%s4529_s1 + $0x648] sm:$0xff]  }
  0xa9   : > { %3363 = vmatprep.subr.bf16.mxu1 %v3676_v45  ;;  %v3742_v45 = vld [vmem:[%s4529_s1 + $0x608] sm:$0xff]  }
  0xab   : > { %3342 = vmatpush3.bf16.msra.mxu0 %v3677_v46  ;;  %v3743_v46 = vld [vmem:[%s4529_s1 + $0x688] sm:$0xff]  }
  0xac   : > { %3364 = vmatpush3.bf16.msra.mxu1 %v3678_v47  ;;  %3371 = vmatprep.subr.bf16.mxu0 %v3685_v52  ;;  %v3744_v47 = vld [vmem:[%s4529_s1 + $0x640] sm:$0xff]  }
  0xad   : > { %3393 = vmatprep.subr.bf16.mxu1 %v3686_v53  ;;  %v3747_v52 = vld [vmem:[%s3921_s12 + $0x60] ss:$108 sps:$4 sm:$0xff]  }
  0xae   : > { %2537 = vmatmul.mubr.bf16.vlgmr.msra.gmra.mxu0 %v3679_v48  ;;  %v3749_v48 = vld [vmem:[%s3921_s12 + $0x64] ss:$108 sps:$4 sm:$0xff]   ;;  %v2753_v53 = vld [vmem:[%s264_s29 + $0x8] sm:$0xff] }
  0xaf   : > { %2578 = vmatmul.mubr.bf16.vlgmr.msra.gmra.mxu1 %v3682_v50  ;;  %3372 = vmatpush3.bf16.msra.mxu0 %v3687_v54  ;;  %v3745_v50 = vld [vmem:[%s4529_s1 + $0x600] sm:$0xff]   ;;  %v3750_v54 = vld [vmem:[%s3921_s12 + $0x68] ss:$108 sps:$4 sm:$0xff]  }
  0xb0   : > { %3394 = vmatpush3.bf16.msra.mxu1 %v3688_v55  ;;  %3373 = vmatprep.subr.bf16.mxu0 %v3689_v56 }
  0xb1   : > { %3395 = vmatprep.subr.bf16.mxu1 %v3690_v57  ;;  %2618 = vmatprep.mubr.bf16.mxu0 %v3719_v22 }
  0xb2   : > { %2659 = vmatprep.mubr.bf16.mxu1 %v3722_v24  ;;  %2761 = vperm.xlu0 %3494, %v2753_v53  }
  0xb3   : > { %3374 = vmatpush3.bf16.msra.mxu0 %v3691_v58 }
  0xb4   : > { %3396 = vmatpush3.bf16.msra.mxu1 %v3692_v59  ;;  %3375 = vmatprep.subr.bf16.mxu0 %v3693_v61 }
  0xb5   : > { %3397 = vmatprep.subr.bf16.mxu1 %v3694_v62 }
  0xb7   : > { %3376 = vmatpush3.bf16.msra.mxu0 %v3695_v63 }
  0xb8   : > { %3398 = vmatpush3.bf16.msra.mxu1 %v3696_v0  ;;  %3377 = vmatprep.subr.bf16.mxu0 %v3697_v1 }
  0xb9   : > { %3399 = vmatprep.subr.bf16.mxu1 %v3698_v2 }
  0xbb   : > { %3378 = vmatpush3.bf16.msra.mxu0 %v3699_v3 }
  0xbc   : > { %3400 = vmatpush3.bf16.msra.mxu1 %v3700_v4  ;;  %3379 = vmatprep.subr.bf16.mxu0 %v3701_v5 }
  0xbd   : > { %3401 = vmatprep.subr.bf16.mxu1 %v3702_v6 }
  0xbf   : > { %3380 = vmatpush3.bf16.msra.mxu0 %v3703_v7 }
  0xc0   : > { %3402 = vmatpush3.bf16.msra.mxu1 %v3704_v8  ;;  %3381 = vmatprep.subr.bf16.mxu0 %v3705_v9 }
  0xc1   : > { %3403 = vmatprep.subr.bf16.mxu1 %v3706_v10 }
  0xc3   : > { %3382 = vmatpush3.bf16.msra.mxu0 %v3707_v11 }
  0xc4   : > { %3404 = vmatpush3.bf16.msra.mxu1 %v3708_v12  ;;  %3383 = vmatprep.subr.bf16.mxu0 %v3709_v13 }
  0xc5   : > { %3405 = vmatprep.subr.bf16.mxu1 %v3710_v14 }
  0xc7   : > { %3384 = vmatpush3.bf16.msra.mxu0 %v3711_v15 }
  0xc8   : > { %3406 = vmatpush3.bf16.msra.mxu1 %v3712_v16  ;;  %3385 = vmatprep.subr.bf16.mxu0 %v3713_v17 }
  0xc9   : > { %3407 = vmatprep.subr.bf16.mxu1 %v3714_v18 }
  0xcb   : > { %3386 = vmatpush3.bf16.msra.mxu0 %v3715_v19 }
  0xcc   : > { %3408 = vmatpush3.bf16.msra.mxu1 %v3716_v20  ;;  %3415 = vmatprep.subr.bf16.mxu0 %v3723_v25 }
  0xcd   : > { %3446 = vmatprep.subr.bf16.mxu1 %v3776_v26 }
  0xce   : > { %2619 = vmatmul.mubr.bf16.vlgmr.msra.gmra.mxu0 %v3717_v21  ;;  %v2894_v21 = vld [vmem:[%s4530_s2] ss:$0 sm:$0xff] }
  0xcf   : > { %2660 = vmatmul.mubr.bf16.vlgmr.msra.gmra.mxu1 %v3720_v23  ;;  %3416 = vmatpush3.bf16.msra.mxu0 %v3724_v27 }
  0xd0   : > { %3462 = vmatprep.mubr.msk.bf16.mxu1 %vm3777_vm0, %v3776_v26  ;;  %3447 = vmatpush3.bf16.msra.mxu1 %v3725_v28 }
  0xd1   : > { %3417 = vmatprep.subr.bf16.mxu0 %v3726_v29  ;;  %3448 = vmatprep.subr.bf16.mxu1 %v3776_v26 }
  0xd2   : > { %2700 = vmatprep.mubr.bf16.mxu0 %v3749_v48 }
  0xd3   : > { %3418 = vmatpush3.bf16.msra.mxu0 %v3727_v30 }
  0xd4   : > { %3449 = vmatpush3.bf16.msra.mxu1 %v3728_v31  ;;  %3419 = vmatprep.subr.bf16.mxu0 %v3729_v32 }
  0xd5   : > { %3450 = vmatprep.subr.bf16.mxu1 %v3776_v26 }
  0xd7   : > { %3420 = vmatpush3.bf16.msra.mxu0 %v3730_v33 }
  0xd8   : > { %3451 = vmatpush3.bf16.msra.mxu1 %v3731_v34  ;;  %3421 = vmatprep.subr.bf16.mxu0 %v3732_v35 }
  0xd9   : > { %3452 = vmatprep.subr.bf16.mxu1 %v3776_v26 }
  0xdb   : > { %3422 = vmatpush3.bf16.msra.mxu0 %v3733_v36 }
  0xdc   : > { %3453 = vmatpush3.bf16.msra.mxu1 %v3734_v37  ;;  %3423 = vmatprep.subr.bf16.mxu0 %v3735_v38 }
  0xdd   : > { %3454 = vmatprep.subr.bf16.mxu1 %v3776_v26 }
  0xdf   : > { %3424 = vmatpush3.bf16.msra.mxu0 %v3736_v39 }
  0xe0   : > { %3455 = vmatpush3.bf16.msra.mxu1 %v3737_v40  ;;  %3425 = vmatprep.subr.bf16.mxu0 %v3738_v41 }
  0xe1   : > { %3456 = vmatprep.subr.bf16.mxu1 %v3776_v26 }
  0xe3   : > { %3426 = vmatpush3.bf16.msra.mxu0 %v3739_v42 }
  0xe4   : > { %3457 = vmatpush3.bf16.msra.mxu1 %v3740_v43  ;;  %3427 = vmatprep.subr.bf16.mxu0 %v3741_v44 }
  0xe5   : > { %3458 = vmatprep.subr.bf16.mxu1 %v3776_v26 }
  0xe7   : > { %3428 = vmatpush3.bf16.msra.mxu0 %v3742_v45 }
  0xe8   : > { %3459 = vmatpush3.bf16.msra.mxu1 %v3743_v46  ;;  %3429 = vmatprep.subr.bf16.mxu0 %v3744_v47 }
  0xe9   : > { %3460 = vmatprep.subr.bf16.mxu1 %v3776_v26 }
  0xeb   : > { %3430 = vmatpush3.bf16.msra.mxu0 %v3745_v50 }
  0xec   : > { %3461 = vmatpush3.bf16.msra.mxu1 %v3746_v51 }
  0xee   : > { %2701 = vmatmul.mubr.bf16.vlgmr.msra.gmra.mxu0 %v3747_v52  ;;  %v3167_v55 = vpop.f32.mrf.mxu0 }
  0xef   : > { %3463 = vmatmul.mubr.bf16.vlgmr.msra.gmra.mxu1 %v3750_v54  ;;  %v3189_v56 = vpop.f32.mrf.mxu1 }
  0xf0   : > { %v3168_v57 = vpop.f32.mrf.mxu0 }
  0xf1   : > { %v3190_v58 = vpop.f32.mrf.mxu1  ;;  %v3169_v20 = vadd.f32 %v3168_v57, %v3167_v55 }
  0xf2   : > { %v3170_v59 = vpop.f32.mrf.mxu0  ;;  %v3191_v25 = vadd.f32 %v3190_v58, %v3189_v56 }
  0xf3   : > { %v3192_v60 = vpop.f32.mrf.mxu1  ;;  %v2211_v24 = vadd.f32 %v3169_v20, %v2894_v21 }
  0xf4   : > { %v3171_v61 = vpop.f32.mrf.mxu0 }
  0xf5   : > { %v3193_v63 = vpop.f32.mrf.mxu1  ;;  %v3172_v26 = vadd.f32 %v3171_v61, %v3170_v59  ;;  %v2252_v30 = vadd.f32 %v3191_v25, %v2211_v24 }
  0xf6   : > { %v3194_v32 = vadd.f32 %v3193_v63, %v3192_v60 }
  0xf7   : > { %v2214_v31 = vadd.f32 %v3172_v26, %v2894_v21 }
  0xf9   : > { %v2255_v38 = vadd.f32 %v3194_v32, %v2214_v31 }
 0x10e   : > { %v3211_v62 = vpop.f32.mrf.mxu0 }
 0x10f   : > { %v3233_v0 = vpop.f32.mrf.mxu1 }
 0x110   : > { %v3212_v1 = vpop.f32.mrf.mxu0 }
 0x111   : > { %v3234_v2 = vpop.f32.mrf.mxu1  ;;  %v3213_v28 = vadd.f32 %v3212_v1, %v3211_v62 }
 0x112   : > { %v3214_v3 = vpop.f32.mrf.mxu0  ;;  %v3235_v36 = vadd.f32 %v3234_v2, %v3233_v0 }
 0x113   : > { %v3236_v4 = vpop.f32.mrf.mxu1  ;;  %v2293_v35 = vadd.f32 %v3213_v28, %v2252_v30 }
 0x114   : > { %v3215_v5 = vpop.f32.mrf.mxu0 }
 0x115   : > { %v3237_v7 = vpop.f32.mrf.mxu1  ;;  %v3216_v37 = vadd.f32 %v3215_v5, %v3214_v3  ;;  %v2334_v42 = vadd.f32 %v3235_v36, %v2293_v35  ;;  %v2757_v36 = vpop.permute.xlu0 %2756 }
 0x116   : > { %v3238_v44 = vadd.f32 %v3237_v7, %v3236_v4 }
 0x117   : > { %v2296_v43 = vadd.f32 %v3216_v37, %v2255_v38 }
 0x119   : > { %v2337_v50 = vadd.f32 %v3238_v44, %v2296_v43 }
 0x12e   : > { %v3255_v6 = vpop.f32.mrf.mxu0 }
 0x12f   : > { %v3277_v8 = vpop.f32.mrf.mxu1 }
 0x130   : > { %v3256_v9 = vpop.f32.mrf.mxu0 }
 0x131   : > { %v3278_v10 = vpop.f32.mrf.mxu1  ;;  %v3257_v39 = vadd.f32 %v3256_v9, %v3255_v6 }
 0x132   : > { %v3258_v11 = vpop.f32.mrf.mxu0  ;;  %v3279_v46 = vadd.f32 %v3278_v10, %v3277_v8 }
 0x133   : > { %v3280_v12 = vpop.f32.mrf.mxu1  ;;  %v2375_v45 = vadd.f32 %v3257_v39, %v2334_v42 }
 0x134   : > { %v3259_v13 = vpop.f32.mrf.mxu0 }
 0x135   : > { %v3281_v15 = vpop.f32.mrf.mxu1  ;;  %v3260_v47 = vadd.f32 %v3259_v13, %v3258_v11  ;;  %v2416_v53 = vadd.f32 %v3279_v46, %v2375_v45 }
 0x136   : > { %v3282_v55 = vadd.f32 %v3281_v15, %v3280_v12 }
 0x137   : > { %v2378_v54 = vadd.f32 %v3260_v47, %v2337_v50 }
 0x139   : > { %v2419_v62 = vadd.f32 %v3282_v55, %v2378_v54 }
 0x14e   : > { %v3299_v14 = vpop.f32.mrf.mxu0 }
 0x14f   : > { %v3321_v16 = vpop.f32.mrf.mxu1 }
 0x150   : > { %v3300_v17 = vpop.f32.mrf.mxu0 }
 0x151   : > { %v3322_v18 = vpop.f32.mrf.mxu1  ;;  %v3301_v51 = vadd.f32 %v3300_v17, %v3299_v14 }
 0x152   : > { %v3302_v19 = vpop.f32.mrf.mxu0  ;;  %v3323_v58 = vadd.f32 %v3322_v18, %v3321_v16 }
 0x153   : > { %v3324_v22 = vpop.f32.mrf.mxu1  ;;  %v2457_v57 = vadd.f32 %v3301_v51, %v2416_v53 }
 0x154   : > { %v3303_v23 = vpop.f32.mrf.mxu0 }
 0x155   : > { %v3325_v29 = vpop.f32.mrf.mxu1  ;;  %v3304_v59 = vadd.f32 %v3303_v23, %v3302_v19  ;;  %v2498_v0 = vadd.f32 %v3323_v58, %v2457_v57 }
 0x156   : > { %v3326_v2 = vadd.f32 %v3325_v29, %v3324_v22 }
 0x157   : > { %v2460_v1 = vadd.f32 %v3304_v59, %v2419_v62 }
 0x159   : > { %v2501_v8 = vadd.f32 %v3326_v2, %v2460_v1 }
 0x16e   : > { %v3343_v27 = vpop.f32.mrf.mxu0 }
 0x16f   : > { %v3365_v33 = vpop.f32.mrf.mxu1 }
 0x170   : > { %v3344_v34 = vpop.f32.mrf.mxu0 }
 0x171   : > { %v3366_v40 = vpop.f32.mrf.mxu1  ;;  %v3345_v63 = vadd.f32 %v3344_v34, %v3343_v27 }
 0x172   : > { %v3346_v41 = vpop.f32.mrf.mxu0  ;;  %v3367_v6 = vadd.f32 %v3366_v40, %v3365_v33 }
 0x173   : > { %v3368_v48 = vpop.f32.mrf.mxu1  ;;  %v2539_v5 = vadd.f32 %v3345_v63, %v2498_v0 }
 0x174   : > { %v3347_v49 = vpop.f32.mrf.mxu0 }
 0x175   : > { %v3369_v56 = vpop.f32.mrf.mxu1  ;;  %v3348_v7 = vadd.f32 %v3347_v49, %v3346_v41  ;;  %v2580_v12 = vadd.f32 %v3367_v6, %v2539_v5  ;;  %v2762_v41 = vpop.permute.xlu0 %2761 }
 0x176   : > { %v3370_v14 = vadd.f32 %v3369_v56, %v3368_v48 }
 0x177   : > { %v2542_v13 = vadd.f32 %v3348_v7, %v2501_v8 }
 0x179   : > { %v2583_v20 = vadd.f32 %v3370_v14, %v2542_v13 }
 0x18e   : > { %v3387_v52 = vpop.f32.mrf.mxu0 }
 0x18f   : > { %v3409_v60 = vpop.f32.mrf.mxu1 }
 0x190   : > { %v3388_v61 = vpop.f32.mrf.mxu0 }
 0x191   : > { %v3410_v3 = vpop.f32.mrf.mxu1  ;;  %v3389_v9 = vadd.f32 %v3388_v61, %v3387_v52 }
 0x192   : > { %v3390_v4 = vpop.f32.mrf.mxu0  ;;  %v3411_v16 = vadd.f32 %v3410_v3, %v3409_v60 }
 0x193   : > { %v3412_v10 = vpop.f32.mrf.mxu1  ;;  %v2621_v15 = vadd.f32 %v3389_v9, %v2580_v12 }
 0x194   : > { %v3391_v11 = vpop.f32.mrf.mxu0 }
 0x195   : > { %v3392_v17 = vadd.f32 %v3391_v11, %v3390_v4  ;;  %v3413_v18 = vpop.f32.mrf.mxu1  ;;  %v2662_v23 = vadd.f32 %v3411_v16, %v2621_v15 }
 0x196   : > { %v3414_v25 = vadd.f32 %v3413_v18, %v3412_v10 }
 0x197   : > { %v2624_v24 = vadd.f32 %v3392_v17, %v2583_v20 }
 0x199   : > { %v2665_v32 = vadd.f32 %v3414_v25, %v2624_v24 }
 0x1ae   : > { %v3431_v19 = vpop.f32.mrf.mxu0 }
 0x1af   : > { %v2743_v21 = vpop.f32.mrf.mxu1 }
 0x1b0   : > { %v3432_v22 = vpop.f32.mrf.mxu0 }
 0x1b1   : > { %v3433_v26 = vadd.f32 %v3432_v22, %v3431_v19  ;;  %v3464_v27 = vpop.f32.mrf.mxu1 }
 0x1b2   : > { %v3434_v28 = vpop.f32.mrf.mxu0 }
 0x1b3   : > { %v2703_v29 = vadd.f32 %v3433_v26, %v2662_v23  ;;  %v2746_v30 = vpop.f32.mrf.mxu1 }
 0x1b4   : > { %v3435_v31 = vpop.f32.mrf.mxu0 }
 0x1b5   : > { %v2744_v33 = vadd.f32 %v2743_v21, %v2703_v29  ;;  %v3436_v34 = vadd.f32 %v3435_v31, %v3434_v28  ;;  %v3465_v35 = vpop.f32.mrf.mxu1 }
 0x1b7   : > { %v2706_v37 = vadd.f32 %v3436_v34, %v2665_v32  ;;  %v2750_v38 = vmax.f32 %v2744_v33, 0.0 }
 0x1b9   : > { %v2747_v39 = vadd.f32 %v2746_v30, %v2706_v37  ;;  %v2764_v42 = vmul.f32 %v2757_v36, %v2750_v38 }
 0x1bb   : > { %v2751_v40 = vmax.f32 %v2747_v39, 0.0 }
 0x1bd   : > { %v2765_v43 = vmul.f32 %v2762_v41, %v2751_v40 }
 0x1bf   : > { %v3149_v44 = vpack.c.bf16 %v2765_v43, %v2764_v42 }
 0x1c1   : > { %3150 = vst [vmem:[%s274_s19] sm:$0xff] %v3149_v44  }
 0x1c2 PF: > { %s14_s17 = sadd.s32 1, %s3773_s17   ;;  %s4533_s15 = smov %s3769_s16 }
 0x1c3   : > { %p11_p5 = scmp.ge.s32.totalorder %s14_s17, 4   ;;  %s4534_s16 = smov %s4536_s18 }
 0x1c5   :  { %13 = sbr.rel (!%p11_p5) target bundleno = 2 (0x2), region = 69 }

</bundles_post_ra>
